<compile_context>
chip_gen: v5e
topology: v5e:2x2
jax: 0.10.0
libtpu: 0.0.40
codegen_flags: <defaults>
</compile_context>

<pallas_src>
import functools

import numpy as np
import jax
import jax.numpy as jnp
from jax.experimental import pallas as pl
from jax.experimental.pallas import tpu as pltpu

_BN_EPS = 1e-5
_FC_PAD = 128            # lane-dense FC width
NUM_CLASSES = 10


# ----------------------------------------------------------------------------
# Fused residual-block kernel (lane-packed: rows = (b, y), lanes = (x, c))
#   x_ref : [tb*H, W*Cin_pad]
#   o_ref : [tb*H/2, (W/2)*Cout]   (MaxPool2d(2) fused)
# ----------------------------------------------------------------------------
def _res_block_kernel(x_ref, w1_ref, b1_ref, w2_ref, b2_ref, ws_ref, o_ref, *, H):
    R = x_ref.shape[0]                       # tb * H rows in this tile
    x = x_ref[...]

    # Per-row y coordinate -> masks for the +/-1-row taps (hoisted, shared by both convs).
    y_idx = jax.lax.broadcasted_iota(jnp.int32, (R, 1), 0) % H
    has_up = y_idx > 0                       # row has a neighbour above within its image
    has_dn = y_idx < H - 1                   # row has a neighbour below within its image

    def stack_rows(v):
        # [up | center | down] stacked along lanes; zero rows at image boundaries.
        up = jnp.where(has_up, pltpu.roll(v, shift=1, axis=0), 0.0)
        dn = jnp.where(has_dn, pltpu.roll(v, shift=R - 1, axis=0), 0.0)
        return jnp.concatenate([up, v, dn], axis=-1).astype(jnp.bfloat16)

    # conv1 + BN1 + ReLU  — single banded matmul over the 3-row stack.
    h1 = jnp.dot(stack_rows(x), w1_ref[...], preferred_element_type=jnp.float32)
    h1 = jnp.maximum(h1 + b1_ref[...], 0.0)

    # conv2 + BN2 + ReLU  (output columns are x-parity ordered: even x | odd x).
    h2 = jnp.dot(stack_rows(h1), w2_ref[...], preferred_element_type=jnp.float32)
    h2 = jnp.maximum(h2 + b2_ref[...], 0.0)

    # 1x1 skip (bias=False, same parity ordering) + residual add (no ReLU after add).
    out = h2 + jnp.dot(x.astype(jnp.bfloat16), ws_ref[...],
                       preferred_element_type=jnp.float32)

    # Fused MaxPool2d(2):
    half = out.shape[1] // 2
    xp = jnp.maximum(out[:, :half], out[:, half:])        # x-pool: even-x vs odd-x halves
    merged = xp.reshape(R // 2, 2 * half)                  # row pairs packed into lanes
    yp = jnp.maximum(merged[:, :half], merged[:, half:])   # y-pool
    o_ref[...] = yp.astype(o_ref.dtype)


def _largest_divisor_leq(n, cap):
    cap = max(1, min(n, cap))
    for d in range(cap, 0, -1):
        if n % d == 0:
            return d
    return 1


def _conv_batch_tile(B, H, target_rows=512):
    cap = max(1, target_rows // H)
    if B >= 2:
        cap = min(cap, max(1, B // 2))   # >=2 grid steps so v7x can use both TensorCores
    return _largest_divisor_leq(B, cap)


def res_block_forward(x2d, p, *, H):
    """Fused SimpleResBlock (conv/bn/relu x2 + 1x1 skip + residual + 2x2 maxpool)."""
    RH, WCin = x2d.shape
    B = RH // H
    WCout = p["w2"].shape[1]
    Hp, Np = H // 2, WCout // 2
    tb = _conv_batch_tile(B, H)
    return pl.pallas_call(
        functools.partial(_res_block_kernel, H=H),
        out_shape=jax.ShapeDtypeStruct((B * Hp, Np), jnp.float32),
        grid=(B // tb,),
        in_specs=[
            pl.BlockSpec((tb * H, WCin), lambda i: (i, 0)),
            pl.BlockSpec(p["w1"].shape, lambda i: (0, 0)),
            pl.BlockSpec(p["b1"].shape, lambda i: (0, 0)),
            pl.BlockSpec(p["w2"].shape, lambda i: (0, 0)),
            pl.BlockSpec(p["b2"].shape, lambda i: (0, 0)),
            pl.BlockSpec(p["wskip"].shape, lambda i: (0, 0)),
        ],
        out_specs=pl.BlockSpec((tb * Hp, Np), lambda i: (i, 0)),
        compiler_params=pltpu.CompilerParams(
            dimension_semantics=("parallel",),
            vmem_limit_bytes=48 * 1024 * 1024,
        ),
    )(x2d, p["w1"], p["b1"], p["w2"], p["b2"], p["wskip"])


# ----------------------------------------------------------------------------
# Fused FC stack: fc1+ReLU -> dropout(identity, eval) -> fc2+ReLU -> fc3
# ----------------------------------------------------------------------------
def _fc_stack_kernel(x_ref, w1_ref, b1_ref, w2_ref, b2_ref, w3_ref, b3_ref, o_ref):
    h = jnp.dot(x_ref[...].astype(jnp.bfloat16), w1_ref[...],
                preferred_element_type=jnp.float32) + b1_ref[...]
    h = jnp.maximum(h, 0.0)
    # dropout: eval-mode identity (see TODO at top)
    h = jnp.dot(h.astype(jnp.bfloat16), w2_ref[...],
                preferred_element_type=jnp.float32) + b2_ref[...]
    h = jnp.maximum(h, 0.0)
    o = jnp.dot(h.astype(jnp.bfloat16), w3_ref[...],
                preferred_element_type=jnp.float32) + b3_ref[...]
    o_ref[...] = o.astype(o_ref.dtype)


def _fc_batch_tile(B):
    if B < 16:
        return B                       # keep full-array tiles at tiny batch
    cap = min(512, B // 2)             # >=2 grid steps for v7x, >=8-row tiles
    best = None
    for t in range(cap, 7, -1):
        if B % t == 0:
            if t % 8 == 0:
                return t
            best = best or t
    return best or B


def fc_stack_forward(xf, fc):
    B, K = xf.shape
    NP = fc["w1"].shape[1]
    tb = _fc_batch_tile(B)
    return pl.pallas_call(
        _fc_stack_kernel,
        out_shape=jax.ShapeDtypeStruct((B, NP), jnp.float32),
        grid=(B // tb,),
        in_specs=[
            pl.BlockSpec((tb, K), lambda i: (i, 0)),
            pl.BlockSpec(fc["w1"].shape, lambda i: (0, 0)),
            pl.BlockSpec(fc["b1"].shape, lambda i: (0, 0)),
            pl.BlockSpec(fc["w2"].shape, lambda i: (0, 0)),
            pl.BlockSpec(fc["b2"].shape, lambda i: (0, 0)),
            pl.BlockSpec(fc["w3"].shape, lambda i: (0, 0)),
            pl.BlockSpec(fc["b3"].shape, lambda i: (0, 0)),
        ],
        out_specs=pl.BlockSpec((tb, NP), lambda i: (i, 0)),
        compiler_params=pltpu.CompilerParams(
            dimension_semantics=("parallel",),
            vmem_limit_bytes=32 * 1024 * 1024,
        ),
    )(xf, fc["w1"], fc["b1"], fc["w2"], fc["b2"], fc["w3"], fc["b3"])


# ----------------------------------------------------------------------------
# Parameter construction (deterministic; eval-mode BatchNorm folded into conv;
# convs expressed as banded matrices acting on lane-packed [up|center|down] rows)
# ----------------------------------------------------------------------------
def _bn_fold(out_c):
    # fresh torch BatchNorm2d in eval mode: gamma=1, beta=0, rm=0, rv=1
    scale = np.ones((out_c,), np.float32) / np.sqrt(1.0 + _BN_EPS)
    shift = np.zeros((out_c,), np.float32)
    return scale, shift


def _banded_conv_bn(key, in_c, out_c, W, in_pad):
    """3x3 conv(+bias) + eval BN as a banded matrix:
    [3*W*in_pad, W*out_c] acting on [up|center|down]-stacked lane-packed rows."""
    kw_, kb_ = jax.random.split(key)
    w = np.asarray(jax.random.normal(kw_, (out_c, in_c, 3, 3), jnp.float32)) / np.sqrt(9.0 * in_c)
    b = np.asarray(jax.random.normal(kb_, (out_c,), jnp.float32)) * 0.01
    scale, shift = _bn_fold(out_c)
    M = np.zeros((3, W * in_pad, W * out_c), np.float32)
    for kh in range(3):               # stacked part: 0=up(y-1), 1=center, 2=down(y+1)
        for kw in range(3):           # x_in = x_out + kw - 1  (banded block-Toeplitz)
            tap = np.zeros((in_pad, out_c), np.float32)
            tap[:in_c, :] = w[:, :, kh, kw].T * scale[None, :]
            M[kh] += np.kron(np.eye(W, k=1 - kw, dtype=np.float32), tap)
    bias = np.tile(b * scale + shift, W).reshape(1, W * out_c)
    return M.reshape(3 * W * in_pad, W * out_c), bias


def _banded_skip(key, in_c, out_c, W, in_pad):
    """1x1 conv (bias=False, matches torch skip) as a block-diagonal matrix."""
    w = np.asarray(jax.random.normal(key, (out_c, in_c), jnp.float32)) / np.sqrt(float(in_c))
    tap = np.zeros((in_pad, out_c), np.float32)
    tap[:in_c, :] = w.T
    return np.kron(np.eye(W, dtype=np.float32), tap)


def _xparity_perm(W, out_c):
    # Column order: all even-x pixels first, then odd-x -> x-pool = max of lane halves.
    order = np.concatenate([np.arange(0, W, 2), np.arange(1, W, 2)])
    return (order[:, None] * out_c + np.arange(out_c)[None, :]).reshape(-1)


def _res_block_params(key, in_c, mid_c, out_c, *, W, in_pad):
    k1, k2, k3 = jax.random.split(key, 3)
    w1, b1 = _banded_conv_bn(k1, in_c, mid_c, W, in_pad)
    w2, b2 = _banded_conv_bn(k2, mid_c, out_c, W, mid_c)
    ws = _banded_skip(k3, in_c, out_c, W, in_pad)
    perm = _xparity_perm(W, out_c)
    w2, b2, ws = w2[:, perm], b2[:, perm], ws[:, perm]
    return dict(
        w1=jnp.asarray(w1, jnp.bfloat16), b1=jnp.asarray(b1, jnp.float32),
        w2=jnp.asarray(w2, jnp.bfloat16), b2=jnp.asarray(b2, jnp.float32),
        wskip=jnp.asarray(ws, jnp.bfloat16),
    )


def _hwc_from_chw_perm(C, H, W):
    # our flatten order (h, w, c)  ->  torch flatten order (c, h, w)
    return np.arange(C * H * W).reshape(C, H, W).transpose(1, 2, 0).reshape(-1)


def _linear_params(key, in_f, out_f, in_pad, out_pad, in_perm=None):
    """torch nn.Linear, transposed to [in, out], rows optionally permuted to NHWC
    flatten order, zero-padded to lane-dense widths, weights in bf16."""
    kw_, kb_ = jax.random.split(key)
    w = np.asarray(jax.random.normal(kw_, (out_f, in_f), jnp.float32)) / np.sqrt(float(in_f))
    b = np.asarray(jax.random.normal(kb_, (out_f,), jnp.float32)) * 0.01
    wt = w.T
    if in_perm is not None:
        wt = wt[in_perm]
    wp = np.zeros((in_pad, out_pad), np.float32)
    wp[:in_f, :out_f] = wt
    bp = np.zeros((1, out_pad), np.float32)
    bp[0, :out_f] = b
    return jnp.asarray(wp, jnp.bfloat16), jnp.asarray(bp, jnp.float32)


def init_params(key):
    k = jax.random.split(key, 5)
    fc1_perm = _hwc_from_chw_perm(32, 8, 8)     # removes the flatten transpose (free reshape)
    f1w, f1b = _linear_params(k[2], 32 * 8 * 8, 120, 32 * 8 * 8, _FC_PAD, in_perm=fc1_perm)
    f2w, f2b = _linear_params(k[3], 120, 84, _FC_PAD, _FC_PAD)
    f3w, f3b = _linear_params(k[4], 84, 10, _FC_PAD, _FC_PAD)
    return dict(
        res1=_res_block_params(k[0], 3, 8, 16, W=32, in_pad=4),     # Cin padded 3->4
        res2=_res_block_params(k[1], 16, 16, 32, W=16, in_pad=16),
        fc=dict(w1=f1w, b1=f1b, w2=f2w, b2=f2b, w3=f3w, b3=f3b),
    )


# ----------------------------------------------------------------------------
# Model forward
# ----------------------------------------------------------------------------
@jax.jit
def lenet_res_dropout(x_nchw, params):
    B = x_nchw.shape[0]
    x = jnp.transpose(x_nchw, (0, 2, 3, 1))                 # NCHW -> NHWC
    x = jnp.pad(x, ((0, 0), (0, 0), (0, 0), (0, 1)))        # pad Cin 3 -> 4 (W*Cin = 128)
    x = x.reshape(B * 32, 32 * 4)                           # lane-packed rows (b, y)
    x = res_block_forward(x, params["res1"], H=32)          # [B*16, 16*16] (pooled)
    x = res_block_forward(x, params["res2"], H=16)          # [B*8,  8*32]  (pooled)
    xf = x.reshape(B, 8 * 8 * 32)                           # free reshape, (h, w, c) order
    logits = fc_stack_forward(xf, params["fc"])             # [B, 128] lane-padded
    return logits[:, :NUM_CLASSES]


if __name__ == "__main__":
    key = jax.random.PRNGKey(0)
    kx, kp = jax.random.split(key)
    x = jax.random.normal(kx, (2, 3, 32, 32), jnp.float32)  # B=2, CIFAR-size input
    params = init_params(kp)
    out = jax.block_until_ready(lenet_res_dropout(x, params))
    assert out.shape == (2, 10) and out.dtype == jnp.float32
    print("KERNEL_OK")
</pallas_src>

<mosaic_0001>
module attributes {stable_mosaic.version = 11 : i64} {
  func.func @_res_block_kernel(%arg0: i32, %arg1: memref<32x128xf32, #tpu.memory_space<vmem>>, %arg2: memref<384x256xbf16, #tpu.memory_space<vmem>>, %arg3: memref<1x256xf32, #tpu.memory_space<vmem>>, %arg4: memref<768x512xbf16, #tpu.memory_space<vmem>>, %arg5: memref<1x512xf32, #tpu.memory_space<vmem>>, %arg6: memref<128x512xbf16, #tpu.memory_space<vmem>>, %arg7: memref<16x256xf32, #tpu.memory_space<vmem>>) attributes {dimension_semantics = [#tpu.dimension_semantics<parallel>], iteration_bounds = array<i64: 2>, scalar_prefetch = 0 : i64, scratch_operands = 0 : i64, tpu.core_type = #tpu.core_type<tc>, window_params = [{transform_indices = @transform_0, window_bounds = array<i64: 32, 128>}, {pipeline_mode = #tpu.pipeline_mode<synchronous>, transform_indices = @transform_1, window_bounds = array<i64: 384, 256>}, {pipeline_mode = #tpu.pipeline_mode<synchronous>, transform_indices = @transform_2, window_bounds = array<i64: 1, 256>}, {pipeline_mode = #tpu.pipeline_mode<synchronous>, transform_indices = @transform_3, window_bounds = array<i64: 768, 512>}, {pipeline_mode = #tpu.pipeline_mode<synchronous>, transform_indices = @transform_4, window_bounds = array<i64: 1, 512>}, {pipeline_mode = #tpu.pipeline_mode<synchronous>, transform_indices = @transform_5, window_bounds = array<i64: 128, 512>}, {transform_indices = @transform_6, window_bounds = array<i64: 16, 256>}]} {
    %c0 = arith.constant 0 : index
    %c0_0 = arith.constant 0 : index
    %0 = vector.load %arg1[%c0, %c0_0] : memref<32x128xf32, #tpu.memory_space<vmem>>, vector<32x128xf32>
    %1 = tpu.iota {dimensions = array<i32: 0>} : vector<32x1xi32>
    %c32_i32 = arith.constant 32 : i32
    %c0_i32 = arith.constant 0 : i32
    %2 = arith.cmpi eq, %c32_i32, %c0_i32 : i32
    %c1_i32 = arith.constant 1 : i32
    %3 = arith.select %2, %c1_i32, %c32_i32 : i32
    %4 = vector.broadcast %3 : i32 to vector<32x1xi32>
    %5 = arith.remsi %1, %4 : vector<32x1xi32>
    %c0_i32_1 = arith.constant 0 : i32
    %6 = vector.broadcast %c0_i32_1 : i32 to vector<32x1xi32>
    %7 = arith.cmpi ne, %5, %6 : vector<32x1xi32>
    %c0_i32_2 = arith.constant 0 : i32
    %8 = vector.broadcast %c0_i32_2 : i32 to vector<32x1xi32>
    %9 = arith.cmpi slt, %5, %8 : vector<32x1xi32>
    %c0_i32_3 = arith.constant 0 : i32
    %10 = arith.cmpi slt, %3, %c0_i32_3 : i32
    %11 = vector.broadcast %10 : i1 to vector<32x1xi1>
    %12 = vector.broadcast %11 : vector<32x1xi1> to vector<32x1xi1>
    %13 = arith.xori %9, %12 : vector<32x1xi1>
    %14 = arith.andi %13, %7 : vector<32x1xi1>
    %15 = vector.broadcast %3 : i32 to vector<32x1xi32>
    %16 = arith.addi %5, %15 : vector<32x1xi32>
    %17 = arith.select %14, %16, %5 : vector<32x1xi1>, vector<32x1xi32>
    %c0_i32_4 = arith.constant 0 : i32
    %18 = vector.broadcast %c0_i32_4 : i32 to vector<32x1xi32>
    %19 = arith.cmpi sgt, %17, %18 : vector<32x1xi32>
    %c31_i32 = arith.constant 31 : i32
    %20 = vector.broadcast %c31_i32 : i32 to vector<32x1xi32>
    %21 = arith.cmpi slt, %17, %20 : vector<32x1xi32>
    %c1_i32_5 = arith.constant 1 : i32
    %22 = tpu.dynamic_rotate %0 by %c1_i32_5 dim 0 : vector<32x128xf32>, i32 -> vector<32x128xf32>
    %cst = arith.constant 0.000000e+00 : f32
    %23 = vector.shape_cast %19 : vector<32x1xi1> to vector<32x1xi1>
    %24 = vector.broadcast %23 : vector<32x1xi1> to vector<32x128xi1>
    %25 = vector.broadcast %cst : f32 to vector<32x128xf32>
    %26 = arith.select %24, %22, %25 : vector<32x128xi1>, vector<32x128xf32>
    %c31_i32_6 = arith.constant 31 : i32
    %27 = tpu.dynamic_rotate %0 by %c31_i32_6 dim 0 : vector<32x128xf32>, i32 -> vector<32x128xf32>
    %cst_7 = arith.constant 0.000000e+00 : f32
    %28 = vector.shape_cast %21 : vector<32x1xi1> to vector<32x1xi1>
    %29 = vector.broadcast %28 : vector<32x1xi1> to vector<32x128xi1>
    %30 = vector.broadcast %cst_7 : f32 to vector<32x128xf32>
    %31 = arith.select %29, %27, %30 : vector<32x128xi1>, vector<32x128xf32>
    %32 = tpu.concatenate %26, %0, %31 in 1 : vector<32x128xf32>, vector<32x128xf32>, vector<32x128xf32> -> vector<32x384xf32>
    %33 = arith.truncf %32 : vector<32x384xf32> to vector<32x384xbf16>
    %c0_8 = arith.constant 0 : index
    %c0_9 = arith.constant 0 : index
    %34 = vector.load %arg2[%c0_8, %c0_9] : memref<384x256xbf16, #tpu.memory_space<vmem>>, vector<384x256xbf16>
    %cst_10 = arith.constant dense<0.000000e+00> : vector<32x256xf32>
    %35 = tpu.matmul %33, %34, %cst_10 {dimension_numbers = #tpu.dot_dimension_numbers<[1], [0], [0], [1], [0, 0, 1, 1], [], []>} : vector<32x384xbf16>, vector<384x256xbf16>, vector<32x256xf32> -> vector<32x256xf32>
    %c0_11 = arith.constant 0 : index
    %c0_12 = arith.constant 0 : index
    %36 = vector.load %arg3[%c0_11, %c0_12] : memref<1x256xf32, #tpu.memory_space<vmem>>, vector<1x256xf32>
    %37 = vector.broadcast %36 : vector<1x256xf32> to vector<32x256xf32>
    %38 = arith.addf %35, %37 : vector<32x256xf32>
    %cst_13 = arith.constant 0.000000e+00 : f32
    %39 = vector.broadcast %cst_13 : f32 to vector<32x256xf32>
    %40 = arith.maximumf %38, %39 : vector<32x256xf32>
    %c1_i32_14 = arith.constant 1 : i32
    %41 = tpu.dynamic_rotate %40 by %c1_i32_14 dim 0 : vector<32x256xf32>, i32 -> vector<32x256xf32>
    %cst_15 = arith.constant 0.000000e+00 : f32
    %42 = vector.shape_cast %19 : vector<32x1xi1> to vector<32x1xi1>
    %43 = vector.broadcast %42 : vector<32x1xi1> to vector<32x256xi1>
    %44 = vector.broadcast %cst_15 : f32 to vector<32x256xf32>
    %45 = arith.select %43, %41, %44 : vector<32x256xi1>, vector<32x256xf32>
    %c31_i32_16 = arith.constant 31 : i32
    %46 = tpu.dynamic_rotate %40 by %c31_i32_16 dim 0 : vector<32x256xf32>, i32 -> vector<32x256xf32>
    %cst_17 = arith.constant 0.000000e+00 : f32
    %47 = vector.shape_cast %21 : vector<32x1xi1> to vector<32x1xi1>
    %48 = vector.broadcast %47 : vector<32x1xi1> to vector<32x256xi1>
    %49 = vector.broadcast %cst_17 : f32 to vector<32x256xf32>
    %50 = arith.select %48, %46, %49 : vector<32x256xi1>, vector<32x256xf32>
    %51 = tpu.concatenate %45, %40, %50 in 1 : vector<32x256xf32>, vector<32x256xf32>, vector<32x256xf32> -> vector<32x768xf32>
    %52 = arith.truncf %51 : vector<32x768xf32> to vector<32x768xbf16>
    %c0_18 = arith.constant 0 : index
    %c0_19 = arith.constant 0 : index
    %53 = vector.load %arg4[%c0_18, %c0_19] : memref<768x512xbf16, #tpu.memory_space<vmem>>, vector<768x512xbf16>
    %cst_20 = arith.constant dense<0.000000e+00> : vector<32x512xf32>
    %54 = tpu.matmul %52, %53, %cst_20 {dimension_numbers = #tpu.dot_dimension_numbers<[1], [0], [0], [1], [0, 0, 1, 1], [], []>} : vector<32x768xbf16>, vector<768x512xbf16>, vector<32x512xf32> -> vector<32x512xf32>
    %c0_21 = arith.constant 0 : index
    %c0_22 = arith.constant 0 : index
    %55 = vector.load %arg5[%c0_21, %c0_22] : memref<1x512xf32, #tpu.memory_space<vmem>>, vector<1x512xf32>
    %56 = vector.broadcast %55 : vector<1x512xf32> to vector<32x512xf32>
    %57 = arith.addf %54, %56 : vector<32x512xf32>
    %cst_23 = arith.constant 0.000000e+00 : f32
    %58 = vector.broadcast %cst_23 : f32 to vector<32x512xf32>
    %59 = arith.maximumf %57, %58 : vector<32x512xf32>
    %60 = arith.truncf %0 : vector<32x128xf32> to vector<32x128xbf16>
    %c0_24 = arith.constant 0 : index
    %c0_25 = arith.constant 0 : index
    %61 = vector.load %arg6[%c0_24, %c0_25] : memref<128x512xbf16, #tpu.memory_space<vmem>>, vector<128x512xbf16>
    %cst_26 = arith.constant dense<0.000000e+00> : vector<32x512xf32>
    %62 = tpu.matmul %60, %61, %cst_26 {dimension_numbers = #tpu.dot_dimension_numbers<[1], [0], [0], [1], [0, 0, 1, 1], [], []>} : vector<32x128xbf16>, vector<128x512xbf16>, vector<32x512xf32> -> vector<32x512xf32>
    %63 = arith.addf %59, %62 : vector<32x512xf32>
    %64 = vector.extract_strided_slice %63 {offsets = [0, 0], sizes = [32, 256], strides = [1, 1]} : vector<32x512xf32> to vector<32x256xf32>
    %65 = vector.extract_strided_slice %63 {offsets = [0, 256], sizes = [32, 256], strides = [1, 1]} : vector<32x512xf32> to vector<32x256xf32>
    %66 = arith.maximumf %64, %65 : vector<32x256xf32>
    %67 = vector.shape_cast %66 : vector<32x256xf32> to vector<16x512xf32>
    %68 = vector.extract_strided_slice %67 {offsets = [0, 0], sizes = [16, 256], strides = [1, 1]} : vector<16x512xf32> to vector<16x256xf32>
    %69 = vector.extract_strided_slice %67 {offsets = [0, 256], sizes = [16, 256], strides = [1, 1]} : vector<16x512xf32> to vector<16x256xf32>
    %70 = arith.maximumf %68, %69 : vector<16x256xf32>
    %c0_27 = arith.constant 0 : index
    %c0_28 = arith.constant 0 : index
    %71 = vector.load %arg7[%c0_27, %c0_28] : memref<16x256xf32, #tpu.memory_space<vmem>>, vector<16x256xf32>
    tpu.vector_store %arg7[%c0_27, %c0_28], %70 {strides = array<i32>} : memref<16x256xf32, #tpu.memory_space<vmem>>, vector<16x256xf32>,
    return
  }
  func.func @transform_0(%arg0: i32) -> (i32, i32) {
    %c0_i32 = arith.constant 0 : i32
    %c0_i32_0 = arith.constant 0 : i32
    return %arg0, %c0_i32 : i32, i32
  }
  func.func @transform_1(%arg0: i32) -> (i32, i32) {
    %c0_i32 = arith.constant 0 : i32
    %c0_i32_0 = arith.constant 0 : i32
    %c0_i32_1 = arith.constant 0 : i32
    return %c0_i32, %c0_i32_0 : i32, i32
  }
  func.func @transform_2(%arg0: i32) -> (i32, i32) {
    %c0_i32 = arith.constant 0 : i32
    %c0_i32_0 = arith.constant 0 : i32
    %c0_i32_1 = arith.constant 0 : i32
    return %c0_i32, %c0_i32_0 : i32, i32
  }
  func.func @transform_3(%arg0: i32) -> (i32, i32) {
    %c0_i32 = arith.constant 0 : i32
    %c0_i32_0 = arith.constant 0 : i32
    %c0_i32_1 = arith.constant 0 : i32
    return %c0_i32, %c0_i32_0 : i32, i32
  }
  func.func @transform_4(%arg0: i32) -> (i32, i32) {
    %c0_i32 = arith.constant 0 : i32
    %c0_i32_0 = arith.constant 0 : i32
    %c0_i32_1 = arith.constant 0 : i32
    return %c0_i32, %c0_i32_0 : i32, i32
  }
  func.func @transform_5(%arg0: i32) -> (i32, i32) {
    %c0_i32 = arith.constant 0 : i32
    %c0_i32_0 = arith.constant 0 : i32
    %c0_i32_1 = arith.constant 0 : i32
    return %c0_i32, %c0_i32_0 : i32, i32
  }
  func.func @transform_6(%arg0: i32) -> (i32, i32) {
    %c0_i32 = arith.constant 0 : i32
    %c0_i32_0 = arith.constant 0 : i32
    return %arg0, %c0_i32 : i32, i32
  }
}

module attributes {stable_mosaic.version = 11 : i64} {
  func.func @_res_block_kernel(%arg0: i32, %arg1: memref<16x256xf32, #tpu.memory_space<vmem>>, %arg2: memref<768x256xbf16, #tpu.memory_space<vmem>>, %arg3: memref<1x256xf32, #tpu.memory_space<vmem>>, %arg4: memref<768x512xbf16, #tpu.memory_space<vmem>>, %arg5: memref<1x512xf32, #tpu.memory_space<vmem>>, %arg6: memref<256x512xbf16, #tpu.memory_space<vmem>>, %arg7: memref<8x256xf32, #tpu.memory_space<vmem>>) attributes {dimension_semantics = [#tpu.dimension_semantics<parallel>], iteration_bounds = array<i64: 2>, scalar_prefetch = 0 : i64, scratch_operands = 0 : i64, tpu.core_type = #tpu.core_type<tc>, window_params = [{transform_indices = @transform_0, window_bounds = array<i64: 16, 256>}, {pipeline_mode = #tpu.pipeline_mode<synchronous>, transform_indices = @transform_1, window_bounds = array<i64: 768, 256>}, {pipeline_mode = #tpu.pipeline_mode<synchronous>, transform_indices = @transform_2, window_bounds = array<i64: 1, 256>}, {pipeline_mode = #tpu.pipeline_mode<synchronous>, transform_indices = @transform_3, window_bounds = array<i64: 768, 512>}, {pipeline_mode = #tpu.pipeline_mode<synchronous>, transform_indices = @transform_4, window_bounds = array<i64: 1, 512>}, {pipeline_mode = #tpu.pipeline_mode<synchronous>, transform_indices = @transform_5, window_bounds = array<i64: 256, 512>}, {transform_indices = @transform_6, window_bounds = array<i64: 8, 256>}]} {
    %c0 = arith.constant 0 : index
    %c0_0 = arith.constant 0 : index
    %0 = vector.load %arg1[%c0, %c0_0] : memref<16x256xf32, #tpu.memory_space<vmem>>, vector<16x256xf32>
    %1 = tpu.iota {dimensions = array<i32: 0>} : vector<16x1xi32>
    %c16_i32 = arith.constant 16 : i32
    %c0_i32 = arith.constant 0 : i32
    %2 = arith.cmpi eq, %c16_i32, %c0_i32 : i32
    %c1_i32 = arith.constant 1 : i32
    %3 = arith.select %2, %c1_i32, %c16_i32 : i32
    %4 = vector.broadcast %3 : i32 to vector<16x1xi32>
    %5 = arith.remsi %1, %4 : vector<16x1xi32>
    %c0_i32_1 = arith.constant 0 : i32
    %6 = vector.broadcast %c0_i32_1 : i32 to vector<16x1xi32>
    %7 = arith.cmpi ne, %5, %6 : vector<16x1xi32>
    %c0_i32_2 = arith.constant 0 : i32
    %8 = vector.broadcast %c0_i32_2 : i32 to vector<16x1xi32>
    %9 = arith.cmpi slt, %5, %8 : vector<16x1xi32>
    %c0_i32_3 = arith.constant 0 : i32
    %10 = arith.cmpi slt, %3, %c0_i32_3 : i32
    %11 = vector.broadcast %10 : i1 to vector<16x1xi1>
    %12 = vector.broadcast %11 : vector<16x1xi1> to vector<16x1xi1>
    %13 = arith.xori %9, %12 : vector<16x1xi1>
    %14 = arith.andi %13, %7 : vector<16x1xi1>
    %15 = vector.broadcast %3 : i32 to vector<16x1xi32>
    %16 = arith.addi %5, %15 : vector<16x1xi32>
    %17 = arith.select %14, %16, %5 : vector<16x1xi1>, vector<16x1xi32>
    %c0_i32_4 = arith.constant 0 : i32
    %18 = vector.broadcast %c0_i32_4 : i32 to vector<16x1xi32>
    %19 = arith.cmpi sgt, %17, %18 : vector<16x1xi32>
    %c15_i32 = arith.constant 15 : i32
    %20 = vector.broadcast %c15_i32 : i32 to vector<16x1xi32>
    %21 = arith.cmpi slt, %17, %20 : vector<16x1xi32>
    %c1_i32_5 = arith.constant 1 : i32
    %22 = tpu.dynamic_rotate %0 by %c1_i32_5 dim 0 : vector<16x256xf32>, i32 -> vector<16x256xf32>
    %cst = arith.constant 0.000000e+00 : f32
    %23 = vector.shape_cast %19 : vector<16x1xi1> to vector<16x1xi1>
    %24 = vector.broadcast %23 : vector<16x1xi1> to vector<16x256xi1>
    %25 = vector.broadcast %cst : f32 to vector<16x256xf32>
    %26 = arith.select %24, %22, %25 : vector<16x256xi1>, vector<16x256xf32>
    %c15_i32_6 = arith.constant 15 : i32
    %27 = tpu.dynamic_rotate %0 by %c15_i32_6 dim 0 : vector<16x256xf32>, i32 -> vector<16x256xf32>
    %cst_7 = arith.constant 0.000000e+00 : f32
    %28 = vector.shape_cast %21 : vector<16x1xi1> to vector<16x1xi1>
    %29 = vector.broadcast %28 : vector<16x1xi1> to vector<16x256xi1>
    %30 = vector.broadcast %cst_7 : f32 to vector<16x256xf32>
    %31 = arith.select %29, %27, %30 : vector<16x256xi1>, vector<16x256xf32>
    %32 = tpu.concatenate %26, %0, %31 in 1 : vector<16x256xf32>, vector<16x256xf32>, vector<16x256xf32> -> vector<16x768xf32>
    %33 = arith.truncf %32 : vector<16x768xf32> to vector<16x768xbf16>
    %c0_8 = arith.constant 0 : index
    %c0_9 = arith.constant 0 : index
    %34 = vector.load %arg2[%c0_8, %c0_9] : memref<768x256xbf16, #tpu.memory_space<vmem>>, vector<768x256xbf16>
    %cst_10 = arith.constant dense<0.000000e+00> : vector<16x256xf32>
    %35 = tpu.matmul %33, %34, %cst_10 {dimension_numbers = #tpu.dot_dimension_numbers<[1], [0], [0], [1], [0, 0, 1, 1], [], []>} : vector<16x768xbf16>, vector<768x256xbf16>, vector<16x256xf32> -> vector<16x256xf32>
    %c0_11 = arith.constant 0 : index
    %c0_12 = arith.constant 0 : index
    %36 = vector.load %arg3[%c0_11, %c0_12] : memref<1x256xf32, #tpu.memory_space<vmem>>, vector<1x256xf32>
    %37 = vector.broadcast %36 : vector<1x256xf32> to vector<16x256xf32>
    %38 = arith.addf %35, %37 : vector<16x256xf32>
    %cst_13 = arith.constant 0.000000e+00 : f32
    %39 = vector.broadcast %cst_13 : f32 to vector<16x256xf32>
    %40 = arith.maximumf %38, %39 : vector<16x256xf32>
    %c1_i32_14 = arith.constant 1 : i32
    %41 = tpu.dynamic_rotate %40 by %c1_i32_14 dim 0 : vector<16x256xf32>, i32 -> vector<16x256xf32>
    %cst_15 = arith.constant 0.000000e+00 : f32
    %42 = vector.shape_cast %19 : vector<16x1xi1> to vector<16x1xi1>
    %43 = vector.broadcast %42 : vector<16x1xi1> to vector<16x256xi1>
    %44 = vector.broadcast %cst_15 : f32 to vector<16x256xf32>
    %45 = arith.select %43, %41, %44 : vector<16x256xi1>, vector<16x256xf32>
    %c15_i32_16 = arith.constant 15 : i32
    %46 = tpu.dynamic_rotate %40 by %c15_i32_16 dim 0 : vector<16x256xf32>, i32 -> vector<16x256xf32>
    %cst_17 = arith.constant 0.000000e+00 : f32
    %47 = vector.shape_cast %21 : vector<16x1xi1> to vector<16x1xi1>
    %48 = vector.broadcast %47 : vector<16x1xi1> to vector<16x256xi1>
    %49 = vector.broadcast %cst_17 : f32 to vector<16x256xf32>
    %50 = arith.select %48, %46, %49 : vector<16x256xi1>, vector<16x256xf32>
    %51 = tpu.concatenate %45, %40, %50 in 1 : vector<16x256xf32>, vector<16x256xf32>, vector<16x256xf32> -> vector<16x768xf32>
    %52 = arith.truncf %51 : vector<16x768xf32> to vector<16x768xbf16>
    %c0_18 = arith.constant 0 : index
    %c0_19 = arith.constant 0 : index
    %53 = vector.load %arg4[%c0_18, %c0_19] : memref<768x512xbf16, #tpu.memory_space<vmem>>, vector<768x512xbf16>
    %cst_20 = arith.constant dense<0.000000e+00> : vector<16x512xf32>
    %54 = tpu.matmul %52, %53, %cst_20 {dimension_numbers = #tpu.dot_dimension_numbers<[1], [0], [0], [1], [0, 0, 1, 1], [], []>} : vector<16x768xbf16>, vector<768x512xbf16>, vector<16x512xf32> -> vector<16x512xf32>
    %c0_21 = arith.constant 0 : index
    %c0_22 = arith.constant 0 : index
    %55 = vector.load %arg5[%c0_21, %c0_22] : memref<1x512xf32, #tpu.memory_space<vmem>>, vector<1x512xf32>
    %56 = vector.broadcast %55 : vector<1x512xf32> to vector<16x512xf32>
    %57 = arith.addf %54, %56 : vector<16x512xf32>
    %cst_23 = arith.constant 0.000000e+00 : f32
    %58 = vector.broadcast %cst_23 : f32 to vector<16x512xf32>
    %59 = arith.maximumf %57, %58 : vector<16x512xf32>
    %60 = arith.truncf %0 : vector<16x256xf32> to vector<16x256xbf16>
    %c0_24 = arith.constant 0 : index
    %c0_25 = arith.constant 0 : index
    %61 = vector.load %arg6[%c0_24, %c0_25] : memref<256x512xbf16, #tpu.memory_space<vmem>>, vector<256x512xbf16>
    %cst_26 = arith.constant dense<0.000000e+00> : vector<16x512xf32>
    %62 = tpu.matmul %60, %61, %cst_26 {dimension_numbers = #tpu.dot_dimension_numbers<[1], [0], [0], [1], [0, 0, 1, 1], [], []>} : vector<16x256xbf16>, vector<256x512xbf16>, vector<16x512xf32> -> vector<16x512xf32>
    %63 = arith.addf %59, %62 : vector<16x512xf32>
    %64 = vector.extract_strided_slice %63 {offsets = [0, 0], sizes = [16, 256], strides = [1, 1]} : vector<16x512xf32> to vector<16x256xf32>
    %65 = vector.extract_strided_slice %63 {offsets = [0, 256], sizes = [16, 256], strides = [1, 1]} : vector<16x512xf32> to vector<16x256xf32>
    %66 = arith.maximumf %64, %65 : vector<16x256xf32>
    %67 = vector.shape_cast %66 : vector<16x256xf32> to vector<8x512xf32>
    %68 = vector.extract_strided_slice %67 {offsets = [0, 0], sizes = [8, 256], strides = [1, 1]} : vector<8x512xf32> to vector<8x256xf32>
    %69 = vector.extract_strided_slice %67 {offsets = [0, 256], sizes = [8, 256], strides = [1, 1]} : vector<8x512xf32> to vector<8x256xf32>
    %70 = arith.maximumf %68, %69 : vector<8x256xf32>
    %c0_27 = arith.constant 0 : index
    %c0_28 = arith.constant 0 : index
    %71 = vector.load %arg7[%c0_27, %c0_28] : memref<8x256xf32, #tpu.memory_space<vmem>>, vector<8x256xf32>
    tpu.vector_store %arg7[%c0_27, %c0_28], %70 {strides = array<i32>} : memref<8x256xf32, #tpu.memory_space<vmem>>, vector<8x256xf32>,
    return
  }
  func.func @transform_0(%arg0: i32) -> (i32, i32) {
    %c0_i32 = arith.constant 0 : i32
    %c0_i32_0 = arith.constant 0 : i32
    return %arg0, %c0_i32 : i32, i32
  }
  func.func @transform_1(%arg0: i32) -> (i32, i32) {
    %c0_i32 = arith.constant 0 : i32
    %c0_i32_0 = arith.constant 0 : i32
    %c0_i32_1 = arith.constant 0 : i32
    return %c0_i32, %c0_i32_0 : i32, i32
  }
  func.func @transform_2(%arg0: i32) -> (i32, i32) {
    %c0_i32 = arith.constant 0 : i32
    %c0_i32_0 = arith.constant 0 : i32
    %c0_i32_1 = arith.constant 0 : i32
    return %c0_i32, %c0_i32_0 : i32, i32
  }
  func.func @transform_3(%arg0: i32) -> (i32, i32) {
    %c0_i32 = arith.constant 0 : i32
    %c0_i32_0 = arith.constant 0 : i32
    %c0_i32_1 = arith.constant 0 : i32
    return %c0_i32, %c0_i32_0 : i32, i32
  }
  func.func @transform_4(%arg0: i32) -> (i32, i32) {
    %c0_i32 = arith.constant 0 : i32
    %c0_i32_0 = arith.constant 0 : i32
    %c0_i32_1 = arith.constant 0 : i32
    return %c0_i32, %c0_i32_0 : i32, i32
  }
  func.func @transform_5(%arg0: i32) -> (i32, i32) {
    %c0_i32 = arith.constant 0 : i32
    %c0_i32_0 = arith.constant 0 : i32
    %c0_i32_1 = arith.constant 0 : i32
    return %c0_i32, %c0_i32_0 : i32, i32
  }
  func.func @transform_6(%arg0: i32) -> (i32, i32) {
    %c0_i32 = arith.constant 0 : i32
    %c0_i32_0 = arith.constant 0 : i32
    return %arg0, %c0_i32 : i32, i32
  }
}

module attributes {stable_mosaic.version = 11 : i64} {
  func.func @_fc_stack_kernel(%arg0: i32, %arg1: memref<2x2048xf32, #tpu.memory_space<vmem>>, %arg2: memref<2048x128xbf16, #tpu.memory_space<vmem>>, %arg3: memref<1x128xf32, #tpu.memory_space<vmem>>, %arg4: memref<128x128xbf16, #tpu.memory_space<vmem>>, %arg5: memref<1x128xf32, #tpu.memory_space<vmem>>, %arg6: memref<128x128xbf16, #tpu.memory_space<vmem>>, %arg7: memref<1x128xf32, #tpu.memory_space<vmem>>, %arg8: memref<2x128xf32, #tpu.memory_space<vmem>>) attributes {dimension_semantics = [#tpu.dimension_semantics<parallel>], iteration_bounds = array<i64: 1>, scalar_prefetch = 0 : i64, scratch_operands = 0 : i64, tpu.core_type = #tpu.core_type<tc>, window_params = [{transform_indices = @transform_0, window_bounds = array<i64: 2, 2048>}, {pipeline_mode = #tpu.pipeline_mode<synchronous>, transform_indices = @transform_1, window_bounds = array<i64: 2048, 128>}, {pipeline_mode = #tpu.pipeline_mode<synchronous>, transform_indices = @transform_2, window_bounds = array<i64: 1, 128>}, {pipeline_mode = #tpu.pipeline_mode<synchronous>, transform_indices = @transform_3, window_bounds = array<i64: 128, 128>}, {pipeline_mode = #tpu.pipeline_mode<synchronous>, transform_indices = @transform_4, window_bounds = array<i64: 1, 128>}, {pipeline_mode = #tpu.pipeline_mode<synchronous>, transform_indices = @transform_5, window_bounds = array<i64: 128, 128>}, {pipeline_mode = #tpu.pipeline_mode<synchronous>, transform_indices = @transform_6, window_bounds = array<i64: 1, 128>}, {transform_indices = @transform_7, window_bounds = array<i64: 2, 128>}]} {
    %c0 = arith.constant 0 : index
    %c0_0 = arith.constant 0 : index
    %0 = vector.load %arg1[%c0, %c0_0] : memref<2x2048xf32, #tpu.memory_space<vmem>>, vector<2x2048xf32>
    %1 = arith.truncf %0 : vector<2x2048xf32> to vector<2x2048xbf16>
    %c0_1 = arith.constant 0 : index
    %c0_2 = arith.constant 0 : index
    %2 = vector.load %arg2[%c0_1, %c0_2] : memref<2048x128xbf16, #tpu.memory_space<vmem>>, vector<2048x128xbf16>
    %cst = arith.constant dense<0.000000e+00> : vector<2x128xf32>
    %3 = tpu.matmul %1, %2, %cst {dimension_numbers = #tpu.dot_dimension_numbers<[1], [0], [0], [1], [0, 0, 1, 1], [], []>} : vector<2x2048xbf16>, vector<2048x128xbf16>, vector<2x128xf32> -> vector<2x128xf32>
    %c0_3 = arith.constant 0 : index
    %c0_4 = arith.constant 0 : index
    %4 = vector.load %arg3[%c0_3, %c0_4] : memref<1x128xf32, #tpu.memory_space<vmem>>, vector<1x128xf32>
    %5 = vector.broadcast %4 : vector<1x128xf32> to vector<2x128xf32>
    %6 = arith.addf %3, %5 : vector<2x128xf32>
    %cst_5 = arith.constant 0.000000e+00 : f32
    %7 = vector.broadcast %cst_5 : f32 to vector<2x128xf32>
    %8 = arith.maximumf %6, %7 : vector<2x128xf32>
    %9 = arith.truncf %8 : vector<2x128xf32> to vector<2x128xbf16>
    %c0_6 = arith.constant 0 : index
    %c0_7 = arith.constant 0 : index
    %10 = vector.load %arg4[%c0_6, %c0_7] : memref<128x128xbf16, #tpu.memory_space<vmem>>, vector<128x128xbf16>
    %cst_8 = arith.constant dense<0.000000e+00> : vector<2x128xf32>
    %11 = tpu.matmul %9, %10, %cst_8 {dimension_numbers = #tpu.dot_dimension_numbers<[1], [0], [0], [1], [0, 0, 1, 1], [], []>} : vector<2x128xbf16>, vector<128x128xbf16>, vector<2x128xf32> -> vector<2x128xf32>
    %c0_9 = arith.constant 0 : index
    %c0_10 = arith.constant 0 : index
    %12 = vector.load %arg5[%c0_9, %c0_10] : memref<1x128xf32, #tpu.memory_space<vmem>>, vector<1x128xf32>
    %13 = vector.broadcast %12 : vector<1x128xf32> to vector<2x128xf32>
    %14 = arith.addf %11, %13 : vector<2x128xf32>
    %cst_11 = arith.constant 0.000000e+00 : f32
    %15 = vector.broadcast %cst_11 : f32 to vector<2x128xf32>
    %16 = arith.maximumf %14, %15 : vector<2x128xf32>
    %17 = arith.truncf %16 : vector<2x128xf32> to vector<2x128xbf16>
    %c0_12 = arith.constant 0 : index
    %c0_13 = arith.constant 0 : index
    %18 = vector.load %arg6[%c0_12, %c0_13] : memref<128x128xbf16, #tpu.memory_space<vmem>>, vector<128x128xbf16>
    %cst_14 = arith.constant dense<0.000000e+00> : vector<2x128xf32>
    %19 = tpu.matmul %17, %18, %cst_14 {dimension_numbers = #tpu.dot_dimension_numbers<[1], [0], [0], [1], [0, 0, 1, 1], [], []>} : vector<2x128xbf16>, vector<128x128xbf16>, vector<2x128xf32> -> vector<2x128xf32>
    %c0_15 = arith.constant 0 : index
    %c0_16 = arith.constant 0 : index
    %20 = vector.load %arg7[%c0_15, %c0_16] : memref<1x128xf32, #tpu.memory_space<vmem>>, vector<1x128xf32>
    %21 = vector.broadcast %20 : vector<1x128xf32> to vector<2x128xf32>
    %22 = arith.addf %19, %21 : vector<2x128xf32>
    %c0_17 = arith.constant 0 : index
    %c0_18 = arith.constant 0 : index
    %23 = vector.load %arg8[%c0_17, %c0_18] : memref<2x128xf32, #tpu.memory_space<vmem>>, vector<2x128xf32>
    tpu.vector_store %arg8[%c0_17, %c0_18], %22 {strides = array<i32>} : memref<2x128xf32, #tpu.memory_space<vmem>>, vector<2x128xf32>,
    return
  }
  func.func @transform_0(%arg0: i32) -> (i32, i32) {
    %c0_i32 = arith.constant 0 : i32
    %c0_i32_0 = arith.constant 0 : i32
    return %arg0, %c0_i32 : i32, i32
  }
  func.func @transform_1(%arg0: i32) -> (i32, i32) {
    %c0_i32 = arith.constant 0 : i32
    %c0_i32_0 = arith.constant 0 : i32
    %c0_i32_1 = arith.constant 0 : i32
    return %c0_i32, %c0_i32_0 : i32, i32
  }
  func.func @transform_2(%arg0: i32) -> (i32, i32) {
    %c0_i32 = arith.constant 0 : i32
    %c0_i32_0 = arith.constant 0 : i32
    %c0_i32_1 = arith.constant 0 : i32
    return %c0_i32, %c0_i32_0 : i32, i32
  }
  func.func @transform_3(%arg0: i32) -> (i32, i32) {
    %c0_i32 = arith.constant 0 : i32
    %c0_i32_0 = arith.constant 0 : i32
    %c0_i32_1 = arith.constant 0 : i32
    return %c0_i32, %c0_i32_0 : i32, i32
  }
  func.func @transform_4(%arg0: i32) -> (i32, i32) {
    %c0_i32 = arith.constant 0 : i32
    %c0_i32_0 = arith.constant 0 : i32
    %c0_i32_1 = arith.constant 0 : i32
    return %c0_i32, %c0_i32_0 : i32, i32
  }
  func.func @transform_5(%arg0: i32) -> (i32, i32) {
    %c0_i32 = arith.constant 0 : i32
    %c0_i32_0 = arith.constant 0 : i32
    %c0_i32_1 = arith.constant 0 : i32
    return %c0_i32, %c0_i32_0 : i32, i32
  }
  func.func @transform_6(%arg0: i32) -> (i32, i32) {
    %c0_i32 = arith.constant 0 : i32
    %c0_i32_0 = arith.constant 0 : i32
    %c0_i32_1 = arith.constant 0 : i32
    return %c0_i32, %c0_i32_0 : i32, i32
  }
  func.func @transform_7(%arg0: i32) -> (i32, i32) {
    %c0_i32 = arith.constant 0 : i32
    %c0_i32_0 = arith.constant 0 : i32
    return %arg0, %c0_i32 : i32, i32
  }
}

</mosaic_0001>

<bundles_post_ra>
// kernel: lenet_res_dropout.5
= control target key start
LH: loop header
LB: loop body
LE: loop exit
PB: predicated region body
PF: predicated region fallthrough
CT: control target
= control target key end

     0   :  { %12 = vsyncpa [#allocation3], 0  ;;  %s2872_s0 = inlined_call_operand.vmem [shape: f32[2,2048], index: 0, kind: input, shape index: {}]   ;;  %s2873_s1 = inlined_call_operand.vmem [shape: bf16[2048,128], index: 1, kind: input, shape index: {}]   ;;  %s2874_s2 = inlined_call_operand.vmem [shape: f32[1,128], index: 2, kind: input, shape index: {}]   ;;  %s2875_s3 = inlined_call_operand.vmem [shape: bf16[128,128], index: 3, kind: input, shape index: {}]   ;;  %s2876_s4 = inlined_call_operand.hbm [shape: f32[1,128], index: 4, kind: input, shape index: {}]   ;;  %s2877_s5 = inlined_call_operand.hbm [shape: bf16[128,128], index: 5, kind: input, shape index: {}]   ;;  %s2878_s6 = inlined_call_operand.hbm [shape: f32[1,128], index: 6, kind: input, shape index: {}]   ;;  %s2879_s7 = inlined_call_operand.hbm [shape: f32[2,128], index: 7, kind: output, shape index: {}]  }
   0x1   :  { %13 = vsyncpa [#allocation6], 0  ;;  %s38_s26 = sshll.u32 %s2877_s5, 4  ;;  %s39_s26 = int_to_ptr.hbm [resolvable:$true] %s38_s26 }
   0x2   :  { %14 = vsyncpa [#allocation4], 0  ;;  %s2383_s27 = smov [#allocation5]   ;;  %s28_s8 = sshll.u32 %s2876_s4, 4  ;;  %s29_s8 = int_to_ptr.hbm [resolvable:$true] %s28_s8 }
   0x3   :  { %s40_s28 = sshll.u32 %s2383_s27, 4  ;;  %s2384_s9 = smov 64   ;;  %s41_s28 = int_to_ptr.vmem [resolvable:$true] %s40_s28 }
   0x4   :  { %s2385_s10 = smov 4   ;;  %s2386_s11 = smov [#allocation2]  }
   0x5   :  { %46 = dma.hbm_to_vmem [thread:$0]  %s39_s26, 1024, %s41_s28, [#allocation6], %s2384_s9, %s2384_s9, %s2385_s10  }
   0x6   :  { %s30_s12 = sshll.u32 %s2386_s11, 4  ;;  %s52_s15 = sshll.u32 %s2878_s6, 4  ;;  %s31_s12 = int_to_ptr.vmem [resolvable:$true] %s30_s12  ;;  %s53_s15 = int_to_ptr.hbm [resolvable:$true] %s52_s15 }
   0x7   :  { %33 = dma.hbm_to_vmem [thread:$0]  %s29_s8, 16, %s31_s12, [#allocation3]  }
   0x8   :  { %s2387_s5 = smov [#allocation7]  }
   0x9   :  { %s54_s16 = sshll.u32 %s2387_s5, 4  ;;  %s55_s16 = int_to_ptr.vmem [resolvable:$true] %s54_s16 }
   0xa   :  { %57 = dma.hbm_to_vmem [thread:$0]  %s53_s15, 16, %s55_s16, [#allocation6]  }
   0xb   :  { %2377 = dma.done.wait [#allocation3], 16  }
   0xc   :  { %2378 = vsyncadd [#allocation3], 4294967280 }
   0xd   :  { %2379 = dma.done.wait [#allocation6], 1040  }
   0xe   :  { %2380 = vsyncadd [#allocation6], 4294966256  ;;  %v2135_v0 = vld [vmem:[%s2873_s1 + $0x38] sm:$0xff]  ;;  %v2134_v4 = vld [vmem:[%s2873_s1 + $0x30] sm:$0xff]  ;;  %s1541_s8 = sshll.u32 %s2879_s7, 4  ;;  %s1542_s8 = int_to_ptr.hbm [resolvable:$true] %s1541_s8 }
   0xf   :  { %v2143_v1 = vld [vmem:[%s2873_s1 + $0x78] sm:$0xff]  ;;  %1159 = vmatpush.bf16.msra.mxu0 %v2135_v0  ;;  %v2142_v5 = vld [vmem:[%s2873_s1 + $0x70] sm:$0xff]  ;;  %v2133_v8 = vld [vmem:[%s2873_s1 + $0x28] sm:$0xff] }
  0x10   :  { %v2151_v2 = vld [vmem:[%s2873_s1 + $0xb8] sm:$0xff]  ;;  %1172 = vmatpush.bf16.msra.mxu1 %v2143_v1  ;;  %v2150_v6 = vld [vmem:[%s2873_s1 + $0xb0] sm:$0xff]  ;;  %v2141_v9 = vld [vmem:[%s2873_s1 + $0x68] sm:$0xff] }
  0x11   :  { %v2159_v3 = vld [vmem:[%s2873_s1 + $0xf8] sm:$0xff]  ;;  %1185 = vmatpush.bf16.msra.mxu2 %v2151_v2  ;;  %v2158_v7 = vld [vmem:[%s2873_s1 + $0xf0] sm:$0xff]  ;;  %v2149_v10 = vld [vmem:[%s2873_s1 + $0xa8] sm:$0xff] }
  0x12   :  { %1198 = vmatpush.bf16.msra.mxu3 %v2159_v3  ;;  %v2157_v11 = vld [vmem:[%s2873_s1 + $0xe8] sm:$0xff]  ;;  %v2132_v12 = vld [vmem:[%s2873_s1 + $0x20] sm:$0xff]  ;;  %v2131_v16 = vld [vmem:[%s2873_s1 + $0x18] sm:$0xff] }
  0x13   :  { %1160 = vmatpush.bf16.msra.mxu0 %v2134_v4  ;;  %v2140_v13 = vld [vmem:[%s2873_s1 + $0x60] sm:$0xff]  ;;  %v2139_v17 = vld [vmem:[%s2873_s1 + $0x58] sm:$0xff]  ;;  %v2130_v20 = vld [vmem:[%s2873_s1 + $0x10] sm:$0xff] }
  0x14   :  { %1173 = vmatpush.bf16.msra.mxu1 %v2142_v5  ;;  %v2148_v14 = vld [vmem:[%s2873_s1 + $0xa0] sm:$0xff]  ;;  %v2147_v18 = vld [vmem:[%s2873_s1 + $0x98] sm:$0xff]  ;;  %v2138_v21 = vld [vmem:[%s2873_s1 + $0x50] sm:$0xff] }
  0x15   :  { %1186 = vmatpush.bf16.msra.mxu2 %v2150_v6  ;;  %v2156_v15 = vld [vmem:[%s2873_s1 + $0xe0] sm:$0xff]  ;;  %v2155_v19 = vld [vmem:[%s2873_s1 + $0xd8] sm:$0xff]  ;;  %v2146_v23 = vld [vmem:[%s2873_s1 + $0x90] sm:$0xff] }
  0x16   :  { %1199 = vmatpush.bf16.msra.mxu3 %v2158_v7  ;;  %v70_v22 = vld [vmem:[%s2872_s0] sm:$0xff]  ;;  %v2154_v24 = vld [vmem:[%s2873_s1 + $0xd0] sm:$0xff]  ;;  %v2129_v25 = vld [vmem:[%s2873_s1 + $0x8] sm:$0xff] }
  0x17   :  { %1161 = vmatpush.bf16.msra.mxu0 %v2133_v8  ;;  %78 = vst [vmem:[#allocation1] ss:$4 sm:$0xff] %v70_v22  ;;  %v2137_v26 = vld [vmem:[%s2873_s1 + $0x48] sm:$0xff]  ;;  %v2128_v29 = vld [vmem:[%s2873_s1] sm:$0xff]  ;;  %v72_v35 = vld [vmem:[%s2872_s0 + $0x10] sm:$0xff] }
  0x18   :  { %1174 = vmatpush.bf16.msra.mxu1 %v2141_v9  ;;  %v2145_v27 = vld [vmem:[%s2873_s1 + $0x88] sm:$0xff]  ;;  %v2136_v30 = vld [vmem:[%s2873_s1 + $0x40] sm:$0xff]  ;;  %v2167_v38 = vld [vmem:[%s2873_s1 + $0x138] sm:$0xff] }
  0x19   :  { %1187 = vmatpush.bf16.msra.mxu2 %v2149_v10  ;;  %v2153_v28 = vld [vmem:[%s2873_s1 + $0xc8] sm:$0xff]  ;;  %v2144_v31 = vld [vmem:[%s2873_s1 + $0x80] sm:$0xff]  ;;  %v2175_v39 = vld [vmem:[%s2873_s1 + $0x178] sm:$0xff] }
  0x1a   :  { %1200 = vmatpush.bf16.msra.mxu3 %v2157_v11  ;;  %v2152_v33 = vld [vmem:[%s2873_s1 + $0xc0] sm:$0xff]  ;;  %v2183_v40 = vld [vmem:[%s2873_s1 + $0x1b8] sm:$0xff]  ;;  %v71_v42 = vld [vmem:[%s2872_s0 + $0x8] sm:$0xff] }
  0x1b   :  { %1162 = vmatpush.bf16.msra.mxu0 %v2132_v12  ;;  %v2191_v41 = vld [vmem:[%s2873_s1 + $0x1f8] sm:$0xff]  ;;  %80 = vst [vmem:[#allocation1 + $0x20] ss:$4 sm:$0xff] %v71_v42  ;;  %v2166_v47 = vld [vmem:[%s2873_s1 + $0x130] sm:$0xff]  ;;  %v2165_v51 = vld [vmem:[%s2873_s1 + $0x128] sm:$0xff] }
  0x1c   :  { %1175 = vmatpush.bf16.msra.mxu1 %v2140_v13  ;;  %v2174_v48 = vld [vmem:[%s2873_s1 + $0x170] sm:$0xff]  ;;  %v2173_v52 = vld [vmem:[%s2873_s1 + $0x168] sm:$0xff]  ;;  %v2164_v55 = vld [vmem:[%s2873_s1 + $0x120] sm:$0xff] }
  0x1d   :  { %1188 = vmatpush.bf16.msra.mxu2 %v2148_v14  ;;  %v2182_v49 = vld [vmem:[%s2873_s1 + $0x1b0] sm:$0xff]  ;;  %v2181_v53 = vld [vmem:[%s2873_s1 + $0x1a8] sm:$0xff]  ;;  %v2172_v57 = vld [vmem:[%s2873_s1 + $0x160] sm:$0xff] }
  0x1e   :  { %1201 = vmatpush.bf16.msra.mxu3 %v2156_v15  ;;  %v83_v32 = vld.sshfl [vmem:[#allocation1 + $0x10] sm:$0xff pattern:$0x73625140]  ;;  %v81_v34 = vld.sshfl [vmem:[#allocation1] sm:$0xff pattern:$0x73625140] }
  0x1f   :  { %1163 = vmatpush.bf16.msra.mxu0 %v2131_v16  ;;  %v84_v36 = vld.sshfl [vmem:[#allocation1 + $0x18] sm:$0xff pattern:$0x73625140]  ;;  %v82_v37 = vld.sshfl [vmem:[#allocation1 + $0x8] sm:$0xff pattern:$0x73625140]  ;;  %v117_v43 = vpack.c.bf16 %v83_v32, %v83_v32  ;;  %v115_v44 = vpack.c.bf16 %v81_v34, %v81_v34 }
  0x20   :  { %1176 = vmatpush.bf16.msra.mxu1 %v2139_v17  ;;  %89 = vst [vmem:[#allocation1] ss:$4 sm:$0xff] %v72_v35  ;;  %v118_v45 = vpack.c.bf16 %v84_v36, %v84_v36  ;;  %v116_v46 = vpack.c.bf16 %v82_v37, %v82_v37  ;;  %v2190_v50 = vld [vmem:[%s2873_s1 + $0x1f0] sm:$0xff]  ;;  %v2189_v54 = vld [vmem:[%s2873_s1 + $0x1e8] sm:$0xff]  ;;  %v73_v59 = vld [vmem:[%s2872_s0 + $0x18] sm:$0xff] }
  0x21   :  { %1189 = vmatpush.bf16.msra.mxu2 %v2147_v18  ;;  %v2180_v62 = vld [vmem:[%s2873_s1 + $0x1a0] sm:$0xff]  ;;  %v2163_v0 = vld [vmem:[%s2873_s1 + $0x118] sm:$0xff]  ;;  %v2162_v4 = vld [vmem:[%s2873_s1 + $0x110] sm:$0xff] }
  0x22   :  { %1202 = vmatpush.bf16.msra.mxu3 %v2155_v19  ;;  %v2582_v56 = vld.sshfl [vmem:[#allocation1 + $0x30] sm:$0xff pattern:$0x73625140]  ;;  %v2587_v58 = vld.sshfl [vmem:[#allocation1 + $0x20] sm:$0xff pattern:$0x73625140] }
  0x23   :  { %1164 = vmatpush.bf16.msra.mxu0 %v2130_v20  ;;  %v88_v60 = vld.sshfl [vmem:[#allocation1 + $0x38] sm:$0xff pattern:$0x73625140]  ;;  %v86_v61 = vld.sshfl [vmem:[#allocation1 + $0x28] sm:$0xff pattern:$0x73625140]  ;;  %v121_v20 = vpack.c.bf16 %v2582_v56, %v2582_v56 }
  0x24   :  { %1177 = vmatpush.bf16.msra.mxu1 %v2138_v21  ;;  %v2188_v63 = vld [vmem:[%s2873_s1 + $0x1e0] sm:$0xff]  ;;  %90 = vst [vmem:[#allocation1 + $0x20] ss:$4 sm:$0xff] %v73_v59  ;;  %v2171_v1 = vld [vmem:[%s2873_s1 + $0x158] sm:$0xff]  ;;  %v2170_v5 = vld [vmem:[%s2873_s1 + $0x150] sm:$0xff]  ;;  %v119_v21 = vpack.c.bf16 %v2587_v58, %v2587_v58  ;;  %v122_v22 = vpack.c.bf16 %v88_v60, %v88_v60 }
  0x25   :  { %1190 = vmatpush.bf16.msra.mxu2 %v2146_v23  ;;  %v2179_v2 = vld [vmem:[%s2873_s1 + $0x198] sm:$0xff]  ;;  %v2178_v6 = vld [vmem:[%s2873_s1 + $0x190] sm:$0xff]  ;;  %v2161_v8 = vld [vmem:[%s2873_s1 + $0x108] sm:$0xff]  ;;  %v120_v23 = vpack.c.bf16 %v86_v61, %v86_v61 }
  0x26   :  { %1203 = vmatpush.bf16.msra.mxu3 %v2154_v24  ;;  %v2187_v3 = vld [vmem:[%s2873_s1 + $0x1d8] sm:$0xff]  ;;  %v2186_v7 = vld [vmem:[%s2873_s1 + $0x1d0] sm:$0xff]  ;;  %v2169_v9 = vld [vmem:[%s2873_s1 + $0x148] sm:$0xff] }
  0x27   :  { %1165 = vmatpush.bf16.msra.mxu0 %v2129_v25  ;;  %v2177_v10 = vld [vmem:[%s2873_s1 + $0x188] sm:$0xff]  ;;  %v2160_v12 = vld [vmem:[%s2873_s1 + $0x100] sm:$0xff]  ;;  %v2199_v16 = vld [vmem:[%s2873_s1 + $0x238] sm:$0xff] }
  0x28   :  { %1178 = vmatpush.bf16.msra.mxu1 %v2137_v26  ;;  %v2185_v11 = vld [vmem:[%s2873_s1 + $0x1c8] sm:$0xff]  ;;  %v2168_v13 = vld [vmem:[%s2873_s1 + $0x140] sm:$0xff]  ;;  %v2207_v17 = vld [vmem:[%s2873_s1 + $0x278] sm:$0xff] }
  0x29   :  { %1191 = vmatpush.bf16.msra.mxu2 %v2145_v27  ;;  %v2176_v14 = vld [vmem:[%s2873_s1 + $0x180] sm:$0xff]  ;;  %v2215_v18 = vld [vmem:[%s2873_s1 + $0x2b8] sm:$0xff]  ;;  %v2198_v24 = vld [vmem:[%s2873_s1 + $0x230] sm:$0xff] }
  0x2a   :  { %1204 = vmatpush.bf16.msra.mxu3 %v2153_v28  ;;  %v2184_v15 = vld [vmem:[%s2873_s1 + $0x1c0] sm:$0xff]  ;;  %v2223_v19 = vld [vmem:[%s2873_s1 + $0x2f8] sm:$0xff]  ;;  %v2206_v25 = vld [vmem:[%s2873_s1 + $0x270] sm:$0xff] }
  0x2b   :  { %1166 = vmatpush.bf16.msra.mxu0 %v2128_v29  ;;  %v2214_v26 = vld [vmem:[%s2873_s1 + $0x2b0] sm:$0xff]  ;;  %v2197_v28 = vld [vmem:[%s2873_s1 + $0x228] sm:$0xff]  ;;  %v2196_v32 = vld [vmem:[%s2873_s1 + $0x220] sm:$0xff] }
  0x2c   :  { %1179 = vmatpush.bf16.msra.mxu1 %v2136_v30  ;;  %v2222_v27 = vld [vmem:[%s2873_s1 + $0x2f0] sm:$0xff]  ;;  %v2205_v29 = vld [vmem:[%s2873_s1 + $0x268] sm:$0xff]  ;;  %v2212_v34 = vld [vmem:[%s2873_s1 + $0x2a0] sm:$0xff] }
  0x2d   :  { %1192 = vmatpush.bf16.msra.mxu2 %v2144_v31  ;;  %v2213_v30 = vld [vmem:[%s2873_s1 + $0x2a8] sm:$0xff]  ;;  %v2220_v35 = vld [vmem:[%s2873_s1 + $0x2e0] sm:$0xff]  ;;  %v2195_v36 = vld [vmem:[%s2873_s1 + $0x218] sm:$0xff] }
  0x2e   :  { %1205 = vmatpush.bf16.msra.mxu3 %v2152_v33  ;;  %1167 = vmatmul.bf16.vlgmr.msra.gmra.mxu0 %v115_v44  ;;  %v2221_v31 = vld [vmem:[%s2873_s1 + $0x2e8] sm:$0xff]  ;;  %v2204_v33 = vld [vmem:[%s2873_s1 + $0x260] sm:$0xff]  ;;  %v2203_v37 = vld [vmem:[%s2873_s1 + $0x258] sm:$0xff] }
  0x2f   :  { %1211 = vmatpush.bf16.msrb.mxu0 %v2167_v38  ;;  %1180 = vmatmul.bf16.vlgmr.msra.gmra.mxu1 %v116_v46  ;;  %v2211_v38 = vld [vmem:[%s2873_s1 + $0x298] sm:$0xff]  ;;  %v2210_v42 = vld [vmem:[%s2873_s1 + $0x290] sm:$0xff]  ;;  %v2193_v44 = vld [vmem:[%s2873_s1 + $0x208] sm:$0xff] }
  0x30   :  { %1224 = vmatpush.bf16.msrb.mxu1 %v2175_v39  ;;  %1193 = vmatmul.bf16.vlgmr.msra.gmra.mxu2 %v117_v43  ;;  %v2219_v39 = vld [vmem:[%s2873_s1 + $0x2d8] sm:$0xff]  ;;  %v2218_v43 = vld [vmem:[%s2873_s1 + $0x2d0] sm:$0xff]  ;;  %v2209_v46 = vld [vmem:[%s2873_s1 + $0x288] sm:$0xff] }
  0x31   :  { %1237 = vmatpush.bf16.msrb.mxu2 %v2183_v40  ;;  %1206 = vmatmul.bf16.vlgmr.msra.gmra.mxu3 %v118_v45  ;;  %v2194_v40 = vld [vmem:[%s2873_s1 + $0x210] sm:$0xff]  ;;  %v2201_v45 = vld [vmem:[%s2873_s1 + $0x248] sm:$0xff]  ;;  %v2247_v58 = vld [vmem:[%s2873_s1 + $0x3b8] sm:$0xff] }
  0x32   :  { %1250 = vmatpush.bf16.msrb.mxu3 %v2191_v41  ;;  %v2202_v41 = vld [vmem:[%s2873_s1 + $0x250] sm:$0xff]  ;;  %v92_v56 = vld.sshfl [vmem:[#allocation1 + $0x8] sm:$0xff pattern:$0x73625140]  ;;  %v2255_v59 = vld [vmem:[%s2873_s1 + $0x3f8] sm:$0xff] }
  0x33   :  { %1212 = vmatpush.bf16.msrb.mxu0 %v2166_v47  ;;  %v2217_v47 = vld [vmem:[%s2873_s1 + $0x2c8] sm:$0xff] }
  0x34   :  { %1225 = vmatpush.bf16.msrb.mxu1 %v2174_v48  ;;  %v2192_v48 = vld [vmem:[%s2873_s1 + $0x200] sm:$0xff] }
  0x35   :  { %1238 = vmatpush.bf16.msrb.mxu2 %v2182_v49  ;;  %v2200_v49 = vld [vmem:[%s2873_s1 + $0x240] sm:$0xff] }
  0x36   :  { %1251 = vmatpush.bf16.msrb.mxu3 %v2190_v50  ;;  %v2208_v50 = vld [vmem:[%s2873_s1 + $0x280] sm:$0xff] }
  0x37   :  { %1213 = vmatpush.bf16.msrb.mxu0 %v2165_v51  ;;  %v2216_v51 = vld [vmem:[%s2873_s1 + $0x2c0] sm:$0xff] }
  0x38   :  { %1226 = vmatpush.bf16.msrb.mxu1 %v2173_v52  ;;  %v2231_v52 = vld [vmem:[%s2873_s1 + $0x338] sm:$0xff] }
  0x39   :  { %1239 = vmatpush.bf16.msrb.mxu2 %v2181_v53  ;;  %v2239_v53 = vld [vmem:[%s2873_s1 + $0x378] sm:$0xff] }
  0x3a   :  { %1252 = vmatpush.bf16.msrb.mxu3 %v2189_v54  ;;  %v91_v54 = vld.sshfl [vmem:[#allocation1] sm:$0xff pattern:$0x73625140] }
  0x3b   :  { %1214 = vmatpush.bf16.msrb.mxu0 %v2164_v55  ;;  %v93_v55 = vld.sshfl [vmem:[#allocation1 + $0x10] sm:$0xff pattern:$0x73625140]  ;;  %v123_v60 = vpack.c.bf16 %v91_v54, %v91_v54 }
  0x3c   :  { %1227 = vmatpush.bf16.msrb.mxu1 %v2172_v57  ;;  %v94_v57 = vld.sshfl [vmem:[#allocation1 + $0x18] sm:$0xff pattern:$0x73625140]  ;;  %v125_v61 = vpack.c.bf16 %v93_v55, %v93_v55 }
  0x3d   :  { %1240 = vmatpush.bf16.msrb.mxu2 %v2180_v62  ;;  %v124_v62 = vpack.c.bf16 %v92_v56, %v92_v56  ;;  %v2262_v56 = vld [vmem:[%s2875_s3 + $0x30] sm:$0xff] }
  0x3e   :  { %1253 = vmatpush.bf16.msrb.mxu3 %v2188_v63  ;;  %v126_v63 = vpack.c.bf16 %v94_v57, %v94_v57  ;;  %v2261_v57 = vld [vmem:[%s2875_s3 + $0x28] sm:$0xff] }
  0x3f   :  { %1215 = vmatpush.bf16.msrb.mxu0 %v2163_v0  ;;  %v2230_v0 = vld [vmem:[%s2873_s1 + $0x330] sm:$0xff] }
  0x40   :  { %1228 = vmatpush.bf16.msrb.mxu1 %v2171_v1  ;;  %v2238_v1 = vld [vmem:[%s2873_s1 + $0x370] sm:$0xff] }
  0x41   :  { %1241 = vmatpush.bf16.msrb.mxu2 %v2179_v2  ;;  %v2246_v2 = vld [vmem:[%s2873_s1 + $0x3b0] sm:$0xff] }
  0x42   :  { %1254 = vmatpush.bf16.msrb.mxu3 %v2187_v3  ;;  %v2254_v3 = vld [vmem:[%s2873_s1 + $0x3f0] sm:$0xff] }
  0x43   :  { %1216 = vmatpush.bf16.msrb.mxu0 %v2162_v4  ;;  %v2229_v4 = vld [vmem:[%s2873_s1 + $0x328] sm:$0xff] }
  0x44   :  { %1229 = vmatpush.bf16.msrb.mxu1 %v2170_v5  ;;  %v2237_v5 = vld [vmem:[%s2873_s1 + $0x368] sm:$0xff] }
  0x45   :  { %1242 = vmatpush.bf16.msrb.mxu2 %v2178_v6  ;;  %v2245_v6 = vld [vmem:[%s2873_s1 + $0x3a8] sm:$0xff] }
  0x46   :  { %1255 = vmatpush.bf16.msrb.mxu3 %v2186_v7  ;;  %v2253_v7 = vld [vmem:[%s2873_s1 + $0x3e8] sm:$0xff] }
  0x47   :  { %1217 = vmatpush.bf16.msrb.mxu0 %v2161_v8  ;;  %v2228_v8 = vld [vmem:[%s2873_s1 + $0x320] sm:$0xff] }
  0x48   :  { %1230 = vmatpush.bf16.msrb.mxu1 %v2169_v9  ;;  %v2236_v9 = vld [vmem:[%s2873_s1 + $0x360] sm:$0xff] }
  0x49   :  { %1243 = vmatpush.bf16.msrb.mxu2 %v2177_v10  ;;  %v2244_v10 = vld [vmem:[%s2873_s1 + $0x3a0] sm:$0xff] }
  0x4a   :  { %1256 = vmatpush.bf16.msrb.mxu3 %v2185_v11  ;;  %v2252_v11 = vld [vmem:[%s2873_s1 + $0x3e0] sm:$0xff] }
  0x4b   :  { %1218 = vmatpush.bf16.msrb.mxu0 %v2160_v12  ;;  %v2227_v12 = vld [vmem:[%s2873_s1 + $0x318] sm:$0xff] }
  0x4c   :  { %1231 = vmatpush.bf16.msrb.mxu1 %v2168_v13  ;;  %v2235_v13 = vld [vmem:[%s2873_s1 + $0x358] sm:$0xff] }
  0x4d   :  { %1244 = vmatpush.bf16.msrb.mxu2 %v2176_v14  ;;  %v2243_v14 = vld [vmem:[%s2873_s1 + $0x398] sm:$0xff] }
  0x4e   :  { %1257 = vmatpush.bf16.msrb.mxu3 %v2184_v15  ;;  %1219 = vmatmul.bf16.vlgmr.msrb.gmra.mxu0 %v119_v21  ;;  %v2251_v15 = vld [vmem:[%s2873_s1 + $0x3d8] sm:$0xff]  ;;  %v2233_v21 = vld [vmem:[%s2873_s1 + $0x348] sm:$0xff] }
  0x4f   :  { %1263 = vmatpush.bf16.msra.mxu0 %v2199_v16  ;;  %1232 = vmatmul.bf16.vlgmr.msrb.gmra.mxu1 %v120_v23  ;;  %v2226_v16 = vld [vmem:[%s2873_s1 + $0x310] sm:$0xff]  ;;  %v2249_v23 = vld [vmem:[%s2873_s1 + $0x3c8] sm:$0xff] }
  0x50   :  { %1276 = vmatpush.bf16.msra.mxu1 %v2207_v17  ;;  %1245 = vmatmul.bf16.vlgmr.msrb.gmra.mxu2 %v121_v20  ;;  %v2234_v17 = vld [vmem:[%s2873_s1 + $0x350] sm:$0xff]  ;;  %v2225_v20 = vld [vmem:[%s2873_s1 + $0x308] sm:$0xff] }
  0x51   :  { %1289 = vmatpush.bf16.msra.mxu2 %v2215_v18  ;;  %1258 = vmatmul.bf16.vlgmr.msrb.gmra.mxu3 %v122_v22  ;;  %v2242_v18 = vld [vmem:[%s2873_s1 + $0x390] sm:$0xff]  ;;  %v2241_v22 = vld [vmem:[%s2873_s1 + $0x388] sm:$0xff] }
  0x52   :  { %1302 = vmatpush.bf16.msra.mxu3 %v2223_v19  ;;  %v2250_v19 = vld [vmem:[%s2873_s1 + $0x3d0] sm:$0xff] }
  0x53   :  { %1264 = vmatpush.bf16.msra.mxu0 %v2198_v24  ;;  %v2224_v24 = vld [vmem:[%s2873_s1 + $0x300] sm:$0xff] }
  0x54   :  { %1277 = vmatpush.bf16.msra.mxu1 %v2206_v25  ;;  %v2232_v25 = vld [vmem:[%s2873_s1 + $0x340] sm:$0xff] }
  0x55   :  { %1290 = vmatpush.bf16.msra.mxu2 %v2214_v26  ;;  %v2240_v26 = vld [vmem:[%s2873_s1 + $0x380] sm:$0xff] }
  0x56   :  { %1303 = vmatpush.bf16.msra.mxu3 %v2222_v27  ;;  %v2248_v27 = vld [vmem:[%s2873_s1 + $0x3c0] sm:$0xff] }
  0x57   :  { %1265 = vmatpush.bf16.msra.mxu0 %v2197_v28  ;;  %v95_v28 = vld.sshfl [vmem:[#allocation1 + $0x20] sm:$0xff pattern:$0x73625140] }
  0x58   :  { %1278 = vmatpush.bf16.msra.mxu1 %v2205_v29  ;;  %v96_v29 = vld.sshfl [vmem:[#allocation1 + $0x28] sm:$0xff pattern:$0x73625140] }
  0x59   :  { %1291 = vmatpush.bf16.msra.mxu2 %v2213_v30  ;;  %v97_v30 = vld.sshfl [vmem:[#allocation1 + $0x30] sm:$0xff pattern:$0x73625140] }
  0x5a   :  { %1304 = vmatpush.bf16.msra.mxu3 %v2221_v31  ;;  %v98_v31 = vld.sshfl [vmem:[#allocation1 + $0x38] sm:$0xff pattern:$0x73625140] }
  0x5b   :  { %1266 = vmatpush.bf16.msra.mxu0 %v2196_v32  ;;  %v127_v32 = vpack.c.bf16 %v95_v28, %v95_v28 }
  0x5c   :  { %1279 = vmatpush.bf16.msra.mxu1 %v2204_v33  ;;  %v128_v33 = vpack.c.bf16 %v96_v29, %v96_v29 }
  0x5d   :  { %1292 = vmatpush.bf16.msra.mxu2 %v2212_v34  ;;  %v129_v34 = vpack.c.bf16 %v97_v30, %v97_v30 }
  0x5e   :  { %1305 = vmatpush.bf16.msra.mxu3 %v2220_v35  ;;  %v130_v35 = vpack.c.bf16 %v98_v31, %v98_v31 }
  0x5f   :  { %1267 = vmatpush.bf16.msra.mxu0 %v2195_v36  ;;  %v2278_v36 = vld [vmem:[%s2874_s2] ss:$0 sm:$0xff] }
  0x60   :  { %1280 = vmatpush.bf16.msra.mxu1 %v2203_v37 }
  0x61   :  { %1293 = vmatpush.bf16.msra.mxu2 %v2211_v38 }
  0x62   :  { %1306 = vmatpush.bf16.msra.mxu3 %v2219_v39 }
  0x63   :  { %1268 = vmatpush.bf16.msra.mxu0 %v2194_v40 }
  0x64   :  { %1281 = vmatpush.bf16.msra.mxu1 %v2202_v41 }
  0x65   :  { %1294 = vmatpush.bf16.msra.mxu2 %v2210_v42 }
  0x66   :  { %1307 = vmatpush.bf16.msra.mxu3 %v2218_v43 }
  0x67   :  { %1269 = vmatpush.bf16.msra.mxu0 %v2193_v44 }
  0x68   :  { %1282 = vmatpush.bf16.msra.mxu1 %v2201_v45 }
  0x69   :  { %1295 = vmatpush.bf16.msra.mxu2 %v2209_v46 }
  0x6a   :  { %1308 = vmatpush.bf16.msra.mxu3 %v2217_v47 }
  0x6b   :  { %1270 = vmatpush.bf16.msra.mxu0 %v2192_v48 }
  0x6c   :  { %1283 = vmatpush.bf16.msra.mxu1 %v2200_v49 }
  0x6d   :  { %1296 = vmatpush.bf16.msra.mxu2 %v2208_v50 }
  0x6e   :  { %1309 = vmatpush.bf16.msra.mxu3 %v2216_v51  ;;  %1271 = vmatmul.bf16.vlgmr.msra.gmra.mxu0 %v123_v60  ;;  %v2260_v60 = vld [vmem:[%s2875_s3 + $0x20] sm:$0xff] }
  0x6f   :  { %1315 = vmatpush.bf16.msrb.mxu0 %v2231_v52  ;;  %1284 = vmatmul.bf16.vlgmr.msra.gmra.mxu1 %v124_v62 }
  0x70   :  { %1328 = vmatpush.bf16.msrb.mxu1 %v2239_v53  ;;  %1297 = vmatmul.bf16.vlgmr.msra.gmra.mxu2 %v125_v61  ;;  %v2263_v53 = vld [vmem:[%s2875_s3 + $0x38] sm:$0xff] }
  0x71   :  { %1341 = vmatpush.bf16.msrb.mxu2 %v2247_v58  ;;  %1310 = vmatmul.bf16.vlgmr.msra.gmra.mxu3 %v126_v63  ;;  %v2259_v61 = vld [vmem:[%s2875_s3 + $0x18] sm:$0xff]  ;;  %v2258_v63 = vld [vmem:[%s2875_s3 + $0x10] sm:$0xff] }
  0x72   :  { %1354 = vmatpush.bf16.msrb.mxu3 %v2255_v59 }
  0x73   :  { %1316 = vmatpush.bf16.msrb.mxu0 %v2230_v0 }
  0x74   :  { %1329 = vmatpush.bf16.msrb.mxu1 %v2238_v1  ;;  %v2257_v1 = vld [vmem:[%s2875_s3 + $0x8] sm:$0xff] }
  0x75   :  { %1342 = vmatpush.bf16.msrb.mxu2 %v2246_v2 }
  0x76   :  { %1355 = vmatpush.bf16.msrb.mxu3 %v2254_v3 }
  0x77   :  { %1317 = vmatpush.bf16.msrb.mxu0 %v2229_v4 }
  0x78   :  { %1330 = vmatpush.bf16.msrb.mxu1 %v2237_v5 }
  0x79   :  { %1343 = vmatpush.bf16.msrb.mxu2 %v2245_v6  ;;  %v2256_v6 = vld [vmem:[%s2875_s3] sm:$0xff]  ;;  %s2388_s3 = smov [#allocation8]  }
  0x7a   :  { %1356 = vmatpush.bf16.msrb.mxu3 %v2253_v7  ;;  %s1539_s28 = sshll.u32 %s2388_s3, 4  ;;  %s1540_s28 = int_to_ptr.vmem [resolvable:$true] %s1539_s28 }
  0x7b   :  { %1318 = vmatpush.bf16.msrb.mxu0 %v2228_v8 }
  0x7c   :  { %1331 = vmatpush.bf16.msrb.mxu1 %v2236_v9 }
  0x7d   :  { %1344 = vmatpush.bf16.msrb.mxu2 %v2244_v10  ;;  %v2271_v10 = vld [vmem:[#allocation5 + $0x38] sm:$0xff] }
  0x7e   :  { %1357 = vmatpush.bf16.msrb.mxu3 %v2252_v11 }
  0x7f   :  { %1319 = vmatpush.bf16.msrb.mxu0 %v2227_v12 }
  0x80   :  { %1332 = vmatpush.bf16.msrb.mxu1 %v2235_v13  ;;  %v2270_v13 = vld [vmem:[#allocation5 + $0x30] sm:$0xff] }
  0x81   :  { %1345 = vmatpush.bf16.msrb.mxu2 %v2243_v14 }
  0x82   :  { %1358 = vmatpush.bf16.msrb.mxu3 %v2251_v15 }
  0x83   :  { %1320 = vmatpush.bf16.msrb.mxu0 %v2226_v16  ;;  %v2269_v16 = vld [vmem:[#allocation5 + $0x28] sm:$0xff] }
  0x84   :  { %1333 = vmatpush.bf16.msrb.mxu1 %v2234_v17 }
  0x85   :  { %1346 = vmatpush.bf16.msrb.mxu2 %v2242_v18  ;;  %v2268_v18 = vld [vmem:[#allocation5 + $0x20] sm:$0xff] }
  0x86   :  { %1359 = vmatpush.bf16.msrb.mxu3 %v2250_v19 }
  0x87   :  { %1321 = vmatpush.bf16.msrb.mxu0 %v2225_v20  ;;  %v2267_v20 = vld [vmem:[#allocation5 + $0x18] sm:$0xff] }
  0x88   :  { %1334 = vmatpush.bf16.msrb.mxu1 %v2233_v21 }
  0x89   :  { %1347 = vmatpush.bf16.msrb.mxu2 %v2241_v22 }
  0x8a   :  { %1360 = vmatpush.bf16.msrb.mxu3 %v2249_v23 }
  0x8b   :  { %1322 = vmatpush.bf16.msrb.mxu0 %v2224_v24 }
  0x8c   :  { %1335 = vmatpush.bf16.msrb.mxu1 %v2232_v25  ;;  %v2266_v25 = vld [vmem:[#allocation5 + $0x10] sm:$0xff] }
  0x8d   :  { %1348 = vmatpush.bf16.msrb.mxu2 %v2240_v26 }
  0x8e   :  { %1361 = vmatpush.bf16.msrb.mxu3 %v2248_v27  ;;  %1323 = vmatmul.bf16.vlgmr.msrb.gmra.mxu0 %v127_v32 }
  0x8f   :  { %1336 = vmatmul.bf16.vlgmr.msrb.gmra.mxu1 %v128_v33  ;;  %1437 = vmatpush.bf16.msra.mxu0 %v2263_v53 }
  0x90   :  { %1349 = vmatmul.bf16.vlgmr.msrb.gmra.mxu2 %v129_v34  ;;  %1520 = vmatpush.bf16.msra.mxu1 %v2271_v10 }
  0x91   :  { %1362 = vmatmul.bf16.vlgmr.msrb.gmra.mxu3 %v130_v35 }
  0x93   :  { %1438 = vmatpush.bf16.msra.mxu0 %v2262_v56 }
  0x94   :  { %1521 = vmatpush.bf16.msra.mxu1 %v2270_v13 }
  0x97   :  { %1439 = vmatpush.bf16.msra.mxu0 %v2261_v57 }
  0x98   :  { %1522 = vmatpush.bf16.msra.mxu1 %v2269_v16 }
  0x9b   :  { %1440 = vmatpush.bf16.msra.mxu0 %v2260_v60 }
  0x9c   :  { %1523 = vmatpush.bf16.msra.mxu1 %v2268_v18 }
  0x9f   :  { %1441 = vmatpush.bf16.msra.mxu0 %v2259_v61 }
  0xa0   :  { %1524 = vmatpush.bf16.msra.mxu1 %v2267_v20 }
  0xa3   :  { %1442 = vmatpush.bf16.msra.mxu0 %v2258_v63 }
  0xa4   :  { %1525 = vmatpush.bf16.msra.mxu1 %v2266_v25 }
  0xa7   :  { %1443 = vmatpush.bf16.msra.mxu0 %v2257_v1 }
  0xab   :  { %v1168_v37 = vpop.f32.mrf.mxu0  ;;  %1444 = vmatpush.bf16.msra.mxu0 %v2256_v6 }
  0xac   :  { %v1169_v38 = vadd.f32 %v2278_v36, %v1168_v37  ;;  %v1181_v39 = vpop.f32.mrf.mxu1  ;;  %v2265_v37 = vld [vmem:[#allocation5 + $0x8] sm:$0xff] }
  0xad   :  { %1526 = vmatpush.bf16.msra.mxu1 %v2265_v37 }
  0xae   :  { %v1182_v40 = vadd.f32 %v1181_v39, %v1169_v38  ;;  %v2264_v38 = vld [vmem:[#allocation5] sm:$0xff]  ;;  %v2279_v39 = vld [vmem:[#allocation2] ss:$0 sm:$0xff] }
  0xb1   :  { %1527 = vmatpush.bf16.msra.mxu1 %v2264_v38 }
  0xb3   :  { %v1194_v41 = vpop.f32.mrf.mxu2  ;;  %v1170_v44 = vpop.f32.mrf.mxu0 }
  0xb4   :  { %v1195_v42 = vadd.f32 %v1194_v41, %v1182_v40  ;;  %v1207_v43 = vpop.f32.mrf.mxu3  ;;  %v1183_v46 = vpop.f32.mrf.mxu1 }
  0xb6   :  { %v1208_v45 = vadd.f32 %v1207_v43, %v1195_v42 }
  0xbb   :  { %v1196_v47 = vpop.f32.mrf.mxu2 }
  0xbc   :  { %v1209_v48 = vpop.f32.mrf.mxu3 }
  0xcb   :  { %v1220_v49 = vpop.f32.mrf.mxu0 }
  0xcc   :  { %v1233_v50 = vpop.f32.mrf.mxu1  ;;  %v1221_v2 = vadd.f32 %v1220_v49, %v1208_v45  ;;  %v2280_v45 = vld [vmem:[#allocation7] ss:$0 sm:$0xff] }
  0xce   :  { %v1234_v7 = vadd.f32 %v1233_v50, %v1221_v2 }
  0xd3   :  { %v1246_v51 = vpop.f32.mrf.mxu2  ;;  %v1222_v54 = vpop.f32.mrf.mxu0 }
  0xd4   :  { %v1259_v52 = vpop.f32.mrf.mxu3  ;;  %v1235_v55 = vpop.f32.mrf.mxu1  ;;  %v1247_v9 = vadd.f32 %v1246_v51, %v1234_v7 }
  0xd6   :  { %v1260_v14 = vadd.f32 %v1259_v52, %v1247_v9 }
  0xdb   :  { %v1248_v58 = vpop.f32.mrf.mxu2 }
  0xdc   :  { %v1261_v59 = vpop.f32.mrf.mxu3 }
  0xeb   :  { %v1272_v62 = vpop.f32.mrf.mxu0 }
  0xec   :  { %v1285_v0 = vpop.f32.mrf.mxu1  ;;  %v1273_v15 = vadd.f32 %v1272_v62, %v1260_v14 }
  0xee   :  { %v1286_v17 = vadd.f32 %v1285_v0, %v1273_v15 }
  0xf3   :  { %v1298_v3 = vpop.f32.mrf.mxu2  ;;  %v1274_v5 = vpop.f32.mrf.mxu0 }
  0xf4   :  { %v1311_v4 = vpop.f32.mrf.mxu3  ;;  %v1287_v8 = vpop.f32.mrf.mxu1  ;;  %v1299_v19 = vadd.f32 %v1298_v3, %v1286_v17 }
  0xf6   :  { %v1312_v21 = vadd.f32 %v1311_v4, %v1299_v19 }
  0xfb   :  { %v1300_v11 = vpop.f32.mrf.mxu2 }
  0xfc   :  { %v1313_v12 = vpop.f32.mrf.mxu3 }
 0x10b   :  { %v1324_v22 = vpop.f32.mrf.mxu0 }
 0x10c   :  { %v1337_v23 = vpop.f32.mrf.mxu1  ;;  %v1325_v24 = vadd.f32 %v1324_v22, %v1312_v21 }
 0x10e   :  { %v1338_v26 = vadd.f32 %v1337_v23, %v1325_v24 }
 0x113   :  { %v1350_v27 = vpop.f32.mrf.mxu2  ;;  %v1326_v30 = vpop.f32.mrf.mxu0 }
 0x114   :  { %v1363_v28 = vpop.f32.mrf.mxu3  ;;  %v1351_v29 = vadd.f32 %v1350_v27, %v1338_v26  ;;  %v1339_v31 = vpop.f32.mrf.mxu1 }
 0x116   :  { %v1364_v32 = vadd.f32 %v1363_v28, %v1351_v29 }
 0x118   :  { %v1367_v33 = vmax.f32 %v1364_v32, 0.0 }
 0x11a   :  { %v1368_v34 = vpack.c.bf16 %v1367_v33, %v1367_v33 }
 0x11b   :  { %v1352_v35 = vpop.f32.mrf.mxu2 }
 0x11c   :  { %v1365_v36 = vpop.f32.mrf.mxu3  ;;  %1445 = vmatmul.bf16.vlgmr.msra.gmra.mxu0 %v1368_v34 }
 0x199   :  { %v1446_v40 = vpop.f32.mrf.mxu0 }
 0x19a   :  { %v1447_v41 = vadd.f32 %v2279_v39, %v1446_v40 }
 0x19c   :  { %v1450_v42 = vmax.f32 %v1447_v41, 0.0 }
 0x19e   :  { %v1451_v43 = vpack.c.bf16 %v1450_v42, %v1450_v42 }
 0x1a0   :  { %1528 = vmatmul.bf16.vlgmr.msra.gmra.mxu1 %v1451_v43 }
 0x1a1   :  { %v1448_v44 = vpop.f32.mrf.mxu0 }
 0x21d   :  { %v1529_v46 = vpop.f32.mrf.mxu1 }
 0x21e   :  { %v1530_v47 = vadd.f32 %v2280_v45, %v1529_v46 }
 0x220   :  { %1533 = vst [vmem:[#allocation8] sm:$0x3] %v1530_v47 }
 0x221   :  { %1544 = dma.vmem_to_hbm [thread:$0]  %s1540_s28, 32, %s1542_s8, [#allocation4]  }
 0x225   :  { %v1531_v48 = vpop.f32.mrf.mxu1 }
 0x226   :  { %2381 = dma.done.wait [#allocation4], 32  }
 0x227   :  { %2382 = vsyncadd [#allocation4], 4294967264 }
 0x228   :  { %1549 = vsyncpa [#allocation3], 1 }
 0x229   :  { %1550 = vsyncpa [#allocation6], 1 }
 0x22a   :  { %1551 = vsyncpa [#allocation4], 1 }

// kernel: lenet_res_dropout.3
= control target key start
LH: loop header
LB: loop body
LE: loop exit
PB: predicated region body
PF: predicated region fallthrough
CT: control target
= control target key end

     0   :  { %11 = vsyncpa [#allocation3], 0  ;;  %s5621_s0 = inlined_call_operand.vmem [shape: f32[64,128], index: 0, kind: input, shape index: {}]   ;;  %s5622_s1 = inlined_call_operand.vmem [shape: bf16[384,256], index: 1, kind: input, shape index: {}]   ;;  %s5623_s2 = inlined_call_operand.hbm [shape: f32[1,256], index: 2, kind: input, shape index: {}]   ;;  %s5624_s3 = inlined_call_operand.hbm [shape: bf16[768,512], index: 3, kind: input, shape index: {}]   ;;  %s5625_s4 = inlined_call_operand.vmem [shape: f32[1,512], index: 4, kind: input, shape index: {}]   ;;  %s5626_s5 = inlined_call_operand.hbm [shape: bf16[128,512], index: 5, kind: input, shape index: {}]   ;;  %s5627_s6 = inlined_call_operand.vmem [shape: f32[32,256], index: 6, kind: output, shape index: {}]  }
   0x1   :  { %12 = vsyncpa [#allocation5], 0  ;;  %s4687_s21 = smov 0  }
   0x2 LB: > { %s206_s24 = sshll.u32 %s5624_s3, 4  ;;  %s4696_s25 = sadd.s32 4294967295, %s4643_s21   ;;  %s4643_s21 = sphi %s4687_s21, %s18_s21   ;;  %s207_s24 = int_to_ptr.hbm [resolvable:$true] %s206_s24 }
   0x3   : > { %p3043_p0 = scmp.ge.s32.totalorder %s4643_s21, 1  ;;  %p180_p1 = scmp.lt.s32.totalorder %s4643_s21, 3 }
   0x4   : > { %p4518_p2 = scmp.eq.s32.totalorder %s4696_s25, 0  ;;  %s4645_s27 = smov [#allocation4]  }
   0x5   : > { %p4701_p3 = pnand %p3043_p0, %p180_p1  ;;  %s208_s28 = sshll.u32 %s4645_s27, 4  ;;  %s209_s28 = int_to_ptr.vmem [resolvable:$true] %s208_s28 }
   0x6   : > { %s195_s7 = sshll.u32 %s5623_s2, 4  ;;  %s4646_s9 = smov [#allocation2]   ;;  %s196_s7 = int_to_ptr.hbm [resolvable:$true] %s195_s7 }
   0x7   : > { %p4508_p4 = pneg %p4701_p3  ;;  %s197_s10 = sshll.u32 %s4646_s9, 4  ;;  %s198_s10 = int_to_ptr.vmem [resolvable:$true] %s197_s10 }
   0x8   : > { %s223_s13 = sshll.u32 %s5626_s5, 4  ;;  %s4647_s14 = smov 256   ;;  %s224_s13 = int_to_ptr.hbm [resolvable:$true] %s223_s13 }
   0x9   : > { %p4712_p5 = pnand %p4518_p2, %p4508_p4  ;;  %s4648_s15 = smov 16  }
   0xa   : > { %s4649_s16 = smov [#allocation6]   ;;  %250 = sbr.rel (%p4701_p3) target bundleno = 635 (0x27b), region = 44 }
   0xb   : > { %4514 = dma.hbm_to_vmem [thread:$0]  (!%p4712_p5), %s207_s24, 24576, %s209_s28, [#allocation5], %s4647_s14, %s4647_s14, %s4648_s15  }
   0xc   : > { %4511 = dma.hbm_to_vmem [thread:$0]  (!%p4712_p5), %s196_s7, 32, %s198_s10, [#allocation3]  }
   0xd   : > { %s225_s17 = sshll.u32 %s4649_s16, 4  ;;  %s226_s17 = int_to_ptr.vmem [resolvable:$true] %s225_s17 }
   0xe   : > { %4517 = dma.hbm_to_vmem [thread:$0]  (!%p4712_p5), %s224_s13, 4096, %s226_s17, [#allocation5], %s4647_s14, %s4647_s14, %s4648_s15  }
   0xf   : > { %4634 = dma.done.wait (%p4518_p2), [#allocation3], 32  }
  0x10   : > { %4636 = vsyncadd (%p4518_p2), [#allocation3], 4294967264 }
  0x11   : > { %4638 = dma.done.wait (%p4518_p2), [#allocation5], 28672  }
  0x12   : > { %4640 = vsyncadd (%p4518_p2), [#allocation5], 4294938624  ;;  %s3052_s18 = sshll.u32 %s4696_s25, 2  ;;  %v3115_v0 = vld [vmem:[%s5622_s1 + $0x70] sm:$0xf]  ;;  %v309_v35 = vlaneseq  ;;  %vm4650_vm3 = vmmov 1  }
  0x13   : > { %v4223_v1 = vld [vmem:[%s5622_s1 + $0x74] sm:$0xf0]  ;;  %v3179_v2 = vld [vmem:[%s5622_s1 + $0xf0] sm:$0xf]  ;;  %v3107_v9 = vld [vmem:[%s5622_s1 + $0x60] sm:$0xf] }
  0x14   : > { %v3116_v3 = vor.u32 %v4223_v1, %v3115_v0  ;;  %v4239_v4 = vld [vmem:[%s5622_s1 + $0xf4] sm:$0xf0]  ;;  %v3243_v5 = vld [vmem:[%s5622_s1 + $0x170] sm:$0xf]  ;;  %v4221_v10 = vld [vmem:[%s5622_s1 + $0x64] sm:$0xf0] }
  0x15   : > { %v4255_v6 = vld [vmem:[%s5622_s1 + $0x174] sm:$0xf0]  ;;  %v3180_v7 = vor.u32 %v4239_v4, %v3179_v2  ;;  %v3171_v11 = vld [vmem:[%s5622_s1 + $0xe0] sm:$0xf]  ;;  %v3108_v12 = vor.u32 %v4221_v10, %v3107_v9  ;;  %v4237_v13 = vld [vmem:[%s5622_s1 + $0xe4] sm:$0xf0] }
  0x16   : > { %v3244_v8 = vor.u32 %v4255_v6, %v3243_v5  ;;  %712 = vmatpush.bf16.msra.mxu0 %v3116_v3  ;;  %v3235_v14 = vld [vmem:[%s5622_s1 + $0x160] sm:$0xf]  ;;  %v4253_v15 = vld [vmem:[%s5622_s1 + $0x164] sm:$0xf0]  ;;  %v3172_v16 = vor.u32 %v4237_v13, %v3171_v11  ;;  %v3099_v18 = vld [vmem:[%s5622_s1 + $0x50] sm:$0xf] }
  0x17   : > { %731 = vmatpush.bf16.msra.mxu1 %v3180_v7  ;;  %v3236_v17 = vor.u32 %v4253_v15, %v3235_v14  ;;  %v4219_v19 = vld [vmem:[%s5622_s1 + $0x54] sm:$0xf0]  ;;  %v3163_v20 = vld [vmem:[%s5622_s1 + $0xd0] sm:$0xf]  ;;  %p4792_p6 = scmp.lt.s32.totalorder %s3052_s18, 7  ;;  %v4854_v50 = vshrl.u32 %v309_v35, 7 }
  0x18   : > { %750 = vmatpush.bf16.msra.mxu2 %v3244_v8  ;;  %v4235_v21 = vld [vmem:[%s5622_s1 + $0xd4] sm:$0xf0]  ;;  %v3227_v22 = vld [vmem:[%s5622_s1 + $0x150] sm:$0xf]  ;;  %v3100_v24 = vor.u32 %v4219_v19, %v3099_v18  ;;  %v3091_v27 = vld [vmem:[%s5622_s1 + $0x40] sm:$0xf] }
  0x19   : > { %v4251_v23 = vld [vmem:[%s5622_s1 + $0x154] sm:$0xf0]  ;;  %v3164_v25 = vor.u32 %v4235_v21, %v3163_v20  ;;  %v4217_v28 = vld [vmem:[%s5622_s1 + $0x44] sm:$0xf0]  ;;  %v3155_v29 = vld [vmem:[%s5622_s1 + $0xc0] sm:$0xf] }
  0x1a   : > { %713 = vmatpush.bf16.msra.mxu0 %v3108_v12  ;;  %v3228_v26 = vor.u32 %v4251_v23, %v3227_v22  ;;  %v4233_v30 = vld [vmem:[%s5622_s1 + $0xc4] sm:$0xf0]  ;;  %v3219_v31 = vld [vmem:[%s5622_s1 + $0x140] sm:$0xf]  ;;  %v4222_v33 = vld [vmem:[%s5622_s1 + $0x74] sm:$0xf]  ;;  %v3092_v36 = vor.u32 %v4217_v28, %v3091_v27 }
  0x1b   : > { %732 = vmatpush.bf16.msra.mxu1 %v3172_v16  ;;  %v4249_v32 = vld [vmem:[%s5622_s1 + $0x144] sm:$0xf0]  ;;  %v3117_v34 = vld [vmem:[%s5622_s1 + $0x78] sm:$0xf0]  ;;  %s5638_s18 = smov (!%p4792_p6, %s3052_s18), 7  ;;  %v3156_v40 = vor.u32 %v4233_v30, %v3155_v29  ;;  %v318_v12 = vand.u32 31, %v4854_v50 }
  0x1c   : > { %751 = vmatpush.bf16.msra.mxu2 %v3236_v17  ;;  %v3083_v37 = vld [vmem:[%s5622_s1 + $0x30] sm:$0xf]  ;;  %v4215_v38 = vld [vmem:[%s5622_s1 + $0x34] sm:$0xf0]  ;;  %v3120_v39 = vor.u32 %v4222_v33, %v3117_v34  ;;  %v3220_v41 = vor.u32 %v4249_v32, %v3219_v31  ;;  %v4220_v44 = vld [vmem:[%s5622_s1 + $0x64] sm:$0xf] }
  0x1d   : > { %v3147_v42 = vld [vmem:[%s5622_s1 + $0xb0] sm:$0xf]  ;;  %v4231_v43 = vld [vmem:[%s5622_s1 + $0xb4] sm:$0xf0]  ;;  %v3109_v47 = vld [vmem:[%s5622_s1 + $0x68] sm:$0xf0]  ;;  %v3084_v51 = vor.u32 %v4215_v38, %v3083_v37 }
  0x1e   : > { %714 = vmatpush.bf16.msra.mxu0 %v3100_v24  ;;  %v3211_v45 = vld [vmem:[%s5622_s1 + $0x130] sm:$0xf]  ;;  %v4247_v46 = vld [vmem:[%s5622_s1 + $0x134] sm:$0xf0]  ;;  %769 = vmatpush.bf16.msra.mxu3 %v3120_v39  ;;  %v3075_v48 = vld [vmem:[%s5622_s1 + $0x20] sm:$0xf]  ;;  %v3112_v49 = vor.u32 %v4220_v44, %v3109_v47  ;;  %v3148_v55 = vor.u32 %v4231_v43, %v3147_v42 }
  0x1f   : > { %733 = vmatpush.bf16.msra.mxu1 %v3164_v25  ;;  %s3053_s29 = sshll.u32 %s5638_s18, 3  ;;  %v4213_v52 = vld [vmem:[%s5622_s1 + $0x24] sm:$0xf0]  ;;  %v4218_v53 = vld [vmem:[%s5622_s1 + $0x54] sm:$0xf]  ;;  %v3212_v56 = vor.u32 %v4247_v46, %v3211_v45  ;;  %vm374_vm0 = vcmp.lt.s32.totalorder %v4854_v50, 1 }
  0x20   : > { %752 = vmatpush.bf16.msra.mxu2 %v3228_v26  ;;  %v3101_v54 = vld [vmem:[%s5622_s1 + $0x58] sm:$0xf0]  ;;  %v3139_v57 = vld [vmem:[%s5622_s1 + $0xa0] sm:$0xf]  ;;  %v4229_v58 = vld [vmem:[%s5622_s1 + $0xa4] sm:$0xf0]  ;;  %s296_s28 = scalar_lea.vmem %s5621_s0, %s3053_s29  ;;  %v3076_v3 = vor.u32 %v4213_v52, %v3075_v48 }
  0x21   : > { %v3203_v59 = vld [vmem:[%s5622_s1 + $0x120] sm:$0xf]  ;;  %v4245_v60 = vld [vmem:[%s5622_s1 + $0x124] sm:$0xf0]  ;;  %v3067_v61 = vld [vmem:[%s5622_s1 + $0x10] sm:$0xf]  ;;  %v3104_v63 = vor.u32 %v4218_v53, %v3101_v54  ;;  %v3140_v7 = vor.u32 %v4229_v58, %v3139_v57 }
  0x22   : > { %715 = vmatpush.bf16.msra.mxu0 %v3092_v36  ;;  %770 = vmatpush.bf16.msra.mxu3 %v3112_v49  ;;  %v4211_v62 = vld [vmem:[%s5622_s1 + $0x14] sm:$0xf0]  ;;  %v3131_v0 = vld [vmem:[%s5622_s1 + $0x90] sm:$0xf]  ;;  %v4216_v1 = vld [vmem:[%s5622_s1 + $0x44] sm:$0xf]  ;;  %v3204_v8 = vor.u32 %v4245_v60, %v3203_v59 }
  0x23   : > { %734 = vmatpush.bf16.msra.mxu1 %v3156_v40  ;;  %v3093_v2 = vld [vmem:[%s5622_s1 + $0x48] sm:$0xf0]  ;;  %v4227_v4 = vld [vmem:[%s5622_s1 + $0x94] sm:$0xf0]  ;;  %v3195_v5 = vld [vmem:[%s5622_s1 + $0x110] sm:$0xf]  ;;  %v3068_v17 = vor.u32 %v4211_v62, %v3067_v61 }
  0x24   : > { %753 = vmatpush.bf16.msra.mxu2 %v3220_v41  ;;  %v4243_v6 = vld [vmem:[%s5622_s1 + $0x114] sm:$0xf0]  ;;  %v4904_v9 = vld [vmem:[%s296_s28] sm:$0xff]  ;;  %v4906_v10 = vld [vmem:[%s296_s28 + $0x8] sm:$0xff]  ;;  %v3096_v15 = vor.u32 %v4216_v1, %v3093_v2  ;;  %v3132_v22 = vor.u32 %v4227_v4, %v3131_v0  ;;  %vm395_vm1 = vcmp.lt.s32.totalorder %v4854_v50, 7  ;;  %vm4971_vm2 = vcmp.gt.s32.totalorder %v318_v12, 0 }
  0x25   : > { %v4908_v11 = vld [vmem:[%s296_s28 + $0x18] sm:$0xff]  ;;  %v3059_v13 = vld [vmem:[%s5622_s1] sm:$0xf]  ;;  %v4209_v14 = vld [vmem:[%s5622_s1 + $0x4] sm:$0xf0]  ;;  %v370_v24 = vrot.slane %v4904_v9, 7  ;;  %v3196_v27 = vor.u32 %v4243_v6, %v3195_v5 }
  0x26   : > { %716 = vmatpush.bf16.msra.mxu0 %v3084_v51  ;;  %771 = vmatpush.bf16.msra.mxu3 %v3104_v63  ;;  %v4918_v16 = vld [vmem:[%s296_s28 + $0x10] sm:$0xff]  ;;  %v3123_v18 = vld [vmem:[%s5622_s1 + $0x80] sm:$0xf]  ;;  %v4225_v19 = vld [vmem:[%s5622_s1 + $0x84] sm:$0xf0]  ;;  %v371_v25 = vrot.slane %v4906_v10, 7  ;;  %v3060_v34 = vor.u32 %v4209_v14, %v3059_v13 }
  0x27   : > { %735 = vmatpush.bf16.msra.mxu1 %v3148_v55  ;;  %v4214_v20 = vld [vmem:[%s5622_s1 + $0x34] sm:$0xf]  ;;  %v3085_v21 = vld [vmem:[%s5622_s1 + $0x38] sm:$0xf0]  ;;  %v3187_v23 = vld [vmem:[%s5622_s1 + $0x100] sm:$0xf]  ;;  %v3124_v38 = vor.u32 %v4225_v19, %v3123_v18 }
  0x28   : > { %754 = vmatpush.bf16.msra.mxu2 %v3212_v56  ;;  %v373_v26 = vrot.slane %v4908_v11, 7  ;;  %v4241_v28 = vld [vmem:[%s5622_s1 + $0x104] sm:$0xf0]  ;;  %v391_v29 = vrot.slane %v4904_v9, 1  ;;  %v392_v30 = vrot.slane %v4906_v10, 1  ;;  %v393_v31 = vrot.slane %v4918_v16, 1  ;;  %vm5004_vm4 = vmpackc.low %vm4650_vm3, %vm4971_vm2 }
  0x29   : > { %v4238_v32 = vld [vmem:[%s5622_s1 + $0xf4] sm:$0xf]  ;;  %v3088_v33 = vor.u32 %v4214_v20, %v3085_v21  ;;  %v3181_v35 = vld [vmem:[%s5622_s1 + $0xf8] sm:$0xf0]  ;;  %v3188_v39 = vor.u32 %v4241_v28, %v3187_v23  ;;  %v377_v40 = vsel %vm374_vm0, %v370_v24, %v371_v25  ;;  %v4212_v42 = vld [vmem:[%s5622_s1 + $0x24] sm:$0xf]  ;;  %v4999_v56 = vpack.c.bf16 %v4906_v10, %v4904_v9 }
  0x2a   : > { %717 = vmatpush.bf16.msra.mxu0 %v3076_v3  ;;  %772 = vmatpush.bf16.msra.mxu3 %v3096_v15  ;;  %v4254_v36 = vld [vmem:[%s5622_s1 + $0x174] sm:$0xf]  ;;  %v3245_v37 = vld [vmem:[%s5622_s1 + $0x178] sm:$0xf0]  ;;  %v378_v41 = vsel %vm374_vm0, %v373_v26, %v370_v24  ;;  %v3077_v43 = vld [vmem:[%s5622_s1 + $0x28] sm:$0xf0]  ;;  %v397_v45 = vsel %vm395_vm1, %v392_v30, %v393_v31  ;;  %v398_v46 = vsel %vm395_vm1, %v391_v29, %v392_v30 }
  0x2b   : > { %736 = vmatpush.bf16.msra.mxu1 %v3140_v7  ;;  %v3184_v47 = vor.u32 %v4238_v32, %v3181_v35  ;;  %v3248_v48 = vor.u32 %v4254_v36, %v3245_v37  ;;  %v4236_v49 = vld [vmem:[%s5622_s1 + $0xe4] sm:$0xf]  ;;  %v4986_v51 = vpack.c.bf16 %v377_v40, %v378_v41  ;;  %v3173_v52 = vld [vmem:[%s5622_s1 + $0xe8] sm:$0xf0]  ;;  %v3080_v53 = vor.u32 %v4212_v42, %v3077_v43  ;;  %v4210_v59 = vld [vmem:[%s5622_s1 + $0x14] sm:$0xf] }
  0x2c   : > { %755 = vmatpush.bf16.msra.mxu2 %v3204_v8  ;;  %v4252_v54 = vld [vmem:[%s5622_s1 + $0x164] sm:$0xf]  ;;  %v3237_v55 = vld [vmem:[%s5622_s1 + $0x168] sm:$0xf0]  ;;  %v5008_v58 = vpack.c.bf16 %v397_v45, %v398_v46  ;;  %v3069_v60 = vld [vmem:[%s5622_s1 + $0x18] sm:$0xf0]  ;;  %v3176_v61 = vor.u32 %v4236_v49, %v3173_v52  ;;  %v5099_v36 = vpack.c.bf16 %v4908_v11, %v4918_v16 }
  0x2d   : > { %v3240_v62 = vor.u32 %v4252_v54, %v3237_v55  ;;  %v4234_v63 = vld [vmem:[%s5622_s1 + $0xd4] sm:$0xf]  ;;  %v3165_v0 = vld [vmem:[%s5622_s1 + $0xd8] sm:$0xf0]  ;;  %v3072_v1 = vor.u32 %v4210_v59, %v3069_v60  ;;  %v4208_v4 = vld [vmem:[%s5622_s1 + $0x4] sm:$0xf] }
  0x2e   : > { %718 = vmatpush.bf16.msra.mxu0 %v3068_v17  ;;  %773 = vmatpush.bf16.msra.mxu3 %v3088_v33  ;;  %v4250_v2 = vld [vmem:[%s5622_s1 + $0x154] sm:$0xf]  ;;  %v3229_v3 = vld [vmem:[%s5622_s1 + $0x158] sm:$0xf0]  ;;  %v3061_v5 = vld [vmem:[%s5622_s1 + $0x8] sm:$0xf0]  ;;  %v3168_v6 = vor.u32 %v4234_v63, %v3165_v0 }
  0x2f   : > { %737 = vmatpush.bf16.msra.mxu1 %v3132_v22  ;;  %v3232_v7 = vor.u32 %v4250_v2, %v3229_v3  ;;  %v4232_v8 = vld [vmem:[%s5622_s1 + $0xc4] sm:$0xf]  ;;  %v313_v12 = vadd.s32 24, %v4854_v50  ;;  %v3157_v13 = vld [vmem:[%s5622_s1 + $0xc8] sm:$0xf0]  ;;  %v3064_v14 = vor.u32 %v4208_v4, %v3061_v5  ;;  %v372_v18 = vrot.slane %v4918_v16, 7 }
  0x30   : > { %756 = vmatpush.bf16.msra.mxu2 %v3196_v27  ;;  %v4248_v15 = vld [vmem:[%s5622_s1 + $0x144] sm:$0xf]  ;;  %v3221_v17 = vld [vmem:[%s5622_s1 + $0x148] sm:$0xf0]  ;;  %v394_v19 = vrot.slane %v4908_v11, 1  ;;  %v3160_v20 = vor.u32 %v4232_v8, %v3157_v13  ;;  %vm2832_vm7 = vcmask 1043456  }
  0x31   : > { %v3224_v21 = vor.u32 %v4248_v15, %v3221_v17  ;;  %v339_v22 = vand.u32 31, %v313_v12  ;;  %v4230_v23 = vld [vmem:[%s5622_s1 + $0xb4] sm:$0xf]  ;;  %v3149_v24 = vld [vmem:[%s5622_s1 + $0xb8] sm:$0xf0]  ;;  %v375_v30 = vsel %vm374_vm0, %v372_v18, %v373_v26  ;;  %v376_v32 = vsel %vm374_vm0, %v371_v25, %v372_v18  ;;  %s3054_s24 = sshll.u32 %s4696_s25, 1 }
  0x32   : > { %719 = vmatpush.bf16.msra.mxu0 %v3060_v34  ;;  %774 = vmatpush.bf16.msra.mxu3 %v3080_v53  ;;  %v4246_v27 = vld [vmem:[%s5622_s1 + $0x134] sm:$0xf]  ;;  %v3213_v28 = vld [vmem:[%s5622_s1 + $0x138] sm:$0xf0]  ;;  %v396_v33 = vsel %vm395_vm1, %v393_v31, %v394_v19  ;;  %v399_v34 = vsel %vm395_vm1, %v394_v19, %v391_v29  ;;  %v3152_v35 = vor.u32 %v4230_v23, %v3149_v24  ;;  %v4228_v10 = vld [vmem:[%s5622_s1 + $0xa4] sm:$0xf] }
  0x33   : > { %738 = vmatpush.bf16.msra.mxu1 %v3124_v38  ;;  %vm369_vm5 = vcmp.lt.s32.totalorder %v339_v22, 31  ;;  %v3216_v26 = vor.u32 %v4246_v27, %v3213_v28  ;;  %v415_v25 = vpack.c.bf16 %v375_v30, %v376_v32  ;;  %v3141_v9 = vld [vmem:[%s5622_s1 + $0xa8] sm:$0xf0]  ;;  %v4244_v29 = vld [vmem:[%s5622_s1 + $0x124] sm:$0xf]  ;;  %v3253_v37 = vpack.c.bf16 %v399_v34, %v396_v33  ;;  %p299_p7 = scmp.lt.s32.totalorder %s3054_s24, 3 }
  0x34   : > { %757 = vmatpush.bf16.msra.mxu2 %v3188_v39  ;;  %v3205_v31 = vld [vmem:[%s5622_s1 + $0x128] sm:$0xf0]  ;;  %vm5102_vm6 = vmpackc.low %vm369_vm5, %vm4650_vm3  ;;  %v3144_v39 = vor.u32 %v4228_v10, %v3141_v9  ;;  %v4226_v41 = vld [vmem:[%s5622_s1 + $0x94] sm:$0xf] }
  0x35   : > { %3251 = vmatmul.msk.bf16.vlgmr.msra.gmra.mxu0 %vm5004_vm4, %v4986_v51  ;;  %v3208_v40 = vor.u32 %v4244_v29, %v3205_v31  ;;  %v3133_v11 = vld [vmem:[%s5622_s1 + $0x98] sm:$0xf0]  ;;  %v4242_v16 = vld [vmem:[%s5622_s1 + $0x114] sm:$0xf]  ;;  %v4224_v45 = vld [vmem:[%s5622_s1 + $0x84] sm:$0xf] }
  0x36   : > { %788 = vmatpush.bf16.msrb.mxu0 %v3184_v47  ;;  %739 = vmatmul.bf16.vlgmr.msra.gmra.mxu1 %v4999_v56  ;;  %v3197_v42 = vld [vmem:[%s5622_s1 + $0x118] sm:$0xf0]  ;;  %v3136_v43 = vor.u32 %v4226_v41, %v3133_v11  ;;  %v3125_v46 = vld [vmem:[%s5622_s1 + $0x88] sm:$0xf0]  ;;  %v4240_v47 = vld [vmem:[%s5622_s1 + $0x104] sm:$0xf] }
  0x37   : > { %807 = vmatpush.bf16.msrb.mxu1 %v3248_v48  ;;  %758 = vmatmul.bf16.vlgmr.msra.gmra.mxu2 %v5008_v58  ;;  %v3200_v44 = vor.u32 %v4242_v16, %v3197_v42  ;;  %v3189_v48 = vld [vmem:[%s5622_s1 + $0x108] sm:$0xf0]  ;;  %v3128_v52 = vor.u32 %v4224_v45, %v3125_v46  ;;  %v4346_v59 = vld [vmem:[#allocation4 + $0x2cc] sm:$0xf0]  ;;  %v3377_v31 = vld [vmem:[#allocation4 + $0xf0] sm:$0xf0] }
  0x38   : > { %775 = vmatpush.bf16.msra.mxu3 %v3072_v1  ;;  %v3631_v49 = vld [vmem:[#allocation4 + $0x2e0] sm:$0xf]  ;;  %v3192_v53 = vor.u32 %v4240_v47, %v3189_v48  ;;  %v4338_v1 = vld [vmem:[#allocation4 + $0x28c] sm:$0xf0]  ;;  %v4284_v9 = vld [vmem:[#allocation4 + $0xe4] sm:$0xf] }
  0x39   : > { %v3615_v55 = vld [vmem:[#allocation4 + $0x2c0] sm:$0xf]  ;;  %v4334_v4 = vld [vmem:[#allocation4 + $0x26c] sm:$0xf0]  ;;  %v4280_v42 = vld [vmem:[#allocation4 + $0xc4] sm:$0xf] }
  0x3a   : > { %789 = vmatpush.bf16.msrb.mxu0 %v3176_v61  ;;  %v3616_v60 = vor.u32 %v4346_v59, %v3615_v55  ;;  %v3599_v61 = vld [vmem:[#allocation4 + $0x2a0] sm:$0xf]  ;;  %v4330_v12 = vld [vmem:[#allocation4 + $0x24c] sm:$0xf0]  ;;  %v5138_v59 = vld [vmem:[#allocation2] sm:$0x3] }
  0x3b   : > { %808 = vmatpush.bf16.msrb.mxu1 %v3240_v62  ;;  %v4342_v62 = vld [vmem:[#allocation4 + $0x2ac] sm:$0xf0]  ;;  %v3583_v0 = vld [vmem:[#allocation4 + $0x280] sm:$0xf]  ;;  %s5640_s24 = smov (!%p299_p7, %s3054_s24), 3 }
  0x3c   : > { %776 = vmatpush.bf16.msra.mxu3 %v3064_v14  ;;  %v3600_v63 = vor.u32 %v4342_v62, %v3599_v61  ;;  %v3584_v2 = vor.u32 %v4338_v1, %v3583_v0  ;;  %v3567_v3 = vld [vmem:[#allocation4 + $0x260] sm:$0xf]  ;;  %v4282_v15 = vld [vmem:[#allocation4 + $0xcc] sm:$0xf0]  ;;  %s4207_s25 = sshll.u32 %s5640_s24, 4 }
  0x3d   : > { %v3568_v5 = vor.u32 %v4334_v4, %v3567_v3  ;;  %v3359_v14 = vld [vmem:[#allocation4 + $0xc0] sm:$0xf]  ;;  %v4326_v19 = vld [vmem:[#allocation4 + $0x22c] sm:$0xf0]  ;;  %s5600_s30 = scalar_lea.vmem %s5627_s6, %s4207_s25 }
  0x3e   : > { %790 = vmatpush.bf16.msrb.mxu0 %v3168_v6  ;;  %v3375_v6 = vld [vmem:[#allocation4 + $0xe0] sm:$0xf]  ;;  %v3360_v17 = vor.u32 %v4282_v15, %v3359_v14  ;;  %v4278_v22 = vld [vmem:[#allocation4 + $0xac] sm:$0xf0] }
  0x3f   : > { %809 = vmatpush.bf16.msrb.mxu1 %v3232_v7  ;;  %3257 = vmatmul.msk.bf16.vlgmr.msra.gmra.mxu3 %vm5004_vm4, %v4986_v51  ;;  %v4350_v51 = vld [vmem:[#allocation4 + $0x2ec] sm:$0xf0]  ;;  %v3535_v18 = vld [vmem:[#allocation4 + $0x220] sm:$0xf] }
  0x40   : > { %v3632_v54 = vor.u32 %v4350_v51, %v3631_v49  ;;  %v4286_v7 = vld [vmem:[#allocation4 + $0xec] sm:$0xf0]  ;;  %v3519_v24 = vld [vmem:[#allocation4 + $0x200] sm:$0xf] }
  0x41   : > { %v3376_v8 = vor.u32 %v4286_v7, %v3375_v6  ;;  %v4322_v27 = vld [vmem:[#allocation4 + $0x20c] sm:$0xf0]  ;;  %v3759_v28 = vld [vmem:[#allocation4 + $0x3e0] sm:$0xf]  ;;  %v5141_v6 = vperm.slane %v5138_v59, 0 }
  0x42   : > { %791 = vmatpush.bf16.msrb.mxu0 %v3160_v20  ;;  %v3536_v20 = vor.u32 %v4326_v19, %v3535_v18  ;;  %v3520_v30 = vor.u32 %v4322_v27, %v3519_v24  ;;  %v4382_v32 = vld [vmem:[#allocation4 + $0x3ec] sm:$0xf0]  ;;  %v3327_v34 = vld [vmem:[#allocation4 + $0x80] sm:$0xf] }
  0x43   : > { %810 = vmatpush.bf16.msrb.mxu1 %v3224_v21  ;;  %2056 = vmatpush.bf16.msrb.mxu2 %v3376_v8  ;;  %v3343_v21 = vld [vmem:[#allocation4 + $0xa0] sm:$0xf]  ;;  %v3760_v33 = vor.u32 %v4382_v32, %v3759_v28  ;;  %v4374_v16 = vld [vmem:[#allocation4 + $0x3ac] sm:$0xf0] }
  0x44   : > { %v3344_v23 = vor.u32 %v4278_v22, %v3343_v21  ;;  %v3743_v10 = vld [vmem:[#allocation4 + $0x3c0] sm:$0xf]  ;;  %v4266_v47 = vld [vmem:[#allocation4 + $0x4c] sm:$0xf0]  ;;  %v3313_v21 = vld [vmem:[#allocation4 + $0x70] sm:$0xf0] }
  0x45   : > { %725 = vmatmul.bf16.gmra.mxu0 %v415_v25  ;;  %v3727_v11 = vld [vmem:[#allocation4 + $0x3a0] sm:$0xf]  ;;  %v4370_v51 = vld [vmem:[#allocation4 + $0x38c] sm:$0xf0] }
  0x46   : > { %792 = vmatpush.bf16.msrb.mxu0 %v3152_v35  ;;  %744 = vmatmul.bf16.gmra.mxu1 %v5099_v36  ;;  %v4274_v35 = vld [vmem:[#allocation4 + $0x8c] sm:$0xf0]  ;;  %v3295_v46 = vld [vmem:[#allocation4 + $0x40] sm:$0xf] }
  0x47   : > { %811 = vmatpush.bf16.msrb.mxu1 %v3216_v26  ;;  %3254 = vmatmul.msk.bf16.gmra.mxu2 %vm5102_vm6, %v3253_v37  ;;  %v3328_v26 = vor.u32 %v4274_v35, %v3327_v34  ;;  %v3296_v48 = vor.u32 %v4266_v47, %v3295_v46  ;;  %v3711_v49 = vld [vmem:[#allocation4 + $0x380] sm:$0xf]  ;;  %v4262_v61 = vld [vmem:[#allocation4 + $0x2c] sm:$0xf0]  ;;  %v4260_v47 = vld [vmem:[#allocation4 + $0x24] sm:$0xf] }
  0x48   : > { %2057 = vmatpush.bf16.msrb.mxu2 %v3360_v17  ;;  %v3695_v0 = vld [vmem:[#allocation4 + $0x360] sm:$0xf]  ;;  %v4366_v1 = vld [vmem:[#allocation4 + $0x36c] sm:$0xf0] }
  0x49   : > { %v3696_v4 = vor.u32 %v4366_v1, %v3695_v0  ;;  %v3503_v8 = vld [vmem:[#allocation4 + $0x1e0] sm:$0xf]  ;;  %v4258_v14 = vld [vmem:[#allocation4 + $0xc] sm:$0xf0] }
  0x4a   : > { %793 = vmatpush.bf16.msrb.mxu0 %v3144_v39  ;;  %v3311_v39 = vld [vmem:[#allocation4 + $0x60] sm:$0xf]  ;;  %v4362_v17 = vld [vmem:[#allocation4 + $0x34c] sm:$0xf0] }
  0x4b   : > { %812 = vmatpush.bf16.msrb.mxu1 %v3208_v40  ;;  %v4270_v40 = vld [vmem:[#allocation4 + $0x6c] sm:$0xf0]  ;;  %v3679_v15 = vld [vmem:[#allocation4 + $0x340] sm:$0xf] }
  0x4c   : > { %2058 = vmatpush.bf16.msrb.mxu2 %v3344_v23  ;;  %v3312_v41 = vor.u32 %v4270_v40, %v3311_v39  ;;  %v3680_v19 = vor.u32 %v4362_v17, %v3679_v15  ;;  %v3487_v24 = vld [vmem:[#allocation4 + $0x1c0] sm:$0xf]  ;;  %v4314_v27 = vld [vmem:[#allocation4 + $0x1cc] sm:$0xf0] }
  0x4d   : > { %v3887_v28 = vld [vmem:[#allocation4 + $0x4e0] sm:$0xf]  ;;  %v4414_v34 = vld [vmem:[#allocation4 + $0x4ec] sm:$0xf0] }
  0x4e   : > { %794 = vmatpush.bf16.msrb.mxu0 %v3136_v43  ;;  %v3728_v43 = vor.u32 %v4374_v16, %v3727_v11  ;;  %v3663_v35 = vld [vmem:[#allocation4 + $0x320] sm:$0xf]  ;;  %v4354_v46 = vld [vmem:[#allocation4 + $0x30c] sm:$0xf0] }
  0x4f   : > { %813 = vmatpush.bf16.msrb.mxu1 %v3200_v44  ;;  %782 = vmatmul.bf16.gmra.mxu3 %v415_v25  ;;  %v4378_v25 = vld [vmem:[#allocation4 + $0x3cc] sm:$0xf0]  ;;  %v3361_v44 = vld [vmem:[#allocation4 + $0xd0] sm:$0xf0]  ;;  %v3471_v40 = vld [vmem:[#allocation4 + $0x1a0] sm:$0xf] }
  0x50   : > { %v3744_v29 = vor.u32 %v4378_v25, %v3743_v10  ;;  %2059 = vmatpush.bf16.msrb.mxu2 %v3328_v26  ;;  %v3364_v45 = vor.u32 %v4280_v42, %v3361_v44  ;;  %v4358_v26 = vld [vmem:[#allocation4 + $0x32c] sm:$0xf0]  ;;  %v3888_v25 = vor.u32 %v4414_v34, %v3887_v28  ;;  %v3871_v11 = vld [vmem:[#allocation4 + $0x4c0] sm:$0xf]  ;;  %v3889_v28 = vld [vmem:[#allocation4 + $0x4f0] sm:$0xf0] }
  0x51   : > { %v3647_v44 = vld [vmem:[#allocation4 + $0x300] sm:$0xf]  ;;  %v4406_v1 = vld [vmem:[#allocation4 + $0x4ac] sm:$0xf0] }
  0x52   : > { %795 = vmatpush.bf16.msrb.mxu0 %v3128_v52  ;;  %v3712_v52 = vor.u32 %v4370_v51, %v3711_v49  ;;  %v3439_v15 = vld [vmem:[#allocation4 + $0x160] sm:$0xf]  ;;  %v4302_v17 = vld [vmem:[#allocation4 + $0x16c] sm:$0xf0] }
  0x53   : > { %814 = vmatpush.bf16.msrb.mxu1 %v3192_v53  ;;  %v4276_v53 = vld [vmem:[#allocation4 + $0xa4] sm:$0xf] }
  0x54   : > { %2060 = vmatpush.bf16.msrb.mxu2 %v3312_v41  ;;  %v4310_v41 = vld [vmem:[#allocation4 + $0x1ac] sm:$0xf0] }
  0x55   : > { %796 = vmatmul.bf16.vlgmr.msrb.gmra.mxu0 %v4999_v56  ;;  %v3472_v42 = vor.u32 %v4310_v41, %v3471_v40 }
  0x56   : > { %2094 = vmatpush.bf16.msra.mxu0 %v3632_v54  ;;  %815 = vmatmul.bf16.vlgmr.msrb.gmra.mxu1 %v5008_v58  ;;  %v3551_v58 = vld [vmem:[#allocation4 + $0x240] sm:$0xf]  ;;  %v3345_v54 = vld [vmem:[#allocation4 + $0xb0] sm:$0xf0] }
  0x57   : > { %v3552_v13 = vor.u32 %v4330_v12, %v3551_v58  ;;  %2113 = vmatpush.bf16.msra.mxu1 %v3760_v33  ;;  %v3348_v55 = vor.u32 %v4276_v53, %v3345_v54  ;;  %v4318_v58 = vld [vmem:[#allocation4 + $0x1ec] sm:$0xf0]  ;;  %v3263_v12 = vld [vmem:[#allocation4] sm:$0xf]  ;;  %v3488_v33 = vor.u32 %v4314_v27, %v3487_v24  ;;  %v3489_v24 = vld [vmem:[#allocation4 + $0x1d0] sm:$0xf0] }
  0x58   : > { %2061 = vmatpush.bf16.msrb.mxu2 %v3296_v48  ;;  %v3264_v18 = vor.u32 %v4258_v14, %v3263_v12  ;;  %v3281_v48 = vld [vmem:[#allocation4 + $0x30] sm:$0xf0]  ;;  %v4412_v27 = vld [vmem:[#allocation4 + $0x4e4] sm:$0xf] }
  0x59   : > { %v3284_v53 = vor.u32 %v4260_v47, %v3281_v48  ;;  %v3807_v47 = vld [vmem:[#allocation4 + $0x440] sm:$0xf] }
  0x5a   : > { %2095 = vmatpush.bf16.msra.mxu0 %v3616_v60  ;;  %v3279_v60 = vld [vmem:[#allocation4 + $0x20] sm:$0xf] }
  0x5b   : > { %2114 = vmatpush.bf16.msra.mxu1 %v3744_v29  ;;  %v4264_v29 = vld [vmem:[#allocation4 + $0x44] sm:$0xf] }
  0x5e   : > { %2096 = vmatpush.bf16.msra.mxu0 %v3600_v63  ;;  %v3280_v63 = vor.u32 %v4262_v61, %v3279_v60  ;;  %v4306_v60 = vld [vmem:[#allocation4 + $0x18c] sm:$0xf0]  ;;  %v3855_v61 = vld [vmem:[#allocation4 + $0x4a0] sm:$0xf] }
  0x5f   : > { %2115 = vmatpush.bf16.msra.mxu1 %v3728_v43  ;;  %v4410_v43 = vld [vmem:[#allocation4 + $0x4cc] sm:$0xf0] }
  0x60   : > { %2062 = vmatpush.bf16.msrb.mxu2 %v3280_v63 }
  0x62   : > { %2097 = vmatpush.bf16.msra.mxu0 %v3584_v2  ;;  %v4272_v2 = vld [vmem:[#allocation4 + $0x84] sm:$0xf] }
  0x63   : > { %2116 = vmatpush.bf16.msra.mxu1 %v3712_v52  ;;  %v3648_v52 = vor.u32 %v4354_v46, %v3647_v44  ;;  %v4294_v46 = vld [vmem:[#allocation4 + $0x12c] sm:$0xf0] }
  0x64   : > { %2063 = vmatpush.bf16.msrb.mxu2 %v3264_v18  ;;  %v3839_v18 = vld [vmem:[#allocation4 + $0x480] sm:$0xf] }
  0x65   : > { %801 = vmatmul.bf16.gmra.mxu0 %v5099_v36 }
  0x66   : > { %3260 = vmatmul.msk.bf16.gmra.mxu1 %vm5102_vm6, %v3253_v37  ;;  %2098 = vmatpush.bf16.msra.mxu0 %v3568_v5  ;;  %v3380_v37 = vor.u32 %v4284_v9, %v3377_v31  ;;  %v3329_v5 = vld [vmem:[#allocation4 + $0x90] sm:$0xf0]  ;;  %v3664_v9 = vor.u32 %v4358_v26, %v3663_v35  ;;  %v3423_v35 = vld [vmem:[#allocation4 + $0x140] sm:$0xf]  ;;  %v4298_v26 = vld [vmem:[#allocation4 + $0x14c] sm:$0xf0] }
  0x67   : > { %v3332_v7 = vor.u32 %v4272_v2, %v3329_v5  ;;  %2117 = vmatpush.bf16.msra.mxu1 %v3696_v4  ;;  %v3297_v31 = vld [vmem:[#allocation4 + $0x50] sm:$0xf0]  ;;  %v4256_v2 = vld [vmem:[#allocation4 + $0x4] sm:$0xf]  ;;  %v3856_v5 = vor.u32 %v4406_v1, %v3855_v61 }
  0x68   : > { %v3300_v39 = vor.u32 %v4264_v29, %v3297_v31  ;;  %2132 = vmatpush.bf16.msra.mxu2 %v3888_v25  ;;  %v3424_v29 = vor.u32 %v4298_v26, %v3423_v35  ;;  %v4398_v31 = vld [vmem:[#allocation4 + $0x46c] sm:$0xf0]  ;;  %v3857_v61 = vld [vmem:[#allocation4 + $0x4b0] sm:$0xf0]  ;;  %v3775_v35 = vld [vmem:[#allocation4 + $0x400] sm:$0xf] }
  0x6a   : > { %2099 = vmatpush.bf16.msra.mxu0 %v3552_v13  ;;  %v3504_v13 = vor.u32 %v4318_v58, %v3503_v8  ;;  %v4316_v8 = vld [vmem:[#allocation4 + $0x1e4] sm:$0xf]  ;;  %v3505_v58 = vld [vmem:[#allocation4 + $0x1f0] sm:$0xf0] }
  0x6b   : > { %2118 = vmatpush.bf16.msra.mxu1 %v3680_v19  ;;  %v3508_v14 = vor.u32 %v4316_v8, %v3505_v58  ;;  %v4390_v58 = vld [vmem:[#allocation4 + $0x42c] sm:$0xf0] }
  0x6c   : > { %2075 = vmatpush.bf16.msrb.mxu3 %v3504_v13 }
  0x6e   : > { %2100 = vmatpush.bf16.msra.mxu0 %v3536_v20  ;;  %v4268_v20 = vld [vmem:[#allocation4 + $0x64] sm:$0xf] }
  0x6f   : > { %v3316_v22 = vor.u32 %v4268_v20, %v3313_v21  ;;  %2119 = vmatpush.bf16.msra.mxu1 %v3664_v9  ;;  %v3440_v20 = vor.u32 %v4302_v17, %v3439_v15  ;;  %v4402_v21 = vld [vmem:[#allocation4 + $0x48c] sm:$0xf0]  ;;  %v3441_v15 = vld [vmem:[#allocation4 + $0x170] sm:$0xf0] }
  0x70   : > { %2076 = vmatpush.bf16.msrb.mxu3 %v3488_v33  ;;  %v3892_v33 = vor.u32 %v4412_v27, %v3889_v28 }
  0x72   : > { %2101 = vmatpush.bf16.msra.mxu0 %v3520_v30 }
  0x73   : > { %2120 = vmatpush.bf16.msra.mxu1 %v3648_v52  ;;  %v4394_v52 = vld [vmem:[#allocation4 + $0x44c] sm:$0xf0] }
  0x74   : > { %2077 = vmatpush.bf16.msrb.mxu3 %v3472_v42  ;;  %v3873_v42 = vld [vmem:[#allocation4 + $0x4d0] sm:$0xf0] }
  0x76   : > { %2170 = vmatpush.bf16.msrb.mxu0 %v3380_v37 }
  0x77   : > { %2189 = vmatpush.bf16.msrb.mxu1 %v3508_v14  ;;  %v4300_v14 = vld [vmem:[#allocation4 + $0x164] sm:$0xf] }
  0x7a   : > { %2171 = vmatpush.bf16.msrb.mxu0 %v3364_v45  ;;  %v3872_v45 = vor.u32 %v4410_v43, %v3871_v11 }
  0x7c   : > { %2133 = vmatpush.bf16.msra.mxu2 %v3872_v45  ;;  %v3407_v45 = vld [vmem:[#allocation4 + $0x120] sm:$0xf] }
  0x7e   : > { %2172 = vmatpush.bf16.msrb.mxu0 %v3348_v55  ;;  %v3455_v55 = vld [vmem:[#allocation4 + $0x180] sm:$0xf] }
  0x7f   : > { %v3456_v0 = vor.u32 %v4306_v60, %v3455_v55  ;;  %v3457_v55 = vld [vmem:[#allocation4 + $0x190] sm:$0xf0]  ;;  %v4404_v60 = vld [vmem:[#allocation4 + $0x4a4] sm:$0xf] }
  0x80   : > { %2134 = vmatpush.bf16.msra.mxu2 %v3856_v5 }
  0x81   : > { %2078 = vmatpush.bf16.msrb.mxu3 %v3456_v0  ;;  %v3860_v0 = vor.u32 %v4404_v60, %v3857_v61  ;;  %v3633_v60 = vld [vmem:[#allocation4 + $0x2f0] sm:$0xf0]  ;;  %v4292_v61 = vld [vmem:[#allocation4 + $0x124] sm:$0xf] }
  0x82   : > { %2173 = vmatpush.bf16.msrb.mxu0 %v3332_v7 }
  0x85   : > { %2079 = vmatpush.bf16.msrb.mxu3 %v3440_v20 }
  0x86   : > { %2174 = vmatpush.bf16.msrb.mxu0 %v3316_v22  ;;  %v4312_v22 = vld [vmem:[#allocation4 + $0x1c4] sm:$0xf] }
  0x89   : > { %2080 = vmatpush.bf16.msrb.mxu3 %v3424_v29  ;;  %v4296_v29 = vld [vmem:[#allocation4 + $0x144] sm:$0xf] }
  0x8a   : > { %2175 = vmatpush.bf16.msrb.mxu0 %v3300_v39  ;;  %v3473_v39 = vld [vmem:[#allocation4 + $0x1b0] sm:$0xf0] }
  0x8e   : > { %2176 = vmatpush.bf16.msrb.mxu0 %v3284_v53  ;;  %v4304_v53 = vld [vmem:[#allocation4 + $0x184] sm:$0xf] }
  0xb2   : > { %v721_v62 = vpop.f32.mrf.mxu0 }
  0xb3   : > { %v740_v3 = vpop.f32.mrf.mxu1  ;;  %v722_v30 = vadd.f32 %v721_v62, %v5141_v6 }
  0xb5   : > { %v741_v16 = vadd.f32 %v740_v3, %v722_v30  ;;  %v3265_v3 = vld [vmem:[#allocation4 + $0x10] sm:$0xf0] }
  0xb6   : > { %v3268_v7 = vor.u32 %v4256_v2, %v3265_v3  ;;  %v3391_v2 = vld [vmem:[#allocation4 + $0x100] sm:$0xf]  ;;  %v4290_v3 = vld [vmem:[#allocation4 + $0x10c] sm:$0xf0] }
  0xb7   : > { %v3392_v8 = vor.u32 %v4290_v3, %v3391_v2  ;;  %v3809_v2 = vld [vmem:[#allocation4 + $0x450] sm:$0xf0]  ;;  %v3983_v3 = vld [vmem:[#allocation4 + $0x5a0] sm:$0xf] }
  0xb8   : > { %2177 = vmatpush.bf16.msrb.mxu0 %v3268_v7 }
  0xba   : > { %v759_v23 = vpop.f32.mrf.mxu2  ;;  %v723_v32 = vpop.f32.mrf.mxu0 }
  0xbb   : > { %v742_v10 = vpop.f32.mrf.mxu1  ;;  %v724_v37 = vadd.f32 %v723_v32, %v5141_v6  ;;  %v760_v49 = vadd.f32 %v759_v23, %v741_v16  ;;  %v3840_v23 = vor.u32 %v4402_v21, %v3839_v18  ;;  %v3492_v32 = vor.u32 %v4312_v22, %v3489_v24  ;;  %v4408_v16 = vld [vmem:[#allocation4 + $0x4c4] sm:$0xf] }
  0xbc   : > { %v3876_v44 = vor.u32 %v4408_v16, %v3873_v42  ;;  %v3444_v21 = vor.u32 %v4300_v14, %v3441_v15  ;;  %v4400_v22 = vld [vmem:[#allocation4 + $0x484] sm:$0xf]  ;;  %v3825_v42 = vld [vmem:[#allocation4 + $0x470] sm:$0xf0] }
  0xbd   : > { %v743_v51 = vadd.f32 %v742_v10, %v724_v37  ;;  %v5145_v12 = vmax.f32 %v760_v49, 0.0  ;;  %2135 = vmatpush.bf16.msra.mxu2 %v3840_v23  ;;  %v3823_v10 = vld [vmem:[#allocation4 + $0x460] sm:$0xf]  ;;  %2190 = vmatpush.bf16.msrb.mxu1 %v3492_v32  ;;  %v4308_v37 = vld [vmem:[#allocation4 + $0x1a4] sm:$0xf]  ;;  %v5157_v49 = vperm.slane %v5138_v59, 1 }
  0xbe   : > { %v3824_v41 = vor.u32 %v4398_v31, %v3823_v10  ;;  %v3476_v11 = vor.u32 %v4308_v37, %v3473_v39  ;;  %v3791_v59 = vld [vmem:[#allocation4 + $0x420] sm:$0xf]  ;;  %v3841_v23 = vld [vmem:[#allocation4 + $0x490] sm:$0xf0]  ;;  %v4288_v15 = vld [vmem:[#allocation4 + $0x104] sm:$0xf] }
  0xbf   : > { %v3792_v20 = vor.u32 %v4390_v58, %v3791_v59  ;;  %v3844_v32 = vor.u32 %v4400_v22, %v3841_v23  ;;  %v834_v26 = vrot.slane %v5145_v12, 7  ;;  %v3425_v39 = vld [vmem:[#allocation4 + $0x150] sm:$0xf0] }
  0xc0   : > { %v3428_v16 = vor.u32 %v4296_v29, %v3425_v39  ;;  %v3793_v23 = vld [vmem:[#allocation4 + $0x430] sm:$0xf0]  ;;  %v4340_v29 = vld [vmem:[#allocation4 + $0x2a4] sm:$0xf] }
  0xc1   : > { %2136 = vmatpush.bf16.msra.mxu2 %v3824_v41  ;;  %2191 = vmatpush.bf16.msrb.mxu1 %v3476_v11 }
  0xc2   : > { %v761_v54 = vpop.f32.mrf.mxu2  ;;  %v726_v63 = vpop.f32.mrf.mxu0 }
  0xc3   : > { %v762_v62 = vadd.f32 %v761_v54, %v743_v51  ;;  %v745_v4 = vpop.f32.mrf.mxu1  ;;  %v778_v30 = vpop.f32.mrf.mxu3  ;;  %v727_v25 = vadd.f32 %v726_v63, %v5141_v6  ;;  %v3408_v51 = vor.u32 %v4294_v46, %v3407_v45  ;;  %v3808_v54 = vor.u32 %v4394_v52, %v3807_v47  ;;  %v3999_v47 = vld [vmem:[#allocation4 + $0x5c0] sm:$0xf] }
  0xc4   : > { %v3460_v63 = vor.u32 %v4304_v53, %v3457_v55  ;;  %v779_v17 = vadd.f32 %v778_v30, %v5157_v49 }
  0xc5   : > { %v5147_v13 = vmax.f32 %v762_v62, 0.0  ;;  %v746_v48 = vadd.f32 %v745_v4, %v727_v25  ;;  %2081 = vmatpush.bf16.msrb.mxu3 %v3408_v51  ;;  %2137 = vmatpush.bf16.msra.mxu2 %v3808_v54  ;;  %v4348_v51 = vld [vmem:[#allocation4 + $0x2e4] sm:$0xf] }
  0xc6   : > { %2192 = vmatpush.bf16.msrb.mxu1 %v3460_v63  ;;  %v3636_v63 = vor.u32 %v4348_v51, %v3633_v60  ;;  %v4430_v51 = vld [vmem:[#allocation4 + $0x56c] sm:$0xf0]  ;;  %v3585_v60 = vld [vmem:[#allocation4 + $0x290] sm:$0xf0] }
  0xc7   : > { %v5151_v19 = vpack.c.bf16 %v5147_v13, %v5145_v12  ;;  %v836_v24 = vrot.slane %v5147_v13, 7 }
  0xc9   : > { %2102 = vmatmul.bf16.vlgmr.msra.gmra.mxu0 %v5151_v19  ;;  %2082 = vmatpush.bf16.msrb.mxu3 %v3392_v8  ;;  %v846_v41 = vsel %vm374_vm0, %v834_v26, %v836_v24  ;;  %v3617_v8 = vld [vmem:[#allocation4 + $0x2d0] sm:$0xf0] }
  0xca   : > { %v764_v34 = vpop.f32.mrf.mxu2  ;;  %v728_v9 = vpop.f32.mrf.mxu0  ;;  %2246 = vmatpush.bf16.msra.mxu0 %v3892_v33  ;;  %2138 = vmatpush.bf16.msra.mxu2 %v3792_v20  ;;  %v4015_v33 = vld [vmem:[#allocation4 + $0x5e0] sm:$0xf] }
  0xcb   : > { %v747_v40 = vpop.f32.mrf.mxu1  ;;  %v729_v43 = vadd.f32 %v728_v9, %v5141_v6  ;;  %v765_v6 = vadd.f32 %v764_v34, %v746_v48  ;;  %v780_v5 = vpop.f32.mrf.mxu3  ;;  %v4446_v34 = vld [vmem:[#allocation4 + $0x5ec] sm:$0xf0]  ;;  %2193 = vmatpush.bf16.msrb.mxu1 %v3444_v21 }
  0xcc   : > { %v4016_v25 = vor.u32 %v4446_v34, %v4015_v33  ;;  %v4386_v9 = vld [vmem:[#allocation4 + $0x40c] sm:$0xf0] }
  0xcd   : > { %v748_v62 = vadd.f32 %v747_v40, %v729_v43  ;;  %v5161_v27 = vmax.f32 %v765_v6, 0.0  ;;  %v3776_v37 = vor.u32 %v4386_v9, %v3775_v35  ;;  %v4396_v40 = vld [vmem:[#allocation4 + $0x464] sm:$0xf]  ;;  %v781_v43 = vadd.f32 %v780_v5, %v5157_v49  ;;  %v4442_v48 = vld [vmem:[#allocation4 + $0x5cc] sm:$0xf0] }
  0xce   : > { %2247 = vmatpush.bf16.msra.mxu0 %v3876_v44  ;;  %2151 = vmatpush.bf16.msra.mxu3 %v4016_v25  ;;  %v3828_v46 = vor.u32 %v4396_v40, %v3825_v42  ;;  %v4000_v55 = vor.u32 %v4442_v48, %v3999_v47  ;;  %v3409_v6 = vld [vmem:[#allocation4 + $0x130] sm:$0xf0]  ;;  %v4438_v5 = vld [vmem:[#allocation4 + $0x5ac] sm:$0xf0]  ;;  %v3951_v48 = vld [vmem:[#allocation4 + $0x560] sm:$0xf] }
  0xcf   : > { %2139 = vmatpush.bf16.msra.mxu2 %v3776_v37  ;;  %2194 = vmatpush.bf16.msrb.mxu1 %v3428_v16  ;;  %v3984_v58 = vor.u32 %v4438_v5, %v3983_v3  ;;  %v4434_v34 = vld [vmem:[#allocation4 + $0x58c] sm:$0xf0]  ;;  %v838_v25 = vrot.slane %v5161_v27, 7  ;;  %v4444_v16 = vld [vmem:[#allocation4 + $0x5e4] sm:$0xf] }
  0xd0   : > { %v4017_v42 = vld [vmem:[#allocation4 + $0x5f0] sm:$0xf0] }
  0xd2   : > { %v766_v1 = vpop.f32.mrf.mxu2  ;;  %v797_v7 = vpop.f32.mrf.mxu0  ;;  %2248 = vmatpush.bf16.msra.mxu0 %v3860_v0  ;;  %v3412_v0 = vor.u32 %v4292_v61, %v3409_v6  ;;  %2152 = vmatpush.bf16.msra.mxu3 %v4000_v55  ;;  %v3952_v55 = vor.u32 %v4430_v51, %v3951_v48  ;;  %v4440_v61 = vld [vmem:[#allocation4 + $0x5c4] sm:$0xf] }
  0xd3   : > { %v767_v4 = vadd.f32 %v766_v1, %v748_v62  ;;  %v816_v18 = vpop.f32.mrf.mxu1  ;;  %v798_v31 = vadd.f32 %v797_v7, %v779_v17  ;;  %v783_v62 = vpop.f32.mrf.mxu3  ;;  %v4392_v1 = vld [vmem:[#allocation4 + $0x444] sm:$0xf]  ;;  %v3393_v17 = vld [vmem:[#allocation4 + $0x110] sm:$0xf0] }
  0xd4   : > { %v4344_v7 = vld [vmem:[#allocation4 + $0x2c4] sm:$0xf]  ;;  %2195 = vmatpush.bf16.msrb.mxu1 %v3412_v0  ;;  %v3396_v22 = vor.u32 %v4288_v15, %v3393_v17  ;;  %v784_v37 = vadd.f32 %v783_v62, %v5157_v49  ;;  %v4001_v62 = vld [vmem:[#allocation4 + $0x5d0] sm:$0xf0]  ;;  %v4351_v0 = vld [vmem:[#allocation4 + $0x2f4] sm:$0xf0] }
  0xd5   : > { %v5163_v28 = vmax.f32 %v767_v4, 0.0  ;;  %v817_v52 = vadd.f32 %v816_v18, %v798_v31  ;;  %v3812_v4 = vor.u32 %v4392_v1, %v3809_v2  ;;  %v3620_v14 = vor.u32 %v4344_v7, %v3617_v8  ;;  %v4388_v18 = vld [vmem:[#allocation4 + $0x424] sm:$0xf]  ;;  %v3601_v31 = vld [vmem:[#allocation4 + $0x2b0] sm:$0xf0] }
  0xd6   : > { %2249 = vmatpush.bf16.msra.mxu0 %v3844_v32  ;;  %v3967_v32 = vld [vmem:[#allocation4 + $0x580] sm:$0xf]  ;;  %v3796_v33 = vor.u32 %v4388_v18, %v3793_v23  ;;  %2153 = vmatpush.bf16.msra.mxu3 %v3984_v58  ;;  %v3604_v40 = vor.u32 %v4340_v29, %v3601_v31  ;;  %v4004_v2 = vor.u32 %v4440_v61, %v4001_v62  ;;  %v4426_v8 = vld [vmem:[#allocation4 + $0x54c] sm:$0xf0]  ;;  %v4332_v58 = vld [vmem:[#allocation4 + $0x264] sm:$0xf] }
  0xd7   : > { %v840_v30 = vrot.slane %v5163_v28, 7  ;;  %v5169_v10 = vpack.c.bf16 %v5163_v28, %v5161_v27  ;;  %v5186_v20 = vmax.f32 %v817_v52, 0.0  ;;  %v4336_v52 = vld [vmem:[#allocation4 + $0x284] sm:$0xf]  ;;  %v3935_v7 = vld [vmem:[#allocation4 + $0x540] sm:$0xf] }
  0xd8   : > { %2196 = vmatpush.bf16.msrb.mxu1 %v3396_v22  ;;  %v3588_v6 = vor.u32 %v4336_v52, %v3585_v60  ;;  %v3936_v15 = vor.u32 %v4426_v8, %v3935_v7  ;;  %v4436_v17 = vld [vmem:[#allocation4 + $0x5a4] sm:$0xf]  ;;  %v3985_v18 = vld [vmem:[#allocation4 + $0x5b0] sm:$0xf0] }
  0xd9   : > { %2107 = vmatmul.bf16.gmra.mxu0 %v5169_v10  ;;  %v848_v11 = vsel %vm374_vm0, %v840_v30, %v834_v26  ;;  %v3968_v26 = vor.u32 %v4434_v34, %v3967_v32  ;;  %v3988_v32 = vor.u32 %v4436_v17, %v3985_v18  ;;  %v4347_v34 = vld [vmem:[#allocation4 + $0x2d4] sm:$0xf0]  ;;  %v4328_v29 = vld [vmem:[#allocation4 + $0x244] sm:$0xf]  ;;  %v3553_v31 = vld [vmem:[#allocation4 + $0x250] sm:$0xf0] }
  0xda   : > { %v5181_v44 = vpack.c.bf16 %v846_v41, %v848_v11  ;;  %v799_v45 = vpop.f32.mrf.mxu0  ;;  %2250 = vmatpush.bf16.msra.mxu0 %v3828_v46  ;;  %v4384_v41 = vld [vmem:[#allocation4 + $0x404] sm:$0xf]  ;;  %v3777_v11 = vld [vmem:[#allocation4 + $0x410] sm:$0xf0]  ;;  %v4020_v46 = vor.u32 %v4444_v16, %v4017_v42 }
  0xdb   : > { %v800_v53 = vadd.f32 %v799_v45, %v781_v43  ;;  %v818_v54 = vpop.f32.mrf.mxu1  ;;  %v842_v43 = vsel %vm374_vm0, %v838_v25, %v840_v30  ;;  %2154 = vmatpush.bf16.msra.mxu3 %v3968_v26  ;;  %v3780_v45 = vor.u32 %v4384_v41, %v3777_v11  ;;  %v785_v47 = vpop.f32.mrf.mxu3  ;;  %v3919_v26 = vld [vmem:[#allocation4 + $0x520] sm:$0xf]  ;;  %v3556_v41 = vor.u32 %v4328_v29, %v3553_v31  ;;  %v4432_v11 = vld [vmem:[#allocation4 + $0x584] sm:$0xf]  ;;  %v3969_v16 = vld [vmem:[#allocation4 + $0x590] sm:$0xf0] }
  0xdc   : > { %4031 = vmatmul.msk.bf16.vlgmr.msrb.gmra.mxu2 %vm5004_vm4, %v5181_v44  ;;  %v786_v1 = vadd.f32 %v785_v47, %v5157_v49  ;;  %v3569_v49 = vld [vmem:[#allocation4 + $0x270] sm:$0xf0]  ;;  %v3972_v42 = vor.u32 %v4432_v11, %v3969_v16  ;;  %v835_v47 = vrot.slane %v5186_v20, 7  ;;  %v4324_v62 = vld [vmem:[#allocation4 + $0x224] sm:$0xf] }
  0xdd   : > { %v819_v59 = vadd.f32 %v818_v54, %v800_v53  ;;  %2208 = vmatpush.bf16.msrb.mxu2 %v3636_v63  ;;  %v844_v54 = vsel %vm374_vm0, %v836_v24, %v838_v25  ;;  %v3639_v63 = vld [vmem:[#allocation4 + $0x2e8] sm:$0xf]  ;;  %v3572_v23 = vor.u32 %v4332_v58, %v3569_v49  ;;  %v4380_v58 = vld [vmem:[#allocation4 + $0x3e4] sm:$0xf]  ;;  %v3521_v17 = vld [vmem:[#allocation4 + $0x210] sm:$0xf0] }
  0xde   : > { %2251 = vmatpush.bf16.msra.mxu0 %v3812_v4  ;;  %v5208_v30 = vpack.c.bf16 %v842_v43, %v844_v54  ;;  %v3640_v24 = vor.u32 %v4351_v0, %v3639_v63  ;;  %v3607_v43 = vld [vmem:[#allocation4 + $0x2a8] sm:$0xf]  ;;  %v860_v54 = vrot.slane %v5147_v13, 1  ;;  %v3537_v63 = vld [vmem:[#allocation4 + $0x230] sm:$0xf0] }
  0xdf   : > { %v5188_v21 = vmax.f32 %v819_v59, 0.0  ;;  %2155 = vmatpush.bf16.msra.mxu3 %v3952_v55  ;;  %v862_v55 = vrot.slane %v5161_v27, 1  ;;  %v4428_v13 = vld [vmem:[#allocation4 + $0x564] sm:$0xf]  ;;  %v4287_v16 = vld [vmem:[#allocation4 + $0xf4] sm:$0xf0] }
  0xe0   : > { %v4376_v31 = vld [vmem:[#allocation4 + $0x3c4] sm:$0xf]  ;;  %v3751_v27 = vld [vmem:[#allocation4 + $0x3c8] sm:$0xf] }
  0xe1   : > { %v5192_v35 = vpack.c.bf16 %v5188_v21, %v5186_v20  ;;  %2209 = vmatpush.bf16.msrb.mxu2 %v3620_v14  ;;  %v837_v3 = vrot.slane %v5188_v21, 7  ;;  %v868_v8 = vsel %vm395_vm1, %v860_v54, %v862_v55 }
  0xe2   : > { %v802_v9 = vpop.f32.mrf.mxu0  ;;  %2252 = vmatpush.bf16.msra.mxu0 %v3796_v33  ;;  %v3623_v33 = vld [vmem:[#allocation4 + $0x2c8] sm:$0xf] }
  0xe3   : > { %v821_v39 = vpop.f32.mrf.mxu1  ;;  %2121 = vmatmul.bf16.vlgmr.msra.gmra.mxu1 %v5192_v35  ;;  %v803_v53 = vadd.f32 %v802_v9, %v784_v37  ;;  %2156 = vmatpush.bf16.msra.mxu3 %v3936_v15  ;;  %v3624_v25 = vor.u32 %v4347_v34, %v3623_v33  ;;  %v4422_v9 = vld [vmem:[#allocation4 + $0x52c] sm:$0xf0]  ;;  %v847_v60 = vsel %vm374_vm0, %v835_v47, %v837_v3  ;;  %v4320_v15 = vld [vmem:[#allocation4 + $0x204] sm:$0xf]  ;;  %v3575_v33 = vld [vmem:[#allocation4 + $0x268] sm:$0xf] }
  0xe4   : > { %2265 = vmatpush.bf16.msra.mxu1 %v4020_v46  ;;  %v3903_v46 = vld [vmem:[#allocation4 + $0x500] sm:$0xf] }
  0xe5   : > { %2210 = vmatpush.bf16.msrb.mxu2 %v3604_v40  ;;  %v822_v4 = vadd.f32 %v821_v39, %v803_v53  ;;  %v3920_v40 = vor.u32 %v4422_v9, %v3919_v26  ;;  %v4418_v53 = vld [vmem:[#allocation4 + $0x50c] sm:$0xf0] }
  0xe6   : > { %2253 = vmatpush.bf16.msra.mxu0 %v3780_v45  ;;  %v4343_v45 = vld [vmem:[#allocation4 + $0x2b4] sm:$0xf0] }
  0xe7   : > { %v5213_v37 = vmax.f32 %v822_v4, 0.0  ;;  %v3608_v52 = vor.u32 %v4343_v45, %v3607_v43  ;;  %2157 = vmatpush.bf16.msra.mxu3 %v3920_v40  ;;  %v858_v4 = vrot.slane %v5145_v12, 1  ;;  %v3745_v40 = vld [vmem:[#allocation4 + $0x3d0] sm:$0xf0] }
  0xe8   : > { %2266 = vmatpush.bf16.msra.mxu1 %v4004_v2  ;;  %v3953_v2 = vld [vmem:[#allocation4 + $0x570] sm:$0xf0]  ;;  %v3748_v11 = vor.u32 %v4376_v31, %v3745_v40  ;;  %v3335_v40 = vld [vmem:[#allocation4 + $0x88] sm:$0xf] }
  0xe9   : > { %4043 = vmatmul.msk.bf16.vlgmr.msrb.gmra.mxu0 %vm5004_vm4, %v5181_v44  ;;  %2211 = vmatpush.bf16.msrb.mxu2 %v3588_v6  ;;  %v3904_v6 = vor.u32 %v4418_v53, %v3903_v46  ;;  %v870_v18 = vsel %vm395_vm1, %v858_v4, %v860_v54  ;;  %v839_v9 = vrot.slane %v5213_v37, 7  ;;  %v3921_v43 = vld [vmem:[#allocation4 + $0x530] sm:$0xf0]  ;;  %v4372_v53 = vld [vmem:[#allocation4 + $0x3a4] sm:$0xf] }
  0xea   : > { %v804_v59 = vpop.f32.mrf.mxu0  ;;  %2322 = vmatpush.bf16.msrb.mxu0 %v3640_v24  ;;  %v3591_v24 = vld [vmem:[#allocation4 + $0x288] sm:$0xf]  ;;  %v5249_v34 = vpack.c.bf16 %v868_v8, %v870_v18  ;;  %v4279_v18 = vld [vmem:[#allocation4 + $0xb4] sm:$0xf0]  ;;  %v3697_v31 = vld [vmem:[#allocation4 + $0x370] sm:$0xf0] }
  0xeb   : > { %v805_v5 = vadd.f32 %v804_v59, %v786_v1  ;;  %v823_v14 = vpop.f32.mrf.mxu1  ;;  %v3540_v1 = vor.u32 %v4324_v62, %v3537_v63  ;;  %v4339_v59 = vld [vmem:[#allocation4 + $0x294] sm:$0xf0]  ;;  %2158 = vmatpush.bf16.msra.mxu3 %v3904_v6 }
  0xec   : > { %2069 = vmatmul.bf16.gmra.mxu2 %v5208_v30  ;;  %2267 = vmatpush.bf16.msra.mxu1 %v3988_v32  ;;  %v3592_v7 = vor.u32 %v4339_v59, %v3591_v24  ;;  %v3937_v32 = vld [vmem:[#allocation4 + $0x550] sm:$0xf0]  ;;  %v4283_v6 = vld [vmem:[#allocation4 + $0xd4] sm:$0xf0] }
  0xed   : > { %v824_v22 = vadd.f32 %v823_v14, %v805_v5  ;;  %2212 = vmatpush.bf16.msrb.mxu2 %v3572_v23  ;;  %v3956_v5 = vor.u32 %v4428_v13, %v3953_v2  ;;  %v3761_v14 = vld [vmem:[#allocation4 + $0x3f0] sm:$0xf0]  ;;  %v4424_v23 = vld [vmem:[#allocation4 + $0x544] sm:$0xf]  ;;  %v3543_v2 = vld [vmem:[#allocation4 + $0x228] sm:$0xf] }
  0xee   : > { %2323 = vmatpush.bf16.msrb.mxu0 %v3624_v25  ;;  %v3764_v49 = vor.u32 %v4380_v58, %v3761_v14  ;;  %v3940_v26 = vor.u32 %v4424_v23, %v3937_v32  ;;  %v4335_v25 = vld [vmem:[#allocation4 + $0x274] sm:$0xf0]  ;;  %v4416_v13 = vld [vmem:[#allocation4 + $0x504] sm:$0xf]  ;;  %v864_v14 = vrot.slane %v5163_v28, 1 }
  0xef   : > { %v5215_v39 = vmax.f32 %v824_v22, 0.0  ;;  %v3524_v22 = vor.u32 %v4320_v15, %v3521_v17  ;;  %v3576_v29 = vor.u32 %v4335_v25, %v3575_v33  ;;  %v4327_v59 = vld [vmem:[#allocation4 + $0x234] sm:$0xf0]  ;;  %v845_v15 = vsel %vm374_vm0, %v837_v3, %v839_v9  ;;  %v3351_v17 = vld [vmem:[#allocation4 + $0xa8] sm:$0xf] }
  0xf0   : > { %2268 = vmatpush.bf16.msra.mxu1 %v3972_v42  ;;  %v4420_v42 = vld [vmem:[#allocation4 + $0x524] sm:$0xf]  ;;  %v3544_v58 = vor.u32 %v4327_v59, %v3543_v2  ;;  %v3352_v23 = vor.u32 %v4279_v18, %v3351_v17  ;;  %v4323_v28 = vld [vmem:[#allocation4 + $0x214] sm:$0xf0]  ;;  %v3767_v32 = vld [vmem:[#allocation4 + $0x3e8] sm:$0xf]  ;;  %v866_v3 = vsel %vm395_vm1, %v862_v55, %v864_v14 }
  0xf1   : > { %v841_v48 = vrot.slane %v5215_v39, 7  ;;  %v5221_v51 = vpack.c.bf16 %v5215_v39, %v5213_v37  ;;  %2213 = vmatpush.bf16.msrb.mxu2 %v3556_v41  ;;  %v3383_v41 = vld [vmem:[#allocation4 + $0xe8] sm:$0xf]  ;;  %v3924_v46 = vor.u32 %v4420_v42, %v3921_v43  ;;  %v4383_v33 = vld [vmem:[#allocation4 + $0x3f4] sm:$0xf0] }
  0xf2   : > { %2324 = vmatpush.bf16.msrb.mxu0 %v3608_v52  ;;  %v3384_v45 = vor.u32 %v4287_v16, %v3383_v41  ;;  %v4331_v52 = vld [vmem:[#allocation4 + $0x254] sm:$0xf0]  ;;  %v3768_v25 = vor.u32 %v4383_v33, %v3767_v32  ;;  %v4285_v43 = vld [vmem:[#allocation4 + $0xec] sm:$0xf]  ;;  %v4356_v2 = vld [vmem:[#allocation4 + $0x324] sm:$0xf] }
  0xf3   : > { %2126 = vmatmul.bf16.gmra.mxu1 %v5221_v51  ;;  %v849_v61 = vsel %vm374_vm0, %v841_v48, %v835_v47  ;;  %v3559_v47 = vld [vmem:[#allocation4 + $0x248] sm:$0xf]  ;;  %v843_v8 = vsel %vm374_vm0, %v839_v9, %v841_v48  ;;  %v872_v9 = vsel %vm395_vm1, %v864_v14, %v858_v4  ;;  %v4379_v42 = vld [vmem:[#allocation4 + $0x3d4] sm:$0xf0]  ;;  %v861_v4 = vrot.slane %v5188_v21, 1 }
  0xf4   : > { %v5234_v0 = vpack.c.bf16 %v847_v60, %v849_v61  ;;  %2269 = vmatpush.bf16.msra.mxu1 %v3956_v5  ;;  %v3560_v54 = vor.u32 %v4331_v52, %v3559_v47  ;;  %v3729_v60 = vld [vmem:[#allocation4 + $0x3b0] sm:$0xf0]  ;;  %v3367_v61 = vld [vmem:[#allocation4 + $0xc8] sm:$0xf]  ;;  %v4368_v5 = vld [vmem:[#allocation4 + $0x384] sm:$0xf]  ;;  %v5265_v48 = vpack.c.bf16 %v843_v8, %v845_v15  ;;  %v5277_v55 = vpack.c.bf16 %v872_v9, %v866_v3 }
  0xf5   : > { %2214 = vmatpush.bf16.msrb.mxu2 %v3540_v1  ;;  %v3732_v62 = vor.u32 %v4372_v53, %v3729_v60  ;;  %v3368_v63 = vor.u32 %v4283_v6, %v3367_v61  ;;  %v3905_v1 = vld [vmem:[#allocation4 + $0x510] sm:$0xf0]  ;;  %v3752_v12 = vor.u32 %v4379_v42, %v3751_v27  ;;  %v4360_v52 = vld [vmem:[#allocation4 + $0x344] sm:$0xf]  ;;  %v4271_v61 = vld [vmem:[#allocation4 + $0x74] sm:$0xf0] }
  0xf6   : > { %4034 = vmatmul.msk.bf16.vlgmr.msrb.gmra.mxu3 %vm5004_vm4, %v5234_v0  ;;  %2325 = vmatpush.bf16.msrb.mxu0 %v3592_v7  ;;  %v3908_v24 = vor.u32 %v4416_v13, %v3905_v1  ;;  %v3713_v7 = vld [vmem:[#allocation4 + $0x390] sm:$0xf0]  ;;  %v3735_v6 = vld [vmem:[#allocation4 + $0x3a8] sm:$0xf]  ;;  %v4281_v13 = vld [vmem:[#allocation4 + $0xcc] sm:$0xf] }
  0xf7   : > { %2227 = vmatpush.bf16.msrb.mxu3 %v3764_v49  ;;  %v3716_v49 = vor.u32 %v4368_v5, %v3713_v7  ;;  %v3681_v53 = vld [vmem:[#allocation4 + $0x350] sm:$0xf0]  ;;  %v3369_v1 = vld [vmem:[#allocation4 + $0xd8] sm:$0xf0]  ;;  %v3303_v5 = vld [vmem:[#allocation4 + $0x48] sm:$0xf] }
  0xf8   : > { %2270 = vmatpush.bf16.msra.mxu1 %v3940_v26  ;;  %v3684_v60 = vor.u32 %v4360_v52, %v3681_v53  ;;  %v3665_v59 = vld [vmem:[#allocation4 + $0x330] sm:$0xf0]  ;;  %v4267_v7 = vld [vmem:[#allocation4 + $0x54] sm:$0xf0]  ;;  %v4277_v15 = vld [vmem:[#allocation4 + $0xac] sm:$0xf] }
  0xf9   : > { %2183 = vmatmul.bf16.gmra.mxu0 %v5208_v30  ;;  %2215 = vmatpush.bf16.msrb.mxu2 %v3524_v22  ;;  %v3527_v22 = vld [vmem:[#allocation4 + $0x208] sm:$0xf]  ;;  %v3668_v8 = vor.u32 %v4356_v2, %v3665_v59  ;;  %v4371_v14 = vld [vmem:[#allocation4 + $0x394] sm:$0xf0]  ;;  %v3353_v18 = vld [vmem:[#allocation4 + $0xb8] sm:$0xf0] }
  0xfa   : > { %2326 = vmatpush.bf16.msrb.mxu0 %v3576_v29  ;;  %v3528_v26 = vor.u32 %v4323_v28, %v3527_v22  ;;  %v4364_v29 = vld [vmem:[#allocation4 + $0x364] sm:$0xf]  ;;  %v859_v28 = vrot.slane %v5186_v20, 1  ;;  %v3356_v33 = vor.u32 %v4277_v15, %v3353_v18  ;;  %v3287_v3 = vld [vmem:[#allocation4 + $0x28] sm:$0xf] }
  0xfb   : > { %2228 = vmatpush.bf16.msrb.mxu3 %v3748_v11  ;;  %v3700_v41 = vor.u32 %v4364_v29, %v3697_v31  ;;  %v4275_v11 = vld [vmem:[#allocation4 + $0x94] sm:$0xf0]  ;;  %v4352_v22 = vld [vmem:[#allocation4 + $0x304] sm:$0xf]  ;;  %v3703_v29 = vld [vmem:[#allocation4 + $0x368] sm:$0xf] }
  0xfc   : > { %2140 = vmatmul.bf16.vlgmr.msra.gmra.mxu2 %v5249_v34  ;;  %2271 = vmatpush.bf16.msra.mxu1 %v3924_v46  ;;  %v3336_v16 = vor.u32 %v4275_v11, %v3335_v40  ;;  %v863_v46 = vrot.slane %v5213_v37, 1  ;;  %v4263_v9 = vld [vmem:[#allocation4 + $0x34] sm:$0xf0]  ;;  %v4273_v11 = vld [vmem:[#allocation4 + $0x8c] sm:$0xf] }
  0xfd   : > { %2284 = vmatpush.bf16.msra.mxu2 %v3384_v45  ;;  %v3385_v45 = vld [vmem:[#allocation4 + $0xf8] sm:$0xf0]  ;;  %v3288_v40 = vor.u32 %v4263_v9, %v3287_v3  ;;  %v3687_v53 = vld [vmem:[#allocation4 + $0x348] sm:$0xf]  ;;  %v4411_v18 = vld [vmem:[#allocation4 + $0x4d4] sm:$0xf0] }
  0xfe   : > { %2327 = vmatpush.bf16.msrb.mxu0 %v3560_v54  ;;  %v3388_v47 = vor.u32 %v4285_v43, %v3385_v45  ;;  %v3319_v54 = vld [vmem:[#allocation4 + $0x68] sm:$0xf]  ;;  %v869_v32 = vsel %vm395_vm1, %v861_v4, %v863_v46  ;;  %v3289_v3 = vld [vmem:[#allocation4 + $0x38] sm:$0xf0]  ;;  %v4317_v20 = vld [vmem:[#allocation4 + $0x1ec] sm:$0xf] }
  0xff   : > { %2229 = vmatpush.bf16.msrb.mxu3 %v3732_v62  ;;  %v4375_v62 = vld [vmem:[#allocation4 + $0x3b4] sm:$0xf0]  ;;  %v3511_v43 = vld [vmem:[#allocation4 + $0x1e8] sm:$0xf] }
 0x100   : > { %2272 = vmatpush.bf16.msra.mxu1 %v3908_v24  ;;  %v3736_v21 = vor.u32 %v4375_v62, %v3735_v6  ;;  %v3372_v24 = vor.u32 %v4281_v13, %v3369_v1  ;;  %v3271_v45 = vld [vmem:[#allocation4 + $0x8] sm:$0xf]  ;;  %v3321_v6 = vld [vmem:[#allocation4 + $0x78] sm:$0xf0]  ;;  %v865_v62 = vrot.slane %v5215_v39, 1 }
 0x101   : > { %2285 = vmatpush.bf16.msra.mxu2 %v3368_v63  ;;  %v3320_v63 = vor.u32 %v4271_v61, %v3319_v54  ;;  %v4363_v54 = vld [vmem:[#allocation4 + $0x354] sm:$0xf0]  ;;  %v3895_v1 = vld [vmem:[#allocation4 + $0x4e8] sm:$0xf] }
 0x102   : > { %2328 = vmatpush.bf16.msrb.mxu0 %v3544_v58  ;;  %v3719_v58 = vld [vmem:[#allocation4 + $0x388] sm:$0xf]  ;;  %v3688_v61 = vor.u32 %v4363_v54, %v3687_v53  ;;  %v4315_v13 = vld [vmem:[#allocation4 + $0x1d4] sm:$0xf0] }
 0x103   : > { %4046 = vmatmul.msk.bf16.vlgmr.msrb.gmra.mxu1 %vm5004_vm4, %v5234_v0  ;;  %2230 = vmatpush.bf16.msrb.mxu3 %v3716_v49  ;;  %v3304_v49 = vor.u32 %v4267_v7, %v3303_v5  ;;  %v3720_v17 = vor.u32 %v4371_v14, %v3719_v58  ;;  %v3671_v59 = vld [vmem:[#allocation4 + $0x328] sm:$0xf]  ;;  %v4359_v5 = vld [vmem:[#allocation4 + $0x334] sm:$0xf0]  ;;  %v4265_v58 = vld [vmem:[#allocation4 + $0x4c] sm:$0xf] }
 0x104   : > { %2341 = vmatpush.bf16.msrb.mxu1 %v3768_v25  ;;  %v3305_v14 = vld [vmem:[#allocation4 + $0x58] sm:$0xf0]  ;;  %v3479_v15 = vld [vmem:[#allocation4 + $0x1a8] sm:$0xf]  ;;  %v4403_v54 = vld [vmem:[#allocation4 + $0x494] sm:$0xf0] }
 0x105   : > { %2286 = vmatpush.bf16.msra.mxu2 %v3352_v23  ;;  %v3649_v23 = vld [vmem:[#allocation4 + $0x310] sm:$0xf0]  ;;  %v3308_v39 = vor.u32 %v4265_v58, %v3305_v14  ;;  %v3463_v9 = vld [vmem:[#allocation4 + $0x188] sm:$0xf] }
 0x106   : > { %2088 = vmatmul.bf16.gmra.mxu3 %v5265_v48  ;;  %2329 = vmatpush.bf16.msrb.mxu0 %v3528_v26  ;;  %v871_v26 = vsel %vm395_vm1, %v859_v28, %v861_v4  ;;  %v3652_v25 = vor.u32 %v4352_v22, %v3649_v23 }
 0x107   : > { %2231 = vmatpush.bf16.msrb.mxu3 %v3700_v41  ;;  %v5294_v31 = vpack.c.bf16 %v869_v32, %v871_v26  ;;  %v4367_v41 = vld [vmem:[#allocation4 + $0x374] sm:$0xf0]  ;;  %v3655_v32 = vld [vmem:[#allocation4 + $0x308] sm:$0xf]  ;;  %v4261_v26 = vld [vmem:[#allocation4 + $0x2c] sm:$0xf] }
 0x108   : > { %2342 = vmatpush.bf16.msrb.mxu1 %v3752_v12  ;;  %v3704_v27 = vor.u32 %v4367_v41, %v3703_v29  ;;  %v4319_v12 = vld [vmem:[#allocation4 + $0x1f4] sm:$0xf0] }
 0x109   : > { %2254 = vmatmul.bf16.vlgmr.msra.gmra.mxu0 %v5249_v34  ;;  %2287 = vmatpush.bf16.msra.mxu2 %v3336_v16  ;;  %v3337_v16 = vld [vmem:[#allocation4 + $0x98] sm:$0xf0]  ;;  %v3512_v4 = vor.u32 %v4319_v12, %v3511_v43  ;;  %v4307_v29 = vld [vmem:[#allocation4 + $0x194] sm:$0xf0]  ;;  %v4257_v43 = vld [vmem:[#allocation4 + $0xc] sm:$0xf] }
 0x10a   : > { %2398 = vmatpush.bf16.msra.mxu0 %v3388_v47  ;;  %v3340_v42 = vor.u32 %v4273_v11, %v3337_v16  ;;  %v4259_v47 = vld [vmem:[#allocation4 + $0x14] sm:$0xf0]  ;;  %v3292_v11 = vor.u32 %v4261_v26, %v3289_v3  ;;  %v3464_v37 = vor.u32 %v4307_v29, %v3463_v9  ;;  %v3863_v16 = vld [vmem:[#allocation4 + $0x4a8] sm:$0xf]  ;;  %v3273_v12 = vld [vmem:[#allocation4 + $0x18] sm:$0xf0] }
 0x10b   : > { %2232 = vmatpush.bf16.msrb.mxu3 %v3684_v60  ;;  %v3272_v52 = vor.u32 %v4259_v47, %v3271_v45  ;;  %v4269_v60 = vld [vmem:[#allocation4 + $0x6c] sm:$0xf]  ;;  %v3276_v50 = vor.u32 %v4257_v43, %v3273_v12  ;;  %v4303_v47 = vld [vmem:[#allocation4 + $0x174] sm:$0xf0]  ;;  %v3465_v26 = vld [vmem:[#allocation4 + $0x198] sm:$0xf0] }
 0x10c   : > { %4037 = vmatmul.msk.bf16.gmra.mxu2 %vm5102_vm6, %v5277_v55  ;;  %2343 = vmatpush.bf16.msrb.mxu1 %v3736_v21  ;;  %v3495_v21 = vld [vmem:[#allocation4 + $0x1c8] sm:$0xf]  ;;  %v3865_v29 = vld [vmem:[#allocation4 + $0x4b8] sm:$0xf0]  ;;  %v4301_v43 = vld [vmem:[#allocation4 + $0x16c] sm:$0xf] }
 0x10d   : > { %2288 = vmatpush.bf16.msra.mxu2 %v3320_v63  ;;  %v3324_v63 = vor.u32 %v4269_v60, %v3321_v6  ;;  %v3496_v2 = vor.u32 %v4315_v13, %v3495_v21  ;;  %v3497_v6 = vld [vmem:[#allocation4 + $0x1d8] sm:$0xf0] }
 0x10e   : > { %2399 = vmatpush.bf16.msra.mxu0 %v3372_v24  ;;  %v4415_v24 = vld [vmem:[#allocation4 + $0x4f4] sm:$0xf0]  ;;  %v3897_v21 = vld [vmem:[#allocation4 + $0x4f8] sm:$0xf0] }
 0x10f   : > { %2233 = vmatpush.bf16.msrb.mxu3 %v3668_v8  ;;  %v3896_v7 = vor.u32 %v4415_v24, %v3895_v1  ;;  %v3672_v8 = vor.u32 %v4359_v5, %v3671_v59  ;;  %v3431_v1 = vld [vmem:[#allocation4 + $0x148] sm:$0xf]  ;;  %v4399_v5 = vld [vmem:[#allocation4 + $0x474] sm:$0xf0]  ;;  %v3449_v12 = vld [vmem:[#allocation4 + $0x178] sm:$0xf0] }
 0x110   : > { %2344 = vmatpush.bf16.msrb.mxu1 %v3720_v17  ;;  %v3879_v17 = vld [vmem:[#allocation4 + $0x4c8] sm:$0xf] }
 0x111   : > { %2289 = vmatpush.bf16.msra.mxu2 %v3304_v49  ;;  %v4311_v49 = vld [vmem:[#allocation4 + $0x1b4] sm:$0xf0]  ;;  %v3880_v23 = vor.u32 %v4411_v18, %v3879_v17  ;;  %v3831_v24 = vld [vmem:[#allocation4 + $0x468] sm:$0xf] }
 0x112   : > { %2400 = vmatpush.bf16.msra.mxu0 %v3356_v33  ;;  %v3480_v22 = vor.u32 %v4311_v49, %v3479_v15  ;;  %v4355_v33 = vld [vmem:[#allocation4 + $0x314] sm:$0xf0]  ;;  %v3832_v58 = vor.u32 %v4399_v5, %v3831_v24  ;;  %v4409_v15 = vld [vmem:[#allocation4 + $0x4cc] sm:$0xf]  ;;  %v3415_v49 = vld [vmem:[#allocation4 + $0x128] sm:$0xf] }
 0x113   : > { %2202 = vmatmul.bf16.gmra.mxu1 %v5265_v48  ;;  %2234 = vmatpush.bf16.msrb.mxu3 %v3652_v25  ;;  %v867_v25 = vsel %vm395_vm1, %v863_v46, %v865_v62  ;;  %v3656_v41 = vor.u32 %v4355_v33, %v3655_v32  ;;  %v4295_v18 = vld [vmem:[#allocation4 + $0x134] sm:$0xf0]  ;;  %v4305_v33 = vld [vmem:[#allocation4 + $0x18c] sm:$0xf]  ;;  %v3641_v5 = vld [vmem:[#allocation4 + $0x2f8] sm:$0xf0] }
 0x114   : > { %2345 = vmatpush.bf16.msrb.mxu1 %v3704_v27  ;;  %v4407_v27 = vld [vmem:[#allocation4 + $0x4b4] sm:$0xf0]  ;;  %v3416_v32 = vor.u32 %v4295_v18, %v3415_v49  ;;  %v3468_v9 = vor.u32 %v4305_v33, %v3465_v26  ;;  %v4349_v24 = vld [vmem:[#allocation4 + $0x2ec] sm:$0xf]  ;;  %v3401_v26 = vld [vmem:[#allocation4 + $0x118] sm:$0xf0] }
 0x115   : > { %2290 = vmatpush.bf16.msra.mxu2 %v3288_v40  ;;  %v873_v40 = vsel %vm395_vm1, %v865_v62, %v859_v28  ;;  %v3513_v28 = vld [vmem:[#allocation4 + $0x1f8] sm:$0xf0]  ;;  %v4413_v62 = vld [vmem:[#allocation4 + $0x4ec] sm:$0xf]  ;;  %v4439_v18 = vld [vmem:[#allocation4 + $0x5b4] sm:$0xf0] }
 0x116   : > { %2159 = vmatmul.bf16.vlgmr.msra.gmra.mxu3 %v5294_v31  ;;  %2401 = vmatpush.bf16.msra.mxu0 %v3340_v42  ;;  %v5311_v46 = vpack.c.bf16 %v873_v40, %v867_v25  ;;  %v3864_v42 = vor.u32 %v4407_v27, %v3863_v16  ;;  %v3516_v45 = vor.u32 %v4317_v20, %v3513_v28  ;;  %v4405_v25 = vld [vmem:[#allocation4 + $0x4ac] sm:$0xf]  ;;  %v3399_v40 = vld [vmem:[#allocation4 + $0x108] sm:$0xf]  ;;  %v4391_v27 = vld [vmem:[#allocation4 + $0x434] sm:$0xf0] }
 0x117   : > { %2303 = vmatpush.bf16.msra.mxu3 %v3512_v4  ;;  %v3447_v4 = vld [vmem:[#allocation4 + $0x168] sm:$0xf]  ;;  %v3900_v13 = vor.u32 %v4413_v62, %v3897_v21  ;;  %v4401_v20 = vld [vmem:[#allocation4 + $0x48c] sm:$0xf]  ;;  %v3849_v28 = vld [vmem:[#allocation4 + $0x498] sm:$0xf0] }
 0x118   : > { %2346 = vmatpush.bf16.msrb.mxu1 %v3688_v61  ;;  %v3448_v53 = vor.u32 %v4303_v47, %v3447_v4  ;;  %v4313_v61 = vld [vmem:[#allocation4 + $0x1cc] sm:$0xf]  ;;  %v3799_v16 = vld [vmem:[#allocation4 + $0x428] sm:$0xf]  ;;  %v4447_v47 = vld [vmem:[#allocation4 + $0x5f4] sm:$0xf0] }
 0x119   : > { %4049 = vmatmul.msk.bf16.gmra.mxu0 %vm5102_vm6, %v5277_v55  ;;  %2291 = vmatpush.bf16.msra.mxu2 %v3272_v52  ;;  %v3847_v52 = vld [vmem:[#allocation4 + $0x488] sm:$0xf]  ;;  %v4397_v62 = vld [vmem:[#allocation4 + $0x46c] sm:$0xf]  ;;  %v3833_v21 = vld [vmem:[#allocation4 + $0x478] sm:$0xf0] }
 0x11a   : > { %2402 = vmatpush.bf16.msra.mxu0 %v3324_v63  ;;  %v3848_v60 = vor.u32 %v4403_v54, %v3847_v52  ;;  %v3500_v63 = vor.u32 %v4313_v61, %v3497_v6  ;;  %v4023_v4 = vld [vmem:[#allocation4 + $0x5e8] sm:$0xf]  ;;  %v4387_v54 = vld [vmem:[#allocation4 + $0x414] sm:$0xf0]  ;;  %v4297_v61 = vld [vmem:[#allocation4 + $0x14c] sm:$0xf] }
 0x11b   : > { %2304 = vmatpush.bf16.msra.mxu3 %v3496_v2  ;;  %v4299_v2 = vld [vmem:[#allocation4 + $0x154] sm:$0xf0]  ;;  %v3783_v52 = vld [vmem:[#allocation4 + $0x408] sm:$0xf]  ;;  %v3433_v6 = vld [vmem:[#allocation4 + $0x158] sm:$0xf0] }
 0x11c   : > { %2216 = vmatmul.bf16.vlgmr.msrb.gmra.mxu2 %v5151_v19  ;;  %2347 = vmatpush.bf16.msrb.mxu1 %v3672_v8  ;;  %v3432_v59 = vor.u32 %v4299_v2, %v3431_v1  ;;  %v3481_v8 = vld [vmem:[#allocation4 + $0x1b8] sm:$0xf0]  ;;  %v4007_v1 = vld [vmem:[#allocation4 + $0x5c8] sm:$0xf]  ;;  %v4443_v2 = vld [vmem:[#allocation4 + $0x5d4] sm:$0xf0] }
 0x11d   : > { %2360 = vmatpush.bf16.msrb.mxu2 %v3896_v7  ;;  %v4309_v7 = vld [vmem:[#allocation4 + $0x1ac] sm:$0xf] }
 0x11e   : > { %2403 = vmatpush.bf16.msra.mxu0 %v3308_v39  ;;  %v3484_v14 = vor.u32 %v4309_v7, %v3481_v8  ;;  %v3881_v39 = vld [vmem:[#allocation4 + $0x4d8] sm:$0xf0]  ;;  %v4293_v7 = vld [vmem:[#allocation4 + $0x12c] sm:$0xf] }
 0x11f   : > { %2305 = vmatpush.bf16.msra.mxu3 %v3480_v22  ;;  %v3884_v17 = vor.u32 %v4409_v15, %v3881_v39  ;;  %v3815_v22 = vld [vmem:[#allocation4 + $0x448] sm:$0xf]  ;;  %v3417_v8 = vld [vmem:[#allocation4 + $0x138] sm:$0xf0]  ;;  %v4393_v15 = vld [vmem:[#allocation4 + $0x44c] sm:$0xf] }
 0x120   : > { %2348 = vmatpush.bf16.msrb.mxu1 %v3656_v41  ;;  %v4291_v41 = vld [vmem:[#allocation4 + $0x114] sm:$0xf0]  ;;  %v3817_v39 = vld [vmem:[#allocation4 + $0x458] sm:$0xf0]  ;;  %v4289_v33 = vld [vmem:[#allocation4 + $0x10c] sm:$0xf] }
 0x121   : > { %2361 = vmatpush.bf16.msrb.mxu2 %v3880_v23  ;;  %v4395_v23 = vld [vmem:[#allocation4 + $0x454] sm:$0xf0]  ;;  %v3820_v49 = vor.u32 %v4393_v15, %v3817_v39  ;;  %v4183_v39 = vld [vmem:[#allocation6 + $0xc8] sm:$0xf] }
 0x122   : > { %2404 = vmatpush.bf16.msra.mxu0 %v3292_v11  ;;  %v3816_v3 = vor.u32 %v4395_v23, %v3815_v22  ;;  %v3868_v11 = vor.u32 %v4405_v25, %v3865_v29  ;;  %v4345_v22 = vld [vmem:[#allocation4 + $0x2cc] sm:$0xf]  ;;  %v3801_v29 = vld [vmem:[#allocation4 + $0x438] sm:$0xf0] }
 0x123   : > { %2273 = vmatmul.bf16.vlgmr.msra.gmra.mxu1 %v5294_v31  ;;  %2306 = vmatpush.bf16.msra.mxu3 %v3464_v37  ;;  %v3400_v37 = vor.u32 %v4291_v41, %v3399_v40  ;;  %v3975_v40 = vld [vmem:[#allocation4 + $0x588] sm:$0xf] }
 0x124   : > { %2417 = vmatpush.bf16.msra.mxu1 %v3516_v45  ;;  %v3852_v45 = vor.u32 %v4401_v20, %v3849_v28  ;;  %v4445_v20 = vld [vmem:[#allocation4 + $0x5ec] sm:$0xf] }
 0x125   : > { %2362 = vmatpush.bf16.msrb.mxu2 %v3864_v42  ;;  %v3800_v42 = vor.u32 %v4391_v27, %v3799_v16  ;;  %v4341_v16 = vld [vmem:[#allocation4 + $0x2ac] sm:$0xf]  ;;  %v3609_v27 = vld [vmem:[#allocation4 + $0x2b8] sm:$0xf0] }
 0x126   : > { %4040 = vmatmul.msk.bf16.gmra.mxu3 %vm5102_vm6, %v5311_v46  ;;  %2405 = vmatpush.bf16.msra.mxu0 %v3276_v50  ;;  %v3452_v50 = vor.u32 %v4301_v43, %v3449_v12  ;;  %v4385_v43 = vld [vmem:[#allocation4 + $0x40c] sm:$0xf]  ;;  %v3785_v12 = vld [vmem:[#allocation4 + $0x418] sm:$0xf0] }
 0x127   : > { %2307 = vmatpush.bf16.msra.mxu3 %v3448_v53  ;;  %v4024_v53 = vor.u32 %v4447_v47, %v4023_v4  ;;  %v3788_v28 = vor.u32 %v4385_v43, %v3785_v12  ;;  %v3959_v47 = vld [vmem:[#allocation4 + $0x568] sm:$0xf]  ;;  %v4429_v12 = vld [vmem:[#allocation4 + $0x56c] sm:$0xf] }
 0x128   : > { %2418 = vmatpush.bf16.msra.mxu1 %v3500_v63  ;;  %v3436_v63 = vor.u32 %v4297_v61, %v3433_v6  ;;  %v4441_v61 = vld [vmem:[#allocation4 + $0x5cc] sm:$0xf]  ;;  %v4009_v6 = vld [vmem:[#allocation4 + $0x5d8] sm:$0xf0] }
 0x129   : > { %2330 = vmatmul.bf16.vlgmr.msrb.gmra.mxu0 %v5151_v19  ;;  %2363 = vmatpush.bf16.msrb.mxu2 %v3848_v60  ;;  %v3784_v60 = vor.u32 %v4387_v54, %v3783_v52  ;;  %v4431_v52 = vld [vmem:[#allocation4 + $0x574] sm:$0xf0] }
 0x12a   : > { %2474 = vmatpush.bf16.msrb.mxu0 %v3900_v13  ;;  %v3836_v13 = vor.u32 %v4397_v62, %v3833_v21  ;;  %v3960_v54 = vor.u32 %v4431_v52, %v3959_v47  ;;  %v4199_v21 = vld [vmem:[#allocation6 + $0xe8] sm:$0xf]  ;;  %v4467_v47 = vld [vmem:[#allocation6 + $0x94] sm:$0xf0] }
 0x12b   : > { %2308 = vmatpush.bf16.msra.mxu3 %v3432_v59  ;;  %v4008_v59 = vor.u32 %v4443_v2, %v4007_v1  ;;  %v3943_v2 = vld [vmem:[#allocation4 + $0x548] sm:$0xf] }
 0x12c   : > { %2221 = vmatmul.bf16.gmra.mxu2 %v5169_v10  ;;  %2419 = vmatpush.bf16.msra.mxu1 %v3484_v14  ;;  %v3420_v14 = vor.u32 %v4293_v7, %v3417_v8  ;;  %v4437_v7 = vld [vmem:[#allocation4 + $0x5ac] sm:$0xf]  ;;  %v3993_v8 = vld [vmem:[#allocation4 + $0x5b8] sm:$0xf0] }
 0x12d   : > { %2364 = vmatpush.bf16.msrb.mxu2 %v3832_v58  ;;  %v3644_v58 = vor.u32 %v4349_v24, %v3641_v5  ;;  %v4427_v24 = vld [vmem:[#allocation4 + $0x554] sm:$0xf0]  ;;  %v3577_v5 = vld [vmem:[#allocation4 + $0x278] sm:$0xf0]  ;;  %v3996_v15 = vor.u32 %v4437_v7, %v3993_v8  ;;  %v4478_v8 = vld [vmem:[#allocation6 + $0xec] sm:$0xf0] }
 0x12e   : > { %2475 = vmatpush.bf16.msrb.mxu0 %v3884_v17  ;;  %v3991_v17 = vld [vmem:[#allocation4 + $0x5a8] sm:$0xf] }
 0x12f   : > { %2309 = vmatpush.bf16.msra.mxu3 %v3416_v32  ;;  %v3992_v23 = vor.u32 %v4439_v18, %v3991_v17  ;;  %v3625_v32 = vld [vmem:[#allocation4 + $0x2d8] sm:$0xf0]  ;;  %v3927_v18 = vld [vmem:[#allocation4 + $0x528] sm:$0xf] }
 0x130   : > { %2420 = vmatpush.bf16.msra.mxu1 %v3468_v9  ;;  %v3628_v25 = vor.u32 %v4345_v22, %v3625_v32  ;;  %v4389_v9 = vld [vmem:[#allocation4 + $0x42c] sm:$0xf]  ;;  %v4423_v22 = vld [vmem:[#allocation4 + $0x534] sm:$0xf0] }
 0x131   : > { %2365 = vmatpush.bf16.msrb.mxu2 %v3816_v3  ;;  %v3404_v3 = vor.u32 %v4289_v33, %v3401_v26  ;;  %v3804_v41 = vor.u32 %v4389_v9, %v3801_v29  ;;  %v3928_v32 = vor.u32 %v4423_v22, %v3927_v18  ;;  %v3561_v33 = vld [vmem:[#allocation4 + $0x258] sm:$0xf0]  ;;  %v4433_v26 = vld [vmem:[#allocation4 + $0x58c] sm:$0xf]  ;;  %v4167_v29 = vld [vmem:[#allocation6 + $0xa8] sm:$0xf] }
 0x132   : > { %2476 = vmatpush.bf16.msrb.mxu0 %v3868_v11  ;;  %v4435_v11 = vld [vmem:[#allocation4 + $0x594] sm:$0xf0]  ;;  %v4119_v22 = vld [vmem:[#allocation6 + $0x48] sm:$0xf] }
 0x133   : > { %4052 = vmatmul.msk.bf16.gmra.mxu1 %vm5102_vm6, %v5311_v46  ;;  %2310 = vmatpush.bf16.msra.mxu3 %v3400_v37  ;;  %v3976_v37 = vor.u32 %v4435_v11, %v3975_v40  ;;  %v4471_v40 = vld [vmem:[#allocation6 + $0xb4] sm:$0xf0] }
 0x134   : > { %2421 = vmatpush.bf16.msra.mxu1 %v3452_v50  ;;  %v5342_v11 = vor.u32 %v4471_v40, %v4167_v29  ;;  %v4474_v40 = vld [vmem:[#allocation6 + $0xcc] sm:$0xf0] }
 0x135   : > { %2366 = vmatpush.bf16.msrb.mxu2 %v3800_v42  ;;  %v3612_v42 = vor.u32 %v4341_v16, %v3609_v27  ;;  %v4325_v27 = vld [vmem:[#allocation4 + $0x22c] sm:$0xf] }
 0x136   : > { %2235 = vmatmul.bf16.vlgmr.msrb.gmra.mxu3 %v5192_v35  ;;  %2477 = vmatpush.bf16.msrb.mxu0 %v3852_v45  ;;  %v4025_v45 = vld [vmem:[#allocation4 + $0x5f8] sm:$0xf0] }
 0x137   : > { %2379 = vmatpush.bf16.msrb.mxu3 %v4024_v53  ;;  %v4028_v4 = vor.u32 %v4445_v20, %v4025_v45  ;;  %v4337_v53 = vld [vmem:[#allocation4 + $0x28c] sm:$0xf]  ;;  %v3961_v20 = vld [vmem:[#allocation4 + $0x578] sm:$0xf0] }
 0x138   : > { %2422 = vmatpush.bf16.msra.mxu1 %v3436_v63  ;;  %v4012_v63 = vor.u32 %v4441_v61, %v4009_v6  ;;  %v3529_v6 = vld [vmem:[#allocation4 + $0x218] sm:$0xf0] }
 0x139   : > { %2335 = vmatmul.bf16.gmra.mxu0 %v5169_v10  ;;  %2367 = vmatpush.bf16.msrb.mxu2 %v3784_v60  ;;  %v3593_v60 = vld [vmem:[#allocation4 + $0x298] sm:$0xf0] }
 0x13a   : > { %2478 = vmatpush.bf16.msrb.mxu0 %v3836_v13  ;;  %v3596_v62 = vor.u32 %v4337_v53, %v3593_v60  ;;  %v4479_v13 = vld [vmem:[#allocation6 + $0xf4] sm:$0xf0]  ;;  %v4381_v53 = vld [vmem:[#allocation4 + $0x3ec] sm:$0xf] }
 0x13b   : > { %2380 = vmatpush.bf16.msrb.mxu3 %v4008_v59  ;;  %v5333_v1 = vor.u32 %v4479_v13, %v4199_v21  ;;  %v4333_v59 = vld [vmem:[#allocation4 + $0x26c] sm:$0xf] }
 0x13c   : > { %4055 = vmatmul.msk.bf16.vlgmr.msra.gmra.mxu2 %vm5004_vm4, %v5181_v44  ;;  %2423 = vmatpush.bf16.msra.mxu1 %v3420_v14  ;;  %v3580_v14 = vor.u32 %v4333_v59, %v3577_v5  ;;  %v4321_v60 = vld [vmem:[#allocation4 + $0x20c] sm:$0xf]  ;;  %v3753_v5 = vld [vmem:[#allocation4 + $0x3d8] sm:$0xf0] }
 0x13d   : > { %2436 = vmatpush.bf16.msra.mxu2 %v3644_v58  ;;  %v3532_v21 = vor.u32 %v4321_v60, %v3529_v6  ;;  %v4451_v60 = vld [vmem:[#allocation6 + $0x14] sm:$0xf0] }
 0x13e   : > { %2479 = vmatpush.bf16.msrb.mxu0 %v3820_v49  ;;  %v4475_v49 = vld [vmem:[#allocation6 + $0xd4] sm:$0xf0] }
 0x13f   : > { %2381 = vmatpush.bf16.msrb.mxu3 %v3992_v23  ;;  %v5339_v17 = vor.u32 %v4475_v49, %v4183_v39  ;;  %v4329_v23 = vld [vmem:[#allocation4 + $0x24c] sm:$0xf] }
 0x140   : > { %2424 = vmatpush.bf16.msra.mxu1 %v3404_v3  ;;  %v3564_v3 = vor.u32 %v4329_v23, %v3561_v33  ;;  %v4459_v23 = vld [vmem:[#allocation6 + $0x54] sm:$0xf0] }
 0x141   : > { %2437 = vmatpush.bf16.msra.mxu2 %v3628_v25  ;;  %v3977_v25 = vld [vmem:[#allocation4 + $0x598] sm:$0xf0]  ;;  %v5363_v33 = vor.u32 %v4459_v23, %v4119_v22  ;;  %v4462_v23 = vld [vmem:[#allocation6 + $0x6c] sm:$0xf0] }
 0x142   : > { %2480 = vmatpush.bf16.msrb.mxu0 %v3804_v41  ;;  %v3980_v9 = vor.u32 %v4433_v26, %v3977_v25  ;;  %v3911_v41 = vld [vmem:[#allocation4 + $0x508] sm:$0xf]  ;;  %v4373_v26 = vld [vmem:[#allocation4 + $0x3ac] sm:$0xf]  ;;  %v3737_v25 = vld [vmem:[#allocation4 + $0x3b8] sm:$0xf0] }
 0x143   : > { %2349 = vmatmul.bf16.vlgmr.msrb.gmra.mxu1 %v5192_v35  ;;  %2382 = vmatpush.bf16.msrb.mxu3 %v3976_v37  ;;  %v4419_v37 = vld [vmem:[#allocation4 + $0x514] sm:$0xf0]  ;;  %v3740_v29 = vor.u32 %v4373_v26, %v3737_v25 }
 0x144   : > { %2493 = vmatpush.bf16.msrb.mxu1 %v4028_v4  ;;  %v3912_v16 = vor.u32 %v4419_v37, %v3911_v41  ;;  %v3964_v4 = vor.u32 %v4429_v12, %v3961_v20  ;;  %v4417_v41 = vld [vmem:[#allocation4 + $0x50c] sm:$0xf]  ;;  %v3913_v37 = vld [vmem:[#allocation4 + $0x518] sm:$0xf0] }
 0x145   : > { %2438 = vmatpush.bf16.msra.mxu2 %v3612_v42  ;;  %v3545_v42 = vld [vmem:[#allocation4 + $0x238] sm:$0xf0]  ;;  %v4369_v20 = vld [vmem:[#allocation4 + $0x38c] sm:$0xf] }
 0x146   : > { %v5327_v50 = vpop.f32.mrf.mxu0  ;;  %2240 = vmatmul.bf16.gmra.mxu3 %v5221_v51  ;;  %2481 = vmatpush.bf16.msrb.mxu0 %v3788_v28  ;;  %v3548_v43 = vor.u32 %v4325_v27, %v3545_v42  ;;  %v4151_v28 = vld [vmem:[#allocation6 + $0x88] sm:$0xf]  ;;  %v3916_v27 = vor.u32 %v4417_v41, %v3913_v37  ;;  %v4357_v37 = vld [vmem:[#allocation4 + $0x32c] sm:$0xf] }
 0x147   : > { %2383 = vmatpush.bf16.msrb.mxu3 %v3960_v54  ;;  %v5351_v52 = vor.u32 %v4467_v47, %v4151_v28  ;;  %v3769_v54 = vld [vmem:[#allocation4 + $0x3f8] sm:$0xf0]  ;;  %v4103_v42 = vld [vmem:[#allocation6 + $0x28] sm:$0xf] }
 0x148   : > { %2494 = vmatpush.bf16.msrb.mxu1 %v4012_v63  ;;  %v3772_v61 = vor.u32 %v4381_v53, %v3769_v54  ;;  %v3945_v63 = vld [vmem:[#allocation4 + $0x558] sm:$0xf0]  ;;  %v4470_v53 = vld [vmem:[#allocation6 + $0xac] sm:$0xf0]  ;;  %v4087_v54 = vld [vmem:[#allocation6 + $0x8] sm:$0xf] }
 0x149   : > { %4067 = vmatmul.msk.bf16.vlgmr.msra.gmra.mxu0 %vm5004_vm4, %v5181_v44  ;;  %2439 = vmatpush.bf16.msra.mxu2 %v3596_v62  ;;  %v3944_v44 = vor.u32 %v4427_v24, %v3943_v2  ;;  %v4425_v62 = vld [vmem:[#allocation4 + $0x54c] sm:$0xf]  ;;  %v4135_v2 = vld [vmem:[#allocation6 + $0x68] sm:$0xf]  ;;  %v4463_v24 = vld [vmem:[#allocation6 + $0x74] sm:$0xf0] }
 0x14a   : > { %2758 = vmatpush.bf16.msra.mxu0 %v5333_v1  ;;  %v3948_v13 = vor.u32 %v4425_v62, %v3945_v63  ;;  %v5355_v59 = vor.u32 %v4463_v24, %v4135_v2  ;;  %v3721_v28 = vld [vmem:[#allocation4 + $0x398] sm:$0xf0]  ;;  %v5376_v62 = vor.u32 %v4451_v60, %v4087_v54  ;;  %v4477_v63 = vld [vmem:[#allocation6 + $0xec] sm:$0xf]  ;;  %v4143_v24 = vld [vmem:[#allocation6 + $0x80] sm:$0xf] }
 0x14b   : > { %2384 = vmatpush.bf16.msrb.mxu3 %v3944_v44  ;;  %v4377_v44 = vld [vmem:[#allocation4 + $0x3cc] sm:$0xf]  ;;  %v3724_v47 = vor.u32 %v4369_v20, %v3721_v28  ;;  %v3705_v2 = vld [vmem:[#allocation4 + $0x378] sm:$0xf0]  ;;  %v4458_v20 = vld [vmem:[#allocation6 + $0x4c] sm:$0xf0] }
 0x14c   : > { %2297 = vmatmul.bf16.gmra.mxu2 %v5208_v30  ;;  %2495 = vmatpush.bf16.msrb.mxu1 %v3996_v15  ;;  %v3756_v7 = vor.u32 %v4377_v44, %v3753_v5  ;;  %v3929_v15 = vld [vmem:[#allocation4 + $0x538] sm:$0xf0]  ;;  %v5406_v28 = vld [vmem:[%s5625_s4] sm:$0xf]  ;;  %v4353_v60 = vld [vmem:[#allocation4 + $0x30c] sm:$0xf] }
 0x14d   : > { %2440 = vmatpush.bf16.msra.mxu2 %v3580_v14  ;;  %v4421_v14 = vld [vmem:[#allocation4 + $0x52c] sm:$0xf] }
 0x14e   : > { %v5336_v58 = vpop.f32.mrf.mxu0  ;;  %2759 = vmatpush.bf16.msra.mxu0 %v5339_v17  ;;  %v3932_v18 = vor.u32 %v4421_v14, %v3929_v15  ;;  %v4185_v14 = vld [vmem:[#allocation6 + $0xd8] sm:$0xf0] }
 0x14f   : > { %2385 = vmatpush.bf16.msrb.mxu3 %v3928_v32 }
 0x150   : > { %2496 = vmatpush.bf16.msrb.mxu1 %v3980_v9 }
 0x151   : > { %2441 = vmatpush.bf16.msra.mxu2 %v3564_v3  ;;  %v4175_v3 = vld [vmem:[#allocation6 + $0xc0] sm:$0xf] }
 0x152   : > { %2760 = vmatpush.bf16.msra.mxu0 %v5342_v11 }
 0x153   : > { %2354 = vmatmul.bf16.gmra.mxu1 %v5221_v51  ;;  %2386 = vmatpush.bf16.msrb.mxu3 %v3912_v16  ;;  %v4176_v16 = vor.u32 %v4474_v40, %v4175_v3  ;;  %v4469_v3 = vld [vmem:[#allocation6 + $0xac] sm:$0xf] }
 0x154   : > { %2497 = vmatpush.bf16.msrb.mxu1 %v3964_v4  ;;  %v4159_v4 = vld [vmem:[#allocation6 + $0xa0] sm:$0xf] }
 0x155   : > { %2442 = vmatpush.bf16.msra.mxu2 %v3548_v43  ;;  %v4455_v43 = vld [vmem:[#allocation6 + $0x34] sm:$0xf0]  ;;  %v4160_v6 = vor.u32 %v4470_v53, %v4159_v4  ;;  %v4153_v53 = vld [vmem:[#allocation6 + $0x98] sm:$0xf0] }
 0x156   : > { %v5345_v45 = vpop.f32.mrf.mxu0  ;;  %4058 = vmatmul.msk.bf16.vlgmr.msra.gmra.mxu3 %vm5004_vm4, %v5234_v0  ;;  %2761 = vmatpush.bf16.msra.mxu0 %v5351_v52  ;;  %v5368_v12 = vor.u32 %v4455_v43, %v4103_v42 }
 0x157   : > { %2455 = vmatpush.bf16.msra.mxu3 %v3772_v61 }
 0x158   : > { %2498 = vmatpush.bf16.msrb.mxu1 %v3948_v13  ;;  %v4365_v13 = vld [vmem:[#allocation4 + $0x36c] sm:$0xf] }
 0x159   : > { %2411 = vmatmul.bf16.gmra.mxu0 %v5208_v30  ;;  %v4191_v30 = vld [vmem:[#allocation6 + $0xe0] sm:$0xf]  ;;  %2443 = vmatpush.bf16.msra.mxu2 %v3532_v21  ;;  %v4201_v21 = vld [vmem:[#allocation6 + $0xf8] sm:$0xf0]  ;;  %v3708_v5 = vor.u32 %v4365_v13, %v3705_v2  ;;  %v4454_v2 = vld [vmem:[#allocation6 + $0x2c] sm:$0xf0] }
 0x15a   : > { %2762 = vmatpush.bf16.msra.mxu0 %v5355_v59  ;;  %v4192_v49 = vor.u32 %v4478_v8, %v4191_v30  ;;  %v4466_v30 = vld [vmem:[#allocation6 + $0x8c] sm:$0xf0]  ;;  %v4473_v8 = vld [vmem:[#allocation6 + $0xcc] sm:$0xf] }
 0x15b   : > { %2456 = vmatpush.bf16.msra.mxu3 %v3756_v7  ;;  %v4144_v7 = vor.u32 %v4466_v30, %v4143_v24  ;;  %v5388_v15 = vor.u32 %v4473_v8, %v4185_v14  ;;  %v4461_v30 = vld [vmem:[#allocation6 + $0x6c] sm:$0xf]  ;;  %v4476_v14 = vld [vmem:[#allocation6 + $0xe4] sm:$0xf] }
 0x15c   : > { %2368 = vmatmul.bf16.vlgmr.msrb.gmra.mxu2 %v5249_v34  ;;  %2499 = vmatpush.bf16.msrb.mxu1 %v3932_v18  ;;  %v4127_v18 = vld [vmem:[#allocation6 + $0x60] sm:$0xf] }
 0x15d   : > { %2720 = vmatpush.bf16.msrb.mxu2 %v4192_v49  ;;  %v4361_v49 = vld [vmem:[#allocation4 + $0x34c] sm:$0xf]  ;;  %v4128_v25 = vor.u32 %v4462_v23, %v4127_v18 }
 0x15e   : > { %v5358_v39 = vpop.f32.mrf.mxu0  ;;  %2763 = vmatpush.bf16.msra.mxu0 %v5363_v33 }
 0x15f   : > { %v5361_v32 = vpop.f32.mrf.mxu2  ;;  %2457 = vmatpush.bf16.msra.mxu3 %v3740_v29  ;;  %v4169_v29 = vld [vmem:[#allocation6 + $0xb8] sm:$0xf0] }
 0x160   : > { %v5365_v9 = vpop.f32.mrf.mxu1  ;;  %2500 = vmatpush.bf16.msrb.mxu1 %v3916_v27  ;;  %v5398_v41 = vor.u32 %v4469_v3, %v4169_v29  ;;  %v4111_v27 = vld [vmem:[#allocation6 + $0x40] sm:$0xf] }
 0x161   : > { %2721 = vmatpush.bf16.msrb.mxu2 %v4176_v16  ;;  %v3673_v16 = vld [vmem:[#allocation4 + $0x338] sm:$0xf0]  ;;  %v4112_v4 = vor.u32 %v4458_v20, %v4111_v27  ;;  %v4177_v20 = vld [vmem:[#allocation6 + $0xd0] sm:$0xf0] }
 0x162   : > { %2764 = vmatpush.bf16.msra.mxu0 %v5368_v12  ;;  %v3676_v43 = vor.u32 %v4357_v37, %v3673_v16  ;;  %v4457_v37 = vld [vmem:[#allocation6 + $0x4c] sm:$0xf]  ;;  %v4121_v16 = vld [vmem:[#allocation6 + $0x58] sm:$0xf0] }
 0x163   : > { %4070 = vmatmul.msk.bf16.vlgmr.msra.gmra.mxu1 %vm5004_vm4, %v5234_v0  ;;  %v5381_v0 = vor.u32 %v4477_v63, %v4201_v21  ;;  %2458 = vmatpush.bf16.msra.mxu3 %v3724_v47  ;;  %v4465_v47 = vld [vmem:[#allocation6 + $0x8c] sm:$0xf]  ;;  %v4095_v63 = vld [vmem:[#allocation6 + $0x20] sm:$0xf]  ;;  %v5412_v21 = vperm.slane %v5406_v28, 0 }
 0x164   : > { %v5408_v54 = vor.u32 %v4465_v47, %v4153_v53 }
 0x165   : > { %2722 = vmatpush.bf16.msrb.mxu2 %v4160_v6  ;;  %2777 = vmatpush.bf16.msra.mxu1 %v5381_v0  ;;  %v3657_v6 = vld [vmem:[#allocation4 + $0x318] sm:$0xf0]  ;;  %v2066_v18 = vadd.f32 %v5361_v32, %v5412_v21  ;;  %v5433_v32 = vperm.slane %v5406_v28, 1 }
 0x166   : > { %v5373_v61 = vpop.f32.mrf.mxu0  ;;  %2316 = vmatmul.bf16.gmra.mxu3 %v5265_v48  ;;  %2765 = vmatpush.bf16.msra.mxu0 %v5376_v62  ;;  %v3660_v13 = vor.u32 %v4353_v60, %v3657_v6  ;;  %v4453_v60 = vld [vmem:[#allocation6 + $0x2c] sm:$0xf]  ;;  %v4105_v6 = vld [vmem:[#allocation6 + $0x38] sm:$0xf0] }
 0x167   : > { %v5378_v57 = vpop.f32.mrf.mxu2  ;;  %2459 = vmatpush.bf16.msra.mxu3 %v3708_v5  ;;  %v4096_v5 = vor.u32 %v4454_v2, %v4095_v63  ;;  %v5442_v2 = vor.u32 %v4453_v60, %v4105_v6  ;;  %v4113_v6 = vld [vmem:[#allocation6 + $0x50] sm:$0xf0] }
 0x168   : > { %v5384_v44 = vpop.f32.mrf.mxu1 }
 0x169   : > { %2482 = vmatmul.bf16.vlgmr.msrb.gmra.mxu0 %v5249_v34  ;;  %v3689_v34 = vld [vmem:[#allocation4 + $0x358] sm:$0xf0]  ;;  %2723 = vmatpush.bf16.msrb.mxu2 %v4144_v7 }
 0x16a   : > { %2778 = vmatpush.bf16.msra.mxu1 %v5388_v15  ;;  %v3692_v22 = vor.u32 %v4361_v49, %v3689_v34  ;;  %v4137_v7 = vld [vmem:[#allocation6 + $0x78] sm:$0xf0]  ;;  %v4193_v49 = vld [vmem:[#allocation6 + $0xf0] sm:$0xf0]  ;;  %v4079_v34 = vld [vmem:[#allocation6] sm:$0xf] }
 0x16b   : > { %v4196_v23 = vor.u32 %v4476_v14, %v4193_v49 }
 0x16c   : > { %4061 = vmatmul.msk.bf16.gmra.mxu2 %vm5102_vm6, %v5277_v55  ;;  %2460 = vmatpush.bf16.msra.mxu3 %v3692_v22 }
 0x16d   : > { %2724 = vmatpush.bf16.msrb.mxu2 %v4128_v25  ;;  %v4450_v25 = vld [vmem:[#allocation6 + $0xc] sm:$0xf0] }
 0x16e   : > { %v5394_v26 = vpop.f32.mrf.mxu0  ;;  %2779 = vmatpush.bf16.msra.mxu1 %v5398_v41  ;;  %v4080_v29 = vor.u32 %v4450_v25, %v4079_v34  ;;  %v4145_v25 = vld [vmem:[#allocation6 + $0x90] sm:$0xf0] }
 0x16f   : > { %v5396_v40 = vpop.f32.mrf.mxu2 }
 0x170   : > { %v5400_v42 = vpop.f32.mrf.mxu1  ;;  %2461 = vmatpush.bf16.msra.mxu3 %v3676_v43  ;;  %v5430_v43 = vor.u32 %v4457_v37, %v4121_v16 }
 0x171   : > { %2725 = vmatpush.bf16.msrb.mxu2 %v4112_v4 }
 0x172   : > { %2780 = vmatpush.bf16.msra.mxu1 %v5408_v54 }
 0x173   : > { %2430 = vmatmul.bf16.gmra.mxu1 %v5265_v48  ;;  %v5420_v48 = vor.u32 %v4461_v30, %v4137_v7  ;;  %v2068_v30 = vadd.f32 %v5378_v57, %v5412_v21  ;;  %v4464_v57 = vld [vmem:[#allocation6 + $0x84] sm:$0xf] }
 0x174   : > { %2462 = vmatpush.bf16.msra.mxu3 %v3660_v13 }
 0x175   : > { %2726 = vmatpush.bf16.msrb.mxu2 %v4096_v5  ;;  %v4161_v5 = vld [vmem:[#allocation6 + $0xb0] sm:$0xf0] }
 0x176   : > { %v5415_v24 = vpop.f32.mrf.mxu0  ;;  %2387 = vmatmul.bf16.vlgmr.msrb.gmra.mxu3 %v5294_v31  ;;  %2781 = vmatpush.bf16.msra.mxu1 %v5420_v48 }
 0x177   : > { %v5417_v8 = vpop.f32.mrf.mxu2 }
 0x178   : > { %v5427_v22 = vpop.f32.mrf.mxu1  ;;  %2739 = vmatpush.bf16.msrb.mxu3 %v4196_v23 }
 0x179   : > { %4073 = vmatmul.msk.bf16.gmra.mxu0 %vm5102_vm6, %v5277_v55  ;;  %v2084_v3 = vpop.f32.mrf.mxu3  ;;  %v4472_v55 = vld [vmem:[#allocation6 + $0xc4] sm:$0xf]  ;;  %2727 = vmatpush.bf16.msrb.mxu2 %v4080_v29  ;;  %v4148_v29 = vor.u32 %v4464_v57, %v4145_v25 }
 0x17a   : > { %v2085_v27 = vadd.f32 %v2084_v3, %v2066_v18  ;;  %v4180_v47 = vor.u32 %v4472_v55, %v4177_v20  ;;  %2782 = vmatpush.bf16.msra.mxu1 %v5430_v43  ;;  %v4089_v18 = vld [vmem:[#allocation6 + $0x18] sm:$0xf0]  ;;  %v2071_v55 = vadd.f32 %v5396_v40, %v5412_v21 }
 0x17c   : > { %2444 = vmatmul.bf16.vlgmr.msra.gmra.mxu2 %v5151_v19  ;;  %v2104_v4 = vadd.f32 %v5327_v50, %v2085_v27  ;;  %2740 = vmatpush.bf16.msrb.mxu3 %v4180_v47  ;;  %v2180_v19 = vadd.f32 %v5373_v61, %v5433_v32  ;;  %v4468_v50 = vld [vmem:[#allocation6 + $0xa4] sm:$0xf] }
 0x17d   : > { %4480 = vmatpush.bf16.msra.mxu2 %v5333_v1  ;;  %v4164_v1 = vor.u32 %v4468_v50, %v4161_v5  ;;  %v4460_v27 = vld [vmem:[#allocation6 + $0x64] sm:$0xf]  ;;  %v2185_v5 = vadd.f32 %v5415_v24, %v5433_v32  ;;  %v4081_v24 = vld [vmem:[#allocation6 + $0x10] sm:$0xf0] }
 0x17e   : > { %v5437_v53 = vpop.f32.mrf.mxu0  ;;  %v2123_v63 = vadd.f32 %v5365_v9, %v2104_v4  ;;  %2783 = vmatpush.bf16.msra.mxu1 %v5442_v2  ;;  %v4449_v9 = vld [vmem:[#allocation6 + $0xc] sm:$0xf] }
 0x17f   : > { %v2141_v13 = vpop.f32.mrf.mxu2  ;;  %v5454_v61 = vor.u32 %v4449_v9, %v4089_v18 }
 0x180   : > { %v5448_v7 = vadd.f32 %v2141_v13, %v2123_v63  ;;  %v2198_v14 = vpop.f32.mrf.mxu1  ;;  %2741 = vmatpush.bf16.msrb.mxu3 %v4164_v1 }
 0x181   : > { %v5450_v49 = vadd.f32 %v2198_v14, %v2180_v19  ;;  %v2086_v34 = vpop.f32.mrf.mxu3  ;;  %4481 = vmatpush.bf16.msra.mxu2 %v5339_v17 }
 0x182   : > { %v2087_v23 = vadd.f32 %v2086_v34, %v2068_v30  ;;  %2784 = vmatpush.bf16.msra.mxu1 %v5454_v61  ;;  %v4097_v30 = vld [vmem:[#allocation6 + $0x30] sm:$0xf0] }
 0x183   : > { %2501 = vmatmul.bf16.vlgmr.msrb.gmra.mxu1 %v5294_v31  ;;  %v2182_v31 = vadd.f32 %v5394_v26, %v5433_v32  ;;  %v4456_v26 = vld [vmem:[#allocation6 + $0x44] sm:$0xf] }
 0x184   : > { %v2106_v3 = vadd.f32 %v5336_v58, %v2087_v23  ;;  %2742 = vmatpush.bf16.msrb.mxu3 %v4148_v29  ;;  %v4129_v58 = vld [vmem:[#allocation6 + $0x70] sm:$0xf0]  ;;  %v4116_v13 = vor.u32 %v4456_v26, %v4113_v6 }
 0x185   : > { %4482 = vmatpush.bf16.msra.mxu2 %v5342_v11  ;;  %v4132_v4 = vor.u32 %v4460_v27, %v4129_v58 }
 0x186   : > { %v5458_v37 = vpop.f32.mrf.mxu0  ;;  %v2125_v17 = vadd.f32 %v5384_v44, %v2106_v3  ;;  %4064 = vmatmul.msk.bf16.gmra.mxu3 %vm5102_vm6, %v5311_v46 }
 0x187   : > { %v2143_v16 = vpop.f32.mrf.mxu2 }
 0x188   : > { %v2144_v20 = vadd.f32 %v2143_v16, %v2125_v17  ;;  %v2200_v11 = vpop.f32.mrf.mxu1  ;;  %2743 = vmatpush.bf16.msrb.mxu3 %v4132_v4 }
 0x189   : > { %2766 = vmatmul.bf16.vlgmr.msra.gmra.mxu0 %v4999_v56  ;;  %v2201_v44 = vadd.f32 %v2200_v11, %v2182_v31  ;;  %v2089_v47 = vpop.f32.mrf.mxu3  ;;  %4483 = vmatpush.bf16.msra.mxu2 %v5351_v52  ;;  %v4452_v52 = vld [vmem:[#allocation6 + $0x24] sm:$0xf] }
 0x18a   : > { %v2090_v60 = vadd.f32 %v2089_v47, %v2071_v55 }
 0x18c   : > { %2449 = vmatmul.bf16.gmra.mxu2 %v5169_v10  ;;  %v2109_v63 = vadd.f32 %v5345_v45, %v2090_v60  ;;  %2744 = vmatpush.bf16.msrb.mxu3 %v4116_v13  ;;  %v2073_v10 = vadd.f32 %v5417_v8, %v5412_v21  ;;  %v4100_v45 = vor.u32 %v4452_v52, %v4097_v30 }
 0x18d   : > { %4484 = vmatpush.bf16.msra.mxu2 %v5355_v59 }
 0x18e   : > { %v5474_v19 = vpop.f32.mrf.mxu0  ;;  %v2128_v40 = vadd.f32 %v5400_v42, %v2109_v63  ;;  %v4448_v42 = vld [vmem:[#allocation6 + $0x4] sm:$0xf] }
 0x18f   : > { %v2146_v50 = vpop.f32.mrf.mxu2  ;;  %v4084_v23 = vor.u32 %v4448_v42, %v4081_v24 }
 0x190   : > { %v2147_v14 = vadd.f32 %v2146_v50, %v2128_v40  ;;  %v2203_v1 = vpop.f32.mrf.mxu1  ;;  %2745 = vmatpush.bf16.msrb.mxu3 %v4100_v45 }
 0x191   : > { %v2204_v34 = vadd.f32 %v2203_v1, %v2185_v5  ;;  %v2091_v9 = vpop.f32.mrf.mxu3  ;;  %4485 = vmatpush.bf16.msra.mxu2 %v5363_v33  ;;  %v2187_v33 = vadd.f32 %v5437_v53, %v5433_v32 }
 0x192   : > { %v2092_v59 = vadd.f32 %v2091_v9, %v2073_v10 }
 0x193   : > { %4076 = vmatmul.msk.bf16.gmra.mxu1 %vm5102_vm6, %v5311_v46 }
 0x194   : > { %v2111_v18 = vadd.f32 %v5358_v39, %v2092_v59  ;;  %2746 = vmatpush.bf16.msrb.mxu3 %v4084_v23 }
 0x195   : > { %4486 = vmatpush.bf16.msra.mxu2 %v5368_v12 }
 0x196   : > { %v5487_v57 = vpop.f32.mrf.mxu0  ;;  %v2130_v21 = vadd.f32 %v5427_v22, %v2111_v18  ;;  %2463 = vmatmul.bf16.vlgmr.msra.gmra.mxu3 %v5192_v35 }
 0x197   : > { %v2148_v8 = vpop.f32.mrf.mxu2 }
 0x198   : > { %v2149_v38 = vadd.f32 %v2148_v8, %v2130_v21  ;;  %v2205_v46 = vpop.f32.mrf.mxu1  ;;  %4488 = vmatpush.bf16.msra.mxu3 %v5381_v0 }
 0x199   : > { %v2206_v25 = vadd.f32 %v2205_v46, %v2187_v33  ;;  %v2160_v39 = vpop.f32.mrf.mxu3  ;;  %4487 = vmatpush.bf16.msra.mxu2 %v5376_v62 }
 0x19a   : > { %v5497_v3 = vadd.f32 %v2160_v39, %v5448_v7 }
 0x19c   : > { %2728 = vmatmul.bf16.vlgmr.msrb.gmra.mxu2 %v4999_v56  ;;  %4489 = vmatpush.bf16.msra.mxu3 %v5388_v15 }
 0x19e   : > { %v2262_v35 = vpop.f32.mrf.mxu0 }
 0x19f   : > { %v2217_v12 = vpop.f32.mrf.mxu2 }
 0x1a0   : > { %v2218_v22 = vadd.f32 %v2217_v12, %v5450_v49  ;;  %v2274_v32 = vpop.f32.mrf.mxu1  ;;  %4490 = vmatpush.bf16.msra.mxu3 %v5398_v41 }
 0x1a1   : > { %v2162_v53 = vpop.f32.mrf.mxu3 }
 0x1a2   : > { %v5503_v0 = vadd.f32 %v2162_v53, %v2144_v20 }
 0x1a3   : > { %2785 = vmatmul.bf16.vlgmr.msra.gmra.mxu1 %v4999_v56 }
 0x1a4   : > { %4491 = vmatpush.bf16.msra.mxu3 %v5408_v54 }
 0x1a6   : > { %v2331_v62 = vpop.f32.mrf.mxu0  ;;  %2468 = vmatmul.bf16.gmra.mxu3 %v5221_v51 }
 0x1a7   : > { %v2219_v7 = vpop.f32.mrf.mxu2 }
 0x1a8   : > { %v2220_v29 = vadd.f32 %v2219_v7, %v2201_v44  ;;  %v2276_v15 = vpop.f32.mrf.mxu1  ;;  %4492 = vmatpush.bf16.msra.mxu3 %v5420_v48 }
 0x1a9   : > { %v2165_v17 = vpop.f32.mrf.mxu3 }
 0x1aa   : > { %v5509_v49 = vadd.f32 %v2165_v17, %v2147_v14 }
 0x1ac   : > { %2733 = vmatmul.bf16.gmra.mxu2 %v5099_v36  ;;  %4493 = vmatpush.bf16.msra.mxu3 %v5430_v43 }
 0x1ae   : > { %v2333_v41 = vpop.f32.mrf.mxu0 }
 0x1af   : > { %v2222_v16 = vpop.f32.mrf.mxu2 }
 0x1b0   : > { %v2223_v31 = vadd.f32 %v2222_v16, %v2204_v34  ;;  %v2279_v27 = vpop.f32.mrf.mxu1  ;;  %4494 = vmatpush.bf16.msra.mxu3 %v5442_v2 }
 0x1b1   : > { %v2167_v54 = vpop.f32.mrf.mxu3 }
 0x1b2   : > { %v5514_v58 = vadd.f32 %v2167_v54, %v2149_v38 }
 0x1b4   : > { %4495 = vmatpush.bf16.msra.mxu3 %v5454_v61 }
 0x1b6   : > { %v2336_v51 = vpop.f32.mrf.mxu0  ;;  %2747 = vmatmul.bf16.vlgmr.msrb.gmra.mxu3 %v4999_v56 }
 0x1b7   : > { %v2224_v48 = vpop.f32.mrf.mxu2 }
 0x1b8   : > { %v2225_v55 = vadd.f32 %v2224_v48, %v2206_v25  ;;  %v2281_v20 = vpop.f32.mrf.mxu1 }
 0x1b9   : > { %v2236_v11 = vpop.f32.mrf.mxu3 }
 0x1ba   : > { %v2237_v4 = vadd.f32 %v2236_v11, %v2218_v22 }
 0x1bc   : > { %2771 = vmatmul.bf16.vlgmr.msra.gmra.mxu2 %v5099_v36  ;;  %v2256_v43 = vadd.f32 %v5458_v37, %v2237_v4 }
 0x1be   : > { %v5520_v47 = vadd.f32 %v2274_v32, %v2256_v43  ;;  %v2338_v2 = vpop.f32.mrf.mxu0 }
 0x1bf   : > { %v2293_v44 = vpop.f32.mrf.mxu2 }
 0x1c0   : > { %v2350_v60 = vpop.f32.mrf.mxu1 }
 0x1c1   : > { %v2238_v26 = vpop.f32.mrf.mxu3 }
 0x1c2   : > { %v2239_v6 = vadd.f32 %v2238_v26, %v2220_v29 }
 0x1c4   : > { %v2258_v61 = vadd.f32 %v5474_v19, %v2239_v6  ;;  %v1090_v19 = vperm.slane %v5406_v28, 2 }
 0x1c6   : > { %2752 = vmatmul.bf16.gmra.mxu3 %v5099_v36  ;;  %v5524_v56 = vadd.f32 %v2276_v15, %v2258_v61  ;;  %v5526_v50 = vpop.f32.mrf.mxu0  ;;  %v2294_v42 = vadd.f32 %v2293_v44, %v1090_v19 }
 0x1c7   : > { %v2295_v63 = vpop.f32.mrf.mxu2 }
 0x1c8   : > { %v2352_v13 = vpop.f32.mrf.mxu1  ;;  %v2296_v38 = vadd.f32 %v2295_v63, %v1090_v19 }
 0x1c9   : > { %v2241_v40 = vpop.f32.mrf.mxu3 }
 0x1ca   : > { %v2242_v5 = vadd.f32 %v2241_v40, %v2223_v31 }
 0x1cc   : > { %v2261_v37 = vadd.f32 %v5487_v57, %v2242_v5 }
 0x1ce   : > { %v5529_v30 = vadd.f32 %v2279_v27, %v2261_v37  ;;  %v5532_v45 = vpop.f32.mrf.mxu0 }
 0x1cf   : > { %v2298_v52 = vpop.f32.mrf.mxu2 }
 0x1d0   : > { %v2355_v10 = vpop.f32.mrf.mxu1  ;;  %v2299_v32 = vadd.f32 %v2298_v52, %v1090_v19 }
 0x1d1   : > { %v2243_v14 = vpop.f32.mrf.mxu3 }
 0x1d2   : > { %v2244_v1 = vadd.f32 %v2243_v14, %v2225_v55 }
 0x1d4   : > { %v2263_v34 = vadd.f32 %v2262_v35, %v2244_v1 }
 0x1d6   : > { %2790 = vmatmul.bf16.vlgmr.msra.gmra.mxu3 %v5099_v36  ;;  %v5535_v59 = vadd.f32 %v2281_v20, %v2263_v34  ;;  %v2412_v21 = vpop.f32.mrf.mxu0 }
 0x1d7   : > { %v2300_v9 = vpop.f32.mrf.mxu2 }
 0x1d8   : > { %v2357_v24 = vpop.f32.mrf.mxu1  ;;  %v2301_v27 = vadd.f32 %v2300_v9, %v1090_v19 }
 0x1d9   : > { %v2312_v18 = vpop.f32.mrf.mxu3 }
 0x1da   : > { %v2313_v23 = vadd.f32 %v2312_v18, %v2294_v42 }
 0x1dc   : > { %v2332_v57 = vadd.f32 %v2331_v62, %v2313_v23  ;;  %v1091_v62 = vperm.slane %v5406_v28, 3 }
 0x1de   : > { %v2351_v8 = vadd.f32 %v2350_v60, %v2332_v57  ;;  %v2414_v36 = vpop.f32.mrf.mxu0  ;;  %v2413_v31 = vadd.f32 %v2412_v21, %v1091_v62  ;;  %v2512_v57 = vmax.f32 %v5497_v3, 0.0 }
 0x1df   : > { %v2369_v33 = vpop.f32.mrf.mxu2  ;;  %v2415_v60 = vadd.f32 %v2414_v36, %v1091_v62 }
 0x1e0   : > { %v5537_v46 = vpop.f32.mrf.mxu1  ;;  %v2370_v9 = vadd.f32 %v2369_v33, %v2351_v8  ;;  %v2516_v8 = vmax.f32 %v5503_v0, 0.0 }
 0x1e1   : > { %v2314_v25 = vpop.f32.mrf.mxu3 }
 0x1e2   : > { %v2315_v39 = vadd.f32 %v2314_v25, %v2296_v38 }
 0x1e4   : > { %v2334_v12 = vadd.f32 %v2333_v41, %v2315_v39 }
 0x1e6   : > { %v2353_v35 = vadd.f32 %v2352_v13, %v2334_v12  ;;  %v2483_v20 = vpop.f32.mrf.mxu0 }
 0x1e7   : > { %v2371_v22 = vpop.f32.mrf.mxu2 }
 0x1e8   : > { %v5539_v53 = vpop.f32.mrf.mxu1  ;;  %v2372_v25 = vadd.f32 %v2371_v22, %v2353_v35 }
 0x1e9   : > { %v2317_v7 = vpop.f32.mrf.mxu3 }
 0x1ea   : > { %v2318_v29 = vadd.f32 %v2317_v7, %v2299_v32 }
 0x1ec   : > { %v2337_v15 = vadd.f32 %v2336_v51, %v2318_v29 }
 0x1ee   : > { %v2356_v17 = vadd.f32 %v2355_v10, %v2337_v15  ;;  %v2485_v61 = vpop.f32.mrf.mxu0  ;;  %v2408_v15 = vadd.f32 %v5526_v50, %v1091_v62 }
 0x1ef   : > { %v2374_v16 = vpop.f32.mrf.mxu2 }
 0x1f0   : > { %v2375_v54 = vadd.f32 %v2374_v16, %v2356_v17  ;;  %v2431_v48 = vpop.f32.mrf.mxu1  ;;  %v2427_v16 = vadd.f32 %v5537_v46, %v2408_v15 }
 0x1f1   : > { %v5542_v55 = vadd.f32 %v2431_v48, %v2413_v31  ;;  %v2319_v41 = vpop.f32.mrf.mxu3 }
 0x1f2   : > { %v2320_v11 = vadd.f32 %v2319_v41, %v2301_v27 }
 0x1f4   : > { %v2339_v4 = vadd.f32 %v2338_v2, %v2320_v11  ;;  %v2410_v11 = vadd.f32 %v5532_v45, %v1091_v62 }
 0x1f6   : > { %v2358_v43 = vadd.f32 %v2357_v24, %v2339_v4  ;;  %v5546_v40 = vpop.f32.mrf.mxu0  ;;  %v2429_v50 = vadd.f32 %v5539_v53, %v2410_v11 }
 0x1f7   : > { %v2376_v44 = vpop.f32.mrf.mxu2 }
 0x1f8   : > { %v2377_v26 = vadd.f32 %v2376_v44, %v2358_v43  ;;  %v2433_v6 = vpop.f32.mrf.mxu1 }
 0x1f9   : > { %v5544_v51 = vadd.f32 %v2433_v6, %v2415_v60  ;;  %v2388_v28 = vpop.f32.mrf.mxu3 }
 0x1fa   : > { %v2389_v24 = vadd.f32 %v2388_v28, %v2370_v9 }
 0x1fc   : > { %v2514_v21 = vmax.f32 %v2389_v24, 0.0 }
 0x1fe   : > { %v5552_v2 = vpop.f32.mrf.mxu0 }
 0x1ff   : > { %v2445_v63 = vpop.f32.mrf.mxu2 }
 0x200   : > { %v2502_v10 = vpop.f32.mrf.mxu1 }
 0x201   : > { %v2390_v13 = vpop.f32.mrf.mxu3 }
 0x202   : > { %v2391_v32 = vadd.f32 %v2390_v13, %v2372_v25  ;;  %v2513_v13 = vmax.f32 %v5520_v47, 0.0 }
 0x204   : > { %v2518_v33 = vmax.f32 %v2391_v32, 0.0 }
 0x206   : > { %v2767_v23 = vpop.f32.mrf.mxu0 }
 0x207   : > { %v2447_v5 = vpop.f32.mrf.mxu2  ;;  %v2798_v39 = vadd.f32 %v2767_v23, %v2514_v21 }
 0x208   : > { %v2504_v42 = vpop.f32.mrf.mxu1  ;;  %v2448_v0 = vadd.f32 %v2447_v5, %v2429_v50 }
 0x209   : > { %v2393_v37 = vpop.f32.mrf.mxu3 }
 0x20a   : > { %v5548_v52 = vadd.f32 %v2393_v37, %v2375_v54  ;;  %v2446_v54 = vadd.f32 %v2445_v63, %v2427_v16 }
 0x20c   : > { %v2522_v5 = vmax.f32 %v5548_v52, 0.0 }
 0x20e   : > { %v2769_v17 = vpop.f32.mrf.mxu0 }
 0x20f   : > { %v5550_v14 = vpop.f32.mrf.mxu2  ;;  %v2802_v3 = vadd.f32 %v2769_v17, %v2518_v33  ;;  %v2524_v33 = vmax.f32 %v5514_v58, 0.0 }
 0x210   : > { %v5559_v36 = vpop.f32.mrf.mxu1 }
 0x211   : > { %v2395_v1 = vpop.f32.mrf.mxu3 }
 0x212   : > { %v5554_v19 = vadd.f32 %v2395_v1, %v2377_v26  ;;  %v4651_v1 = vmov 1966171168  }
 0x213   : > { %v2854_v9 = vunpack.c.l.s4 %v4651_v1 }
 0x214   : > { %v2526_v16 = vmax.f32 %v5554_v19, 0.0 }
 0x217   : > { %v5556_v34 = vpop.f32.mrf.mxu2 }
 0x218   : > { %v5566_v41 = vpop.f32.mrf.mxu1 }
 0x219   : > { %v2464_v18 = vpop.f32.mrf.mxu3 }
 0x21a   : > { %v2465_v48 = vadd.f32 %v2464_v18, %v2446_v54  ;;  %v5575_v18 = vunpack.c.0.s8 %v2854_v9 }
 0x21c   : > { %v2484_v4 = vadd.f32 %v2483_v20, %v2465_v48  ;;  %v2520_v20 = vmax.f32 %v5509_v49, 0.0 }
 0x21e   : > { %v2503_v60 = vadd.f32 %v2502_v10, %v2484_v4  ;;  %v2451_v4 = vadd.f32 %v5550_v14, %v5542_v55  ;;  %v2453_v14 = vadd.f32 %v5556_v34, %v5544_v51 }
 0x21f   : > { %v2729_v38 = vpop.f32.mrf.mxu2 }
 0x220   : > { %v2796_v12 = vadd.f32 %v2729_v38, %v2512_v57  ;;  %v2786_v26 = vpop.f32.mrf.mxu1  ;;  %v2515_v28 = vmax.f32 %v2503_v60, 0.0 }
 0x221   : > { %v2466_v29 = vpop.f32.mrf.mxu3 }
 0x222   : > { %v2812_v7 = vmax.f32 %v2796_v12, %v2798_v39  ;;  %v2467_v46 = vadd.f32 %v2466_v29, %v2448_v0  ;;  %v2799_v24 = vadd.f32 %v2786_v26, %v2515_v28 }
 0x224   : > { %v2486_v6 = vadd.f32 %v2485_v61, %v2467_v46 }
 0x226   : > { %v2505_v45 = vadd.f32 %v2504_v42, %v2486_v6  ;;  %v2517_v42 = vmax.f32 %v5524_v56, 0.0 }
 0x227   : > { %v2731_v31 = vpop.f32.mrf.mxu2 }
 0x228   : > { %v2800_v27 = vadd.f32 %v2731_v31, %v2516_v8  ;;  %v2519_v10 = vmax.f32 %v2505_v45, 0.0  ;;  %v2788_v57 = vpop.f32.mrf.mxu1 }
 0x229   : > { %v5564_v22 = vpop.f32.mrf.mxu3 }
 0x22a   : > { %v2814_v35 = vmax.f32 %v2800_v27, %v2802_v3  ;;  %v2803_v32 = vadd.f32 %v2788_v57, %v2519_v10  ;;  %v2470_v46 = vadd.f32 %v5564_v22, %v2451_v4 }
 0x22f   : > { %v2734_v43 = vpop.f32.mrf.mxu2 }
 0x230   : > { %v2804_v21 = vadd.f32 %v2734_v43, %v2520_v20 }
 0x231   : > { %v5570_v44 = vpop.f32.mrf.mxu3 }
 0x232   : > { %v2472_v22 = vadd.f32 %v5570_v44, %v2453_v14 }
 0x234   : > { %v2491_v1 = vadd.f32 %v5552_v2, %v2472_v22 }
 0x236   : > { %v2510_v45 = vadd.f32 %v5566_v41, %v2491_v1 }
 0x237   : > { %v2736_v63 = vpop.f32.mrf.mxu2 }
 0x238   : > { %v2808_v27 = vadd.f32 %v2736_v63, %v2524_v33  ;;  %v2489_v63 = vadd.f32 %v5546_v40, %v2470_v46  ;;  %v2521_v40 = vmax.f32 %v5529_v30, 0.0 }
 0x239   : > { %v2748_v37 = vpop.f32.mrf.mxu3 }
 0x23a   : > { %v2797_v62 = vadd.f32 %v2748_v37, %v2513_v13  ;;  %v2508_v13 = vadd.f32 %v5559_v36, %v2489_v63 }
 0x23c   : > { %v2813_v53 = vmax.f32 %v2797_v62, %v2799_v24  ;;  %v2523_v37 = vmax.f32 %v2508_v13, 0.0 }
 0x23e   : > { %v2828_v61 = vrot.slane %v2813_v53, 4  ;;  %v2525_v53 = vmax.f32 %v5535_v59, 0.0 }
 0x23f   : > { %v2772_v23 = vpop.f32.mrf.mxu2 }
 0x240   : > { %v2806_v47 = vadd.f32 %v2772_v23, %v2522_v5  ;;  %v2833_v38 = vsel %vm2832_vm7, %v2812_v7, %v2828_v61  ;;  %v2834_v25 = vsel %vm2832_vm7, %v2828_v61, %v2812_v7  ;;  %v2527_v5 = vmax.f32 %v2510_v45, 0.0 }
 0x241   : > { %v2835_v39 = vrot.slane %v2834_v25, 4  ;;  %v2856_v49 = vperm.slane %v2833_v38, %v5575_v18  ;;  %v2750_v52 = vpop.f32.mrf.mxu3 }
 0x242   : > { %v2816_v12 = vmax.f32 %v2804_v21, %v2806_v47  ;;  %v2801_v29 = vadd.f32 %v2750_v52, %v2517_v42 }
 0x243   : > { %v2860_v15 = vperm.slane %v2835_v39, %v5575_v18  ;;  %v2893_v17 = vrot.slane %v2856_v49, 4 }
 0x244   : > { %v2815_v8 = vmax.f32 %v2801_v29, %v2803_v32 }
 0x245   : > { %v2894_v31 = vrot.slane %v2860_v15, 4  ;;  %v2909_v7 = vmax.f32 %v2856_v49, %v2893_v17 }
 0x246   : > { %v2829_v3 = vrot.slane %v2815_v8, 4 }
 0x247   : > { %v2774_v56 = vpop.f32.mrf.mxu2  ;;  %v2910_v54 = vmax.f32 %v2860_v15, %v2894_v31  ;;  %2925 = vst [vmem:[#allocation1] ss:$4 sm:$0xff] %v2909_v7 }
 0x248   : > { %v2810_v48 = vadd.f32 %v2774_v56, %v2526_v16  ;;  %v2836_v11 = vsel %vm2832_vm7, %v2814_v35, %v2829_v3  ;;  %v2837_v50 = vsel %vm2832_vm7, %v2829_v3, %v2814_v35 }
 0x249   : > { %2927 = vst [vmem:[#allocation1 + $0x1] ss:$4 sm:$0xff] %v2910_v54  ;;  %v2838_v58 = vrot.slane %v2837_v50, 4  ;;  %v2864_v19 = vperm.slane %v2836_v11, %v5575_v18  ;;  %v2753_v0 = vpop.f32.mrf.mxu3 }
 0x24a   : > { %v2818_v43 = vmax.f32 %v2808_v27, %v2810_v48  ;;  %v2805_v34 = vadd.f32 %v2753_v0, %v2521_v40 }
 0x24b   : > { %v2868_v60 = vperm.slane %v2838_v58, %v5575_v18  ;;  %v2895_v26 = vrot.slane %v2864_v19, 4 }
 0x24d   : > { %v2896_v6 = vrot.slane %v2868_v60, 4  ;;  %v2911_v28 = vmax.f32 %v2864_v19, %v2895_v26 }
 0x24f   : > { %v2912_v35 = vmax.f32 %v2868_v60, %v2896_v6  ;;  %2929 = vst [vmem:[#allocation1 + $0x2] ss:$4 sm:$0xff] %v2911_v28 }
 0x251   : > { %2931 = vst [vmem:[#allocation1 + $0x3] ss:$4 sm:$0xff] %v2912_v35  ;;  %v2755_v55 = vpop.f32.mrf.mxu3 }
 0x252   : > { %v2809_v23 = vadd.f32 %v2755_v55, %v2525_v53 }
 0x258   : > { %v2940_v9 = vld.sshfl [vmem:[#allocation1] sm:$0xff pattern:$0x73625140]  ;;  %v2941_v24 = vld.sshfl [vmem:[#allocation1 + $0x8] sm:$0xff pattern:$0x73625140] }
 0x259   : > { %2948 = vst [vmem:[%s5600_s30] sm:$0xff] %v2940_v9  ;;  %v2791_v51 = vpop.f32.mrf.mxu3 }
 0x25a   : > { %2949 = vst [vmem:[%s5600_s30 + $0x8] sm:$0xff] %v2941_v24  ;;  %v2807_v36 = vadd.f32 %v2791_v51, %v2523_v37 }
 0x25c   : > { %v2817_v44 = vmax.f32 %v2805_v34, %v2807_v36 }
 0x25e   : > { %v2830_v62 = vrot.slane %v2817_v44, 4 }
 0x260   : > { %v2839_v20 = vsel %vm2832_vm7, %v2816_v12, %v2830_v62  ;;  %v2840_v30 = vsel %vm2832_vm7, %v2830_v62, %v2816_v12 }
 0x261   : > { %v2841_v10 = vrot.slane %v2840_v30, 4  ;;  %v2872_v2 = vperm.slane %v2839_v20, %v5575_v18  ;;  %v2793_v61 = vpop.f32.mrf.mxu3 }
 0x262   : > { %v2811_v57 = vadd.f32 %v2793_v61, %v2527_v5 }
 0x263   : > { %v2876_v21 = vperm.slane %v2841_v10, %v5575_v18  ;;  %v2897_v47 = vrot.slane %v2872_v2, 4 }
 0x264   : > { %v2819_v38 = vmax.f32 %v2809_v23, %v2811_v57 }
 0x265   : > { %v2898_v25 = vrot.slane %v2876_v21, 4  ;;  %v2913_v41 = vmax.f32 %v2872_v2, %v2897_v47 }
 0x266   : > { %v2831_v42 = vrot.slane %v2819_v38, 4 }
 0x267   : > { %v2914_v39 = vmax.f32 %v2876_v21, %v2898_v25  ;;  %2933 = vst [vmem:[#allocation1 + $0x20] ss:$4 sm:$0xff] %v2913_v41 }
 0x268   : > { %v2842_v59 = vsel %vm2832_vm7, %v2818_v43, %v2831_v42  ;;  %v2843_v49 = vsel %vm2832_vm7, %v2831_v42, %v2818_v43 }
 0x269   : > { %2935 = vst [vmem:[#allocation1 + $0x21] ss:$4 sm:$0xff] %v2914_v39  ;;  %v2844_v12 = vrot.slane %v2843_v49, 4  ;;  %v2880_v52 = vperm.slane %v2842_v59, %v5575_v18 }
 0x26b   : > { %v2884_v32 = vperm.slane %v2844_v12, %v5575_v18  ;;  %v2899_v29 = vrot.slane %v2880_v52, 4 }
 0x26d   : > { %v2900_v15 = vrot.slane %v2884_v32, 4  ;;  %v2915_v17 = vmax.f32 %v2880_v52, %v2899_v29 }
 0x26f   : > { %v2916_v8 = vmax.f32 %v2884_v32, %v2900_v15  ;;  %2937 = vst [vmem:[#allocation1 + $0x22] ss:$4 sm:$0xff] %v2915_v17 }
 0x271   : > { %2939 = vst [vmem:[#allocation1 + $0x23] ss:$4 sm:$0xff] %v2916_v8 }
 0x278   : > { %v2942_v33 = vld.sshfl [vmem:[#allocation1 + $0x20] sm:$0xff pattern:$0x73625140]  ;;  %v2943_v16 = vld.sshfl [vmem:[#allocation1 + $0x28] sm:$0xff pattern:$0x73625140] }
 0x279   : > { %2950 = vst [vmem:[%s5600_s30 + $0x10] sm:$0xff] %v2942_v33 }
 0x27a   : > { %2951 = vst [vmem:[%s5600_s30 + $0x18] sm:$0xff] %v2943_v16 }
 0x27b PF: > { %s18_s21 = sadd.s32 1, %s4643_s21  }
 0x27c   : > { %p15_p8 = scmp.ge.s32.totalorder %s18_s21, 4  }
 0x27e   :  { %17 = sbr.rel (!%p15_p8) target bundleno = 2 (0x2), region = 94 }
 0x283   :  { %2976 = vsyncpa [#allocation3], 1 }
 0x284   :  { %2978 = vsyncpa [#allocation3 + $0x1], 1 }
 0x285   :  { %2979 = vsyncpa [#allocation5], 1 }

// kernel: lenet_res_dropout.4
= control target key start
LH: loop header
LB: loop body
LE: loop exit
PB: predicated region body
PF: predicated region fallthrough
CT: control target
= control target key end

     0   :  { %11 = vsyncpa [#allocation3], 0  ;;  %s5789_s0 = inlined_call_operand.vmem [shape: f32[32,256], index: 0, kind: input, shape index: {}]   ;;  %s5790_s1 = inlined_call_operand.hbm [shape: bf16[768,256], index: 1, kind: input, shape index: {}]   ;;  %s5791_s2 = inlined_call_operand.vmem [shape: f32[1,256], index: 2, kind: input, shape index: {}]   ;;  %s5792_s3 = inlined_call_operand.hbm [shape: bf16[768,512], index: 3, kind: input, shape index: {}]   ;;  %s5793_s4 = inlined_call_operand.hbm [shape: f32[1,512], index: 4, kind: input, shape index: {}]   ;;  %s5794_s5 = inlined_call_operand.hbm [shape: bf16[256,512], index: 5, kind: input, shape index: {}]   ;;  %s5795_s6 = inlined_call_operand.vmem [shape: f32[16,256], index: 6, kind: output, shape index: {}]  }
   0x1   :  { %12 = vsyncpa [#allocation5], 0 }
   0x2   :  { %13 = vsyncpa [#allocation8], 0  ;;  %s5451_s21 = smov 0  }
   0x3 LB: > { %s209_s24 = sshll.u32 %s5792_s3, 4  ;;  %s5460_s25 = sadd.s32 4294967295, %s5404_s21   ;;  %s5404_s21 = sphi %s5451_s21, %s19_s21   ;;  %s210_s24 = int_to_ptr.hbm [resolvable:$true] %s209_s24 }
   0x4   : > { %p3359_p0 = scmp.ge.s32.totalorder %s5404_s21, 1  ;;  %p181_p1 = scmp.lt.s32.totalorder %s5404_s21, 3 }
   0x5   : > { %p5240_p2 = scmp.eq.s32.totalorder %s5460_s25, 0  ;;  %s5406_s27 = smov [#allocation4]  }
   0x6   : > { %p5465_p3 = pnand %p3359_p0, %p181_p1  ;;  %s211_s28 = sshll.u32 %s5406_s27, 4  ;;  %s212_s28 = int_to_ptr.vmem [resolvable:$true] %s211_s28 }
   0x7   : > { %s192_s7 = sshll.u32 %s5790_s1, 4  ;;  %s5407_s9 = smov [#allocation2]   ;;  %s193_s7 = int_to_ptr.hbm [resolvable:$true] %s192_s7 }
   0x8   : > { %p5227_p4 = pneg %p5465_p3  ;;  %s194_s10 = sshll.u32 %s5407_s9, 4  ;;  %s195_s10 = int_to_ptr.vmem [resolvable:$true] %s194_s10 }
   0x9   : > { %s5408_s11 = smov 256   ;;  %s5409_s12 = smov 16  }
   0xa   : > { %p5476_p5 = pnand %p5240_p2, %p5227_p4  ;;  %s224_s15 = sshll.u32 %s5793_s4, 4  ;;  %s225_s15 = int_to_ptr.hbm [resolvable:$true] %s224_s15 }
   0xb   : > { %s5410_s16 = smov 128   ;;  %s5411_s17 = smov 8  }
   0xc   : > { %5233 = dma.hbm_to_vmem [thread:$0]  (!%p5476_p5), %s210_s24, 24576, %s212_s28, [#allocation5], %s5408_s11, %s5408_s11, %s5409_s12  }
   0xd   : > { %5230 = dma.hbm_to_vmem [thread:$0]  (!%p5476_p5), %s193_s7, 12288, %s195_s10, [#allocation3], %s5410_s16, %s5410_s16, %s5411_s17  }
   0xe   : > { %s5412_s18 = smov [#allocation6]   ;;  %s235_s23 = sshll.u32 %s5794_s5, 4  ;;  %s236_s23 = int_to_ptr.hbm [resolvable:$true] %s235_s23 }
   0xf   : > { %s226_s19 = sshll.u32 %s5412_s18, 4  ;;  %s5413_s24 = smov [#allocation7]   ;;  %s227_s19 = int_to_ptr.vmem [resolvable:$true] %s226_s19 }
  0x10   : > { %5236 = dma.hbm_to_vmem [thread:$0]  (!%p5476_p5), %s225_s15, 64, %s227_s19, [#allocation5]  }
  0x11   : > { %s237_s27 = sshll.u32 %s5413_s24, 4  ;;  %263 = sbr.rel (%p5465_p3) target bundleno = 634 (0x27a), region = 44  ;;  %s238_s27 = int_to_ptr.vmem [resolvable:$true] %s237_s27 }
  0x12   : > { %5239 = dma.hbm_to_vmem [thread:$0]  (!%p5476_p5), %s236_s23, 8192, %s238_s27, [#allocation8], %s5408_s11, %s5408_s11, %s5409_s12  }
  0x16   : > { %5391 = dma.done.wait (%p5240_p2), [#allocation3], 12288  }
  0x17   : > { %5393 = vsyncadd (%p5240_p2), [#allocation3], 4294955008 }
  0x18   : > { %5395 = dma.done.wait (%p5240_p2), [#allocation5], 24640  }
  0x19   : > { %5397 = vsyncadd (%p5240_p2), [#allocation5], 4294942656 }
  0x1a   : > { %5399 = dma.done.wait (%p5240_p2), [#allocation8], 8192  }
  0x1b   : > { %5401 = vsyncadd (%p5240_p2), [#allocation8], 4294959104  ;;  %v3433_v0 = vld [vmem:[#allocation2 + $0x70] sm:$0xf]  ;;  %v4874_v1 = vld [vmem:[#allocation2 + $0x74] sm:$0xf0] }
  0x1c   : > { %v3497_v2 = vld [vmem:[#allocation2 + $0xf0] sm:$0xf]  ;;  %v3434_v3 = vor.u32 %v4874_v1, %v3433_v0  ;;  %v4890_v4 = vld [vmem:[#allocation2 + $0xf4] sm:$0xf0]  ;;  %v3425_v11 = vld [vmem:[#allocation2 + $0x60] sm:$0xf] }
  0x1d   : > { %v3561_v5 = vld [vmem:[#allocation2 + $0x170] sm:$0xf]  ;;  %v4906_v6 = vld [vmem:[#allocation2 + $0x174] sm:$0xf0]  ;;  %v3498_v7 = vor.u32 %v4890_v4, %v3497_v2  ;;  %v4872_v13 = vld [vmem:[#allocation2 + $0x64] sm:$0xf0] }
  0x1e   : > { %v3562_v8 = vor.u32 %v4906_v6, %v3561_v5  ;;  %v3625_v9 = vld [vmem:[#allocation2 + $0x1f0] sm:$0xf]  ;;  %v4922_v10 = vld [vmem:[#allocation2 + $0x1f4] sm:$0xf0]  ;;  %979 = vmatpush.bf16.msra.mxu0 %v3434_v3  ;;  %v3489_v14 = vld [vmem:[#allocation2 + $0xe0] sm:$0xf]  ;;  %v3426_v16 = vor.u32 %v4872_v13, %v3425_v11 }
  0x1f   : > { %v3626_v12 = vor.u32 %v4922_v10, %v3625_v9  ;;  %v4888_v15 = vld [vmem:[#allocation2 + $0xe4] sm:$0xf0]  ;;  %993 = vmatpush.bf16.msra.mxu1 %v3498_v7  ;;  %v3553_v18 = vld [vmem:[#allocation2 + $0x160] sm:$0xf]  ;;  %v3417_v23 = vld [vmem:[#allocation2 + $0x50] sm:$0xf] }
  0x20   : > { %1007 = vmatpush.bf16.msra.mxu2 %v3562_v8  ;;  %v3490_v17 = vor.u32 %v4888_v15, %v3489_v14  ;;  %v4904_v19 = vld [vmem:[#allocation2 + $0x164] sm:$0xf0]  ;;  %v3617_v20 = vld [vmem:[#allocation2 + $0x1e0] sm:$0xf]  ;;  %v4870_v24 = vld [vmem:[#allocation2 + $0x54] sm:$0xf0] }
  0x21   : > { %1021 = vmatpush.bf16.msra.mxu3 %v3626_v12  ;;  %v3554_v21 = vor.u32 %v4904_v19, %v3553_v18  ;;  %v4920_v22 = vld [vmem:[#allocation2 + $0x1e4] sm:$0xf0]  ;;  %v3481_v26 = vld [vmem:[#allocation2 + $0xd0] sm:$0xf]  ;;  %v4886_v27 = vld [vmem:[#allocation2 + $0xd4] sm:$0xf0]  ;;  %v3418_v29 = vor.u32 %v4870_v24, %v3417_v23 }
  0x22   : > { %v3618_v25 = vor.u32 %v4920_v22, %v3617_v20  ;;  %v3545_v28 = vld [vmem:[#allocation2 + $0x150] sm:$0xf]  ;;  %980 = vmatpush.bf16.msra.mxu0 %v3426_v16  ;;  %v4902_v30 = vld [vmem:[#allocation2 + $0x154] sm:$0xf0]  ;;  %v3482_v33 = vor.u32 %v4886_v27, %v3481_v26  ;;  %v3409_v35 = vld [vmem:[#allocation2 + $0x40] sm:$0xf] }
  0x23   : > { %v3609_v31 = vld [vmem:[#allocation2 + $0x1d0] sm:$0xf]  ;;  %v4918_v32 = vld [vmem:[#allocation2 + $0x1d4] sm:$0xf0]  ;;  %994 = vmatpush.bf16.msra.mxu1 %v3490_v17  ;;  %v3546_v34 = vor.u32 %v4902_v30, %v3545_v28  ;;  %v4868_v36 = vld [vmem:[#allocation2 + $0x44] sm:$0xf0] }
  0x24   : > { %1008 = vmatpush.bf16.msra.mxu2 %v3554_v21  ;;  %v3473_v37 = vld [vmem:[#allocation2 + $0xc0] sm:$0xf]  ;;  %v3610_v38 = vor.u32 %v4918_v32, %v3609_v31  ;;  %v4884_v39 = vld [vmem:[#allocation2 + $0xc4] sm:$0xf0]  ;;  %v3410_v44 = vor.u32 %v4868_v36, %v3409_v35  ;;  %s3370_s26 = sshll.u32 %s5460_s25, 1  ;;  %vm5414_vm2 = vmmov 1  }
  0x25   : > { %1022 = vmatpush.bf16.msra.mxu3 %v3618_v25  ;;  %v3537_v40 = vld [vmem:[#allocation2 + $0x140] sm:$0xf]  ;;  %v4900_v41 = vld [vmem:[#allocation2 + $0x144] sm:$0xf0]  ;;  %v3474_v45 = vor.u32 %v4884_v39, %v3473_v37  ;;  %v3401_v47 = vld [vmem:[#allocation2 + $0x30] sm:$0xf]  ;;  %v326_v39 = vlaneseq }
  0x26   : > { %v3601_v42 = vld [vmem:[#allocation2 + $0x1c0] sm:$0xf]  ;;  %v4916_v43 = vld [vmem:[#allocation2 + $0x1c4] sm:$0xf0]  ;;  %981 = vmatpush.bf16.msra.mxu0 %v3418_v29  ;;  %v3538_v46 = vor.u32 %v4900_v41, %v3537_v40  ;;  %v4866_v48 = vld [vmem:[#allocation2 + $0x34] sm:$0xf0] }
  0x27   : > { %995 = vmatpush.bf16.msra.mxu1 %v3482_v33  ;;  %v3465_v49 = vld [vmem:[#allocation2 + $0xb0] sm:$0xf]  ;;  %v3602_v50 = vor.u32 %v4916_v43, %v3601_v42  ;;  %v4882_v51 = vld [vmem:[#allocation2 + $0xb4] sm:$0xf0]  ;;  %v3402_v56 = vor.u32 %v4866_v48, %v3401_v47  ;;  %p5511_p6 = scmp.lt.s32.totalorder %s3370_s26, 3  ;;  %vm3201_vm7 = vcmask 1043456  }
  0x28   : > { %1009 = vmatpush.bf16.msra.mxu2 %v3546_v34  ;;  %v3529_v52 = vld [vmem:[#allocation2 + $0x130] sm:$0xf]  ;;  %v4898_v53 = vld [vmem:[#allocation2 + $0x134] sm:$0xf0]  ;;  %v3466_v57 = vor.u32 %v4882_v51, %v3465_v49  ;;  %v3393_v59 = vld [vmem:[#allocation2 + $0x20] sm:$0xf] }
  0x29   : > { %1023 = vmatpush.bf16.msra.mxu3 %v3610_v38  ;;  %v3593_v54 = vld [vmem:[#allocation2 + $0x1b0] sm:$0xf]  ;;  %v4914_v55 = vld [vmem:[#allocation2 + $0x1b4] sm:$0xf0]  ;;  %v3530_v58 = vor.u32 %v4898_v53, %v3529_v52  ;;  %v4864_v60 = vld [vmem:[#allocation2 + $0x24] sm:$0xf0] }
  0x2a   : > { %982 = vmatpush.bf16.msra.mxu0 %v3410_v44  ;;  %v3457_v61 = vld [vmem:[#allocation2 + $0xa0] sm:$0xf]  ;;  %v3594_v62 = vor.u32 %v4914_v55, %v3593_v54  ;;  %v4880_v63 = vld [vmem:[#allocation2 + $0xa4] sm:$0xf0]  ;;  %v3394_v4 = vor.u32 %v4864_v60, %v3393_v59  ;;  %s5806_s26 = smov (!%p5511_p6, %s3370_s26), 3  ;;  %p317_p7 = scmp.lt.s32.totalorder %s5460_s25, 1 }
  0x2b   : > { %996 = vmatpush.bf16.msra.mxu1 %v3474_v45  ;;  %v3521_v0 = vld [vmem:[#allocation2 + $0x120] sm:$0xf]  ;;  %v4896_v1 = vld [vmem:[#allocation2 + $0x124] sm:$0xf0]  ;;  %v3458_v5 = vor.u32 %v4880_v63, %v3457_v61  ;;  %v3385_v7 = vld [vmem:[#allocation2 + $0x10] sm:$0xf] }
  0x2c   : > { %1010 = vmatpush.bf16.msra.mxu2 %v3538_v46  ;;  %v3585_v2 = vld [vmem:[#allocation2 + $0x1a0] sm:$0xf]  ;;  %v4912_v3 = vld [vmem:[#allocation2 + $0x1a4] sm:$0xf0]  ;;  %v3522_v6 = vor.u32 %v4896_v1, %v3521_v0  ;;  %v4862_v8 = vld [vmem:[#allocation2 + $0x14] sm:$0xf0] }
  0x2d   : > { %1024 = vmatpush.bf16.msra.mxu3 %v3602_v50  ;;  %v3449_v9 = vld [vmem:[#allocation2 + $0x90] sm:$0xf]  ;;  %v3586_v10 = vor.u32 %v4912_v3, %v3585_v2  ;;  %v4878_v11 = vld [vmem:[#allocation2 + $0x94] sm:$0xf0]  ;;  %v3386_v16 = vor.u32 %v4862_v8, %v3385_v7  ;;  %v3377_v17 = vld [vmem:[#allocation2] sm:$0xf] }
  0x2e   : > { %983 = vmatpush.bf16.msra.mxu0 %v3402_v56  ;;  %v3513_v12 = vld [vmem:[#allocation2 + $0x110] sm:$0xf]  ;;  %v4894_v13 = vld [vmem:[#allocation2 + $0x114] sm:$0xf0]  ;;  %v4860_v18 = vld [vmem:[#allocation2 + $0x4] sm:$0xf0]  ;;  %v3450_v19 = vor.u32 %v4878_v11, %v3449_v9 }
  0x2f   : > { %997 = vmatpush.bf16.msra.mxu1 %v3466_v57  ;;  %v3577_v14 = vld [vmem:[#allocation2 + $0x190] sm:$0xf]  ;;  %v4910_v15 = vld [vmem:[#allocation2 + $0x194] sm:$0xf0]  ;;  %s4857_s29 = sshll.u32 %s5806_s26, 4  ;;  %v3514_v20 = vor.u32 %v4894_v13, %v3513_v12  ;;  %v3378_v31 = vor.u32 %v4860_v18, %v3377_v17  ;;  %v5535_v57 = vshrl.u32 %v326_v39, 7 }
  0x30   : > { %1011 = vmatpush.bf16.msra.mxu2 %v3530_v58  ;;  %v3441_v21 = vld [vmem:[#allocation2 + $0x80] sm:$0xf]  ;;  %v4876_v22 = vld [vmem:[#allocation2 + $0x84] sm:$0xf0]  ;;  %v3578_v24 = vor.u32 %v4910_v15, %v3577_v14  ;;  %v3689_v28 = vld [vmem:[#allocation2 + $0x270] sm:$0xf]  ;;  %s5527_s8 = scalar_lea.vmem %s5789_s0, %s4857_s29 }
  0x31   : > { %1025 = vmatpush.bf16.msra.mxu3 %v3594_v62  ;;  %v3505_v23 = vld [vmem:[#allocation2 + $0x100] sm:$0xf]  ;;  %v4892_v25 = vld [vmem:[#allocation2 + $0x104] sm:$0xf0]  ;;  %v4938_v29 = vld [vmem:[#allocation2 + $0x274] sm:$0xf0]  ;;  %v3442_v35 = vor.u32 %v4876_v22, %v3441_v21 }
  0x32   : > { %984 = vmatpush.bf16.msra.mxu0 %v3394_v4  ;;  %v3569_v26 = vld [vmem:[#allocation2 + $0x180] sm:$0xf]  ;;  %v4908_v27 = vld [vmem:[#allocation2 + $0x184] sm:$0xf0]  ;;  %v3753_v30 = vld [vmem:[#allocation2 + $0x2f0] sm:$0xf]  ;;  %v3506_v36 = vor.u32 %v4892_v25, %v3505_v23  ;;  %v3690_v41 = vor.u32 %v4938_v29, %v3689_v28 }
  0x33   : > { %998 = vmatpush.bf16.msra.mxu1 %v3458_v5  ;;  %v4954_v32 = vld [vmem:[#allocation2 + $0x2f4] sm:$0xf0]  ;;  %v4873_v33 = vld [vmem:[#allocation2 + $0x74] sm:$0xf]  ;;  %v3435_v34 = vld [vmem:[#allocation2 + $0x78] sm:$0xf0]  ;;  %v3570_v40 = vor.u32 %v4908_v27, %v3569_v26 }
  0x34   : > { %1012 = vmatpush.bf16.msra.mxu2 %v3522_v6  ;;  %v4889_v37 = vld [vmem:[#allocation2 + $0xf4] sm:$0xf]  ;;  %v3499_v38 = vld [vmem:[#allocation2 + $0xf8] sm:$0xf0]  ;;  %v3681_v42 = vld [vmem:[#allocation2 + $0x260] sm:$0xf]  ;;  %v3754_v44 = vor.u32 %v4954_v32, %v3753_v30  ;;  %v3438_v45 = vor.u32 %v4873_v33, %v3435_v34 }
  0x35   : > { %1026 = vmatpush.bf16.msra.mxu3 %v3586_v10  ;;  %v4936_v43 = vld [vmem:[#allocation2 + $0x264] sm:$0xf0]  ;;  %v3745_v46 = vld [vmem:[#allocation2 + $0x2e0] sm:$0xf]  ;;  %v4871_v48 = vld [vmem:[#allocation2 + $0x64] sm:$0xf]  ;;  %v3502_v49 = vor.u32 %v4889_v37, %v3499_v38 }
  0x36   : > { %985 = vmatpush.bf16.msra.mxu0 %v3386_v16  ;;  %v4952_v47 = vld [vmem:[#allocation2 + $0x2e4] sm:$0xf0]  ;;  %v3427_v50 = vld [vmem:[#allocation2 + $0x68] sm:$0xf0]  ;;  %v4887_v51 = vld [vmem:[#allocation2 + $0xe4] sm:$0xf]  ;;  %v3682_v53 = vor.u32 %v4936_v43, %v3681_v42 }
  0x37   : > { %999 = vmatpush.bf16.msra.mxu1 %v3450_v19  ;;  %v3491_v52 = vld [vmem:[#allocation2 + $0xe8] sm:$0xf0]  ;;  %v3673_v54 = vld [vmem:[#allocation2 + $0x250] sm:$0xf]  ;;  %v5530_v55 = vld [vmem:[%s5527_s8] sm:$0xff]  ;;  %v3746_v58 = vor.u32 %v4952_v47, %v3745_v46  ;;  %v3430_v0 = vor.u32 %v4871_v48, %v3427_v50  ;;  %v333_v2 = vand.u32 15, %v5535_v57 }
  0x38   : > { %1013 = vmatpush.bf16.msra.mxu2 %v3514_v20  ;;  %v5533_v56 = vld [vmem:[%s5527_s8 + $0x10] sm:$0xff]  ;;  %v4934_v59 = vld [vmem:[#allocation2 + $0x254] sm:$0xf0]  ;;  %v3737_v60 = vld [vmem:[#allocation2 + $0x2d0] sm:$0xf]  ;;  %v357_v61 = vrot.slane %v5530_v55, 7  ;;  %v3494_v4 = vor.u32 %v4887_v51, %v3491_v52 }
  0x39   : > { %1027 = vmatpush.bf16.msra.mxu3 %v3578_v24  ;;  %v359_v62 = vrot.slane %v5533_v56, 7  ;;  %v5541_v63 = vpack.c.bf16 %v5533_v56, %v5530_v55  ;;  %v4950_v1 = vld [vmem:[#allocation2 + $0x2d4] sm:$0xf0]  ;;  %vm361_vm0 = vcmp.lt.s32.totalorder %v5535_v57, 1  ;;  %v5546_v3 = vld [vmem:[%s5527_s8 + $0x8] sm:$0xff]  ;;  %vm353_vm1 = vcmp.gt.s32.totalorder %v333_v2, 0 }
  0x3a   : > { %986 = vmatpush.bf16.msra.mxu0 %v3378_v31  ;;  %v4869_v5 = vld [vmem:[#allocation2 + $0x54] sm:$0xf]  ;;  %v3419_v6 = vld [vmem:[#allocation2 + $0x58] sm:$0xf0]  ;;  %v358_v13 = vrot.slane %v5546_v3, 7  ;;  %v3674_v14 = vor.u32 %v4934_v59, %v3673_v54  ;;  %vm5560_vm3 = vmpackc.low %vm5414_vm2, %vm353_vm1  ;;  %v3738_v18 = vor.u32 %v4950_v1, %v3737_v60  ;;  %vm378_vm4 = vcmp.lt.s32.totalorder %v5535_v57, 7 }
  0x3b   : > { %1000 = vmatpush.bf16.msra.mxu1 %v3442_v35  ;;  %v4885_v7 = vld [vmem:[#allocation2 + $0xd4] sm:$0xf]  ;;  %v362_v8 = vsel %vm361_vm0, %v357_v61, %v359_v62  ;;  %v364_v9 = vsel %vm361_vm0, %v359_v62, %v357_v61  ;;  %v3483_v10 = vld [vmem:[#allocation2 + $0xd8] sm:$0xf0]  ;;  %v3422_v19 = vor.u32 %v4869_v5, %v3419_v6  ;;  %v3665_v20 = vld [vmem:[#allocation2 + $0x240] sm:$0xf] }
  0x3c   : > { %1014 = vmatpush.bf16.msra.mxu2 %v3506_v36  ;;  %v5553_v11 = vpack.c.bf16 %v362_v8, %v364_v9  ;;  %v5556_v12 = vld [vmem:[%s5527_s8 + $0x18] sm:$0xff]  ;;  %v4932_v21 = vld [vmem:[#allocation2 + $0x244] sm:$0xf0]  ;;  %v3729_v22 = vld [vmem:[#allocation2 + $0x2c0] sm:$0xf]  ;;  %v3486_v23 = vor.u32 %v4885_v7, %v3483_v10  ;;  %s5808_s25 = smov (!%p317_p7, %s5460_s25), 1 }
  0x3d   : > { %1028 = vmatpush.bf16.msra.mxu3 %v3570_v40  ;;  %v360_v16 = vrot.slane %v5556_v12, 7  ;;  %v5567_v17 = vpack.c.bf16 %v5556_v12, %v5546_v3  ;;  %v4948_v24 = vld [vmem:[#allocation2 + $0x2c4] sm:$0xf0]  ;;  %v4867_v25 = vld [vmem:[#allocation2 + $0x44] sm:$0xf]  ;;  %v3666_v32 = vor.u32 %v4932_v21, %v3665_v20  ;;  %s4858_s11 = sshll.u32 %s5808_s25, 4 }
  0x3e   : > { %1035 = vmatpush.bf16.msrb.mxu0 %v3690_v41  ;;  %v3411_v26 = vld [vmem:[#allocation2 + $0x48] sm:$0xf0]  ;;  %v4883_v29 = vld [vmem:[#allocation2 + $0xc4] sm:$0xf]  ;;  %v3730_v33 = vor.u32 %v4948_v24, %v3729_v22  ;;  %v3657_v35 = vld [vmem:[#allocation2 + $0x230] sm:$0xf]  ;;  %s321_s14 = scalar_lea.vmem %s5795_s6, %s4858_s11 }
  0x3f   : > { %1049 = vmatpush.bf16.msrb.mxu1 %v3754_v44  ;;  %1015 = vmatmul.bf16.vlgmr.msra.gmra.mxu2 %v5541_v63  ;;  %v363_v27 = vsel %vm361_vm0, %v358_v13, %v360_v16  ;;  %v365_v28 = vsel %vm361_vm0, %v360_v16, %v358_v13  ;;  %v3475_v30 = vld [vmem:[#allocation2 + $0xc8] sm:$0xf0]  ;;  %v3414_v34 = vor.u32 %v4867_v25, %v3411_v26  ;;  %v4930_v36 = vld [vmem:[#allocation2 + $0x234] sm:$0xf0]  ;;  %v3721_v37 = vld [vmem:[#allocation2 + $0x2b0] sm:$0xf] }
  0x40   : > { %1063 = vmatpush.bf16.msrb.mxu2 %v3438_v45  ;;  %3761 = vmatmul.msk.bf16.vlgmr.msra.gmra.mxu0 %vm5560_vm3, %v5553_v11  ;;  %v5576_v31 = vpack.c.bf16 %v363_v27, %v365_v28  ;;  %v3478_v38 = vor.u32 %v4883_v29, %v3475_v30  ;;  %v4946_v39 = vld [vmem:[#allocation2 + $0x2b4] sm:$0xf0]  ;;  %v4865_v40 = vld [vmem:[#allocation2 + $0x34] sm:$0xf]  ;;  %v3403_v41 = vld [vmem:[#allocation2 + $0x38] sm:$0xf0]  ;;  %v3658_v45 = vor.u32 %v4930_v36, %v3657_v35 }
  0x41   : > { %1077 = vmatpush.bf16.msrb.mxu3 %v3502_v49  ;;  %v4881_v42 = vld [vmem:[#allocation2 + $0xb4] sm:$0xf]  ;;  %v3467_v43 = vld [vmem:[#allocation2 + $0xb8] sm:$0xf0]  ;;  %v5583_v44 = vadd.s32 8, %v5535_v57  ;;  %v3722_v46 = vor.u32 %v4946_v39, %v3721_v37  ;;  %v3406_v47 = vor.u32 %v4865_v40, %v3403_v41  ;;  %v374_v25 = vrot.slane %v5530_v55, 1 }
  0x42   : > { %1036 = vmatpush.bf16.msrb.mxu0 %v3682_v53  ;;  %1029 = vmatmul.bf16.vlgmr.msra.gmra.mxu3 %v5567_v17  ;;  %v3649_v48 = vld [vmem:[#allocation2 + $0x220] sm:$0xf]  ;;  %v4928_v49 = vld [vmem:[#allocation2 + $0x224] sm:$0xf0]  ;;  %v3470_v51 = vor.u32 %v4881_v42, %v3467_v43  ;;  %v4863_v53 = vld [vmem:[#allocation2 + $0x24] sm:$0xf] }
  0x43   : > { %1050 = vmatpush.bf16.msrb.mxu1 %v3746_v58  ;;  %v3713_v50 = vld [vmem:[#allocation2 + $0x2a0] sm:$0xf]  ;;  %v4944_v52 = vld [vmem:[#allocation2 + $0x2a4] sm:$0xf0]  ;;  %v3395_v54 = vld [vmem:[#allocation2 + $0x28] sm:$0xf0]  ;;  %v3650_v60 = vor.u32 %v4928_v49, %v3649_v48 }
  0x44   : > { %1064 = vmatpush.bf16.msrb.mxu2 %v3430_v0  ;;  %3764 = vmatmul.msk.bf16.vlgmr.msra.gmra.mxu1 %vm5560_vm3, %v5576_v31  ;;  %v4879_v58 = vld [vmem:[#allocation2 + $0xa4] sm:$0xf]  ;;  %v3459_v59 = vld [vmem:[#allocation2 + $0xa8] sm:$0xf0]  ;;  %v3641_v61 = vld [vmem:[#allocation2 + $0x210] sm:$0xf]  ;;  %v3714_v0 = vor.u32 %v4944_v52, %v3713_v50  ;;  %v3398_v1 = vor.u32 %v4863_v53, %v3395_v54 }
  0x45   : > { %1078 = vmatpush.bf16.msrb.mxu3 %v3494_v4  ;;  %v340_v62 = vand.u32 15, %v5583_v44  ;;  %v4926_v2 = vld [vmem:[#allocation2 + $0x214] sm:$0xf0]  ;;  %v3705_v4 = vld [vmem:[#allocation2 + $0x290] sm:$0xf]  ;;  %v3462_v6 = vor.u32 %v4879_v58, %v3459_v59  ;;  %v376_v26 = vrot.slane %v5533_v56, 1 }
  0x46   : > { %1037 = vmatpush.bf16.msrb.mxu0 %v3674_v14  ;;  %v4942_v5 = vld [vmem:[#allocation2 + $0x294] sm:$0xf0]  ;;  %v4861_v7 = vld [vmem:[#allocation2 + $0x14] sm:$0xf]  ;;  %v3387_v8 = vld [vmem:[#allocation2 + $0x18] sm:$0xf0]  ;;  %v3642_v16 = vor.u32 %v4926_v2, %v3641_v61 }
  0x47   : > { %1051 = vmatpush.bf16.msrb.mxu1 %v3738_v18  ;;  %v4877_v9 = vld [vmem:[#allocation2 + $0x94] sm:$0xf]  ;;  %v3451_v10 = vld [vmem:[#allocation2 + $0x98] sm:$0xf0]  ;;  %v3633_v13 = vld [vmem:[#allocation2 + $0x200] sm:$0xf]  ;;  %v3706_v21 = vor.u32 %v4942_v5, %v3705_v4  ;;  %v3390_v22 = vor.u32 %v4861_v7, %v3387_v8 }
  0x48   : > { %1065 = vmatpush.bf16.msrb.mxu2 %v3422_v19  ;;  %v4924_v14 = vld [vmem:[#allocation2 + $0x204] sm:$0xf0]  ;;  %v3697_v18 = vld [vmem:[#allocation2 + $0x280] sm:$0xf]  ;;  %v4859_v20 = vld [vmem:[#allocation2 + $0x4] sm:$0xf]  ;;  %v3454_v27 = vor.u32 %v4877_v9, %v3451_v10 }
  0x49   : > { %1079 = vmatpush.bf16.msrb.mxu3 %v3486_v23  ;;  %v4940_v19 = vld [vmem:[#allocation2 + $0x284] sm:$0xf0]  ;;  %v3379_v23 = vld [vmem:[#allocation2 + $0x8] sm:$0xf0]  ;;  %v4875_v24 = vld [vmem:[#allocation2 + $0x84] sm:$0xf]  ;;  %v3634_v35 = vor.u32 %v4924_v14, %v3633_v13 }
  0x4a   : > { %1038 = vmatpush.bf16.msrb.mxu0 %v3666_v32  ;;  %v3443_v28 = vld [vmem:[#allocation2 + $0x88] sm:$0xf0]  ;;  %v375_v29 = vrot.slane %v5546_v3, 1  ;;  %v377_v30 = vrot.slane %v5556_v12, 1  ;;  %v4905_v32 = vld [vmem:[#allocation2 + $0x174] sm:$0xf]  ;;  %v3698_v36 = vor.u32 %v4940_v19, %v3697_v18  ;;  %v3382_v37 = vor.u32 %v4859_v20, %v3379_v23 }
  0x4b   : > { %1052 = vmatpush.bf16.msrb.mxu1 %v3730_v33  ;;  %v3563_v33 = vld [vmem:[#allocation2 + $0x178] sm:$0xf0]  ;;  %v4937_v55 = vld [vmem:[#allocation2 + $0x274] sm:$0xf]  ;;  %v3446_v56 = vor.u32 %v4875_v24, %v3443_v28  ;;  %v379_v3 = vsel %vm378_vm4, %v374_v25, %v376_v26  ;;  %v381_v12 = vsel %vm378_vm4, %v376_v26, %v374_v25  ;;  %vm5595_vm5 = vcmp.lt.s32.totalorder %v340_v62, 15 }
  0x4c   : > { %1066 = vmatpush.bf16.msrb.mxu2 %v3414_v34  ;;  %v4921_v34 = vld [vmem:[#allocation2 + $0x1f4] sm:$0xf]  ;;  %v3691_v39 = vld [vmem:[#allocation2 + $0x278] sm:$0xf0]  ;;  %v3566_v42 = vor.u32 %v4905_v32, %v3563_v33  ;;  %v380_v44 = vsel %vm378_vm4, %v375_v29, %v377_v30  ;;  %v4903_v48 = vld [vmem:[#allocation2 + $0x164] sm:$0xf]  ;;  %v5603_v52 = vpack.c.bf16 %v381_v12, %v379_v3 }
  0x4d   : > { %1080 = vmatpush.bf16.msrb.mxu3 %v3478_v38  ;;  %v3627_v38 = vld [vmem:[#allocation2 + $0x1f8] sm:$0xf0]  ;;  %v4953_v40 = vld [vmem:[#allocation2 + $0x2f4] sm:$0xf]  ;;  %v3555_v49 = vld [vmem:[#allocation2 + $0x168] sm:$0xf0] }
  0x4e   : > { %1039 = vmatpush.bf16.msrb.mxu0 %v3658_v45  ;;  %v3755_v41 = vld [vmem:[#allocation2 + $0x2f8] sm:$0xf0]  ;;  %v382_v45 = vsel %vm378_vm4, %v377_v30, %v375_v29  ;;  %v4919_v50 = vld [vmem:[#allocation2 + $0x1e4] sm:$0xf]  ;;  %v3619_v53 = vld [vmem:[#allocation2 + $0x1e8] sm:$0xf0] }
  0x4f   : > { %1053 = vmatpush.bf16.msrb.mxu1 %v3722_v46  ;;  %v3630_v46 = vor.u32 %v4921_v34, %v3627_v38  ;;  %v4935_v54 = vld [vmem:[#allocation2 + $0x264] sm:$0xf]  ;;  %v3683_v58 = vld [vmem:[#allocation2 + $0x268] sm:$0xf0]  ;;  %vm5608_vm6 = vmpackc.low %vm5595_vm5, %vm5414_vm2 }
  0x50   : > { %1067 = vmatpush.bf16.msrb.mxu2 %v3406_v47  ;;  %v3694_v47 = vor.u32 %v4937_v55, %v3691_v39  ;;  %v4951_v61 = vld [vmem:[#allocation2 + $0x2e4] sm:$0xf]  ;;  %v3747_v62 = vld [vmem:[#allocation2 + $0x2e8] sm:$0xf0]  ;;  %v3686_v2 = vor.u32 %v4935_v54, %v3683_v58  ;;  %v4901_v4 = vld [vmem:[#allocation2 + $0x154] sm:$0xf] }
  0x51   : > { %1081 = vmatpush.bf16.msrb.mxu3 %v3470_v51  ;;  %v3758_v51 = vor.u32 %v4953_v40, %v3755_v41  ;;  %v3547_v5 = vld [vmem:[#allocation2 + $0x158] sm:$0xf0]  ;;  %v3750_v7 = vor.u32 %v4951_v61, %v3747_v62  ;;  %v4933_v9 = vld [vmem:[#allocation2 + $0x254] sm:$0xf]  ;;  %v4899_v20 = vld [vmem:[#allocation2 + $0x144] sm:$0xf] }
  0x52   : > { %1040 = vmatpush.bf16.msrb.mxu0 %v3650_v60  ;;  %v5612_v60 = vpack.c.bf16 %v382_v45, %v380_v44  ;;  %v3611_v8 = vld [vmem:[#allocation2 + $0x1d8] sm:$0xf0]  ;;  %v4949_v13 = vld [vmem:[#allocation2 + $0x2d4] sm:$0xf]  ;;  %v3603_v24 = vld [vmem:[#allocation2 + $0x1c8] sm:$0xf0] }
  0x53   : > { %1054 = vmatpush.bf16.msrb.mxu1 %v3714_v0  ;;  %v3558_v0 = vor.u32 %v4903_v48, %v3555_v49  ;;  %v3675_v10 = vld [vmem:[#allocation2 + $0x258] sm:$0xf0]  ;;  %v4931_v25 = vld [vmem:[#allocation2 + $0x244] sm:$0xf]  ;;  %v4897_v30 = vld [vmem:[#allocation2 + $0x134] sm:$0xf] }
  0x54   : > { %1068 = vmatpush.bf16.msrb.mxu2 %v3398_v1  ;;  %v3622_v1 = vor.u32 %v4919_v50, %v3619_v53  ;;  %v3739_v14 = vld [vmem:[#allocation2 + $0x2d8] sm:$0xf0]  ;;  %v3678_v19 = vor.u32 %v4933_v9, %v3675_v10  ;;  %v4947_v26 = vld [vmem:[#allocation2 + $0x2c4] sm:$0xf]  ;;  %v4913_v33 = vld [vmem:[#allocation2 + $0x1b4] sm:$0xf] }
  0x55   : > { %1082 = vmatpush.bf16.msrb.mxu3 %v3462_v6  ;;  %v4917_v6 = vld [vmem:[#allocation2 + $0x1d4] sm:$0xf]  ;;  %v3742_v23 = vor.u32 %v4949_v13, %v3739_v14  ;;  %v3531_v32 = vld [vmem:[#allocation2 + $0x138] sm:$0xf0]  ;;  %v4895_v41 = vld [vmem:[#allocation2 + $0x124] sm:$0xf] }
  0x56   : > { %1041 = vmatpush.bf16.msrb.mxu0 %v3642_v16  ;;  %v3550_v16 = vor.u32 %v4901_v4, %v3547_v5  ;;  %v3614_v18 = vor.u32 %v4917_v6, %v3611_v8  ;;  %v4945_v38 = vld [vmem:[#allocation2 + $0x2b4] sm:$0xf]  ;;  %v3723_v55 = vld [vmem:[#allocation2 + $0x2b8] sm:$0xf0]  ;;  %v3534_v39 = vor.u32 %v4897_v30, %v3531_v32  ;;  %v3523_v3 = vld [vmem:[#allocation2 + $0x128] sm:$0xf0] }
  0x57   : > { %1055 = vmatpush.bf16.msrb.mxu1 %v3706_v21  ;;  %v3539_v21 = vld [vmem:[#allocation2 + $0x148] sm:$0xf0]  ;;  %v4911_v12 = vld [vmem:[#allocation2 + $0x1a4] sm:$0xf]  ;;  %v3526_v48 = vor.u32 %v4895_v41, %v3523_v3  ;;  %v3515_v53 = vld [vmem:[#allocation2 + $0x118] sm:$0xf0] }
  0x58   : > { %1069 = vmatpush.bf16.msrb.mxu2 %v3390_v22  ;;  %v4915_v22 = vld [vmem:[#allocation2 + $0x1c4] sm:$0xf]  ;;  %v3542_v28 = vor.u32 %v4899_v20, %v3539_v21  ;;  %v3587_v43 = vld [vmem:[#allocation2 + $0x1a8] sm:$0xf0]  ;;  %v4909_v54 = vld [vmem:[#allocation2 + $0x194] sm:$0xf] }
  0x59   : > { %1083 = vmatpush.bf16.msrb.mxu3 %v3454_v27  ;;  %v3731_v27 = vld [vmem:[#allocation2 + $0x2c8] sm:$0xf0]  ;;  %v3606_v29 = vor.u32 %v4915_v22, %v3603_v24  ;;  %v4927_v44 = vld [vmem:[#allocation2 + $0x224] sm:$0xf]  ;;  %v3590_v49 = vor.u32 %v4911_v12, %v3587_v43  ;;  %v3579_v61 = vld [vmem:[#allocation2 + $0x198] sm:$0xf0] }
  0x5a   : > { %1042 = vmatpush.bf16.msrb.mxu0 %v3634_v35  ;;  %v3734_v34 = vor.u32 %v4947_v26, %v3731_v27  ;;  %v3595_v35 = vld [vmem:[#allocation2 + $0x1b8] sm:$0xf0]  ;;  %v3651_v45 = vld [vmem:[#allocation2 + $0x228] sm:$0xf0]  ;;  %v4925_v62 = vld [vmem:[#allocation2 + $0x214] sm:$0xf]  ;;  %v3582_v6 = vor.u32 %v4909_v54, %v3579_v61 }
  0x5b   : > { %1056 = vmatpush.bf16.msrb.mxu1 %v3698_v36  ;;  %v4929_v36 = vld [vmem:[#allocation2 + $0x234] sm:$0xf]  ;;  %v3654_v50 = vor.u32 %v4927_v44, %v3651_v45  ;;  %v4891_v5 = vld [vmem:[#allocation2 + $0x104] sm:$0xf]  ;;  %v3507_v8 = vld [vmem:[#allocation2 + $0x108] sm:$0xf0] }
  0x5c   : > { %1070 = vmatpush.bf16.msrb.mxu2 %v3382_v37  ;;  %v3659_v37 = vld [vmem:[#allocation2 + $0x238] sm:$0xf0]  ;;  %v4907_v9 = vld [vmem:[#allocation2 + $0x184] sm:$0xf]  ;;  %v3571_v10 = vld [vmem:[#allocation2 + $0x188] sm:$0xf0]  ;;  %v3510_v22 = vor.u32 %v4891_v5, %v3507_v8 }
  0x5d   : > { %1084 = vmatpush.bf16.msrb.mxu3 %v3446_v56  ;;  %3767 = vmatmul.msk.bf16.vlgmr.msrb.gmra.mxu0 %vm5608_vm6, %v5603_v52  ;;  %v3598_v56 = vor.u32 %v4913_v33, %v3595_v35  ;;  %v3662_v40 = vor.u32 %v4929_v36, %v3659_v37  ;;  %v4923_v14 = vld [vmem:[#allocation2 + $0x204] sm:$0xf]  ;;  %v4153_v20 = vld [vmem:[#allocation4 + $0x2e0] sm:$0xf]  ;;  %v5049_v21 = vld [vmem:[#allocation4 + $0x2ec] sm:$0xf0] }
  0x5e   : > { %1091 = vmatpush.bf16.msra.mxu0 %v3566_v42  ;;  %3770 = vmatmul.msk.bf16.vlgmr.msrb.gmra.mxu1 %vm5608_vm6, %v5612_v60  ;;  %v3726_v42 = vor.u32 %v4945_v38, %v3723_v55  ;;  %v3897_v26 = vld [vmem:[#allocation4 + $0xe0] sm:$0xf]  ;;  %v4985_v27 = vld [vmem:[#allocation4 + $0xec] sm:$0xf0]  ;;  %v4983_v5 = vld [vmem:[#allocation4 + $0xe4] sm:$0xf] }
  0x5f   : > { %1105 = vmatpush.bf16.msra.mxu1 %v3630_v46  ;;  %3773 = vmatmul.msk.bf16.vlgmr.msrb.gmra.mxu2 %vm5560_vm3, %v5553_v11  ;;  %v3667_v11 = vld [vmem:[#allocation2 + $0x248] sm:$0xf0]  ;;  %v4943_v46 = vld [vmem:[#allocation2 + $0x2a4] sm:$0xf]  ;;  %v3881_v32 = vld [vmem:[#allocation4 + $0xc0] sm:$0xf] }
  0x60   : > { %1119 = vmatpush.bf16.msra.mxu2 %v3694_v47  ;;  %3776 = vmatmul.msk.bf16.vlgmr.msrb.gmra.mxu3 %vm5560_vm3, %v5576_v31  ;;  %v3670_v31 = vor.u32 %v4931_v25, %v3667_v11  ;;  %v3715_v47 = vld [vmem:[#allocation2 + $0x2a8] sm:$0xf0]  ;;  %v4154_v11 = vor.u32 %v5049_v21, %v4153_v20  ;;  %v4981_v33 = vld [vmem:[#allocation4 + $0xcc] sm:$0xf0]  ;;  %v3865_v38 = vld [vmem:[#allocation4 + $0xa0] sm:$0xf] }
  0x61   : > { %1133 = vmatpush.bf16.msra.mxu3 %v3758_v51  ;;  %v4893_v51 = vld [vmem:[#allocation2 + $0x114] sm:$0xf]  ;;  %v3718_v58 = vor.u32 %v4943_v46, %v3715_v47  ;;  %v5041_v35 = vld [vmem:[#allocation4 + $0x2ac] sm:$0xf0]  ;;  %v3882_v36 = vor.u32 %v4981_v33, %v3881_v32  ;;  %v3849_v3 = vld [vmem:[#allocation4 + $0x80] sm:$0xf] }
  0x62   : > { %1092 = vmatpush.bf16.msra.mxu0 %v3558_v0  ;;  %v3643_v0 = vld [vmem:[#allocation2 + $0x218] sm:$0xf0]  ;;  %v3518_v4 = vor.u32 %v4893_v51, %v3515_v53  ;;  %v4977_v55 = vld [vmem:[#allocation4 + $0xac] sm:$0xf0]  ;;  %v3833_v44 = vld [vmem:[#allocation4 + $0x60] sm:$0xf] }
  0x63   : > { %1106 = vmatpush.bf16.msra.mxu1 %v3622_v1  ;;  %v4941_v1 = vld [vmem:[#allocation2 + $0x294] sm:$0xf]  ;;  %v4973_v12 = vld [vmem:[#allocation4 + $0x8c] sm:$0xf0]  ;;  %v4073_v46 = vld [vmem:[#allocation4 + $0x240] sm:$0xf] }
  0x64   : > { %1120 = vmatpush.bf16.msra.mxu2 %v3686_v2  ;;  %v3707_v2 = vld [vmem:[#allocation2 + $0x298] sm:$0xf0]  ;;  %v3850_v43 = vor.u32 %v4973_v12, %v3849_v3  ;;  %v4969_v45 = vld [vmem:[#allocation4 + $0x6c] sm:$0xf0]  ;;  %v4057_v53 = vld [vmem:[#allocation4 + $0x220] sm:$0xf] }
  0x65   : > { %1134 = vmatpush.bf16.msra.mxu3 %v3750_v7  ;;  %v3646_v7 = vor.u32 %v4925_v62, %v3643_v0  ;;  %v3710_v13 = vor.u32 %v4941_v1, %v3707_v2  ;;  %v5029_v47 = vld [vmem:[#allocation4 + $0x24c] sm:$0xf0]  ;;  %v3801_v62 = vld [vmem:[#allocation4 + $0x20] sm:$0xf]  ;;  %v3883_v20 = vld [vmem:[#allocation4 + $0xd0] sm:$0xf0] }
  0x66   : > { %1093 = vmatpush.bf16.msra.mxu0 %v3550_v16  ;;  %v3635_v16 = vld [vmem:[#allocation2 + $0x208] sm:$0xf0]  ;;  %v4965_v51 = vld [vmem:[#allocation4 + $0x4c] sm:$0xf0]  ;;  %v4041_v1 = vld [vmem:[#allocation4 + $0x200] sm:$0xf] }
  0x67   : > { %1107 = vmatpush.bf16.msra.mxu1 %v3614_v18  ;;  %v4939_v18 = vld [vmem:[#allocation2 + $0x284] sm:$0xf]  ;;  %v3638_v24 = vor.u32 %v4923_v14, %v3635_v16  ;;  %v5025_v54 = vld [vmem:[#allocation4 + $0x22c] sm:$0xf0]  ;;  %v4265_v32 = vld [vmem:[#allocation4 + $0x3c0] sm:$0xf] }
  0x68   : > { %1121 = vmatpush.bf16.msra.mxu2 %v3678_v19  ;;  %v3699_v19 = vld [vmem:[#allocation2 + $0x288] sm:$0xf0]  ;;  %v4058_v61 = vor.u32 %v5025_v54, %v4057_v53  ;;  %v4961_v0 = vld [vmem:[#allocation4 + $0x2c] sm:$0xf0]  ;;  %v4249_v12 = vld [vmem:[#allocation4 + $0x3a0] sm:$0xf] }
  0x69   : > { %1135 = vmatpush.bf16.msra.mxu3 %v3742_v23  ;;  %v3574_v23 = vor.u32 %v4907_v9, %v3571_v10  ;;  %v3702_v25 = vor.u32 %v4939_v18, %v3699_v19  ;;  %v3802_v2 = vor.u32 %v4961_v0, %v3801_v62  ;;  %v3785_v9 = vld [vmem:[#allocation4] sm:$0xf]  ;;  %v4957_v10 = vld [vmem:[#allocation4 + $0xc] sm:$0xf0]  ;;  %v4979_v19 = vld [vmem:[#allocation4 + $0xc4] sm:$0xf] }
  0x6a   : > { %1094 = vmatpush.bf16.msra.mxu0 %v3542_v28  ;;  %v4137_v28 = vld [vmem:[#allocation4 + $0x2c0] sm:$0xf]  ;;  %v3786_v14 = vor.u32 %v4957_v10, %v3785_v9  ;;  %v5113_v16 = vld [vmem:[#allocation4 + $0x4ec] sm:$0xf0]  ;;  %v3886_v21 = vor.u32 %v4979_v19, %v3883_v20  ;;  %v4963_v0 = vld [vmem:[#allocation4 + $0x44] sm:$0xf] }
  0x6b   : > { %1108 = vmatpush.bf16.msra.mxu1 %v3606_v29  ;;  %v5045_v29 = vld [vmem:[#allocation4 + $0x2cc] sm:$0xf0]  ;;  %v5637_v9 = vld [vmem:[%s5791_s2] sm:$0x3]  ;;  %v3803_v19 = vld [vmem:[#allocation4 + $0x30] sm:$0xf0] }
  0x6c   : > { %1122 = vmatpush.bf16.msra.mxu2 %v3670_v31  ;;  %v3898_v31 = vor.u32 %v4985_v27, %v3897_v26  ;;  %v4138_v30 = vor.u32 %v5045_v29, %v4137_v28  ;;  %v4975_v26 = vld [vmem:[#allocation4 + $0xa4] sm:$0xf]  ;;  %v3867_v27 = vld [vmem:[#allocation4 + $0xb0] sm:$0xf0]  ;;  %v5069_v53 = vld [vmem:[#allocation4 + $0x38c] sm:$0xf0] }
  0x6d   : > { %1136 = vmatpush.bf16.msra.mxu3 %v3734_v34  ;;  %v4121_v34 = vld [vmem:[#allocation4 + $0x2a0] sm:$0xf]  ;;  %v3870_v29 = vor.u32 %v4975_v26, %v3867_v27  ;;  %v5061_v27 = vld [vmem:[#allocation4 + $0x34c] sm:$0xf0]  ;;  %v4795_v59 = vld [vmem:[#allocation7 + $0x190] sm:$0xf0] }
  0x6e   : > { %1095 = vmatpush.bf16.msra.mxu0 %v3534_v39  ;;  %v4122_v37 = vor.u32 %v5041_v35, %v4121_v34  ;;  %v4105_v39 = vld [vmem:[#allocation4 + $0x280] sm:$0xf]  ;;  %v5077_v34 = vld [vmem:[#allocation4 + $0x3cc] sm:$0xf0] }
  0x6f   : > { %1109 = vmatpush.bf16.msra.mxu1 %v3598_v56  ;;  %v5037_v56 = vld [vmem:[#allocation4 + $0x28c] sm:$0xf0]  ;;  %v4377_v35 = vld [vmem:[#allocation4 + $0x4a0] sm:$0xf] }
  0x70   : > { %1123 = vmatpush.bf16.msra.mxu2 %v3662_v40  ;;  %v3866_v40 = vor.u32 %v4977_v55, %v3865_v38  ;;  %v4106_v41 = vor.u32 %v5037_v56, %v4105_v39  ;;  %v4971_v55 = vld [vmem:[#allocation4 + $0x84] sm:$0xf]  ;;  %v3851_v39 = vld [vmem:[#allocation4 + $0x90] sm:$0xf0]  ;;  %v4201_v26 = vld [vmem:[#allocation4 + $0x340] sm:$0xf] }
  0x71   : > { %1137 = vmatpush.bf16.msra.mxu3 %v3726_v42  ;;  %v4089_v42 = vld [vmem:[#allocation4 + $0x260] sm:$0xf]  ;;  %v3854_v56 = vor.u32 %v4971_v55, %v3851_v39  ;;  %v5057_v39 = vld [vmem:[#allocation4 + $0x32c] sm:$0xf0] }
  0x72   : > { %1096 = vmatpush.bf16.msra.mxu0 %v3526_v48  ;;  %v3834_v48 = vor.u32 %v4969_v45, %v3833_v44  ;;  %v4967_v45 = vld [vmem:[#allocation4 + $0x64] sm:$0xf]  ;;  %v4185_v55 = vld [vmem:[#allocation4 + $0x320] sm:$0xf] }
  0x73   : > { %1110 = vmatpush.bf16.msra.mxu1 %v3590_v49  ;;  %v4074_v49 = vor.u32 %v5029_v47, %v4073_v46  ;;  %v3835_v46 = vld [vmem:[#allocation4 + $0x70] sm:$0xf0] }
  0x74   : > { %1124 = vmatpush.bf16.msra.mxu2 %v3654_v50  ;;  %v3817_v50 = vld [vmem:[#allocation4 + $0x40] sm:$0xf]  ;;  %v3838_v47 = vor.u32 %v4967_v45, %v3835_v46  ;;  %v5053_v45 = vld [vmem:[#allocation4 + $0x30c] sm:$0xf0] }
  0x75   : > { %1138 = vmatpush.bf16.msra.mxu3 %v3718_v58  ;;  %v3818_v58 = vor.u32 %v4965_v51, %v3817_v50  ;;  %v4233_v51 = vld [vmem:[#allocation4 + $0x380] sm:$0xf] }
  0x76   : > { %1097 = vmatpush.bf16.msra.mxu0 %v3518_v4  ;;  %v5021_v4 = vld [vmem:[#allocation4 + $0x20c] sm:$0xf0]  ;;  %v4234_v54 = vor.u32 %v5069_v53, %v4233_v51 }
  0x77   : > { %1111 = vmatpush.bf16.msra.mxu1 %v3582_v6  ;;  %v3899_v6 = vld [vmem:[#allocation4 + $0xf0] sm:$0xf0] }
  0x78   : > { %1125 = vmatpush.bf16.msra.mxu2 %v3646_v7  ;;  %v4042_v7 = vor.u32 %v5021_v4, %v4041_v1  ;;  %v3902_v8 = vor.u32 %v4983_v5, %v3899_v6  ;;  %v3819_v1 = vld [vmem:[#allocation4 + $0x50] sm:$0xf0]  ;;  %v3977_v4 = vld [vmem:[#allocation4 + $0x180] sm:$0xf]  ;;  %v5005_v5 = vld [vmem:[#allocation4 + $0x18c] sm:$0xf0] }
  0x79   : > { %1139 = vmatpush.bf16.msra.mxu3 %v3710_v13  ;;  %v4409_v13 = vld [vmem:[#allocation4 + $0x4e0] sm:$0xf]  ;;  %v3978_v6 = vor.u32 %v5005_v5, %v3977_v4  ;;  %v5011_v5 = vld [vmem:[#allocation4 + $0x1c4] sm:$0xf] }
  0x7a   : > { %1098 = vmatpush.bf16.msra.mxu0 %v3510_v22  ;;  %v4410_v18 = vor.u32 %v5113_v16, %v4409_v13  ;;  %v4281_v22 = vld [vmem:[#allocation4 + $0x3e0] sm:$0xf] }
  0x7b   : > { %1112 = vmatpush.bf16.msra.mxu1 %v3574_v23  ;;  %v5081_v23 = vld [vmem:[#allocation4 + $0x3ec] sm:$0xf0]  ;;  %v4329_v13 = vld [vmem:[#allocation4 + $0x440] sm:$0xf] }
  0x7c   : > { %1126 = vmatpush.bf16.msra.mxu2 %v3638_v24  ;;  %v4393_v24 = vld [vmem:[#allocation4 + $0x4c0] sm:$0xf] }
  0x7d   : > { %1140 = vmatpush.bf16.msra.mxu3 %v3702_v25  ;;  %1099 = vmatmul.bf16.vlgmr.msra.gmra.mxu0 %v5541_v63  ;;  %v4282_v25 = vor.u32 %v5081_v23, %v4281_v22  ;;  %v3961_v22 = vld [vmem:[#allocation4 + $0x160] sm:$0xf]  ;;  %v5001_v23 = vld [vmem:[#allocation4 + $0x16c] sm:$0xf0] }
  0x7e   : > { %1113 = vmatmul.bf16.vlgmr.msra.gmra.mxu1 %v5567_v17  ;;  %2343 = vmatpush.bf16.msrb.mxu0 %v3898_v31  ;;  %v4025_v31 = vld [vmem:[#allocation4 + $0x1e0] sm:$0xf] }
  0x7f   : > { %3779 = vmatmul.msk.bf16.vlgmr.msra.gmra.mxu2 %vm5608_vm6, %v5603_v52  ;;  %v5033_v52 = vld [vmem:[#allocation4 + $0x26c] sm:$0xf0] }
  0x80   : > { %2371 = vmatpush.bf16.msrb.mxu2 %v4154_v11  ;;  %3782 = vmatmul.msk.bf16.vlgmr.msra.gmra.mxu3 %vm5608_vm6, %v5612_v60  ;;  %v4090_v60 = vor.u32 %v5033_v52, %v4089_v42  ;;  %v5109_v11 = vld [vmem:[#allocation4 + $0x4cc] sm:$0xf0] }
  0x81   : > { %v4394_v28 = vor.u32 %v5109_v11, %v4393_v24  ;;  %2385 = vmatpush.bf16.msrb.mxu3 %v4282_v25  ;;  %v5073_v42 = vld [vmem:[#allocation4 + $0x3ac] sm:$0xf0]  ;;  %v495_v24 = vperm.slane %v5637_v9, 0  ;;  %v3962_v11 = vor.u32 %v5001_v23, %v3961_v22 }
  0x82   : > { %2344 = vmatpush.bf16.msrb.mxu0 %v3882_v36  ;;  %v5105_v36 = vld [vmem:[#allocation4 + $0x4ac] sm:$0xf0]  ;;  %v4250_v52 = vor.u32 %v5073_v42, %v4249_v12  ;;  %v3929_v42 = vld [vmem:[#allocation4 + $0x120] sm:$0xf] }
  0x83   : > { %v4378_v38 = vor.u32 %v5105_v36, %v4377_v35  ;;  %v3945_v35 = vld [vmem:[#allocation4 + $0x140] sm:$0xf]  ;;  %v4997_v36 = vld [vmem:[#allocation4 + $0x14c] sm:$0xf0] }
  0x84   : > { %2372 = vmatpush.bf16.msrb.mxu2 %v4138_v30  ;;  %v5017_v30 = vld [vmem:[#allocation4 + $0x1ec] sm:$0xf0] }
  0x85   : > { %v4026_v33 = vor.u32 %v5017_v30, %v4025_v31  ;;  %v5089_v31 = vld [vmem:[#allocation4 + $0x42c] sm:$0xf0] }
  0x86   : > { %2345 = vmatpush.bf16.msrb.mxu0 %v3866_v40  ;;  %v4009_v40 = vld [vmem:[#allocation4 + $0x1c0] sm:$0xf] }
  0x87   : > { %2357 = vmatpush.bf16.msrb.mxu1 %v4026_v33  ;;  %v3787_v33 = vld [vmem:[#allocation4 + $0x10] sm:$0xf0] }
  0x88   : > { %2373 = vmatpush.bf16.msrb.mxu2 %v4122_v37  ;;  %v4266_v37 = vor.u32 %v5077_v34, %v4265_v32  ;;  %v4955_v32 = vld [vmem:[#allocation4 + $0x4] sm:$0xf] }
  0x89   : > { %v3790_v34 = vor.u32 %v4955_v32, %v3787_v33 }
  0x8a   : > { %2346 = vmatpush.bf16.msrb.mxu0 %v3850_v43  ;;  %2386 = vmatpush.bf16.msrb.mxu3 %v4266_v37  ;;  %v4361_v43 = vld [vmem:[#allocation4 + $0x480] sm:$0xf] }
  0x8c   : > { %2374 = vmatpush.bf16.msrb.mxu2 %v4106_v41  ;;  %v5013_v41 = vld [vmem:[#allocation4 + $0x1cc] sm:$0xf0] }
  0x8d   : > { %v4010_v3 = vor.u32 %v5013_v41, %v4009_v40  ;;  %v4297_v40 = vld [vmem:[#allocation4 + $0x400] sm:$0xf]  ;;  %v5085_v41 = vld [vmem:[#allocation4 + $0x40c] sm:$0xf0] }
  0x8e   : > { %2347 = vmatpush.bf16.msrb.mxu0 %v3834_v48  ;;  %2387 = vmatpush.bf16.msrb.mxu3 %v4250_v52  ;;  %v3993_v48 = vld [vmem:[#allocation4 + $0x1a0] sm:$0xf]  ;;  %v4993_v52 = vld [vmem:[#allocation4 + $0x12c] sm:$0xf0] }
  0x8f   : > { %2358 = vmatpush.bf16.msrb.mxu1 %v4010_v3  ;;  %v4298_v3 = vor.u32 %v5085_v41, %v4297_v40 }
  0x90   : > { %2375 = vmatpush.bf16.msrb.mxu2 %v4090_v60  ;;  %v5101_v60 = vld [vmem:[#allocation4 + $0x48c] sm:$0xf0] }
  0x91   : > { %v4362_v44 = vor.u32 %v5101_v60, %v4361_v43  ;;  %v3930_v60 = vor.u32 %v4993_v52, %v3929_v42  ;;  %v4995_v52 = vld [vmem:[#allocation4 + $0x144] sm:$0xf] }
  0x92   : > { %2348 = vmatpush.bf16.msrb.mxu0 %v3818_v58  ;;  %v4345_v58 = vld [vmem:[#allocation4 + $0x460] sm:$0xf]  ;;  %2388 = vmatpush.bf16.msrb.mxu3 %v4234_v54 }
  0x93   : > { %v3913_v54 = vld [vmem:[#allocation4 + $0x100] sm:$0xf] }
  0x94   : > { %2376 = vmatpush.bf16.msrb.mxu2 %v4074_v49  ;;  %v5009_v49 = vld [vmem:[#allocation4 + $0x1ac] sm:$0xf0] }
  0x95   : > { %v3994_v50 = vor.u32 %v5009_v49, %v3993_v48  ;;  %v5015_v48 = vld [vmem:[#allocation4 + $0x1e4] sm:$0xf]  ;;  %v4027_v49 = vld [vmem:[#allocation4 + $0x1f0] sm:$0xf0] }
  0x96   : > { %2349 = vmatpush.bf16.msrb.mxu0 %v3802_v2  ;;  %v3822_v2 = vor.u32 %v4963_v0, %v3819_v1  ;;  %v4030_v51 = vor.u32 %v5015_v48, %v4027_v49  ;;  %v4537_v1 = vld [vmem:[#allocation4 + $0x5e0] sm:$0xf] }
  0x97   : > { %2359 = vmatpush.bf16.msrb.mxu1 %v3994_v50 }
  0x98   : > { %2377 = vmatpush.bf16.msrb.mxu2 %v4058_v61  ;;  %v5097_v61 = vld [vmem:[#allocation4 + $0x46c] sm:$0xf0] }
  0x99   : > { %v4346_v62 = vor.u32 %v5097_v61, %v4345_v58  ;;  %v4989_v58 = vld [vmem:[#allocation4 + $0x10c] sm:$0xf0] }
  0x9a   : > { %2350 = vmatpush.bf16.msrb.mxu0 %v3786_v14  ;;  %v5093_v14 = vld [vmem:[#allocation4 + $0x44c] sm:$0xf0]  ;;  %v3914_v0 = vor.u32 %v4989_v58, %v3913_v54  ;;  %v4155_v54 = vld [vmem:[#allocation4 + $0x2f0] sm:$0xf0]  ;;  %v5107_v58 = vld [vmem:[#allocation4 + $0x4c4] sm:$0xf] }
  0x9b   : > { %2360 = vmatpush.bf16.msrb.mxu1 %v3978_v6  ;;  %v4330_v16 = vor.u32 %v5093_v14, %v4329_v13  ;;  %v4011_v6 = vld [vmem:[#allocation4 + $0x1d0] sm:$0xf0]  ;;  %v4521_v13 = vld [vmem:[#allocation4 + $0x5c0] sm:$0xf]  ;;  %v5141_v14 = vld [vmem:[#allocation4 + $0x5cc] sm:$0xf0] }
  0x9c   : > { %2378 = vmatpush.bf16.msrb.mxu2 %v4042_v7  ;;  %v4217_v7 = vld [vmem:[#allocation4 + $0x360] sm:$0xf] }
  0x9e   : > { %2399 = vmatpush.bf16.msra.mxu0 %v4410_v18  ;;  %v4959_v18 = vld [vmem:[#allocation4 + $0x24] sm:$0xf] }
  0x9f   : > { %2361 = vmatpush.bf16.msrb.mxu1 %v3962_v11  ;;  %v4505_v11 = vld [vmem:[#allocation4 + $0x5a0] sm:$0xf] }
  0xa0   : > { %2427 = vmatpush.bf16.msra.mxu2 %v3902_v8  ;;  %v5065_v8 = vld [vmem:[#allocation4 + $0x36c] sm:$0xf0] }
  0xa1   : > { %v4218_v10 = vor.u32 %v5065_v8, %v4217_v7  ;;  %v4014_v7 = vor.u32 %v5011_v5, %v4011_v6 }
  0xa2   : > { %2400 = vmatpush.bf16.msra.mxu0 %v4394_v28  ;;  %v4202_v28 = vor.u32 %v5061_v27, %v4201_v26  ;;  %v5137_v26 = vld [vmem:[#allocation4 + $0x5ac] sm:$0xf0] }
  0xa3   : > { %2389 = vmatpush.bf16.msrb.mxu3 %v4218_v10 }
  0xa4   : > { %2428 = vmatpush.bf16.msra.mxu2 %v3886_v21  ;;  %v3806_v21 = vor.u32 %v4959_v18, %v3803_v19  ;;  %v4522_v18 = vor.u32 %v5141_v14, %v4521_v13  ;;  %v5007_v19 = vld [vmem:[#allocation4 + $0x1a4] sm:$0xf]  ;;  %v4441_v13 = vld [vmem:[#allocation4 + $0x520] sm:$0xf]  ;;  %v5121_v14 = vld [vmem:[#allocation4 + $0x52c] sm:$0xf0] }
  0xa6   : > { %2401 = vmatpush.bf16.msra.mxu0 %v4378_v38  ;;  %v3946_v38 = vor.u32 %v4997_v36, %v3945_v35  ;;  %v5133_v35 = vld [vmem:[#allocation4 + $0x58c] sm:$0xf0] }
  0xa7   : > { %2390 = vmatpush.bf16.msrb.mxu3 %v4202_v28  ;;  %v4506_v28 = vor.u32 %v5137_v26, %v4505_v11  ;;  %v4442_v11 = vor.u32 %v5121_v14, %v4441_v13 }
  0xa8   : > { %2429 = vmatpush.bf16.msra.mxu2 %v3870_v29  ;;  %v4313_v29 = vld [vmem:[#allocation4 + $0x420] sm:$0xf]  ;;  %2362 = vmatpush.bf16.msrb.mxu1 %v3946_v38  ;;  %v3963_v38 = vld [vmem:[#allocation4 + $0x170] sm:$0xf0] }
  0xa9   : > { %v4314_v30 = vor.u32 %v5089_v31, %v4313_v29  ;;  %v5003_v29 = vld [vmem:[#allocation4 + $0x184] sm:$0xf]  ;;  %v3979_v31 = vld [vmem:[#allocation4 + $0x190] sm:$0xf0] }
  0xaa   : > { %2402 = vmatpush.bf16.msra.mxu0 %v4362_v44  ;;  %v4169_v44 = vld [vmem:[#allocation4 + $0x300] sm:$0xf] }
  0xac   : > { %2430 = vmatpush.bf16.msra.mxu2 %v3854_v56  ;;  %v4186_v56 = vor.u32 %v5057_v39, %v4185_v55  ;;  %2363 = vmatpush.bf16.msrb.mxu1 %v3930_v60 }
  0xae   : > { %2403 = vmatpush.bf16.msra.mxu0 %v4346_v62  ;;  %2391 = vmatpush.bf16.msrb.mxu3 %v4186_v56 }
  0xb0   : > { %2431 = vmatpush.bf16.msra.mxu2 %v3838_v47  ;;  %v4170_v47 = vor.u32 %v5053_v45, %v4169_v44  ;;  %2364 = vmatpush.bf16.msrb.mxu1 %v3914_v0  ;;  %v5111_v44 = vld [vmem:[#allocation4 + $0x4e4] sm:$0xf]  ;;  %v4411_v45 = vld [vmem:[#allocation4 + $0x4f0] sm:$0xf0] }
  0xb2   : > { %2404 = vmatpush.bf16.msra.mxu0 %v4330_v16  ;;  %2392 = vmatpush.bf16.msrb.mxu3 %v4170_v47  ;;  %v5047_v47 = vld [vmem:[#allocation4 + $0x2e4] sm:$0xf] }
  0xb4   : > { %2432 = vmatpush.bf16.msra.mxu2 %v3822_v2  ;;  %v5145_v2 = vld [vmem:[#allocation4 + $0x5ec] sm:$0xf0] }
  0xb5   : > { %v4538_v4 = vor.u32 %v5145_v2, %v4537_v1  ;;  %v4395_v2 = vld [vmem:[#allocation4 + $0x4d0] sm:$0xf0] }
  0xb6   : > { %2405 = vmatpush.bf16.msra.mxu0 %v4314_v30  ;;  %2441 = vmatpush.bf16.msra.mxu3 %v4030_v51  ;;  %v3982_v30 = vor.u32 %v5003_v29, %v3979_v31  ;;  %v5125_v51 = vld [vmem:[#allocation4 + $0x54c] sm:$0xf0] }
  0xb7   : > { %2413 = vmatpush.bf16.msra.mxu1 %v4538_v4  ;;  %v3931_v4 = vld [vmem:[#allocation4 + $0x130] sm:$0xf0]  ;;  %v5117_v29 = vld [vmem:[#allocation4 + $0x50c] sm:$0xf0] }
  0xb8   : > { %2433 = vmatpush.bf16.msra.mxu2 %v3806_v21 }
  0xba   : > { %2406 = vmatpush.bf16.msra.mxu0 %v4298_v3  ;;  %2442 = vmatpush.bf16.msra.mxu3 %v4014_v7  ;;  %v4473_v3 = vld [vmem:[#allocation4 + $0x560] sm:$0xf] }
  0xbb   : > { %2414 = vmatpush.bf16.msra.mxu1 %v4522_v18 }
  0xbc   : > { %2434 = vmatpush.bf16.msra.mxu2 %v3790_v34  ;;  %v4489_v34 = vld [vmem:[#allocation4 + $0x580] sm:$0xf] }
  0xbd   : > { %v988_v20 = vpop.f32.mrf.mxu0  ;;  %v4490_v36 = vor.u32 %v5133_v35, %v4489_v34  ;;  %v496_v34 = vperm.slane %v5637_v9, 1  ;;  %v5099_v35 = vld [vmem:[#allocation4 + $0x484] sm:$0xf] }
  0xbe   : > { %v989_v37 = vadd.f32 %v988_v20, %v495_v24  ;;  %v3995_v20 = vld [vmem:[#allocation4 + $0x1b0] sm:$0xf0] }
  0xbf   : > { %v3998_v21 = vor.u32 %v5007_v19, %v3995_v20  ;;  %2415 = vmatpush.bf16.msra.mxu1 %v4506_v28  ;;  %v4398_v19 = vor.u32 %v5107_v58, %v4395_v2  ;;  %v4139_v20 = vld [vmem:[#allocation4 + $0x2d0] sm:$0xf0]  ;;  %v4425_v28 = vld [vmem:[#allocation4 + $0x500] sm:$0xf] }
  0xc0   : > { %v4075_v2 = vld [vmem:[#allocation4 + $0x250] sm:$0xf0] }
  0xc1   : > { %v1002_v25 = vpop.f32.mrf.mxu1  ;;  %2443 = vmatpush.bf16.msra.mxu3 %v3998_v21  ;;  %v4987_v21 = vld [vmem:[#allocation4 + $0x104] sm:$0xf] }
  0xc2   : > { %v1016_v12 = vpop.f32.mrf.mxu2  ;;  %v1003_v43 = vadd.f32 %v1002_v25, %v989_v37  ;;  %v4999_v37 = vld [vmem:[#allocation4 + $0x164] sm:$0xf] }
  0xc3   : > { %v3966_v55 = vor.u32 %v4999_v37, %v3963_v38  ;;  %2416 = vmatpush.bf16.msra.mxu1 %v4490_v36  ;;  %v4363_v36 = vld [vmem:[#allocation4 + $0x490] sm:$0xf0] }
  0xc4   : > { %v1017_v62 = vadd.f32 %v1016_v12, %v1003_v43  ;;  %v5129_v12 = vld [vmem:[#allocation4 + $0x56c] sm:$0xf0]  ;;  %v3947_v43 = vld [vmem:[#allocation4 + $0x150] sm:$0xf0]  ;;  %v4366_v38 = vor.u32 %v5099_v35, %v4363_v36  ;;  %v4986_v35 = vld [vmem:[#allocation4 + $0xf4] sm:$0xf0] }
  0xc5   : > { %v990_v46 = vpop.f32.mrf.mxu0  ;;  %v1030_v53 = vpop.f32.mrf.mxu3  ;;  %2444 = vmatpush.bf16.msra.mxu3 %v3982_v30  ;;  %v4474_v42 = vor.u32 %v5129_v12, %v4473_v3  ;;  %v5039_v30 = vld [vmem:[#allocation4 + $0x2a4] sm:$0xf] }
  0xc6   : > { %v991_v61 = vadd.f32 %v990_v46, %v495_v24  ;;  %v1031_v10 = vadd.f32 %v1030_v53, %v1017_v62  ;;  %v3950_v46 = vor.u32 %v4995_v52, %v3947_v43  ;;  %v4414_v53 = vor.u32 %v5111_v44, %v4411_v45  ;;  %v4991_v62 = vld [vmem:[#allocation4 + $0x124] sm:$0xf] }
  0xc7   : > { %2417 = vmatpush.bf16.msra.mxu1 %v4474_v42  ;;  %v3934_v5 = vor.u32 %v4991_v62, %v3931_v4  ;;  %v5095_v12 = vld [vmem:[#allocation4 + $0x464] sm:$0xf]  ;;  %v4347_v42 = vld [vmem:[#allocation4 + $0x470] sm:$0xf0] }
  0xc8   : > { %v4350_v44 = vor.u32 %v5095_v12, %v4347_v42  ;;  %v5031_v45 = vld [vmem:[#allocation4 + $0x264] sm:$0xf]  ;;  %v4539_v12 = vld [vmem:[#allocation4 + $0x5f0] sm:$0xf0] }
  0xc9   : > { %v1004_v50 = vpop.f32.mrf.mxu1  ;;  %2445 = vmatpush.bf16.msra.mxu3 %v3966_v55  ;;  %v5035_v55 = vld [vmem:[#allocation4 + $0x284] sm:$0xf] }
  0xca   : > { %v1005_v8 = vadd.f32 %v1004_v50, %v991_v61  ;;  %v1018_v16 = vpop.f32.mrf.mxu2  ;;  %v4457_v50 = vld [vmem:[#allocation4 + $0x540] sm:$0xf]  ;;  %v5087_v4 = vld [vmem:[#allocation4 + $0x424] sm:$0xf] }
  0xcb   : > { %v4458_v61 = vor.u32 %v5125_v51, %v4457_v50  ;;  %v4331_v50 = vld [vmem:[#allocation4 + $0x450] sm:$0xf0] }
  0xcc   : > { %v1019_v25 = vadd.f32 %v1018_v16, %v1005_v8  ;;  %v4158_v8 = vor.u32 %v5047_v47, %v4155_v54 }
  0xcd   : > { %v1032_v27 = vpop.f32.mrf.mxu3  ;;  %2446 = vmatpush.bf16.msra.mxu3 %v3950_v46  ;;  %2418 = vmatpush.bf16.msra.mxu1 %v4458_v61  ;;  %v4091_v46 = vld [vmem:[#allocation4 + $0x270] sm:$0xf0] }
  0xce   : > { %v1033_v33 = vadd.f32 %v1032_v27, %v1019_v25  ;;  %v4379_v25 = vld [vmem:[#allocation4 + $0x4b0] sm:$0xf0]  ;;  %v4094_v58 = vor.u32 %v5031_v45, %v4091_v46  ;;  %v5042_v45 = vld [vmem:[#allocation4 + $0x2b4] sm:$0xf0] }
  0xd1   : > { %2447 = vmatpush.bf16.msra.mxu3 %v3934_v5  ;;  %2419 = vmatpush.bf16.msra.mxu1 %v4442_v11  ;;  %v4315_v5 = vld [vmem:[#allocation4 + $0x430] sm:$0xf0]  ;;  %v5050_v11 = vld [vmem:[#allocation4 + $0x2f4] sm:$0xf0] }
  0xda   : > { %v1044_v22 = vpop.f32.mrf.mxu0 }
  0xdb   : > { %v1045_v23 = vadd.f32 %v1044_v22, %v1031_v10  ;;  %v1058_v24 = vpop.f32.mrf.mxu1  ;;  %v5043_v10 = vld [vmem:[#allocation4 + $0x2c4] sm:$0xf]  ;;  %v3915_v22 = vld [vmem:[#allocation4 + $0x110] sm:$0xf0] }
  0xdc   : > { %v3918_v26 = vor.u32 %v4987_v21, %v3915_v22  ;;  %v4142_v27 = vor.u32 %v5043_v10, %v4139_v20  ;;  %v4059_v20 = vld [vmem:[#allocation4 + $0x230] sm:$0xf0] }
  0xdd   : > { %v1059_v32 = vadd.f32 %v1058_v24, %v1045_v23  ;;  %v5103_v24 = vld [vmem:[#allocation4 + $0x4a4] sm:$0xf] }
  0xde   : > { %v4382_v31 = vor.u32 %v5103_v24, %v4379_v25  ;;  %2448 = vmatpush.bf16.msra.mxu3 %v3918_v26  ;;  %v4299_v24 = vld [vmem:[#allocation4 + $0x410] sm:$0xf0]  ;;  %v4161_v25 = vld [vmem:[#allocation4 + $0x2e8] sm:$0xf] }
  0xdf   : > { %v5640_v56 = vmax.f32 %v1059_v32, 0.0  ;;  %v4123_v32 = vld [vmem:[#allocation4 + $0x2b0] sm:$0xf0] }
  0xe0   : > { %v4126_v37 = vor.u32 %v5039_v30, %v4123_v32 }
  0xe1   : > { %v1151_v48 = vrot.slane %v5640_v56, 7 }
  0xe2   : > { %v1046_v39 = vpop.f32.mrf.mxu0  ;;  %v1072_v18 = vpop.f32.mrf.mxu2 }
  0xe3   : > { %v1047_v40 = vadd.f32 %v1046_v39, %v1033_v33  ;;  %v1060_v41 = vpop.f32.mrf.mxu1  ;;  %v1086_v23 = vpop.f32.mrf.mxu3  ;;  %v4426_v33 = vor.u32 %v5117_v29, %v4425_v28  ;;  %v4107_v39 = vld [vmem:[#allocation4 + $0x290] sm:$0xf0]  ;;  %v1073_v3 = vadd.f32 %v1072_v18, %v496_v34  ;;  %v4318_v18 = vor.u32 %v5087_v4, %v4315_v5  ;;  %v5019_v29 = vld [vmem:[#allocation4 + $0x204] sm:$0xf]  ;;  %v4113_v4 = vld [vmem:[#allocation4 + $0x288] sm:$0xf] }
  0xe4   : > { %v5038_v5 = vld [vmem:[#allocation4 + $0x294] sm:$0xf0] }
  0xe5   : > { %v1061_v60 = vadd.f32 %v1060_v41, %v1047_v40  ;;  %2420 = vmatpush.bf16.msra.mxu1 %v4426_v33  ;;  %v1163_v40 = vrot.slane %v5640_v56, 1  ;;  %v4162_v33 = vor.u32 %v5050_v11, %v4161_v25  ;;  %v4097_v25 = vld [vmem:[#allocation4 + $0x268] sm:$0xf]  ;;  %v5034_v11 = vld [vmem:[#allocation4 + $0x274] sm:$0xf0] }
  0xe7   : > { %v5643_v49 = vmax.f32 %v1061_v60, 0.0  ;;  %v4110_v60 = vor.u32 %v5035_v55, %v4107_v39 }
  0xe9   : > { %v1153_v0 = vrot.slane %v5643_v49, 7  ;;  %v5648_v1 = vpack.c.bf16 %v5643_v49, %v5640_v56  ;;  %v1165_v41 = vrot.slane %v5643_v49, 1  ;;  %v5091_v49 = vld [vmem:[#allocation4 + $0x444] sm:$0xf] }
  0xea   : > { %v1074_v52 = vpop.f32.mrf.mxu2  ;;  %v4334_v62 = vor.u32 %v5091_v49, %v4331_v50  ;;  %v4283_v49 = vld [vmem:[#allocation4 + $0x3f0] sm:$0xf0]  ;;  %v5139_v50 = vld [vmem:[#allocation4 + $0x5c4] sm:$0xf] }
  0xeb   : > { %v1155_v6 = vsel %vm361_vm0, %v1151_v48, %v1153_v0  ;;  %v1157_v7 = vsel %vm361_vm0, %v1153_v0, %v1151_v48  ;;  %2379 = vmatmul.bf16.vlgmr.msrb.gmra.mxu2 %v5648_v1  ;;  %v1088_v43 = vpop.f32.mrf.mxu3  ;;  %v1167_v47 = vsel %vm378_vm4, %v1163_v40, %v1165_v41  ;;  %v1169_v56 = vsel %vm378_vm4, %v1165_v41, %v1163_v40  ;;  %v5027_v0 = vld [vmem:[#allocation4 + $0x244] sm:$0xf] }
  0xec   : > { %v5655_v16 = vpack.c.bf16 %v1155_v6, %v1157_v7  ;;  %2483 = vmatpush.bf16.msrb.mxu2 %v4414_v53  ;;  %v1087_v48 = vadd.f32 %v1086_v23, %v1073_v3  ;;  %v1075_v53 = vadd.f32 %v1074_v52, %v496_v34  ;;  %v5670_v61 = vpack.c.bf16 %v1169_v56, %v1167_v47  ;;  %v5083_v23 = vld [vmem:[#allocation4 + $0x404] sm:$0xf]  ;;  %v3905_v34 = vld [vmem:[#allocation4 + $0xe8] sm:$0xf] }
  0xed   : > { %v4078_v14 = vor.u32 %v5027_v0, %v4075_v2  ;;  %v4302_v28 = vor.u32 %v5083_v23, %v4299_v24  ;;  %v3906_v41 = vor.u32 %v4986_v35, %v3905_v34  ;;  %v5143_v3 = vld [vmem:[#allocation4 + $0x5e4] sm:$0xf]  ;;  %v3873_v0 = vld [vmem:[#allocation4 + $0xa8] sm:$0xf]  ;;  %v4978_v2 = vld [vmem:[#allocation4 + $0xb4] sm:$0xf0] }
  0xee   : > { %4553 = vmatmul.msk.bf16.vlgmr.msrb.gmra.mxu0 %vm5560_vm3, %v5655_v16  ;;  %v1089_v7 = vadd.f32 %v1088_v43, %v1075_v53  ;;  %v5079_v47 = vld [vmem:[#allocation4 + $0x3e4] sm:$0xf]  ;;  %v4542_v56 = vor.u32 %v5143_v3, %v4539_v12  ;;  %v3857_v23 = vld [vmem:[#allocation4 + $0x88] sm:$0xf]  ;;  %v4974_v24 = vld [vmem:[#allocation4 + $0x94] sm:$0xf0] }
  0xef   : > { %2455 = vmatpush.bf16.msrb.mxu0 %v4158_v8  ;;  %v3841_v34 = vld [vmem:[#allocation4 + $0x68] sm:$0xf]  ;;  %v4970_v35 = vld [vmem:[#allocation4 + $0x74] sm:$0xf0]  ;;  %v5127_v3 = vld [vmem:[#allocation4 + $0x564] sm:$0xf] }
  0xf0   : > { %2484 = vmatpush.bf16.msrb.mxu2 %v4398_v19  ;;  %v5023_v19 = vld [vmem:[#allocation4 + $0x224] sm:$0xf]  ;;  %v4475_v12 = vld [vmem:[#allocation4 + $0x570] sm:$0xf0] }
  0xf1   : > { %v4062_v26 = vor.u32 %v5023_v19, %v4059_v20  ;;  %v4267_v19 = vld [vmem:[#allocation4 + $0x3d0] sm:$0xf0]  ;;  %v5135_v20 = vld [vmem:[#allocation4 + $0x5a4] sm:$0xf] }
  0xf3   : > { %2456 = vmatpush.bf16.msrb.mxu0 %v4142_v27 }
  0xf4   : > { %2485 = vmatpush.bf16.msrb.mxu2 %v4382_v31  ;;  %v4043_v31 = vld [vmem:[#allocation4 + $0x210] sm:$0xf0] }
  0xf5   : > { %v4046_v39 = vor.u32 %v5019_v29, %v4043_v31  ;;  %v5071_v29 = vld [vmem:[#allocation4 + $0x3a4] sm:$0xf]  ;;  %v4251_v31 = vld [vmem:[#allocation4 + $0x3b0] sm:$0xf0] }
  0xf7   : > { %2457 = vmatpush.bf16.msrb.mxu0 %v4126_v37  ;;  %v4145_v37 = vld [vmem:[#allocation4 + $0x2c8] sm:$0xf] }
  0xf8   : > { %2486 = vmatpush.bf16.msrb.mxu2 %v4366_v38  ;;  %v5046_v38 = vld [vmem:[#allocation4 + $0x2d4] sm:$0xf0] }
  0xf9   : > { %v4146_v43 = vor.u32 %v5046_v38, %v4145_v37  ;;  %v5030_v37 = vld [vmem:[#allocation4 + $0x254] sm:$0xf0]  ;;  %v4254_v38 = vor.u32 %v5071_v29, %v4251_v31  ;;  %v3891_v29 = vld [vmem:[#allocation4 + $0xd8] sm:$0xf0] }
  0xfa   : > { %v1100_v9 = vpop.f32.mrf.mxu0 }
  0xfb   : > { %v1114_v51 = vpop.f32.mrf.mxu1  ;;  %v1101_v54 = vadd.f32 %v1100_v9, %v1087_v48  ;;  %2458 = vmatpush.bf16.msrb.mxu0 %v4110_v60  ;;  %4565 = vmatmul.msk.bf16.vlgmr.msra.gmra.mxu2 %vm5560_vm3, %v5655_v16  ;;  %v3889_v9 = vld [vmem:[#allocation4 + $0xc8] sm:$0xf]  ;;  %v4982_v60 = vld [vmem:[#allocation4 + $0xd4] sm:$0xf0] }
  0xfc   : > { %2487 = vmatpush.bf16.msrb.mxu2 %v4350_v44  ;;  %v4129_v44 = vld [vmem:[#allocation4 + $0x2a8] sm:$0xf]  ;;  %v3890_v48 = vor.u32 %v4982_v60, %v3889_v9  ;;  %v4966_v60 = vld [vmem:[#allocation4 + $0x54] sm:$0xf0] }
  0xfd   : > { %v1115_v8 = vadd.f32 %v1114_v51, %v1101_v54  ;;  %v4523_v51 = vld [vmem:[#allocation4 + $0x5d0] sm:$0xf0]  ;;  %v3825_v9 = vld [vmem:[#allocation4 + $0x48] sm:$0xf] }
  0xfe   : > { %4559 = vmatmul.msk.bf16.vlgmr.msra.gmra.mxu0 %vm5608_vm6, %v5670_v61 }
  0xff   : > { %2459 = vmatpush.bf16.msrb.mxu0 %v4094_v58 }
 0x100   : > { %2488 = vmatpush.bf16.msrb.mxu2 %v4334_v62  ;;  %v4130_v62 = vor.u32 %v5042_v45, %v4129_v44  ;;  %v4065_v44 = vld [vmem:[#allocation4 + $0x228] sm:$0xf]  ;;  %v5026_v45 = vld [vmem:[#allocation4 + $0x234] sm:$0xf0] }
 0x102   : > { %v1128_v6 = vpop.f32.mrf.mxu2  ;;  %v1102_v13 = vpop.f32.mrf.mxu0 }
 0x103   : > { %v1142_v10 = vpop.f32.mrf.mxu3  ;;  %v1129_v21 = vadd.f32 %v1128_v6, %v1115_v8  ;;  %v1103_v22 = vadd.f32 %v1102_v13, %v1089_v7  ;;  %2460 = vmatpush.bf16.msrb.mxu0 %v4078_v14  ;;  %v1116_v27 = vpop.f32.mrf.mxu1  ;;  %v4286_v8 = vor.u32 %v5079_v47, %v4283_v49  ;;  %v4526_v13 = vor.u32 %v5139_v50, %v4523_v51  ;;  %v5063_v50 = vld [vmem:[#allocation4 + $0x364] sm:$0xf]  ;;  %v4219_v51 = vld [vmem:[#allocation4 + $0x370] sm:$0xf0] }
 0x104   : > { %2489 = vmatpush.bf16.msrb.mxu2 %v4318_v18  ;;  %v3874_v14 = vor.u32 %v4978_v2, %v3873_v0  ;;  %v5075_v18 = vld [vmem:[#allocation4 + $0x3c4] sm:$0xf]  ;;  %v3826_v49 = vor.u32 %v4966_v60, %v3825_v9  ;;  %v4459_v0 = vld [vmem:[#allocation4 + $0x550] sm:$0xf0]  ;;  %v3809_v2 = vld [vmem:[#allocation4 + $0x28] sm:$0xf] }
 0x105   : > { %v1143_v30 = vadd.f32 %v1142_v10, %v1129_v21  ;;  %v1117_v32 = vadd.f32 %v1116_v27, %v1103_v22  ;;  %v4114_v21 = vor.u32 %v5038_v5, %v4113_v4  ;;  %v4507_v22 = vld [vmem:[#allocation4 + $0x5b0] sm:$0xf0]  ;;  %v4049_v4 = vld [vmem:[#allocation4 + $0x208] sm:$0xf]  ;;  %v5022_v5 = vld [vmem:[#allocation4 + $0x214] sm:$0xf0] }
 0x106   : > { %v4510_v27 = vor.u32 %v5135_v20, %v4507_v22  ;;  %v5119_v20 = vld [vmem:[#allocation4 + $0x524] sm:$0xf]  ;;  %v4443_v22 = vld [vmem:[#allocation4 + $0x530] sm:$0xf0] }
 0x107   : > { %2461 = vmatpush.bf16.msrb.mxu0 %v4062_v26  ;;  %v5675_v42 = vmax.f32 %v1143_v30, 0.0  ;;  %v4270_v26 = vor.u32 %v5075_v18, %v4267_v19  ;;  %v5131_v30 = vld [vmem:[#allocation4 + $0x584] sm:$0xf]  ;;  %v4203_v19 = vld [vmem:[#allocation4 + $0x350] sm:$0xf0]  ;;  %v4446_v31 = vor.u32 %v5119_v20, %v4443_v22 }
 0x108   : > { %2490 = vmatpush.bf16.msrb.mxu2 %v4302_v28  ;;  %v3858_v28 = vor.u32 %v4974_v24, %v3857_v23  ;;  %v5059_v18 = vld [vmem:[#allocation4 + $0x344] sm:$0xf]  ;;  %v3793_v23 = vld [vmem:[#allocation4 + $0x8] sm:$0xf]  ;;  %v4958_v24 = vld [vmem:[#allocation4 + $0x14] sm:$0xf0] }
 0x109   : > { %v1152_v53 = vrot.slane %v5675_v42, 7  ;;  %v1164_v47 = vrot.slane %v5675_v42, 1  ;;  %v4171_v9 = vld [vmem:[#allocation4 + $0x310] sm:$0xf0]  ;;  %v4001_v22 = vld [vmem:[#allocation4 + $0x1a8] sm:$0xf] }
 0x10a   : > { %v1130_v36 = vpop.f32.mrf.mxu2 }
 0x10b   : > { %v1131_v55 = vadd.f32 %v1130_v36, %v1117_v32  ;;  %v1144_v40 = vpop.f32.mrf.mxu3  ;;  %2462 = vmatpush.bf16.msrb.mxu0 %v4046_v39  ;;  %4571 = vmatmul.msk.bf16.vlgmr.msrb.gmra.mxu2 %vm5608_vm6, %v5670_v61  ;;  %v4098_v32 = vor.u32 %v5034_v11, %v4097_v25  ;;  %v4081_v36 = vld [vmem:[#allocation4 + $0x248] sm:$0xf] }
 0x10c   : > { %2539 = vmatpush.bf16.msra.mxu2 %v4162_v33  ;;  %v4491_v33 = vld [vmem:[#allocation4 + $0x590] sm:$0xf0]  ;;  %v4417_v11 = vld [vmem:[#allocation4 + $0x4e8] sm:$0xf] }
 0x10d   : > { %v1145_v52 = vadd.f32 %v1144_v40, %v1131_v55  ;;  %v5067_v55 = vld [vmem:[#allocation4 + $0x384] sm:$0xf]  ;;  %v4494_v39 = vor.u32 %v5131_v30, %v4491_v33  ;;  %v3842_v40 = vor.u32 %v4970_v35, %v3841_v34  ;;  %v3794_v30 = vor.u32 %v4958_v24, %v3793_v23  ;;  %v4187_v33 = vld [vmem:[#allocation4 + $0x330] sm:$0xf0]  ;;  %v5010_v23 = vld [vmem:[#allocation4 + $0x1b4] sm:$0xf0] }
 0x10e   : > { %2463 = vmatmul.bf16.vlgmr.msrb.gmra.mxu0 %v5648_v1  ;;  %v5115_v35 = vld [vmem:[#allocation4 + $0x504] sm:$0xf]  ;;  %v4241_v24 = vld [vmem:[#allocation4 + $0x388] sm:$0xf] }
 0x10f   : > { %v5677_v46 = vmax.f32 %v1145_v52, 0.0  ;;  %2511 = vmatpush.bf16.msra.mxu0 %v3906_v41  ;;  %v4235_v41 = vld [vmem:[#allocation4 + $0x390] sm:$0xf0] }
 0x110   : > { %2540 = vmatpush.bf16.msra.mxu2 %v4146_v43  ;;  %v4082_v43 = vor.u32 %v5030_v37, %v4081_v36  ;;  %v4427_v36 = vld [vmem:[#allocation4 + $0x510] sm:$0xf0]  ;;  %v4289_v37 = vld [vmem:[#allocation4 + $0x3e8] sm:$0xf] }
 0x111   : > { %v1154_v54 = vrot.slane %v5677_v46, 7  ;;  %v5686_v58 = vpack.c.bf16 %v5677_v46, %v5675_v42  ;;  %v1166_v52 = vrot.slane %v5677_v46, 1  ;;  %v4962_v42 = vld [vmem:[#allocation4 + $0x34] sm:$0xf0] }
 0x113   : > { %v1156_v6 = vsel %vm361_vm0, %v1152_v53, %v1154_v54  ;;  %v1158_v7 = vsel %vm361_vm0, %v1154_v54, %v1152_v53  ;;  %2393 = vmatmul.bf16.vlgmr.msrb.gmra.mxu3 %v5686_v58  ;;  %2512 = vmatpush.bf16.msra.mxu0 %v3890_v48  ;;  %v4478_v48 = vor.u32 %v5127_v3, %v4475_v12  ;;  %v5123_v53 = vld [vmem:[#allocation4 + $0x544] sm:$0xf]  ;;  %v4976_v3 = vld [vmem:[#allocation4 + $0xac] sm:$0xf]  ;;  %v3875_v12 = vld [vmem:[#allocation4 + $0xb8] sm:$0xf0] }
 0x114   : > { %v5694_v10 = vpack.c.bf16 %v1156_v6, %v1158_v7  ;;  %2497 = vmatpush.bf16.msrb.mxu3 %v4542_v56  ;;  %2541 = vmatpush.bf16.msra.mxu2 %v4130_v62  ;;  %v4238_v56 = vor.u32 %v5067_v55, %v4235_v41  ;;  %v1168_v46 = vsel %vm378_vm4, %v1164_v47, %v1166_v52  ;;  %v4984_v7 = vld [vmem:[#allocation4 + $0xec] sm:$0xf]  ;;  %v5082_v55 = vld [vmem:[#allocation4 + $0x3f4] sm:$0xf0] }
 0x115   : > { %v1170_v54 = vsel %vm378_vm4, %v1166_v52, %v1164_v47  ;;  %v4066_v62 = vor.u32 %v5026_v45, %v4065_v44  ;;  %v4222_v6 = vor.u32 %v5063_v50, %v4219_v51  ;;  %v4462_v57 = vor.u32 %v5123_v53, %v4459_v0  ;;  %v4033_v45 = vld [vmem:[#allocation4 + $0x1e8] sm:$0xf]  ;;  %v5018_v47 = vld [vmem:[#allocation4 + $0x1f4] sm:$0xf0] }
 0x116   : > { %4556 = vmatmul.msk.bf16.vlgmr.msrb.gmra.mxu1 %vm5560_vm3, %v5694_v10  ;;  %v4430_v52 = vor.u32 %v5115_v35, %v4427_v36  ;;  %v4290_v60 = vor.u32 %v5082_v55, %v4289_v37  ;;  %v4385_v50 = vld [vmem:[#allocation4 + $0x4a8] sm:$0xf]  ;;  %v5106_v51 = vld [vmem:[#allocation4 + $0x4b4] sm:$0xf0] }
 0x117   : > { %2469 = vmatpush.bf16.msrb.mxu1 %v4286_v8  ;;  %2513 = vmatpush.bf16.msra.mxu0 %v3874_v14  ;;  %v3907_v8 = vld [vmem:[#allocation4 + $0xf8] sm:$0xf0]  ;;  %v3810_v14 = vor.u32 %v4962_v42, %v3809_v2  ;;  %v4386_v2 = vor.u32 %v5106_v51, %v4385_v50  ;;  %v4017_v42 = vld [vmem:[#allocation4 + $0x1c8] sm:$0xf]  ;;  %v5066_v37 = vld [vmem:[#allocation4 + $0x374] sm:$0xf0] }
 0x118   : > { %2498 = vmatpush.bf16.msrb.mxu3 %v4526_v13  ;;  %2542 = vmatpush.bf16.msra.mxu2 %v4114_v21  ;;  %v5708_v13 = vpack.c.bf16 %v1170_v54, %v1168_v46  ;;  %v4050_v21 = vor.u32 %v5022_v5, %v4049_v4  ;;  %v3910_v25 = vor.u32 %v4984_v7, %v3907_v8  ;;  %v4972_v46 = vld [vmem:[#allocation4 + $0x8c] sm:$0xf]  ;;  %v3859_v54 = vld [vmem:[#allocation4 + $0x98] sm:$0xf0]  ;;  %v5014_v4 = vld [vmem:[#allocation4 + $0x1d4] sm:$0xf0] }
 0x119   : > { %v4257_v5 = vld [vmem:[#allocation4 + $0x3a8] sm:$0xf]  ;;  %v5074_v7 = vld [vmem:[#allocation4 + $0x3b4] sm:$0xf0]  ;;  %v5112_v50 = vld [vmem:[#allocation4 + $0x4ec] sm:$0xf] }
 0x11a   : > { %v4369_v8 = vld [vmem:[#allocation4 + $0x488] sm:$0xf]  ;;  %v4258_v20 = vor.u32 %v5074_v7, %v4257_v5  ;;  %v5094_v55 = vld [vmem:[#allocation4 + $0x454] sm:$0xf0]  ;;  %v4419_v51 = vld [vmem:[#allocation4 + $0x4f8] sm:$0xf0] }
 0x11b   : > { %2470 = vmatpush.bf16.msrb.mxu1 %v4270_v26  ;;  %2514 = vmatpush.bf16.msra.mxu0 %v3858_v28  ;;  %v5114_v26 = vld [vmem:[#allocation4 + $0x4f4] sm:$0xf0]  ;;  %v4980_v28 = vld [vmem:[#allocation4 + $0xcc] sm:$0xf]  ;;  %v4225_v35 = vld [vmem:[#allocation4 + $0x368] sm:$0xf] }
 0x11c   : > { %2499 = vmatpush.bf16.msrb.mxu3 %v4510_v27  ;;  %2543 = vmatpush.bf16.msra.mxu2 %v4098_v32  ;;  %v4206_v27 = vor.u32 %v5059_v18, %v4203_v19  ;;  %v5055_v32 = vld [vmem:[#allocation4 + $0x324] sm:$0xf]  ;;  %v4418_v34 = vor.u32 %v5114_v26, %v4417_v11  ;;  %v3843_v18 = vld [vmem:[#allocation4 + $0x78] sm:$0xf0]  ;;  %v4018_v19 = vor.u32 %v5014_v4, %v4017_v42  ;;  %v5070_v11 = vld [vmem:[#allocation4 + $0x394] sm:$0xf0] }
 0x11d   : > { %v4190_v41 = vor.u32 %v5055_v32, %v4187_v33  ;;  %v4353_v26 = vld [vmem:[#allocation4 + $0x468] sm:$0xf]  ;;  %v5058_v42 = vld [vmem:[#allocation4 + $0x334] sm:$0xf0]  ;;  %v5048_v7 = vld [vmem:[#allocation4 + $0x2ec] sm:$0xf] }
 0x11e   : > { %v3985_v33 = vld [vmem:[#allocation4 + $0x188] sm:$0xf]  ;;  %v5086_v5 = vld [vmem:[#allocation4 + $0x414] sm:$0xf0] }
 0x11f   : > { %2471 = vmatpush.bf16.msrb.mxu1 %v4254_v38  ;;  %2515 = vmatpush.bf16.msra.mxu0 %v3842_v40  ;;  %v3894_v38 = vor.u32 %v4980_v28, %v3891_v29  ;;  %v5110_v40 = vld [vmem:[#allocation4 + $0x4d4] sm:$0xf0]  ;;  %v4964_v28 = vld [vmem:[#allocation4 + $0x4c] sm:$0xf]  ;;  %v3827_v29 = vld [vmem:[#allocation4 + $0x58] sm:$0xf0] }
 0x120   : > { %2500 = vmatpush.bf16.msrb.mxu3 %v4494_v39  ;;  %2544 = vmatpush.bf16.msra.mxu2 %v4082_v43  ;;  %v4401_v39 = vld [vmem:[#allocation4 + $0x4c8] sm:$0xf]  ;;  %v5051_v43 = vld [vmem:[#allocation4 + $0x304] sm:$0xf]  ;;  %v3830_v36 = vor.u32 %v4964_v28, %v3827_v29  ;;  %v5044_v28 = vld [vmem:[#allocation4 + $0x2cc] sm:$0xf] }
 0x121   : > { %v4402_v44 = vor.u32 %v5110_v40, %v4401_v39  ;;  %v4174_v53 = vor.u32 %v5051_v43, %v4171_v9  ;;  %v4960_v39 = vld [vmem:[#allocation4 + $0x2c] sm:$0xf]  ;;  %v3811_v40 = vld [vmem:[#allocation4 + $0x38] sm:$0xf0]  ;;  %v5002_v43 = vld [vmem:[#allocation4 + $0x174] sm:$0xf0] }
 0x122   : > { %v4209_v9 = vld [vmem:[#allocation4 + $0x348] sm:$0xf]  ;;  %v4147_v29 = vld [vmem:[#allocation4 + $0x2d8] sm:$0xf0] }
 0x123   : > { %2472 = vmatpush.bf16.msrb.mxu1 %v4238_v56  ;;  %4568 = vmatmul.msk.bf16.vlgmr.msra.gmra.mxu3 %vm5560_vm3, %v5694_v10  ;;  %v4273_v56 = vld [vmem:[#allocation4 + $0x3c8] sm:$0xf] }
 0x124   : > { %2501 = vmatpush.bf16.msrb.mxu3 %v4478_v48  ;;  %2516 = vmatpush.bf16.msra.mxu0 %v3826_v49  ;;  %v3878_v48 = vor.u32 %v4976_v3, %v3875_v12  ;;  %v5078_v49 = vld [vmem:[#allocation4 + $0x3d4] sm:$0xf0]  ;;  %v4226_v3 = vor.u32 %v5066_v37, %v4225_v35  ;;  %v4305_v4 = vld [vmem:[#allocation4 + $0x408] sm:$0xf]  ;;  %v4150_v37 = vor.u32 %v5044_v28, %v4147_v29  ;;  %v4323_v28 = vld [vmem:[#allocation4 + $0x438] sm:$0xf0] }
 0x125   : > { %2545 = vmatpush.bf16.msra.mxu2 %v4066_v62  ;;  %v4034_v62 = vor.u32 %v5018_v47, %v4033_v45  ;;  %v4274_v0 = vor.u32 %v5078_v49, %v4273_v56  ;;  %v4321_v45 = vld [vmem:[#allocation4 + $0x428] sm:$0xf]  ;;  %v5090_v47 = vld [vmem:[#allocation4 + $0x434] sm:$0xf0]  ;;  %v4956_v56 = vld [vmem:[#allocation4 + $0xc] sm:$0xf] }
 0x126   : > { %4562 = vmatmul.msk.bf16.vlgmr.msra.gmra.mxu1 %vm5608_vm6, %v5708_v13  ;;  %v4990_v35 = vld [vmem:[#allocation4 + $0x114] sm:$0xf0] }
 0x127   : > { %2473 = vmatpush.bf16.msrb.mxu1 %v4222_v6  ;;  %v3862_v6 = vor.u32 %v4972_v46, %v3859_v54  ;;  %v4322_v46 = vor.u32 %v5090_v47, %v4321_v45  ;;  %v3953_v54 = vld [vmem:[#allocation4 + $0x148] sm:$0xf]  ;;  %v5142_v47 = vld [vmem:[#allocation4 + $0x5d4] sm:$0xf0] }
 0x128   : > { %2502 = vmatpush.bf16.msrb.mxu3 %v4462_v57  ;;  %2517 = vmatpush.bf16.msra.mxu0 %v3810_v14  ;;  %v5102_v57 = vld [vmem:[#allocation4 + $0x494] sm:$0xf0]  ;;  %v4968_v14 = vld [vmem:[#allocation4 + $0x6c] sm:$0xf]  ;;  %v4529_v45 = vld [vmem:[#allocation4 + $0x5c8] sm:$0xf] }
 0x129   : > { %2546 = vmatpush.bf16.msra.mxu2 %v4050_v21  ;;  %v4370_v21 = vor.u32 %v5102_v57, %v4369_v8  ;;  %v4163_v8 = vld [vmem:[#allocation4 + $0x2f8] sm:$0xf0] }
 0x12b   : > { %2474 = vmatpush.bf16.msrb.mxu1 %v4206_v27  ;;  %v5098_v27 = vld [vmem:[#allocation4 + $0x474] sm:$0xf0] }
 0x12c   : > { %2503 = vmatpush.bf16.msrb.mxu3 %v4446_v31  ;;  %2518 = vmatpush.bf16.msra.mxu0 %v3794_v30  ;;  %v4002_v31 = vor.u32 %v5010_v23, %v4001_v22  ;;  %v4242_v30 = vor.u32 %v5070_v11, %v4241_v24  ;;  %v4354_v32 = vor.u32 %v5098_v27, %v4353_v26  ;;  %v4994_v22 = vld [vmem:[#allocation4 + $0x134] sm:$0xf0]  ;;  %v4177_v24 = vld [vmem:[#allocation4 + $0x308] sm:$0xf]  ;;  %v5016_v11 = vld [vmem:[#allocation4 + $0x1ec] sm:$0xf] }
 0x12d   : > { %2595 = vmatpush.bf16.msrb.mxu2 %v3910_v25  ;;  %v3846_v25 = vor.u32 %v4968_v14, %v3843_v18  ;;  %v5108_v14 = vld [vmem:[#allocation4 + $0x4cc] sm:$0xf]  ;;  %v4403_v18 = vld [vmem:[#allocation4 + $0x4d8] sm:$0xf0]  ;;  %v4166_v23 = vor.u32 %v5048_v7, %v4163_v8 }
 0x12e   : > { %2547 = vmatmul.bf16.vlgmr.msra.gmra.mxu2 %v5648_v1  ;;  %v4406_v26 = vor.u32 %v5108_v14, %v4403_v18  ;;  %v4035_v27 = vld [vmem:[#allocation4 + $0x1f8] sm:$0xf0]  ;;  %v5032_v7 = vld [vmem:[#allocation4 + $0x26c] sm:$0xf] }
 0x12f   : > { %2475 = vmatpush.bf16.msrb.mxu1 %v4190_v41  ;;  %4577 = vmatmul.msk.bf16.vlgmr.msra.gmra.mxu0 %vm5560_vm3, %v5655_v16  ;;  %v4099_v8 = vld [vmem:[#allocation4 + $0x278] sm:$0xf0] }
 0x130   : > { %2567 = vmatpush.bf16.msrb.mxu0 %v4418_v34  ;;  %2504 = vmatpush.bf16.msrb.mxu3 %v4430_v52  ;;  %v5006_v34 = vld [vmem:[#allocation4 + $0x194] sm:$0xf0]  ;;  %v3969_v52 = vld [vmem:[#allocation4 + $0x168] sm:$0xf]  ;;  %v4339_v14 = vld [vmem:[#allocation4 + $0x458] sm:$0xf0] }
 0x131   : > { %2596 = vmatpush.bf16.msrb.mxu2 %v3894_v38  ;;  %v4337_v38 = vld [vmem:[#allocation4 + $0x448] sm:$0xf]  ;;  %v3986_v41 = vor.u32 %v5006_v34, %v3985_v33  ;;  %v3970_v49 = vor.u32 %v5002_v43, %v3969_v52  ;;  %v5100_v43 = vld [vmem:[#allocation4 + $0x48c] sm:$0xf] }
 0x132   : > { %v4338_v12 = vor.u32 %v5094_v55, %v4337_v38  ;;  %v3921_v34 = vld [vmem:[#allocation4 + $0x108] sm:$0xf]  ;;  %v5146_v55 = vld [vmem:[#allocation4 + $0x5f4] sm:$0xf0] }
 0x133   : > { %2476 = vmatpush.bf16.msrb.mxu1 %v4174_v53  ;;  %4574 = vmatmul.msk.bf16.vlgmr.msrb.gmra.mxu3 %vm5608_vm6, %v5708_v13  ;;  %v4545_v38 = vld [vmem:[#allocation4 + $0x5e8] sm:$0xf]  ;;  %v3922_v52 = vor.u32 %v4990_v35, %v3921_v34  ;;  %v4996_v34 = vld [vmem:[#allocation4 + $0x14c] sm:$0xf] }
 0x134   : > { %2553 = vmatpush.bf16.msra.mxu3 %v4290_v60  ;;  %2568 = vmatpush.bf16.msrb.mxu0 %v4402_v44  ;;  %v3814_v60 = vor.u32 %v4960_v39, %v3811_v40  ;;  %v5062_v44 = vld [vmem:[#allocation4 + $0x354] sm:$0xf0]  ;;  %v5012_v39 = vld [vmem:[#allocation4 + $0x1cc] sm:$0xf] }
 0x135   : > { %2597 = vmatpush.bf16.msrb.mxu2 %v3878_v48  ;;  %v3795_v48 = vld [vmem:[#allocation4 + $0x18] sm:$0xf0]  ;;  %v4210_v53 = vor.u32 %v5062_v44, %v4209_v9 }
 0x136   : > { %2477 = vmatmul.bf16.vlgmr.msrb.gmra.mxu1 %v5686_v58  ;;  %v4371_v9 = vld [vmem:[#allocation4 + $0x498] sm:$0xf0] }
 0x137   : > { %2525 = vmatpush.bf16.msra.mxu1 %v4034_v62  ;;  %v4998_v62 = vld [vmem:[#allocation4 + $0x154] sm:$0xf0] }
 0x138   : > { %2554 = vmatpush.bf16.msra.mxu3 %v4274_v0  ;;  %2569 = vmatpush.bf16.msrb.mxu0 %v4386_v2  ;;  %v4193_v0 = vld [vmem:[#allocation4 + $0x328] sm:$0xf]  ;;  %v3798_v2 = vor.u32 %v4956_v56, %v3795_v48  ;;  %v3954_v57 = vor.u32 %v4998_v62, %v3953_v54  ;;  %v5008_v56 = vld [vmem:[#allocation4 + $0x1ac] sm:$0xf]  ;;  %v4374_v48 = vor.u32 %v5100_v43, %v4371_v9  ;;  %v5126_v9 = vld [vmem:[#allocation4 + $0x554] sm:$0xf0] }
 0x139   : > { %2598 = vmatpush.bf16.msrb.mxu2 %v3862_v6  ;;  %v4422_v6 = vor.u32 %v5112_v50, %v4419_v51  ;;  %v5036_v50 = vld [vmem:[#allocation4 + $0x28c] sm:$0xf]  ;;  %v4115_v51 = vld [vmem:[#allocation4 + $0x298] sm:$0xf0]  ;;  %v4530_v54 = vor.u32 %v5142_v47, %v4529_v45  ;;  %v4465_v43 = vld [vmem:[#allocation4 + $0x548] sm:$0xf] }
 0x13a   : > { %v5020_v45 = vld [vmem:[#allocation4 + $0x20c] sm:$0xf]  ;;  %v4051_v47 = vld [vmem:[#allocation4 + $0x218] sm:$0xf0] }
 0x13b   : > { %2526 = vmatpush.bf16.msra.mxu1 %v4018_v19  ;;  %v4194_v19 = vor.u32 %v5058_v42, %v4193_v0  ;;  %v4118_v0 = vor.u32 %v5036_v50, %v4115_v51  ;;  %v5138_v42 = vld [vmem:[#allocation4 + $0x5b4] sm:$0xf0] }
 0x13c   : > { %2555 = vmatpush.bf16.msra.mxu3 %v4258_v20  ;;  %2570 = vmatpush.bf16.msrb.mxu0 %v4370_v21  ;;  %v4306_v20 = vor.u32 %v5086_v5, %v4305_v4  ;;  %v3937_v21 = vld [vmem:[#allocation4 + $0x128] sm:$0xf]  ;;  %v5004_v4 = vld [vmem:[#allocation4 + $0x18c] sm:$0xf]  ;;  %v4699_v50 = vld [vmem:[#allocation7 + $0xd0] sm:$0xf0] }
 0x13d   : > { %2599 = vmatpush.bf16.msrb.mxu2 %v3846_v25  ;;  %v5054_v25 = vld [vmem:[#allocation4 + $0x314] sm:$0xf0] }
 0x13e   : > { %v4178_v33 = vor.u32 %v5054_v25, %v4177_v24  ;;  %v3971_v25 = vld [vmem:[#allocation4 + $0x178] sm:$0xf0] }
 0x13f   : > { %2527 = vmatpush.bf16.msra.mxu1 %v4002_v31  ;;  %v3938_v31 = vor.u32 %v4994_v22, %v3937_v21  ;;  %v4497_v21 = vld [vmem:[#allocation4 + $0x588] sm:$0xf]  ;;  %v5134_v22 = vld [vmem:[#allocation4 + $0x594] sm:$0xf0] }
 0x140   : > { %2556 = vmatpush.bf16.msra.mxu3 %v4242_v30  ;;  %2571 = vmatpush.bf16.msrb.mxu0 %v4354_v32  ;;  %v5104_v30 = vld [vmem:[#allocation4 + $0x4ac] sm:$0xf]  ;;  %v4387_v32 = vld [vmem:[#allocation4 + $0x4b8] sm:$0xf0]  ;;  %v4498_v29 = vor.u32 %v5134_v22, %v4497_v21 }
 0x141   : > { %2600 = vmatpush.bf16.msrb.mxu2 %v3830_v36  ;;  %v4038_v36 = vor.u32 %v5016_v11, %v4035_v27  ;;  %v4390_v40 = vor.u32 %v5104_v30, %v4387_v32  ;;  %v5028_v11 = vld [vmem:[#allocation4 + $0x24c] sm:$0xf]  ;;  %v4481_v32 = vld [vmem:[#allocation4 + $0x568] sm:$0xf] }
 0x142   : > { %v5088_v27 = vld [vmem:[#allocation4 + $0x42c] sm:$0xf] }
 0x143   : > { %2528 = vmatpush.bf16.msra.mxu1 %v3986_v41  ;;  %v4019_v41 = vld [vmem:[#allocation4 + $0x1d8] sm:$0xf0]  ;;  %v4326_v35 = vor.u32 %v5088_v27, %v4323_v28  ;;  %v5080_v22 = vld [vmem:[#allocation4 + $0x3ec] sm:$0xf]  ;;  %v4697_v27 = vld [vmem:[#allocation7 + $0xc0] sm:$0xf] }
 0x144   : > { %2557 = vmatpush.bf16.msra.mxu3 %v4226_v3  ;;  %2572 = vmatpush.bf16.msrb.mxu0 %v4338_v12  ;;  %v5040_v3 = vld [vmem:[#allocation4 + $0x2ac] sm:$0xf]  ;;  %v4131_v12 = vld [vmem:[#allocation4 + $0x2b8] sm:$0xf0]  ;;  %v5173_v28 = vld [vmem:[#allocation7 + $0xcc] sm:$0xf0] }
 0x145   : > { %2601 = vmatpush.bf16.msrb.mxu2 %v3814_v60  ;;  %v4022_v60 = vor.u32 %v5012_v39, %v4019_v41  ;;  %v4134_v44 = vor.u32 %v5040_v3, %v4131_v12  ;;  %v4307_v39 = vld [vmem:[#allocation4 + $0x418] sm:$0xf0]  ;;  %v5175_v41 = vld [vmem:[#allocation7 + $0xe4] sm:$0xf]  ;;  %v4715_v3 = vld [vmem:[#allocation7 + $0xf0] sm:$0xf0] }
 0x147   : > { %2529 = vmatpush.bf16.msra.mxu1 %v3970_v49  ;;  %v4003_v49 = vld [vmem:[#allocation4 + $0x1b8] sm:$0xf0] }
 0x148   : > { %2558 = vmatpush.bf16.msra.mxu3 %v4210_v53  ;;  %2573 = vmatpush.bf16.msrb.mxu0 %v4322_v46  ;;  %v5096_v53 = vld [vmem:[#allocation4 + $0x46c] sm:$0xf]  ;;  %v4355_v46 = vld [vmem:[#allocation4 + $0x478] sm:$0xf0]  ;;  %v4006_v62 = vor.u32 %v5008_v56, %v4003_v49  ;;  %v4718_v56 = vor.u32 %v5175_v41, %v4715_v3  ;;  %v5171_v49 = vld [vmem:[#allocation7 + $0xc4] sm:$0xf] }
 0x149   : > { %2602 = vmatpush.bf16.msrb.mxu2 %v3798_v2  ;;  %v4513_v2 = vld [vmem:[#allocation4 + $0x5a8] sm:$0xf]  ;;  %v4358_v5 = vor.u32 %v5096_v53, %v4355_v46  ;;  %v4054_v53 = vor.u32 %v5020_v45, %v4051_v47  ;;  %v4651_v41 = vld [vmem:[#allocation7 + $0x70] sm:$0xf0] }
 0x14a   : > { %v4514_v18 = vor.u32 %v5138_v42, %v4513_v2  ;;  %v4449_v46 = vld [vmem:[#allocation4 + $0x528] sm:$0xf]  ;;  %v5144_v2 = vld [vmem:[#allocation4 + $0x5ec] sm:$0xf]  ;;  %v4547_v42 = vld [vmem:[#allocation4 + $0x5f8] sm:$0xf0] }
 0x14b   : > { %2530 = vmatpush.bf16.msra.mxu1 %v3954_v57  ;;  %v5092_v57 = vld [vmem:[#allocation4 + $0x44c] sm:$0xf]  ;;  %v4550_v21 = vor.u32 %v5144_v2, %v4547_v42  ;;  %v4635_v47 = vld [vmem:[#allocation7 + $0x50] sm:$0xf0] }
 0x14c   : > { %2559 = vmatpush.bf16.msra.mxu3 %v4194_v19  ;;  %2574 = vmatpush.bf16.msrb.mxu0 %v4306_v20  ;;  %v4102_v20 = vor.u32 %v5032_v7, %v4099_v8  ;;  %v4342_v24 = vor.u32 %v5092_v57, %v4339_v14  ;;  %v5177_v7 = vld [vmem:[#allocation7 + $0xec] sm:$0xf0]  ;;  %v5167_v8 = vld [vmem:[#allocation7 + $0xa4] sm:$0xf]  ;;  %v4619_v42 = vld [vmem:[#allocation7 + $0x30] sm:$0xf0] }
 0x14d   : > { %2651 = vmatpush.bf16.msra.mxu2 %v4422_v6  ;;  %v3987_v6 = vld [vmem:[#allocation4 + $0x198] sm:$0xf0]  ;;  %v4433_v14 = vld [vmem:[#allocation4 + $0x508] sm:$0xf] }
 0x14e   : > { %4589 = vmatmul.msk.bf16.vlgmr.msrb.gmra.mxu2 %vm5560_vm3, %v5655_v16  ;;  %v4546_v16 = vor.u32 %v5146_v55, %v4545_v38  ;;  %v3990_v19 = vor.u32 %v5004_v4, %v3987_v6  ;;  %v4067_v38 = vld [vmem:[#allocation4 + $0x238] sm:$0xf0]  ;;  %v5084_v55 = vld [vmem:[#allocation4 + $0x40c] sm:$0xf]  ;;  %v4702_v4 = vor.u32 %v5171_v49, %v4699_v50  ;;  %v4713_v6 = vld [vmem:[#allocation7 + $0xe0] sm:$0xf] }
 0x14f   : > { %2531 = vmatpush.bf16.msra.mxu1 %v3938_v31  ;;  %4583 = vmatmul.msk.bf16.vlgmr.msrb.gmra.mxu0 %vm5608_vm6, %v5670_v61  ;;  %v4243_v49 = vld [vmem:[#allocation4 + $0x398] sm:$0xf0]  ;;  %v5128_v50 = vld [vmem:[#allocation4 + $0x56c] sm:$0xf] }
 0x150   : > { %2623 = vmatpush.bf16.msra.mxu0 %v4166_v23  ;;  %2560 = vmatpush.bf16.msra.mxu3 %v4178_v33  ;;  %v5000_v23 = vld [vmem:[#allocation4 + $0x16c] sm:$0xf]  ;;  %v5130_v33 = vld [vmem:[#allocation4 + $0x574] sm:$0xf0] }
 0x151   : > { %2652 = vmatpush.bf16.msra.mxu2 %v4406_v26  ;;  %v4083_v26 = vld [vmem:[#allocation4 + $0x258] sm:$0xf0]  ;;  %v3974_v31 = vor.u32 %v5000_v23, %v3971_v25 }
 0x152   : > { %v4086_v30 = vor.u32 %v5028_v11, %v4083_v26  ;;  %v4291_v23 = vld [vmem:[#allocation4 + $0x3f8] sm:$0xf0] }
 0x153   : > { %2532 = vmatpush.bf16.msra.mxu1 %v3922_v52  ;;  %2561 = vmatmul.bf16.vlgmr.msra.gmra.mxu3 %v5686_v58  ;;  %v4531_v25 = vld [vmem:[#allocation4 + $0x5d8] sm:$0xf0] }
 0x154   : > { %2609 = vmatpush.bf16.msrb.mxu3 %v4038_v36  ;;  %2624 = vmatpush.bf16.msra.mxu0 %v4150_v37  ;;  %v3955_v36 = vld [vmem:[#allocation4 + $0x158] sm:$0xf0]  ;;  %v5024_v37 = vld [vmem:[#allocation4 + $0x22c] sm:$0xf] }
 0x155   : > { %2653 = vmatpush.bf16.msra.mxu2 %v4390_v40  ;;  %v4482_v40 = vor.u32 %v5130_v33, %v4481_v32  ;;  %v3958_v12 = vor.u32 %v4996_v34, %v3955_v36  ;;  %v4070_v52 = vor.u32 %v5024_v37, %v4067_v38  ;;  %v4667_v32 = vld [vmem:[#allocation7 + $0x90] sm:$0xf0]  ;;  %v5076_v33 = vld [vmem:[#allocation4 + $0x3cc] sm:$0xf]  ;;  %v4275_v34 = vld [vmem:[#allocation4 + $0x3d8] sm:$0xf0] }
 0x156   : > { %4580 = vmatmul.msk.bf16.vlgmr.msra.gmra.mxu1 %vm5560_vm3, %v5694_v10  ;;  %v4515_v36 = vld [vmem:[#allocation4 + $0x5b8] sm:$0xf0]  ;;  %v5169_v38 = vld [vmem:[#allocation7 + $0xac] sm:$0xf0] }
 0x157   : > { %2581 = vmatpush.bf16.msrb.mxu1 %v4546_v16  ;;  %v4992_v16 = vld [vmem:[#allocation4 + $0x12c] sm:$0xf] }
 0x158   : > { %2610 = vmatpush.bf16.msrb.mxu3 %v4022_v60  ;;  %2625 = vmatpush.bf16.msra.mxu0 %v4134_v44  ;;  %v4310_v60 = vor.u32 %v5084_v55, %v4307_v39  ;;  %v3939_v44 = vld [vmem:[#allocation4 + $0x138] sm:$0xf0]  ;;  %v5159_v55 = vld [vmem:[#allocation7 + $0x64] sm:$0xf]  ;;  %v4278_v39 = vor.u32 %v5076_v33, %v4275_v34 }
 0x159   : > { %2654 = vmatpush.bf16.msra.mxu2 %v4374_v48  ;;  %v4466_v48 = vor.u32 %v5126_v9, %v4465_v43  ;;  %v3942_v51 = vor.u32 %v4992_v16, %v3939_v44  ;;  %v5132_v43 = vld [vmem:[#allocation4 + $0x58c] sm:$0xf]  ;;  %v4499_v9 = vld [vmem:[#allocation4 + $0x598] sm:$0xf0]  ;;  %v4654_v15 = vor.u32 %v5159_v55, %v4651_v41  ;;  %v5165_v16 = vld [vmem:[#allocation7 + $0x8c] sm:$0xf0] }
 0x15a   : > { %v5116_v55 = vld [vmem:[#allocation4 + $0x50c] sm:$0xf]  ;;  %v4843_v41 = vld [vmem:[#allocation7 + $0x1f0] sm:$0xf0] }
 0x15b   : > { %2582 = vmatpush.bf16.msrb.mxu1 %v4530_v54  ;;  %v5122_v54 = vld [vmem:[#allocation4 + $0x534] sm:$0xf0] }
 0x15c   : > { %2611 = vmatpush.bf16.msrb.mxu3 %v4006_v62  ;;  %2626 = vmatpush.bf16.msra.mxu0 %v4118_v0  ;;  %v4988_v62 = vld [vmem:[#allocation4 + $0x10c] sm:$0xf]  ;;  %v3923_v0 = vld [vmem:[#allocation4 + $0x118] sm:$0xf0] }
 0x15d   : > { %2655 = vmatpush.bf16.msra.mxu2 %v4358_v5  ;;  %v4450_v5 = vor.u32 %v5122_v54, %v4449_v46  ;;  %v3926_v57 = vor.u32 %v4988_v62, %v3923_v0  ;;  %v4649_v46 = vld [vmem:[#allocation7 + $0x60] sm:$0xf]  ;;  %v5161_v54 = vld [vmem:[#allocation7 + $0x6c] sm:$0xf0]  ;;  %v5151_v62 = vld [vmem:[#allocation7 + $0x24] sm:$0xf] }
 0x15e   : > { %v4650_v2 = vor.u32 %v5161_v54, %v4649_v46 }
 0x15f   : > { %2583 = vmatpush.bf16.msrb.mxu1 %v4514_v18  ;;  %v5118_v18 = vld [vmem:[#allocation4 + $0x514] sm:$0xf0] }
 0x160   : > { %2612 = vmatpush.bf16.msrb.mxu3 %v3990_v19  ;;  %2627 = vmatpush.bf16.msra.mxu0 %v4102_v20  ;;  %v4714_v19 = vor.u32 %v5177_v7, %v4713_v6  ;;  %v4683_v20 = vld [vmem:[#allocation7 + $0xb0] sm:$0xf0]  ;;  %v4434_v26 = vor.u32 %v5118_v18, %v4433_v14  ;;  %v4227_v6 = vld [vmem:[#allocation4 + $0x378] sm:$0xf0]  ;;  %v5124_v7 = vld [vmem:[#allocation4 + $0x54c] sm:$0xf] }
 0x161   : > { %2656 = vmatpush.bf16.msra.mxu2 %v4342_v24  ;;  %v5140_v24 = vld [vmem:[#allocation4 + $0x5cc] sm:$0xf]  ;;  %v4686_v11 = vor.u32 %v5167_v8, %v4683_v20  ;;  %v4467_v8 = vld [vmem:[#allocation4 + $0x558] sm:$0xf0]  ;;  %v4633_v14 = vld [vmem:[#allocation7 + $0x40] sm:$0xf] }
 0x162   : > { %v5157_v18 = vld [vmem:[#allocation7 + $0x4c] sm:$0xf0] }
 0x163   : > { %2584 = vmatpush.bf16.msrb.mxu1 %v4498_v29  ;;  %v5163_v29 = vld [vmem:[#allocation7 + $0x84] sm:$0xf] }
 0x164   : > { %2613 = vmatpush.bf16.msrb.mxu3 %v3974_v31  ;;  %2628 = vmatpush.bf16.msra.mxu0 %v4086_v30  ;;  %v4294_v31 = vor.u32 %v5080_v22, %v4291_v23  ;;  %v4698_v30 = vor.u32 %v5173_v28, %v4697_v27  ;;  %v4670_v37 = vor.u32 %v5163_v29, %v4667_v32  ;;  %v4603_v23 = vld [vmem:[#allocation7 + $0x10] sm:$0xf0]  ;;  %v5120_v27 = vld [vmem:[#allocation4 + $0x52c] sm:$0xf]  ;;  %v4451_v28 = vld [vmem:[#allocation4 + $0x538] sm:$0xf0] }
 0x165   : > { %2657 = vmatpush.bf16.msra.mxu2 %v4326_v35  ;;  %v5136_v35 = vld [vmem:[#allocation4 + $0x5ac] sm:$0xf]  ;;  %v4634_v22 = vor.u32 %v5157_v18, %v4633_v14  ;;  %v5153_v32 = vld [vmem:[#allocation7 + $0x2c] sm:$0xf0]  ;;  %v5747_v14 = vld [vmem:[#allocation6] sm:$0xf] }
 0x166   : > { %v4518_v3 = vor.u32 %v5136_v35, %v4515_v36  ;;  %v5172_v35 = vld [vmem:[#allocation7 + $0xcc] sm:$0xf]  ;;  %v4707_v36 = vld [vmem:[#allocation7 + $0xd8] sm:$0xf0]  ;;  %v5199_v18 = vld [vmem:[#allocation7 + $0x1a4] sm:$0xf] }
 0x167   : > { %2585 = vmatpush.bf16.msrb.mxu1 %v4482_v40 }
 0x168   : > { %2614 = vmatpush.bf16.msrb.mxu3 %v3958_v12  ;;  %2629 = vmatpush.bf16.msra.mxu0 %v4070_v52  ;;  %v5072_v12 = vld [vmem:[#allocation4 + $0x3ac] sm:$0xf]  ;;  %v4259_v52 = vld [vmem:[#allocation4 + $0x3b8] sm:$0xf0] }
 0x169   : > { %2658 = vmatpush.bf16.msra.mxu2 %v4310_v60  ;;  %v5155_v60 = vld [vmem:[#allocation7 + $0x44] sm:$0xf]  ;;  %v4262_v44 = vor.u32 %v5072_v12, %v4259_v52  ;;  %v4601_v12 = vld [vmem:[#allocation7] sm:$0xf]  ;;  %v5149_v52 = vld [vmem:[#allocation7 + $0xc] sm:$0xf0] }
 0x16b   : > { %2586 = vmatpush.bf16.msrb.mxu1 %v4466_v48  ;;  %v5068_v48 = vld [vmem:[#allocation4 + $0x38c] sm:$0xf] }
 0x16c   : > { %2615 = vmatpush.bf16.msrb.mxu3 %v3942_v51  ;;  %2630 = vmatpush.bf16.msra.mxu0 %v4054_v53  ;;  %v4483_v51 = vld [vmem:[#allocation4 + $0x578] sm:$0xf0]  ;;  %v4638_v53 = vor.u32 %v5155_v60, %v4635_v47  ;;  %v4246_v0 = vor.u32 %v5068_v48, %v4243_v49  ;;  %v5168_v47 = vld [vmem:[#allocation7 + $0xac] sm:$0xf]  ;;  %v4841_v49 = vld [vmem:[#allocation7 + $0x1e0] sm:$0xf] }
 0x16d   : > { %3099 = vmatpush.bf16.msrb.mxu2 %v4718_v56  ;;  %v4502_v56 = vor.u32 %v5132_v43, %v4499_v9  ;;  %v5052_v9 = vld [vmem:[#allocation4 + $0x30c] sm:$0xf] }
 0x16e   : > { %4595 = vmatmul.msk.bf16.vlgmr.msra.gmra.mxu2 %vm5608_vm6, %v5670_v61  ;;  %v4534_v61 = vor.u32 %v5140_v24, %v4531_v25  ;;  %v4470_v24 = vor.u32 %v5124_v7, %v4467_v8  ;;  %v4211_v25 = vld [vmem:[#allocation4 + $0x358] sm:$0xf0]  ;;  %v4825_v8 = vld [vmem:[#allocation7 + $0x1c0] sm:$0xf] }
 0x16f   : > { %2587 = vmatpush.bf16.msrb.mxu1 %v4450_v5  ;;  %2631 = vmatmul.bf16.vlgmr.msra.gmra.mxu0 %v5648_v1  ;;  %v4681_v1 = vld [vmem:[#allocation7 + $0xa0] sm:$0xf]  ;;  %v5064_v5 = vld [vmem:[#allocation4 + $0x36c] sm:$0xf] }
 0x170   : > { %3071 = vmatpush.bf16.msrb.mxu0 %v4714_v19  ;;  %2616 = vmatpush.bf16.msrb.mxu3 %v3926_v57  ;;  %v4682_v40 = vor.u32 %v5169_v38, %v4681_v1  ;;  %v4622_v57 = vor.u32 %v5151_v62, %v4619_v42  ;;  %v5147_v19 = vld [vmem:[#allocation7 + $0x4] sm:$0xf]  ;;  %v4230_v20 = vor.u32 %v5064_v5, %v4227_v6  ;;  %v5056_v1 = vld [vmem:[#allocation4 + $0x32c] sm:$0xf]  ;;  %v4195_v38 = vld [vmem:[#allocation4 + $0x338] sm:$0xf0] }
 0x171   : > { %3100 = vmatpush.bf16.msrb.mxu2 %v4702_v4  ;;  %v4486_v4 = vor.u32 %v5128_v50, %v4483_v51  ;;  %v4606_v29 = vor.u32 %v5147_v19, %v4603_v23  ;;  %v4198_v43 = vor.u32 %v5056_v1, %v4195_v38  ;;  %v5209_v50 = vld [vmem:[#allocation7 + $0x1ec] sm:$0xf0]  ;;  %v5203_v51 = vld [vmem:[#allocation7 + $0x1c4] sm:$0xf]  ;;  %v4705_v62 = vld [vmem:[#allocation7 + $0xc8] sm:$0xf] }
 0x172   : > { %v4842_v42 = vor.u32 %v5209_v50, %v4841_v49  ;;  %v4675_v5 = vld [vmem:[#allocation7 + $0x98] sm:$0xf0]  ;;  %v4811_v19 = vld [vmem:[#allocation7 + $0x1b0] sm:$0xf0]  ;;  %v5160_v23 = vld [vmem:[#allocation7 + $0x6c] sm:$0xf] }
 0x173   : > { %2588 = vmatpush.bf16.msrb.mxu1 %v4434_v26  ;;  %4592 = vmatmul.msk.bf16.vlgmr.msrb.gmra.mxu3 %vm5560_vm3, %v5694_v10  ;;  %v4665_v10 = vld [vmem:[#allocation7 + $0x80] sm:$0xf]  ;;  %v4723_v26 = vld [vmem:[#allocation7 + $0xf8] sm:$0xf0]  ;;  %v4763_v49 = vld [vmem:[#allocation7 + $0x150] sm:$0xf0] }
 0x174   : > { %2665 = vmatpush.bf16.msra.mxu3 %v4550_v21  ;;  %3072 = vmatpush.bf16.msrb.mxu0 %v4698_v30  ;;  %v4666_v45 = vor.u32 %v5165_v16, %v4665_v10  ;;  %v5060_v21 = vld [vmem:[#allocation4 + $0x34c] sm:$0xf]  ;;  %v4617_v30 = vld [vmem:[#allocation7 + $0x20] sm:$0xf]  ;;  %v5178_v16 = vld [vmem:[#allocation7 + $0xf4] sm:$0xf0] }
 0x175   : > { %3101 = vmatpush.bf16.msrb.mxu2 %v4686_v11  ;;  %v5176_v11 = vld [vmem:[#allocation7 + $0xec] sm:$0xf]  ;;  %v4214_v33 = vor.u32 %v5060_v21, %v4211_v25  ;;  %v4618_v34 = vor.u32 %v5153_v32, %v4617_v30  ;;  %v4721_v10 = vld [vmem:[#allocation7 + $0xe8] sm:$0xf]  ;;  %v5195_v30 = vld [vmem:[#allocation7 + $0x184] sm:$0xf] }
 0x176   : > { %4586 = vmatmul.msk.bf16.vlgmr.msrb.gmra.mxu1 %vm5608_vm6, %v5708_v13  ;;  %v4689_v21 = vld [vmem:[#allocation7 + $0xa8] sm:$0xf]  ;;  %v4798_v1 = vor.u32 %v5195_v30, %v4795_v59  ;;  %v4793_v38 = vld [vmem:[#allocation7 + $0x180] sm:$0xf]  ;;  %v5179_v30 = vld [vmem:[#allocation7 + $0x104] sm:$0xf] }
 0x177   : > { %2637 = vmatpush.bf16.msra.mxu1 %v4294_v31  ;;  %v4726_v31 = vor.u32 %v5176_v11, %v4723_v26  ;;  %v4659_v26 = vld [vmem:[#allocation7 + $0x78] sm:$0xf0]  ;;  %v4673_v32 = vld [vmem:[#allocation7 + $0x88] sm:$0xf]  ;;  %v4731_v59 = vld [vmem:[#allocation7 + $0x110] sm:$0xf0] }
 0x178   : > { %2666 = vmatpush.bf16.msra.mxu3 %v4534_v61  ;;  %3073 = vmatpush.bf16.msrb.mxu0 %v4682_v40  ;;  %v5741_v61 = vpop.f32.mrf.mxu0  ;;  %v5207_v40 = vld [vmem:[#allocation7 + $0x1e4] sm:$0xf] }
 0x179   : > { %3102 = vmatpush.bf16.msrb.mxu2 %v4670_v37  ;;  %v4454_v37 = vor.u32 %v5120_v27, %v4451_v28  ;;  %v4846_v48 = vor.u32 %v5207_v40, %v4843_v41  ;;  %v4814_v27 = vor.u32 %v5199_v18, %v4811_v19  ;;  %v4809_v28 = vld [vmem:[#allocation7 + $0x1a0] sm:$0xf]  ;;  %v4779_v40 = vld [vmem:[#allocation7 + $0x170] sm:$0xf0] }
 0x17b   : > { %2638 = vmatpush.bf16.msra.mxu1 %v4278_v39  ;;  %v4435_v39 = vld [vmem:[#allocation4 + $0x518] sm:$0xf0] }
 0x17c   : > { %2667 = vmatpush.bf16.msra.mxu3 %v4518_v3  ;;  %3074 = vmatpush.bf16.msrb.mxu0 %v4666_v45  ;;  %v4710_v3 = vor.u32 %v5172_v35, %v4707_v36  ;;  %v4438_v60 = vor.u32 %v5116_v55, %v4435_v39  ;;  %v4722_v45 = vor.u32 %v5178_v16, %v4721_v10  ;;  %v5197_v55 = vld [vmem:[#allocation7 + $0x18c] sm:$0xf0]  ;;  %v5191_v39 = vld [vmem:[#allocation7 + $0x164] sm:$0xf]  ;;  %v4627_v16 = vld [vmem:[#allocation7 + $0x38] sm:$0xf0] }
 0x17d   : > { %3103 = vmatpush.bf16.msrb.mxu2 %v4654_v15  ;;  %v4602_v15 = vor.u32 %v5149_v52, %v4601_v12  ;;  %v4657_v12 = vld [vmem:[#allocation7 + $0x68] sm:$0xf]  ;;  %v5162_v52 = vld [vmem:[#allocation7 + $0x74] sm:$0xf0] }
 0x17e   : > { %v4658_v10 = vor.u32 %v5162_v52, %v4657_v12  ;;  %v5204_v12 = vld [vmem:[#allocation7 + $0x1cc] sm:$0xf]  ;;  %v4835_v52 = vld [vmem:[#allocation7 + $0x1d8] sm:$0xf0] }
 0x17f   : > { %2639 = vmatpush.bf16.msra.mxu1 %v4262_v44  ;;  %v4179_v44 = vld [vmem:[#allocation4 + $0x318] sm:$0xf0] }
 0x180   : > { %2668 = vmatpush.bf16.msra.mxu3 %v4502_v56  ;;  %3075 = vmatpush.bf16.msrb.mxu0 %v4650_v2  ;;  %v4691_v56 = vld [vmem:[#allocation7 + $0xb8] sm:$0xf0]  ;;  %v4182_v54 = vor.u32 %v5052_v9, %v4179_v44  ;;  %v5164_v2 = vld [vmem:[#allocation7 + $0x8c] sm:$0xf]  ;;  %v5744_v6 = vpop.f32.mrf.mxu0  ;;  %v4782_v44 = vor.u32 %v5191_v39, %v4779_v40  ;;  %v5181_v39 = vld [vmem:[#allocation7 + $0x10c] sm:$0xf0] }
 0x181   : > { %3104 = vmatpush.bf16.msrb.mxu2 %v4638_v53  ;;  %v4827_v53 = vld [vmem:[#allocation7 + $0x1d0] sm:$0xf0]  ;;  %v4694_v46 = vor.u32 %v5168_v47, %v4691_v56  ;;  %v5193_v47 = vld [vmem:[#allocation7 + $0x16c] sm:$0xf0]  ;;  %v1376_v40 = vperm.slane %v5747_v14, 1 }
 0x182   : > { %v4830_v7 = vor.u32 %v5203_v51, %v4827_v53  ;;  %v4641_v53 = vld [vmem:[#allocation7 + $0x48] sm:$0xf] }
 0x183   : > { %2640 = vmatpush.bf16.msra.mxu1 %v4246_v0  ;;  %v5174_v0 = vld [vmem:[#allocation7 + $0xd4] sm:$0xf0] }
 0x184   : > { %2669 = vmatpush.bf16.msra.mxu3 %v4486_v4  ;;  %3076 = vmatpush.bf16.msrb.mxu0 %v4634_v22  ;;  %v4706_v4 = vor.u32 %v5174_v0, %v4705_v62  ;;  %v5170_v22 = vld [vmem:[#allocation7 + $0xb4] sm:$0xf0] }
 0x185   : > { %3105 = vmatpush.bf16.msrb.mxu2 %v4622_v57  ;;  %v5205_v57 = vld [vmem:[#allocation7 + $0x1cc] sm:$0xf0]  ;;  %v4690_v11 = vor.u32 %v5170_v22, %v4689_v21  ;;  %v4625_v21 = vld [vmem:[#allocation7 + $0x28] sm:$0xf]  ;;  %v5154_v22 = vld [vmem:[#allocation7 + $0x34] sm:$0xf0] }
 0x186   : > { %v4826_v25 = vor.u32 %v5205_v57, %v4825_v8  ;;  %v5183_v8 = vld [vmem:[#allocation7 + $0x124] sm:$0xf]  ;;  %v4747_v57 = vld [vmem:[#allocation7 + $0x130] sm:$0xf0] }
 0x187   : > { %2641 = vmatpush.bf16.msra.mxu1 %v4230_v20  ;;  %v4678_v20 = vor.u32 %v5164_v2, %v4675_v5  ;;  %v4611_v2 = vld [vmem:[#allocation7 + $0x18] sm:$0xf0]  ;;  %v4761_v5 = vld [vmem:[#allocation7 + $0x140] sm:$0xf] }
 0x188   : > { %2670 = vmatpush.bf16.msra.mxu3 %v4470_v24  ;;  %3077 = vmatpush.bf16.msrb.mxu0 %v4618_v34  ;;  %v2380_v24 = vpop.f32.mrf.mxu2  ;;  %v5156_v34 = vld [vmem:[#allocation7 + $0x4c] sm:$0xf] }
 0x189   : > { %3106 = vmatpush.bf16.msrb.mxu2 %v4606_v29  ;;  %v5201_v29 = vld [vmem:[#allocation7 + $0x1ac] sm:$0xf0] }
 0x18a   : > { %v4810_v35 = vor.u32 %v5201_v29, %v4809_v28  ;;  %v4745_v28 = vld [vmem:[#allocation7 + $0x120] sm:$0xf]  ;;  %v5185_v29 = vld [vmem:[#allocation7 + $0x12c] sm:$0xf0] }
 0x18b   : > { %2642 = vmatpush.bf16.msra.mxu1 %v4214_v33  ;;  %v5166_v33 = vld [vmem:[#allocation7 + $0x94] sm:$0xf0] }
 0x18c   : > { %2671 = vmatpush.bf16.msra.mxu3 %v4454_v37  ;;  %3107 = vmatmul.bf16.vlgmr.msrb.gmra.mxu2 %v5541_v63  ;;  %v4674_v36 = vor.u32 %v5166_v33, %v4673_v32  ;;  %v4643_v37 = vld [vmem:[#allocation7 + $0x58] sm:$0xf0]  ;;  %v4609_v33 = vld [vmem:[#allocation7 + $0x8] sm:$0xf] }
 0x18d   : > { %3155 = vmatpush.bf16.msra.mxu2 %v4726_v31  ;;  %3078 = vmatpush.bf16.msrb.mxu0 %v4602_v15  ;;  %v1375_v31 = vperm.slane %v5747_v14, 0  ;;  %v4794_v15 = vor.u32 %v5197_v55, %v4793_v38  ;;  %v4734_v38 = vor.u32 %v5179_v30, %v4731_v59  ;;  %v4729_v55 = vld [vmem:[#allocation7 + $0x100] sm:$0xf] }
 0x18f   : > { %2643 = vmatpush.bf16.msra.mxu1 %v4198_v43  ;;  %v2353_v41 = vadd.f32 %v5741_v61, %v1375_v31  ;;  %v5152_v43 = vld [vmem:[#allocation7 + $0x2c] sm:$0xf]  ;;  %v2355_v19 = vadd.f32 %v5744_v6, %v1375_v31  ;;  %v4851_v31 = vld [vmem:[#allocation7 + $0x1f8] sm:$0xf0] }
 0x190   : > { %2672 = vmatpush.bf16.msra.mxu3 %v4438_v60  ;;  %3079 = vmatmul.bf16.vlgmr.msrb.gmra.mxu0 %v5541_v63  ;;  %v2382_v56 = vpop.f32.mrf.mxu2  ;;  %v4630_v61 = vor.u32 %v5152_v43, %v4627_v16 }
 0x191   : > { %3156 = vmatpush.bf16.msra.mxu2 %v4710_v3  ;;  %3127 = vmatpush.bf16.msra.mxu0 %v4722_v45  ;;  %v2408_v3 = vpop.f32.mrf.mxu0  ;;  %v4777_v45 = vld [vmem:[#allocation7 + $0x160] sm:$0xf] }
 0x192   : > { %v4778_v62 = vor.u32 %v5193_v47, %v4777_v45  ;;  %v4833_v45 = vld [vmem:[#allocation7 + $0x1c8] sm:$0xf]  ;;  %v5206_v47 = vld [vmem:[#allocation7 + $0x1d4] sm:$0xf0] }
 0x193   : > { %2644 = vmatpush.bf16.msra.mxu1 %v4182_v54  ;;  %4598 = vmatmul.msk.bf16.vlgmr.msra.gmra.mxu3 %vm5608_vm6, %v5708_v13  ;;  %v4662_v13 = vor.u32 %v5160_v23, %v4659_v26  ;;  %v2366_v9 = vpop.f32.mrf.mxu1  ;;  %v5148_v54 = vld [vmem:[#allocation7 + $0xc] sm:$0xf] }
 0x194   : > { %3113 = vmatpush.bf16.msrb.mxu3 %v4846_v48  ;;  %v2367_v60 = vadd.f32 %v2366_v9, %v2353_v41  ;;  %v5187_v48 = vld [vmem:[#allocation7 + $0x144] sm:$0xf]  ;;  %v4614_v18 = vor.u32 %v5148_v54, %v4611_v2  ;;  %v4849_v41 = vld [vmem:[#allocation7 + $0x1e8] sm:$0xf]  ;;  %v5196_v2 = vld [vmem:[#allocation7 + $0x18c] sm:$0xf] }
 0x195   : > { %3157 = vmatpush.bf16.msra.mxu2 %v4694_v46  ;;  %3128 = vmatpush.bf16.msra.mxu0 %v4706_v4  ;;  %v5158_v46 = vld [vmem:[#allocation7 + $0x54] sm:$0xf0]  ;;  %v4766_v4 = vor.u32 %v5187_v48, %v4763_v49  ;;  %v5200_v49 = vld [vmem:[#allocation7 + $0x1ac] sm:$0xf]  ;;  %v4817_v54 = vld [vmem:[#allocation7 + $0x1a8] sm:$0xf] }
 0x196   : > { %2645 = vmatmul.bf16.vlgmr.msra.gmra.mxu1 %v5686_v58  ;;  %v4646_v58 = vor.u32 %v5156_v34, %v4643_v37  ;;  %v2381_v50 = vadd.f32 %v2380_v24, %v2367_v60  ;;  %v2394_v51 = vpop.f32.mrf.mxu3  ;;  %v4642_v0 = vor.u32 %v5158_v46, %v4641_v53  ;;  %v5150_v34 = vld [vmem:[#allocation7 + $0x14] sm:$0xf0] }
 0x197   : > { %3085 = vmatpush.bf16.msrb.mxu1 %v4842_v42  ;;  %v4610_v37 = vor.u32 %v5150_v34, %v4609_v33  ;;  %v5190_v33 = vld [vmem:[#allocation7 + $0x154] sm:$0xf0] }
 0x198   : > { %3114 = vmatpush.bf16.msrb.mxu3 %v4830_v7  ;;  %v2395_v42 = vadd.f32 %v2394_v51, %v2381_v50  ;;  %v5189_v7 = vld [vmem:[#allocation7 + $0x14c] sm:$0xf0]  ;;  %v4834_v51 = vor.u32 %v5206_v47, %v4833_v45 }
 0x199   : > { %3158 = vmatpush.bf16.msra.mxu2 %v4678_v20  ;;  %3129 = vmatpush.bf16.msra.mxu0 %v4690_v11  ;;  %v4762_v24 = vor.u32 %v5189_v7, %v4761_v5  ;;  %v2410_v11 = vpop.f32.mrf.mxu0 }
 0x19a   : > { %v2409_v20 = vadd.f32 %v2408_v3, %v2395_v42  ;;  %v5210_v3 = vld [vmem:[#allocation7 + $0x1f4] sm:$0xf0]  ;;  %v4803_v42 = vld [vmem:[#allocation7 + $0x198] sm:$0xf0] }
 0x19b   : > { %3086 = vmatpush.bf16.msrb.mxu1 %v4826_v25  ;;  %v2368_v23 = vpop.f32.mrf.mxu1  ;;  %v4626_v25 = vor.u32 %v5154_v22, %v4625_v21  ;;  %v4850_v16 = vor.u32 %v5210_v3, %v4849_v41  ;;  %v4787_v21 = vld [vmem:[#allocation7 + $0x178] sm:$0xf0] }
 0x19c   : > { %3115 = vmatpush.bf16.msrb.mxu3 %v4814_v27  ;;  %v2369_v26 = vadd.f32 %v2368_v23, %v2355_v19  ;;  %v4750_v27 = vor.u32 %v5183_v8, %v4747_v57  ;;  %v4806_v8 = vor.u32 %v5196_v2, %v4803_v42  ;;  %v4801_v57 = vld [vmem:[#allocation7 + $0x188] sm:$0xf]  ;;  %v4739_v41 = vld [vmem:[#allocation7 + $0x118] sm:$0xf0] }
 0x19d   : > { %3159 = vmatpush.bf16.msra.mxu2 %v4662_v13  ;;  %3130 = vmatpush.bf16.msra.mxu0 %v4674_v36  ;;  %v5208_v13 = vld [vmem:[#allocation7 + $0x1ec] sm:$0xf]  ;;  %v4746_v36 = vor.u32 %v5185_v29, %v4745_v28  ;;  %v4771_v29 = vld [vmem:[#allocation7 + $0x158] sm:$0xf0] }
 0x19e   : > { %v2383_v32 = vadd.f32 %v2382_v56, %v2369_v26  ;;  %v2396_v6 = vpop.f32.mrf.mxu3  ;;  %v5194_v26 = vld [vmem:[#allocation7 + $0x174] sm:$0xf0]  ;;  %v5188_v28 = vld [vmem:[#allocation7 + $0x14c] sm:$0xf] }
 0x19f   : > { %3087 = vmatpush.bf16.msrb.mxu1 %v4810_v35  ;;  %v2436_v35 = vpop.f32.mrf.mxu2 }
 0x1a0   : > { %3116 = vmatpush.bf16.msrb.mxu3 %v4798_v1  ;;  %v2397_v1 = vadd.f32 %v2396_v6, %v2383_v32  ;;  %v2437_v60 = vadd.f32 %v2436_v35, %v1376_v40  ;;  %v4774_v6 = vor.u32 %v5188_v28, %v4771_v29 }
 0x1a1   : > { %3160 = vmatpush.bf16.msra.mxu2 %v4646_v58  ;;  %3131 = vmatpush.bf16.msra.mxu0 %v4658_v10  ;;  %v4854_v58 = vor.u32 %v5208_v13, %v4851_v31  ;;  %v2464_v56 = vpop.f32.mrf.mxu0  ;;  %v4769_v31 = vld [vmem:[#allocation7 + $0x148] sm:$0xf] }
 0x1a2   : > { %v2411_v43 = vadd.f32 %v2410_v11, %v2397_v1  ;;  %v4785_v11 = vld [vmem:[#allocation7 + $0x168] sm:$0xf] }
 0x1a3   : > { %3088 = vmatpush.bf16.msrb.mxu1 %v4794_v15  ;;  %v2422_v9 = vpop.f32.mrf.mxu1  ;;  %v4730_v15 = vor.u32 %v5181_v39, %v4729_v55  ;;  %v4786_v32 = vor.u32 %v5194_v26, %v4785_v11  ;;  %v4753_v39 = vld [vmem:[#allocation7 + $0x128] sm:$0xf] }
 0x1a4   : > { %3117 = vmatpush.bf16.msrb.mxu3 %v4782_v44  ;;  %v5758_v10 = vadd.f32 %v2422_v9, %v2409_v20  ;;  %v4838_v44 = vor.u32 %v5204_v12, %v4835_v52  ;;  %v5192_v20 = vld [vmem:[#allocation7 + $0x16c] sm:$0xf] }
 0x1a5   : > { %3161 = vmatpush.bf16.msra.mxu2 %v4630_v61  ;;  %3132 = vmatpush.bf16.msra.mxu0 %v4642_v0  ;;  %v4819_v61 = vld [vmem:[#allocation7 + $0x1b8] sm:$0xf0] }
 0x1a6   : > { %v2450_v48 = vpop.f32.mrf.mxu3  ;;  %v4822_v46 = vor.u32 %v5200_v49, %v4819_v61 }
 0x1a7   : > { %3089 = vmatpush.bf16.msrb.mxu1 %v4778_v62  ;;  %v2451_v50 = vadd.f32 %v2450_v48, %v2437_v60  ;;  %v2438_v53 = vpop.f32.mrf.mxu2  ;;  %v5202_v62 = vld [vmem:[#allocation7 + $0x1b4] sm:$0xf0] }
 0x1a8   : > { %3118 = vmatpush.bf16.msrb.mxu3 %v4766_v4  ;;  %v2439_v7 = vadd.f32 %v2438_v53, %v1376_v40  ;;  %v5186_v40 = vld [vmem:[#allocation7 + $0x134] sm:$0xf0] }
 0x1a9   : > { %3162 = vmatpush.bf16.msra.mxu2 %v4614_v18  ;;  %3133 = vmatpush.bf16.msra.mxu0 %v4626_v25  ;;  %v2465_v0 = vadd.f32 %v2464_v56, %v2451_v50  ;;  %v5198_v18 = vld [vmem:[#allocation7 + $0x194] sm:$0xf0]  ;;  %v2466_v23 = vpop.f32.mrf.mxu0  ;;  %v4790_v25 = vor.u32 %v5192_v20, %v4787_v21  ;;  %v4754_v52 = vor.u32 %v5186_v40, %v4753_v39 }
 0x1ab   : > { %3090 = vmatpush.bf16.msrb.mxu1 %v4762_v24  ;;  %v2424_v4 = vpop.f32.mrf.mxu1  ;;  %v4802_v24 = vor.u32 %v5198_v18, %v4801_v57 }
 0x1ac   : > { %3119 = vmatpush.bf16.msrb.mxu3 %v4750_v27  ;;  %3163 = vmatmul.bf16.vlgmr.msra.gmra.mxu2 %v5541_v63  ;;  %v5763_v5 = vadd.f32 %v2424_v4, %v2411_v43 }
 0x1ad   : > { %3134 = vmatpush.bf16.msra.mxu0 %v4610_v37  ;;  %v4755_v37 = vld [vmem:[#allocation7 + $0x138] sm:$0xf0] }
 0x1ae   : > { %v2452_v19 = vpop.f32.mrf.mxu3 }
 0x1af   : > { %3091 = vmatpush.bf16.msrb.mxu1 %v4746_v36  ;;  %v2453_v22 = vadd.f32 %v2452_v19, %v2439_v7  ;;  %v2492_v30 = vpop.f32.mrf.mxu2  ;;  %v5184_v36 = vld [vmem:[#allocation7 + $0x12c] sm:$0xf] }
 0x1b0   : > { %3120 = vmatpush.bf16.msrb.mxu3 %v4734_v38  ;;  %3135 = vmatmul.bf16.vlgmr.msra.gmra.mxu0 %v5541_v63  ;;  %v4818_v63 = vor.u32 %v5202_v62, %v4817_v54  ;;  %v4770_v38 = vor.u32 %v5190_v33, %v4769_v31  ;;  %v4758_v55 = vor.u32 %v5184_v36, %v4755_v37 }
 0x1b1   : > { %v2467_v27 = vadd.f32 %v2466_v23, %v2453_v22  ;;  %v2520_v56 = vpop.f32.mrf.mxu0  ;;  %v1377_v23 = vperm.slane %v5747_v14, 2 }
 0x1b3   : > { %3092 = vmatpush.bf16.msrb.mxu1 %v4730_v15  ;;  %3121 = vmatmul.bf16.vlgmr.msrb.gmra.mxu3 %v5567_v17  ;;  %v2478_v59 = vpop.f32.mrf.mxu1  ;;  %v4737_v15 = vld [vmem:[#allocation7 + $0x108] sm:$0xf] }
 0x1b4   : > { %3169 = vmatpush.bf16.msra.mxu3 %v4854_v58  ;;  %v2479_v13 = vadd.f32 %v2478_v59, %v2465_v0  ;;  %v5180_v58 = vld [vmem:[#allocation7 + $0x10c] sm:$0xf] }
 0x1b5   : > { %v4742_v9 = vor.u32 %v5180_v58, %v4739_v41 }
 0x1b6   : > { %3093 = vmatmul.bf16.vlgmr.msrb.gmra.mxu1 %v5567_v17  ;;  %v2493_v34 = vadd.f32 %v2492_v30, %v2479_v13  ;;  %v2506_v35 = vpop.f32.mrf.mxu3 }
 0x1b7   : > { %3141 = vmatpush.bf16.msra.mxu1 %v4850_v16  ;;  %v2494_v43 = vpop.f32.mrf.mxu2  ;;  %v5182_v16 = vld [vmem:[#allocation7 + $0x114] sm:$0xf0] }
 0x1b8   : > { %3170 = vmatpush.bf16.msra.mxu3 %v4838_v44  ;;  %v5765_v1 = vadd.f32 %v2506_v35, %v2493_v34  ;;  %v4738_v47 = vor.u32 %v5182_v16, %v4737_v15 }
 0x1b9   : > { %v2522_v50 = vpop.f32.mrf.mxu0 }
 0x1bb   : > { %3142 = vmatpush.bf16.msra.mxu1 %v4834_v51  ;;  %v2480_v3 = vpop.f32.mrf.mxu1 }
 0x1bc   : > { %3171 = vmatpush.bf16.msra.mxu3 %v4822_v46  ;;  %v2481_v12 = vadd.f32 %v2480_v3, %v2467_v27  ;;  %v2521_v27 = vadd.f32 %v2520_v56, %v1377_v23 }
 0x1be   : > { %v2495_v60 = vadd.f32 %v2494_v43, %v2481_v12  ;;  %v2508_v44 = vpop.f32.mrf.mxu3 }
 0x1bf   : > { %3143 = vmatpush.bf16.msra.mxu1 %v4818_v63  ;;  %v2548_v49 = vpop.f32.mrf.mxu2 }
 0x1c0   : > { %3172 = vmatpush.bf16.msra.mxu3 %v4806_v8  ;;  %v5767_v45 = vadd.f32 %v2508_v44, %v2495_v60 }
 0x1c3   : > { %3144 = vmatpush.bf16.msra.mxu1 %v4802_v24  ;;  %v1378_v24 = vperm.slane %v5747_v14, 3 }
 0x1c4   : > { %3173 = vmatpush.bf16.msra.mxu3 %v4790_v25 }
 0x1c7   : > { %3145 = vmatpush.bf16.msra.mxu1 %v4786_v32  ;;  %v2550_v53 = vpop.f32.mrf.mxu2 }
 0x1c8   : > { %3174 = vmatpush.bf16.msra.mxu3 %v4774_v6  ;;  %v2523_v6 = vadd.f32 %v2522_v50, %v1377_v23 }
 0x1cb   : > { %3146 = vmatpush.bf16.msra.mxu1 %v4770_v38 }
 0x1cc   : > { %3175 = vmatpush.bf16.msra.mxu3 %v4758_v55  ;;  %v2576_v54 = vpop.f32.mrf.mxu0 }
 0x1cf   : > { %3147 = vmatpush.bf16.msra.mxu1 %v4754_v52 }
 0x1d0   : > { %3176 = vmatpush.bf16.msra.mxu3 %v4742_v9 }
 0x1d1   : > { %v2604_v0 = vpop.f32.mrf.mxu2 }
 0x1d2   : > { %v2605_v28 = vadd.f32 %v2604_v0, %v1378_v24  ;;  %v5415_v0 = vmov 1966171168  }
 0x1d3   : > { %3148 = vmatpush.bf16.msra.mxu1 %v4738_v47  ;;  %3177 = vmatmul.bf16.vlgmr.msra.gmra.mxu3 %v5567_v17  ;;  %v2534_v48 = vpop.f32.mrf.mxu1  ;;  %v2680_v47 = vmax.f32 %v5765_v1, 0.0 }
 0x1d4   : > { %v2578_v42 = vpop.f32.mrf.mxu0  ;;  %v2535_v30 = vadd.f32 %v2534_v48, %v2521_v27 }
 0x1d6   : > { %3149 = vmatmul.bf16.vlgmr.msra.gmra.mxu1 %v5567_v17  ;;  %v2562_v61 = vpop.f32.mrf.mxu3  ;;  %v2549_v13 = vadd.f32 %v2548_v49, %v2535_v30 }
 0x1d8   : > { %v2563_v55 = vadd.f32 %v2562_v61, %v2549_v13 }
 0x1d9   : > { %v2606_v63 = vpop.f32.mrf.mxu2 }
 0x1da   : > { %v2607_v31 = vadd.f32 %v2606_v63, %v1378_v24  ;;  %v2577_v41 = vadd.f32 %v2576_v54, %v2563_v55  ;;  %v3213_v54 = vunpack.c.l.s4 %v5415_v0 }
 0x1db   : > { %v2536_v51 = vpop.f32.mrf.mxu1 }
 0x1dc   : > { %v2537_v36 = vadd.f32 %v2536_v51, %v2523_v6  ;;  %v3214_v1 = vunpack.c.0.s8 %v3213_v54 }
 0x1de   : > { %v2564_v46 = vpop.f32.mrf.mxu3  ;;  %v2551_v40 = vadd.f32 %v2550_v53, %v2537_v36 }
 0x1e0   : > { %v2565_v15 = vadd.f32 %v2564_v46, %v2551_v40 }
 0x1e2   : > { %v2579_v53 = vadd.f32 %v2578_v42, %v2565_v15  ;;  %v2684_v42 = vmax.f32 %v5767_v45, 0.0 }
 0x1ec   : > { %v2632_v8 = vpop.f32.mrf.mxu0 }
 0x1f1   : > { %v2660_v18 = vpop.f32.mrf.mxu2 }
 0x1f3   : > { %v2590_v62 = vpop.f32.mrf.mxu1 }
 0x1f4   : > { %v2634_v19 = vpop.f32.mrf.mxu0  ;;  %v2591_v52 = vadd.f32 %v2590_v62, %v2577_v41 }
 0x1f6   : > { %v2618_v2 = vpop.f32.mrf.mxu3  ;;  %v2681_v49 = vmax.f32 %v2591_v52, 0.0 }
 0x1f7   : > { %v2619_v59 = vadd.f32 %v2618_v2, %v2605_v28  ;;  %v2679_v2 = vmax.f32 %v5758_v10, 0.0 }
 0x1f9   : > { %v2662_v21 = vpop.f32.mrf.mxu2  ;;  %v2633_v32 = vadd.f32 %v2632_v8, %v2619_v59  ;;  %v2683_v59 = vmax.f32 %v5763_v5, 0.0 }
 0x1fb   : > { %v2592_v4 = vpop.f32.mrf.mxu1 }
 0x1fc   : > { %v2593_v46 = vadd.f32 %v2592_v4, %v2579_v53 }
 0x1fe   : > { %v2620_v7 = vpop.f32.mrf.mxu3 }
 0x1ff   : > { %v2621_v37 = vadd.f32 %v2620_v7, %v2607_v31 }
 0x201   : > { %v2635_v58 = vadd.f32 %v2634_v19, %v2621_v37 }
 0x20d   : > { %v3080_v25 = vpop.f32.mrf.mxu0 }
 0x20f   : > { %v3108_v26 = vpop.f32.mrf.mxu2 }
 0x213   : > { %v2646_v57 = vpop.f32.mrf.mxu1 }
 0x214   : > { %v2647_v34 = vadd.f32 %v2646_v57, %v2633_v32 }
 0x215   : > { %v3082_v33 = vpop.f32.mrf.mxu0 }
 0x216   : > { %v2674_v17 = vpop.f32.mrf.mxu3  ;;  %v2661_v39 = vadd.f32 %v2660_v18, %v2647_v34 }
 0x217   : > { %v3110_v38 = vpop.f32.mrf.mxu2 }
 0x218   : > { %v2675_v43 = vadd.f32 %v2674_v17, %v2661_v39 }
 0x21a   : > { %v2682_v61 = vmax.f32 %v2675_v43, 0.0 }
 0x21b   : > { %v2648_v20 = vpop.f32.mrf.mxu1 }
 0x21c   : > { %v2649_v3 = vadd.f32 %v2648_v20, %v2635_v58 }
 0x21e   : > { %v2676_v22 = vpop.f32.mrf.mxu3  ;;  %v2663_v56 = vadd.f32 %v2662_v21, %v2649_v3 }
 0x220   : > { %v2677_v8 = vadd.f32 %v2676_v22, %v2663_v56 }
 0x22d   : > { %v3136_v12 = vpop.f32.mrf.mxu0 }
 0x22f   : > { %v3164_v16 = vpop.f32.mrf.mxu2 }
 0x233   : > { %v3094_v11 = vpop.f32.mrf.mxu1 }
 0x234   : > { %v3095_v50 = vadd.f32 %v3094_v11, %v3080_v25  ;;  %v2685_v25 = vmax.f32 %v2593_v46, 0.0  ;;  %v2686_v11 = vmax.f32 %v2677_v8, 0.0 }
 0x235   : > { %v3138_v19 = vpop.f32.mrf.mxu0 }
 0x236   : > { %v3122_v29 = vpop.f32.mrf.mxu3  ;;  %v3183_v57 = vadd.f32 %v3095_v50, %v2679_v2 }
 0x237   : > { %v3123_v60 = vadd.f32 %v3122_v29, %v3108_v26  ;;  %v3166_v10 = vpop.f32.mrf.mxu2 }
 0x239   : > { %v3184_v62 = vadd.f32 %v3123_v60, %v2680_v47 }
 0x23b   : > { %v3096_v35 = vpop.f32.mrf.mxu1 }
 0x23c   : > { %v3097_v27 = vadd.f32 %v3096_v35, %v3082_v33 }
 0x23e   : > { %v3124_v14 = vpop.f32.mrf.mxu3  ;;  %v3187_v34 = vadd.f32 %v3097_v27, %v2683_v59 }
 0x23f   : > { %v3125_v20 = vadd.f32 %v3124_v14, %v3110_v38 }
 0x241   : > { %v3188_v13 = vadd.f32 %v3125_v20, %v2684_v42 }
 0x253   : > { %v3150_v9 = vpop.f32.mrf.mxu1 }
 0x254   : > { %v3151_v44 = vadd.f32 %v3150_v9, %v3136_v12 }
 0x256   : > { %v3178_v48 = vpop.f32.mrf.mxu3  ;;  %v3185_v63 = vadd.f32 %v3151_v44, %v2681_v49 }
 0x257   : > { %v3179_v51 = vadd.f32 %v3178_v48, %v3164_v16 }
 0x258   : > { %v3191_v21 = vmax.f32 %v3183_v57, %v3185_v63 }
 0x259   : > { %v3186_v7 = vadd.f32 %v3179_v51, %v2682_v61 }
 0x25b   : > { %v3192_v18 = vmax.f32 %v3184_v62, %v3186_v7  ;;  %v3152_v17 = vpop.f32.mrf.mxu1 }
 0x25c   : > { %v3153_v24 = vadd.f32 %v3152_v17, %v3138_v19 }
 0x25d   : > { %v3199_v23 = vrot.slane %v3192_v18, 4 }
 0x25e   : > { %v3180_v26 = vpop.f32.mrf.mxu3  ;;  %v3189_v32 = vadd.f32 %v3153_v24, %v2685_v25 }
 0x25f   : > { %v3202_v4 = vsel %vm3201_vm7, %v3191_v21, %v3199_v23  ;;  %v3203_v22 = vsel %vm3201_vm7, %v3199_v23, %v3191_v21  ;;  %v3181_v28 = vadd.f32 %v3180_v26, %v3166_v10 }
 0x260   : > { %v3204_v29 = vrot.slane %v3203_v22, 4  ;;  %v3215_v30 = vperm.slane %v3202_v4, %v3214_v1  ;;  %v3193_v35 = vmax.f32 %v3187_v34, %v3189_v32 }
 0x261   : > { %v3190_v6 = vadd.f32 %v3181_v28, %v2686_v11 }
 0x262   : > { %v3219_v31 = vperm.slane %v3204_v29, %v3214_v1  ;;  %v3232_v45 = vrot.slane %v3215_v30, 4 }
 0x263   : > { %v3194_v36 = vmax.f32 %v3188_v13, %v3190_v6 }
 0x264   : > { %v3233_v37 = vrot.slane %v3219_v31, 4  ;;  %v3240_v33 = vmax.f32 %v3215_v30, %v3232_v45 }
 0x265   : > { %v3200_v38 = vrot.slane %v3194_v36, 4 }
 0x266   : > { %v3241_v55 = vmax.f32 %v3219_v31, %v3233_v37  ;;  %3248 = vst [vmem:[#allocation1] ss:$4 sm:$0xff] %v3240_v33 }
 0x267   : > { %v3205_v14 = vsel %vm3201_vm7, %v3193_v35, %v3200_v38  ;;  %v3206_v39 = vsel %vm3201_vm7, %v3200_v38, %v3193_v35 }
 0x268   : > { %3250 = vst [vmem:[#allocation1 + $0x1] ss:$4 sm:$0xff] %v3241_v55  ;;  %v3207_v5 = vrot.slane %v3206_v39, 4  ;;  %v3223_v40 = vperm.slane %v3205_v14, %v3214_v1 }
 0x26a   : > { %v3227_v58 = vperm.slane %v3207_v5, %v3214_v1  ;;  %v3234_v41 = vrot.slane %v3223_v40, 4 }
 0x26c   : > { %v3235_v3 = vrot.slane %v3227_v58, 4  ;;  %v3242_v12 = vmax.f32 %v3223_v40, %v3234_v41 }
 0x26e   : > { %v3243_v52 = vmax.f32 %v3227_v58, %v3235_v3  ;;  %3252 = vst [vmem:[#allocation1 + $0x2] ss:$4 sm:$0xff] %v3242_v12 }
 0x270   : > { %3254 = vst [vmem:[#allocation1 + $0x3] ss:$4 sm:$0xff] %v3243_v52 }
 0x277   : > { %v3255_v43 = vld.sshfl [vmem:[#allocation1] sm:$0xff pattern:$0x73625140]  ;;  %v3256_v9 = vld.sshfl [vmem:[#allocation1 + $0x8] sm:$0xff pattern:$0x73625140] }
 0x278   : > { %3259 = vst [vmem:[%s321_s14] sm:$0xff] %v3255_v43 }
 0x279   : > { %3260 = vst [vmem:[%s321_s14 + $0x8] sm:$0xff] %v3256_v9 }
 0x27a PF: > { %s19_s21 = sadd.s32 1, %s5404_s21  }
 0x27b   : > { %p16_p8 = scmp.ge.s32.totalorder %s19_s21, 4  }
 0x27d   :  { %18 = sbr.rel (!%p16_p8) target bundleno = 3 (0x3), region = 94 }
 0x282   :  { %3282 = vsyncpa [#allocation3], 1 }
 0x283   :  { %3284 = vsyncpa [#allocation3 + $0x1], 1 }
 0x284   :  { %3285 = vsyncpa [#allocation5], 1 }
 0x285   :  { %3286 = vsyncpa [#allocation8], 1 }

</bundles_post_ra>
